<compile_context>
chip_gen: v7x
topology: tpu7x:2x2x1
jax: 0.10.0
libtpu: 0.0.40
codegen_flags: <defaults>
</compile_context>

<pallas_src>
import functools
import math

import jax
import jax.numpy as jnp
from jax.experimental import pallas as pl
from jax.experimental.pallas import tpu as pltpu


# ----------------------------------------------------------------------------
# In-kernel helpers (operate on values already resident in vregs)
# ----------------------------------------------------------------------------
def _ln(x, g, b):
    """PyTorch nn.LayerNorm: biased variance, eps=1e-5."""
    mu = jnp.mean(x, axis=-1, keepdims=True)
    var = jnp.mean(jnp.square(x - mu), axis=-1, keepdims=True)
    return (x - mu) * jax.lax.rsqrt(var + 1e-5) * g + b


def _attn_heads(q, k, v, num_heads):
    """softmax(q_h k_h^T / sqrt(Dh)) v_h per head; returns the (Lq, E)
    head-concatenated context.  The out-projection is applied ONCE on the
    whole (batch*Lq, E) slab by the caller, not per head.
    The reference's all-ones additive float mask is softmax-invariant and is
    intentionally not applied."""
    _, E = q.shape
    Dh = E // num_heads
    q = q * (1.0 / math.sqrt(Dh))
    outs = []
    for h in range(num_heads):       # Dh=8 lane slices are unavoidable at E=32
        sl = slice(h * Dh, (h + 1) * Dh)
        s = jax.lax.dot_general(q[:, sl], k[:, sl],
                                (((1,), (1,)), ((), ())),
                                preferred_element_type=jnp.float32)
        s = s - jnp.max(s, axis=-1, keepdims=True)
        p = jnp.exp(s)
        p = p * pl.reciprocal(jnp.sum(p, axis=-1, keepdims=True), approx=True)
        outs.append(jnp.dot(p, v[:, sl], preferred_element_type=jnp.float32))
    return jnp.concatenate(outs, axis=-1)


# ----------------------------------------------------------------------------
# Fused layer kernels (one pallas_call per transformer layer)
# ----------------------------------------------------------------------------
def _encoder_layer_kernel(x_ref, wqkv_ref, bqkv_ref, wo_ref, bo_ref,
                          ln1g_ref, ln1b_ref,
                          w1_ref, b1_ref, w2_ref, b2_ref,
                          ln2g_ref, ln2b_ref,
                          o_ref, attn_scr, *, num_heads, seq_len):
    x = x_ref[...]                                          # (Bb*L, E)
    M, E = x.shape
    nb = M // seq_len
    # fused QKV projection for ALL batch rows at once (single M=Bb*L matmul)
    qkv = jnp.dot(x, wqkv_ref[...],
                  preferred_element_type=jnp.float32) + bqkv_ref[...]
    for b in range(nb):                                     # per-sequence attn
        r = slice(b * seq_len, (b + 1) * seq_len)
        attn_scr[pl.ds(b * seq_len, seq_len), :] = _attn_heads(
            qkv[r, :E], qkv[r, E:2 * E], qkv[r, 2 * E:], num_heads)
    # single out-projection over the whole block
    attn = jnp.dot(attn_scr[...], wo_ref[...],
                   preferred_element_type=jnp.float32) + bo_ref[...]
    x = _ln(x + attn, ln1g_ref[...], ln1b_ref[...])
    # FFN with fused ReLU, residual and LN epilogue (M=Bb*L matmuls)
    ffn = jnp.maximum(
        jnp.dot(x, w1_ref[...], preferred_element_type=jnp.float32) + b1_ref[...],
        0.0)
    x = _ln(x + jnp.dot(ffn, w2_ref[...],
                        preferred_element_type=jnp.float32) + b2_ref[...],
            ln2g_ref[...], ln2b_ref[...])
    o_ref[...] = x


def _decoder_layer_kernel(x_ref, kv_ref,
                          s_wqkv_ref, s_bqkv_ref, s_wo_ref, s_bo_ref,
                          ln1g_ref, ln1b_ref,
                          c_wq_ref, c_bq_ref, c_wo_ref, c_bo_ref,
                          ln2g_ref, ln2b_ref,
                          w1_ref, b1_ref, w2_ref, b2_ref,
                          ln3g_ref, ln3b_ref,
                          o_ref, attn_scr, *, self_heads, cross_heads, lo, li):
    x = x_ref[...]                                          # (Bb*Lo, E)
    kv = kv_ref[...]                                        # (Bb*Li, 2E) precomputed
    M, E = x.shape
    nb = M // lo

    # "masked" self-attention (mask is an all-ones float add -> dropped)
    qkv = jnp.dot(x, s_wqkv_ref[...],
                  preferred_element_type=jnp.float32) + s_bqkv_ref[...]
    for b in range(nb):
        r = slice(b * lo, (b + 1) * lo)
        attn_scr[pl.ds(b * lo, lo), :] = _attn_heads(
            qkv[r, :E], qkv[r, E:2 * E], qkv[r, 2 * E:], self_heads)
    attn = jnp.dot(attn_scr[...], s_wo_ref[...],
                   preferred_element_type=jnp.float32) + s_bo_ref[...]
    x = _ln(x + attn, ln1g_ref[...], ln1b_ref[...])

    # cross-attention: q from decoder state; K/V were projected once per
    # forward (layer-invariant: shared weights + fixed encoder output)
    q = jnp.dot(x, c_wq_ref[...],
                preferred_element_type=jnp.float32) + c_bq_ref[...]
    for b in range(nb):
        rq = slice(b * lo, (b + 1) * lo)
        rk = slice(b * li, (b + 1) * li)
        attn_scr[pl.ds(b * lo, lo), :] = _attn_heads(
            q[rq, :], kv[rk, :E], kv[rk, E:], cross_heads)
    attn = jnp.dot(attn_scr[...], c_wo_ref[...],
                   preferred_element_type=jnp.float32) + c_bo_ref[...]
    x = _ln(x + attn, ln2g_ref[...], ln2b_ref[...])

    # FFN
    ffn = jnp.maximum(
        jnp.dot(x, w1_ref[...], preferred_element_type=jnp.float32) + b1_ref[...],
        0.0)
    x = _ln(x + jnp.dot(ffn, w2_ref[...],
                        preferred_element_type=jnp.float32) + b2_ref[...],
            ln3g_ref[...], ln3b_ref[...])
    o_ref[...] = x


def _cross_kv_kernel(enc_ref, wkv_ref, bkv_ref, o_ref):
    o_ref[...] = jnp.dot(enc_ref[...], wkv_ref[...],
                         preferred_element_type=jnp.float32) + bkv_ref[...]


def _final_linear_kernel(x_ref, wt_ref, b_ref, o_ref):
    o_ref[...] = jnp.dot(x_ref[...], wt_ref[...],
                         preferred_element_type=jnp.float32) + b_ref[...]


# ----------------------------------------------------------------------------
# pallas_call wrappers
# ----------------------------------------------------------------------------
_ENC_KEYS = ["wqkv_t", "bqkv", "wo_t", "bo", "ln1g", "ln1b",
             "w1_t", "b1", "w2_t", "b2", "ln2g", "ln2b"]

_DEC_KEYS = ["s_wqkv_t", "s_bqkv", "s_wo_t", "s_bo", "ln1g", "ln1b",
             "c_wq_t", "c_bq", "c_wo_t", "c_bo", "ln2g", "ln2b",
             "w1_t", "b1", "w2_t", "b2", "ln3g", "ln3b"]

_VMEM_LIMIT = 32 * 1024 * 1024  # safe on v5e/v6e/v7x scoped VMEM


def _weight_specs(weights):
    # full-array (constant-index) blocks; when dims scale up these should be
    # cast to bf16 and/or single-buffered (pipeline_mode=pl.Buffered(1)).
    return [pl.BlockSpec(a.shape, lambda i: (0, 0)) for a in weights]


def _num_blocks(batch, *seq_lens):
    """2-wide parallel grid so both v7x TensorCores get work; fall back to 1
    if the split would produce row blocks that violate the (8,128) rule."""
    if batch >= 2 and batch % 2 == 0:
        if all(((batch // 2) * s) % 8 == 0 for s in seq_lens):
            return 2
    return 1


def encoder_layer(x2d, w, num_heads, seq_len, num_blocks):
    M, E = x2d.shape
    Mb = M // num_blocks
    weights = [w[k] for k in _ENC_KEYS]
    return pl.pallas_call(
        functools.partial(_encoder_layer_kernel,
                          num_heads=num_heads, seq_len=seq_len),
        out_shape=jax.ShapeDtypeStruct((M, E), jnp.float32),
        grid=(num_blocks,),
        in_specs=[pl.BlockSpec((Mb, E), lambda i: (i, 0))] + _weight_specs(weights),
        out_specs=pl.BlockSpec((Mb, E), lambda i: (i, 0)),
        scratch_shapes=[pltpu.VMEM((Mb, E), jnp.float32)],
        compiler_params=pltpu.CompilerParams(
            dimension_semantics=("parallel",),
            vmem_limit_bytes=_VMEM_LIMIT),
    )(x2d, *weights)


def decoder_layer(x2d, kv2d, w, self_heads, cross_heads, lo, li, num_blocks):
    M, E = x2d.shape
    Mk, E2 = kv2d.shape
    Mb, Mkb = M // num_blocks, Mk // num_blocks
    weights = [w[k] for k in _DEC_KEYS]
    return pl.pallas_call(
        functools.partial(_decoder_layer_kernel, self_heads=self_heads,
                          cross_heads=cross_heads, lo=lo, li=li),
        out_shape=jax.ShapeDtypeStruct((M, E), jnp.float32),
        grid=(num_blocks,),
        in_specs=[pl.BlockSpec((Mb, E), lambda i: (i, 0)),
                  pl.BlockSpec((Mkb, E2), lambda i: (i, 0))] + _weight_specs(weights),
        out_specs=pl.BlockSpec((Mb, E), lambda i: (i, 0)),
        scratch_shapes=[pltpu.VMEM((Mb, E), jnp.float32)],
        compiler_params=pltpu.CompilerParams(
            dimension_semantics=("parallel",),
            vmem_limit_bytes=_VMEM_LIMIT),
    )(x2d, kv2d, *weights)


def cross_kv(enc2d, wkv_t, bkv, num_blocks):
    """Layer-invariant cross-attention K/V projection, computed once."""
    M, E = enc2d.shape
    N = wkv_t.shape[1]
    Mb = M // num_blocks
    return pl.pallas_call(
        _cross_kv_kernel,
        out_shape=jax.ShapeDtypeStruct((M, N), jnp.float32),
        grid=(num_blocks,),
        in_specs=[pl.BlockSpec((Mb, E), lambda i: (i, 0)),
                  pl.BlockSpec(wkv_t.shape, lambda i: (0, 0)),
                  pl.BlockSpec(bkv.shape, lambda i: (0, 0))],
        out_specs=pl.BlockSpec((Mb, N), lambda i: (i, 0)),
        compiler_params=pltpu.CompilerParams(
            dimension_semantics=("parallel",),
            vmem_limit_bytes=_VMEM_LIMIT),
    )(enc2d, wkv_t, bkv)


def final_linear(x2d, wt, b2):
    """y = x @ wt + b with weight transpose / bias reshape hoisted to prepare."""
    M, K = x2d.shape
    N = wt.shape[1]
    return pl.pallas_call(
        _final_linear_kernel,
        out_shape=jax.ShapeDtypeStruct((M, N), jnp.float32),
        grid=(1,),
        in_specs=[pl.BlockSpec((M, K), lambda i: (0, 0)),
                  pl.BlockSpec((K, N), lambda i: (0, 0)),
                  pl.BlockSpec((1, N), lambda i: (0, 0))],
        out_specs=pl.BlockSpec((M, N), lambda i: (0, 0)),
        compiler_params=pltpu.CompilerParams(vmem_limit_bytes=_VMEM_LIMIT),
    )(x2d, wt, b2)


# ----------------------------------------------------------------------------
# One-time weight preprocessing (hoisted out of the layer loops)
# ----------------------------------------------------------------------------
def prepare_encoder_weights(p):
    mha = p["in_mha"]
    return {
        "wqkv_t": mha["in_proj_weight"].T,                 # (E, 3E)
        "bqkv": mha["in_proj_bias"].reshape(1, -1),
        "wo_t": mha["out_proj_weight"].T,                  # (E, E)
        "bo": mha["out_proj_bias"].reshape(1, -1),
        "ln1g": p["in_mha_ln_g"].reshape(1, -1),
        "ln1b": p["in_mha_ln_b"].reshape(1, -1),
        "w1_t": p["inner_in_fc_w"].T,                      # (E, H)
        "b1": p["inner_in_fc_b"].reshape(1, -1),
        "w2_t": p["in_fc_w"].T,                            # (H, E)
        "b2": p["in_fc_b"].reshape(1, -1),
        "ln2g": p["in_fc_ln_g"].reshape(1, -1),
        "ln2b": p["in_fc_ln_b"].reshape(1, -1),
    }


def prepare_decoder_weights(p, hp):
    E = hp["output_embedding_size"]
    smha = p["masked_out_mha"]
    cmha = p["out_mha"]
    return {
        "s_wqkv_t": smha["in_proj_weight"].T,              # (E, 3E)
        "s_bqkv": smha["in_proj_bias"].reshape(1, -1),
        "s_wo_t": smha["out_proj_weight"].T,
        "s_bo": smha["out_proj_bias"].reshape(1, -1),
        "ln1g": p["masked_out_mha_ln_g"].reshape(1, -1),
        "ln1b": p["masked_out_mha_ln_b"].reshape(1, -1),
        "c_wq_t": cmha["in_proj_weight"][:E, :].T,         # (E, E)
        "c_bq": cmha["in_proj_bias"][:E].reshape(1, -1),
        "c_wkv_t": cmha["in_proj_weight"][E:, :].T,        # (E, 2E)  (K then V rows)
        "c_bkv": cmha["in_proj_bias"][E:].reshape(1, -1),
        "c_wo_t": cmha["out_proj_weight"].T,
        "c_bo": cmha["out_proj_bias"].reshape(1, -1),
        "ln2g": p["out_mha_ln_g"].reshape(1, -1),
        "ln2b": p["out_mha_ln_b"].reshape(1, -1),
        "w1_t": p["inner_out_fc_w"].T,                     # (E, H)
        "b1": p["inner_out_fc_b"].reshape(1, -1),
        "w2_t": p["out_fc_w"].T,                           # (H, E)
        "b2": p["out_fc_b"].reshape(1, -1),
        "ln3g": p["out_fc_ln_g"].reshape(1, -1),
        "ln3b": p["out_fc_ln_b"].reshape(1, -1),
    }


def prepare_final_weights(p):
    return p["final_w"].T, p["final_b"].reshape(1, -1)


# ----------------------------------------------------------------------------
# Forward pass
# ----------------------------------------------------------------------------
def lm_forward(params, hp, inbatch_ids, outbatch_ids):
    # prepared once per forward; the encoder/decoder stacks share one module
    # (nn.ModuleList([m] * N)), so the same prepared set is reused every layer.
    enc_w = prepare_encoder_weights(params)
    dec_w = prepare_decoder_weights(params, hp)
    fin_wt, fin_b = prepare_final_weights(params)

    B = inbatch_ids.shape[0]
    Li = inbatch_ids.shape[1]
    Lo = outbatch_ids.shape[1]
    E_in = hp["input_embedding_size"]
    E_out = hp["output_embedding_size"]
    nblk = _num_blocks(B, Li, Lo)

    # embeddings (gather + rel-pos add are glue); activations are kept as 2-D
    # (batch*seq, E) slabs so the kernels see full-height matmul tiles.
    x_in = jnp.take(params["input_embeddings"], inbatch_ids, axis=0)
    x_in = x_in - params["input_rel_pos_emb"]
    x_in = x_in.reshape(B * Li, E_in)
    for _ in range(hp["lm_in_N"]):
        x_in = encoder_layer(x_in, enc_w, hp["lm_in_mhsa_num_heads"], Li, nblk)

    # cross-attention K/V is identical for every decoder layer -> compute once
    kv = cross_kv(x_in, dec_w["c_wkv_t"], dec_w["c_bkv"], nblk)

    x_out = jnp.take(params["output_embeddings"], outbatch_ids, axis=0)
    x_out = x_out + params["output_rel_pos_emb"]
    x_out = x_out.reshape(B * Lo, E_out)
    # NOTE: `inbatch = outbatch.unsqueeze(1)` in the reference forward() is
    # dead code and skipped.  get_mask() yields an all-ones float additive
    # mask (softmax-invariant) and is dropped inside the kernel.
    for _ in range(hp["lm_out_N"]):
        x_out = decoder_layer(x_out, kv, dec_w,
                              hp["lm_masked_out_mhsa_num_heads"],
                              hp["lm_out_mhsa_num_heads"], Lo, Li, nblk)

    # x.flatten(1).unsqueeze(1) @ final_linear -> squeeze()
    x_flat = x_out.reshape(B, Lo * E_out)
    return final_linear(x_flat, fin_wt, fin_b)


# ----------------------------------------------------------------------------
# Deterministic parameter construction
# ----------------------------------------------------------------------------
def make_mha_params(key, embed_dim):
    k0, k1, k2 = jax.random.split(key, 3)
    return {
        "in_proj_weight": 0.05 * jax.random.normal(
            k0, (3 * embed_dim, embed_dim), jnp.float32),
        "in_proj_bias": jnp.zeros((3 * embed_dim,), jnp.float32),
        "out_proj_weight": 0.05 * jax.random.normal(
            k1, (embed_dim, embed_dim), jnp.float32),
        "out_proj_bias": 0.01 * jax.random.normal(k2, (embed_dim,), jnp.float32),
    }


def make_params(key, hp):
    E_in, E_out = hp["input_embedding_size"], hp["output_embedding_size"]
    V_in, V_out = hp["input_vocab_size"], hp["output_vocab_size"]
    B = hp["batch_size"] * hp["lm_max_len"]
    H_in, H_out = hp["lm_innner_input_nodes"], hp["lm_innner_output_nodes"]
    keys = jax.random.split(key, 16)

    return {
        "input_embeddings": jax.random.normal(keys[0], (V_in, E_in), jnp.float32),
        "output_embeddings": jax.random.normal(keys[1], (V_out, E_out), jnp.float32),
        "input_rel_pos_emb": 0.02 * jax.random.normal(keys[2], (B, V_in, E_in), jnp.float32),
        "output_rel_pos_emb": 0.02 * jax.random.normal(keys[3], (B, V_out, E_out), jnp.float32),
        # encoder stack (single shared module, see ModuleList([m]*N))
        "in_mha": make_mha_params(keys[4], E_in),
        "in_mha_ln_g": jnp.ones((E_in,), jnp.float32),
        "in_mha_ln_b": jnp.zeros((E_in,), jnp.float32),
        "inner_in_fc_w": 0.05 * jax.random.normal(keys[5], (H_in, E_in), jnp.float32),
        "inner_in_fc_b": jnp.zeros((H_in,), jnp.float32),
        "in_fc_w": 0.05 * jax.random.normal(keys[6], (E_in, H_in), jnp.float32),
        "in_fc_b": jnp.zeros((E_in,), jnp.float32),
        "in_fc_ln_g": jnp.ones((E_in,), jnp.float32),
        "in_fc_ln_b": jnp.zeros((E_in,), jnp.float32),
        # decoder stack (shared)
        "masked_out_mha": make_mha_params(keys[7], E_out),
        "masked_out_mha_ln_g": jnp.ones((E_out,), jnp.float32),
        "masked_out_mha_ln_b": jnp.zeros((E_out,), jnp.float32),
        "out_mha": make_mha_params(keys[8], E_out),
        "out_mha_ln_g": jnp.ones((E_out,), jnp.float32),
        "out_mha_ln_b": jnp.zeros((E_out,), jnp.float32),
        "inner_out_fc_w": 0.05 * jax.random.normal(keys[9], (H_out, E_out), jnp.float32),
        "inner_out_fc_b": jnp.zeros((H_out,), jnp.float32),
        "out_fc_w": 0.05 * jax.random.normal(keys[10], (E_out, H_out), jnp.float32),
        "out_fc_b": jnp.zeros((E_out,), jnp.float32),
        "out_fc_ln_g": jnp.ones((E_out,), jnp.float32),
        "out_fc_ln_b": jnp.zeros((E_out,), jnp.float32),
        # final projection: (E_out * V_out) -> V_out
        "final_w": 0.02 * jax.random.normal(keys[11], (V_out, E_out * V_out), jnp.float32),
        "final_b": jnp.zeros((V_out,), jnp.float32),
    }


if __name__ == "__main__":
    hp = {
        "batch_size": 2,
        "lm_max_len": 4,
        "input_vocab_size": 16,
        "output_vocab_size": 16,
        "input_embedding_size": 32,
        "output_embedding_size": 32,   # must equal input size for cross-attn
        "lm_in_mhsa_num_heads": 4,
        "lm_out_mhsa_num_heads": 4,
        "lm_masked_out_mhsa_num_heads": 4,
        "lm_in_N": 2,
        "lm_out_N": 2,
        "lm_innner_input_nodes": 64,
        "lm_innner_output_nodes": 64,
    }
    B = hp["batch_size"] * hp["lm_max_len"]

    key = jax.random.PRNGKey(0)
    kp, ki, ko = jax.random.split(key, 3)
    params = make_params(kp, hp)

    inbatch = jax.random.randint(ki, (B, hp["input_vocab_size"]), 0,
                                 hp["input_vocab_size"], dtype=jnp.int32)
    outbatch = jax.random.randint(ko, (B, hp["output_vocab_size"]), 0,
                                  hp["output_vocab_size"], dtype=jnp.int32)

    fwd = jax.jit(lambda p, i, o: lm_forward(p, hp, i, o))
    out = fwd(params, inbatch, outbatch)
    out = jax.block_until_ready(out)
    assert out.shape == (B, hp["output_vocab_size"]), out.shape
    assert bool(jnp.all(jnp.isfinite(out)))
    print("KERNEL_OK")
</pallas_src>

<mosaic_0001>
module attributes {stable_mosaic.version = 11 : i64} {
  func.func @_cross_kv_kernel(%arg0: i32, %arg1: memref<64x32xf32, #tpu.memory_space<vmem>>, %arg2: memref<32x64xf32, #tpu.memory_space<vmem>>, %arg3: memref<1x64xf32, #tpu.memory_space<vmem>>, %arg4: memref<64x64xf32, #tpu.memory_space<vmem>>) attributes {dimension_semantics = [#tpu.dimension_semantics<parallel>], iteration_bounds = array<i64: 2>, scalar_prefetch = 0 : i64, scratch_operands = 0 : i64, tpu.core_type = #tpu.core_type<tc>, window_params = [{transform_indices = @transform_0, window_bounds = array<i64: 64, 32>}, {pipeline_mode = #tpu.pipeline_mode<synchronous>, transform_indices = @transform_1, window_bounds = array<i64: 32, 64>}, {pipeline_mode = #tpu.pipeline_mode<synchronous>, transform_indices = @transform_2, window_bounds = array<i64: 1, 64>}, {transform_indices = @transform_3, window_bounds = array<i64: 64, 64>}]} {
    %c0 = arith.constant 0 : index
    %c0_0 = arith.constant 0 : index
    %0 = vector.load %arg1[%c0, %c0_0] : memref<64x32xf32, #tpu.memory_space<vmem>>, vector<64x32xf32>
    %c0_1 = arith.constant 0 : index
    %c0_2 = arith.constant 0 : index
    %1 = vector.load %arg2[%c0_1, %c0_2] : memref<32x64xf32, #tpu.memory_space<vmem>>, vector<32x64xf32>
    %cst = arith.constant dense<0.000000e+00> : vector<64x64xf32>
    %2 = tpu.matmul %0, %1, %cst {dimension_numbers = #tpu.dot_dimension_numbers<[1], [0], [0], [1], [0, 0, 1, 1], [], []>} : vector<64x32xf32>, vector<32x64xf32>, vector<64x64xf32> -> vector<64x64xf32>
    %c0_3 = arith.constant 0 : index
    %c0_4 = arith.constant 0 : index
    %3 = vector.load %arg3[%c0_3, %c0_4] : memref<1x64xf32, #tpu.memory_space<vmem>>, vector<1x64xf32>
    %4 = vector.broadcast %3 : vector<1x64xf32> to vector<64x64xf32>
    %5 = arith.addf %2, %4 : vector<64x64xf32>
    %c0_5 = arith.constant 0 : index
    %c0_6 = arith.constant 0 : index
    %6 = vector.load %arg4[%c0_5, %c0_6] : memref<64x64xf32, #tpu.memory_space<vmem>>, vector<64x64xf32>
    tpu.vector_store %arg4[%c0_5, %c0_6], %5 {strides = array<i32>} : memref<64x64xf32, #tpu.memory_space<vmem>>, vector<64x64xf32>,
    return
  }
  func.func @transform_0(%arg0: i32) -> (i32, i32) {
    %c0_i32 = arith.constant 0 : i32
    %c0_i32_0 = arith.constant 0 : i32
    return %arg0, %c0_i32 : i32, i32
  }
  func.func @transform_1(%arg0: i32) -> (i32, i32) {
    %c0_i32 = arith.constant 0 : i32
    %c0_i32_0 = arith.constant 0 : i32
    %c0_i32_1 = arith.constant 0 : i32
    return %c0_i32, %c0_i32_0 : i32, i32
  }
  func.func @transform_2(%arg0: i32) -> (i32, i32) {
    %c0_i32 = arith.constant 0 : i32
    %c0_i32_0 = arith.constant 0 : i32
    %c0_i32_1 = arith.constant 0 : i32
    return %c0_i32, %c0_i32_0 : i32, i32
  }
  func.func @transform_3(%arg0: i32) -> (i32, i32) {
    %c0_i32 = arith.constant 0 : i32
    %c0_i32_0 = arith.constant 0 : i32
    return %arg0, %c0_i32 : i32, i32
  }
}

module attributes {stable_mosaic.version = 11 : i64} {
  func.func @_encoder_layer_kernel(%arg0: i32, %arg1: memref<64x32xf32, #tpu.memory_space<vmem>>, %arg2: memref<32x96xf32, #tpu.memory_space<vmem>>, %arg3: memref<1x96xf32, #tpu.memory_space<vmem>>, %arg4: memref<32x32xf32, #tpu.memory_space<vmem>>, %arg5: memref<1x32xf32, #tpu.memory_space<vmem>>, %arg6: memref<1x32xf32, #tpu.memory_space<vmem>>, %arg7: memref<1x32xf32, #tpu.memory_space<vmem>>, %arg8: memref<32x64xf32, #tpu.memory_space<vmem>>, %arg9: memref<1x64xf32, #tpu.memory_space<vmem>>, %arg10: memref<64x32xf32, #tpu.memory_space<vmem>>, %arg11: memref<1x32xf32, #tpu.memory_space<vmem>>, %arg12: memref<1x32xf32, #tpu.memory_space<vmem>>, %arg13: memref<1x32xf32, #tpu.memory_space<vmem>>, %arg14: memref<64x32xf32, #tpu.memory_space<vmem>>, %arg15: memref<64x32xf32, #tpu.memory_space<vmem>>) attributes {dimension_semantics = [#tpu.dimension_semantics<parallel>], iteration_bounds = array<i64: 2>, scalar_prefetch = 0 : i64, scratch_operands = 1 : i64, tpu.core_type = #tpu.core_type<tc>, window_params = [{transform_indices = @transform_0, window_bounds = array<i64: 64, 32>}, {pipeline_mode = #tpu.pipeline_mode<synchronous>, transform_indices = @transform_1, window_bounds = array<i64: 32, 96>}, {pipeline_mode = #tpu.pipeline_mode<synchronous>, transform_indices = @transform_2, window_bounds = array<i64: 1, 96>}, {pipeline_mode = #tpu.pipeline_mode<synchronous>, transform_indices = @transform_3, window_bounds = array<i64: 32, 32>}, {pipeline_mode = #tpu.pipeline_mode<synchronous>, transform_indices = @transform_4, window_bounds = array<i64: 1, 32>}, {pipeline_mode = #tpu.pipeline_mode<synchronous>, transform_indices = @transform_5, window_bounds = array<i64: 1, 32>}, {pipeline_mode = #tpu.pipeline_mode<synchronous>, transform_indices = @transform_6, window_bounds = array<i64: 1, 32>}, {pipeline_mode = #tpu.pipeline_mode<synchronous>, transform_indices = @transform_7, window_bounds = array<i64: 32, 64>}, {pipeline_mode = #tpu.pipeline_mode<synchronous>, transform_indices = @transform_8, window_bounds = array<i64: 1, 64>}, {pipeline_mode = #tpu.pipeline_mode<synchronous>, transform_indices = @transform_9, window_bounds = array<i64: 64, 32>}, {pipeline_mode = #tpu.pipeline_mode<synchronous>, transform_indices = @transform_10, window_bounds = array<i64: 1, 32>}, {pipeline_mode = #tpu.pipeline_mode<synchronous>, transform_indices = @transform_11, window_bounds = array<i64: 1, 32>}, {pipeline_mode = #tpu.pipeline_mode<synchronous>, transform_indices = @transform_12, window_bounds = array<i64: 1, 32>}, {transform_indices = @transform_13, window_bounds = array<i64: 64, 32>}]} {
    %c0 = arith.constant 0 : index
    %c0_0 = arith.constant 0 : index
    %0 = vector.load %arg1[%c0, %c0_0] : memref<64x32xf32, #tpu.memory_space<vmem>>, vector<64x32xf32>
    %c0_1 = arith.constant 0 : index
    %c0_2 = arith.constant 0 : index
    %1 = vector.load %arg2[%c0_1, %c0_2] : memref<32x96xf32, #tpu.memory_space<vmem>>, vector<32x96xf32>
    %cst = arith.constant dense<0.000000e+00> : vector<64x96xf32>
    %2 = tpu.matmul %0, %1, %cst {dimension_numbers = #tpu.dot_dimension_numbers<[1], [0], [0], [1], [0, 0, 1, 1], [], []>} : vector<64x32xf32>, vector<32x96xf32>, vector<64x96xf32> -> vector<64x96xf32>
    %c0_3 = arith.constant 0 : index
    %c0_4 = arith.constant 0 : index
    %3 = vector.load %arg3[%c0_3, %c0_4] : memref<1x96xf32, #tpu.memory_space<vmem>>, vector<1x96xf32>
    %4 = vector.broadcast %3 : vector<1x96xf32> to vector<64x96xf32>
    %5 = arith.addf %2, %4 : vector<64x96xf32>
    %6 = vector.extract_strided_slice %5 {offsets = [0, 0], sizes = [16, 32], strides = [1, 1]} : vector<64x96xf32> to vector<16x32xf32>
    %7 = vector.extract_strided_slice %5 {offsets = [0, 32], sizes = [16, 32], strides = [1, 1]} : vector<64x96xf32> to vector<16x32xf32>
    %8 = vector.extract_strided_slice %5 {offsets = [0, 64], sizes = [16, 32], strides = [1, 1]} : vector<64x96xf32> to vector<16x32xf32>
    %cst_5 = arith.constant 0.353553385 : f32
    %9 = vector.broadcast %cst_5 : f32 to vector<16x32xf32>
    %10 = arith.mulf %6, %9 : vector<16x32xf32>
    %11 = vector.extract_strided_slice %10 {offsets = [0, 0], sizes = [16, 8], strides = [1, 1]} : vector<16x32xf32> to vector<16x8xf32>
    %12 = vector.extract_strided_slice %7 {offsets = [0, 0], sizes = [16, 8], strides = [1, 1]} : vector<16x32xf32> to vector<16x8xf32>
    %cst_6 = arith.constant dense<0.000000e+00> : vector<16x16xf32>
    %13 = tpu.matmul %11, %12, %cst_6 {dimension_numbers = #tpu.dot_dimension_numbers<[1], [1], [0], [0], [0, 0, 1, 0], [], []>} : vector<16x8xf32>, vector<16x8xf32>, vector<16x16xf32> -> vector<16x16xf32>
    %cst_7 = arith.constant dense<0xFF800000> : vector<16xf32>
    %14 = vector.multi_reduction <maximumf>, %13, %cst_7 [1] : vector<16x16xf32> to vector<16xf32>
    %15 = vector.shape_cast %14 : vector<16xf32> to vector<16x1xf32>
    %16 = vector.broadcast %15 : vector<16x1xf32> to vector<16x16xf32>
    %17 = arith.subf %13, %16 : vector<16x16xf32>
    %18 = math.exp %17 : vector<16x16xf32>
    %cst_8 = arith.constant dense<0.000000e+00> : vector<16xf32>
    %19 = vector.multi_reduction <add>, %18, %cst_8 [1] : vector<16x16xf32> to vector<16xf32>
    %20 = vector.shape_cast %19 : vector<16xf32> to vector<16x1xf32>
    %21 = tpu.reciprocal %20 {approx = true} : vector<16x1xf32> -> vector<16x1xf32>
    %22 = vector.broadcast %21 : vector<16x1xf32> to vector<16x16xf32>
    %23 = arith.mulf %18, %22 : vector<16x16xf32>
    %24 = vector.extract_strided_slice %8 {offsets = [0, 0], sizes = [16, 8], strides = [1, 1]} : vector<16x32xf32> to vector<16x8xf32>
    %cst_9 = arith.constant dense<0.000000e+00> : vector<16x8xf32>
    %25 = tpu.matmul %23, %24, %cst_9 {dimension_numbers = #tpu.dot_dimension_numbers<[1], [0], [0], [1], [0, 0, 1, 1], [], []>} : vector<16x16xf32>, vector<16x8xf32>, vector<16x8xf32> -> vector<16x8xf32>
    %26 = vector.extract_strided_slice %10 {offsets = [0, 8], sizes = [16, 8], strides = [1, 1]} : vector<16x32xf32> to vector<16x8xf32>
    %27 = vector.extract_strided_slice %7 {offsets = [0, 8], sizes = [16, 8], strides = [1, 1]} : vector<16x32xf32> to vector<16x8xf32>
    %cst_10 = arith.constant dense<0.000000e+00> : vector<16x16xf32>
    %28 = tpu.matmul %26, %27, %cst_10 {dimension_numbers = #tpu.dot_dimension_numbers<[1], [1], [0], [0], [0, 0, 1, 0], [], []>} : vector<16x8xf32>, vector<16x8xf32>, vector<16x16xf32> -> vector<16x16xf32>
    %cst_11 = arith.constant dense<0xFF800000> : vector<16xf32>
    %29 = vector.multi_reduction <maximumf>, %28, %cst_11 [1] : vector<16x16xf32> to vector<16xf32>
    %30 = vector.shape_cast %29 : vector<16xf32> to vector<16x1xf32>
    %31 = vector.broadcast %30 : vector<16x1xf32> to vector<16x16xf32>
    %32 = arith.subf %28, %31 : vector<16x16xf32>
    %33 = math.exp %32 : vector<16x16xf32>
    %cst_12 = arith.constant dense<0.000000e+00> : vector<16xf32>
    %34 = vector.multi_reduction <add>, %33, %cst_12 [1] : vector<16x16xf32> to vector<16xf32>
    %35 = vector.shape_cast %34 : vector<16xf32> to vector<16x1xf32>
    %36 = tpu.reciprocal %35 {approx = true} : vector<16x1xf32> -> vector<16x1xf32>
    %37 = vector.broadcast %36 : vector<16x1xf32> to vector<16x16xf32>
    %38 = arith.mulf %33, %37 : vector<16x16xf32>
    %39 = vector.extract_strided_slice %8 {offsets = [0, 8], sizes = [16, 8], strides = [1, 1]} : vector<16x32xf32> to vector<16x8xf32>
    %cst_13 = arith.constant dense<0.000000e+00> : vector<16x8xf32>
    %40 = tpu.matmul %38, %39, %cst_13 {dimension_numbers = #tpu.dot_dimension_numbers<[1], [0], [0], [1], [0, 0, 1, 1], [], []>} : vector<16x16xf32>, vector<16x8xf32>, vector<16x8xf32> -> vector<16x8xf32>
    %41 = vector.extract_strided_slice %10 {offsets = [0, 16], sizes = [16, 8], strides = [1, 1]} : vector<16x32xf32> to vector<16x8xf32>
    %42 = vector.extract_strided_slice %7 {offsets = [0, 16], sizes = [16, 8], strides = [1, 1]} : vector<16x32xf32> to vector<16x8xf32>
    %cst_14 = arith.constant dense<0.000000e+00> : vector<16x16xf32>
    %43 = tpu.matmul %41, %42, %cst_14 {dimension_numbers = #tpu.dot_dimension_numbers<[1], [1], [0], [0], [0, 0, 1, 0], [], []>} : vector<16x8xf32>, vector<16x8xf32>, vector<16x16xf32> -> vector<16x16xf32>
    %cst_15 = arith.constant dense<0xFF800000> : vector<16xf32>
    %44 = vector.multi_reduction <maximumf>, %43, %cst_15 [1] : vector<16x16xf32> to vector<16xf32>
    %45 = vector.shape_cast %44 : vector<16xf32> to vector<16x1xf32>
    %46 = vector.broadcast %45 : vector<16x1xf32> to vector<16x16xf32>
    %47 = arith.subf %43, %46 : vector<16x16xf32>
    %48 = math.exp %47 : vector<16x16xf32>
    %cst_16 = arith.constant dense<0.000000e+00> : vector<16xf32>
    %49 = vector.multi_reduction <add>, %48, %cst_16 [1] : vector<16x16xf32> to vector<16xf32>
    %50 = vector.shape_cast %49 : vector<16xf32> to vector<16x1xf32>
    %51 = tpu.reciprocal %50 {approx = true} : vector<16x1xf32> -> vector<16x1xf32>
    %52 = vector.broadcast %51 : vector<16x1xf32> to vector<16x16xf32>
    %53 = arith.mulf %48, %52 : vector<16x16xf32>
    %54 = vector.extract_strided_slice %8 {offsets = [0, 16], sizes = [16, 8], strides = [1, 1]} : vector<16x32xf32> to vector<16x8xf32>
    %cst_17 = arith.constant dense<0.000000e+00> : vector<16x8xf32>
    %55 = tpu.matmul %53, %54, %cst_17 {dimension_numbers = #tpu.dot_dimension_numbers<[1], [0], [0], [1], [0, 0, 1, 1], [], []>} : vector<16x16xf32>, vector<16x8xf32>, vector<16x8xf32> -> vector<16x8xf32>
    %56 = vector.extract_strided_slice %10 {offsets = [0, 24], sizes = [16, 8], strides = [1, 1]} : vector<16x32xf32> to vector<16x8xf32>
    %57 = vector.extract_strided_slice %7 {offsets = [0, 24], sizes = [16, 8], strides = [1, 1]} : vector<16x32xf32> to vector<16x8xf32>
    %cst_18 = arith.constant dense<0.000000e+00> : vector<16x16xf32>
    %58 = tpu.matmul %56, %57, %cst_18 {dimension_numbers = #tpu.dot_dimension_numbers<[1], [1], [0], [0], [0, 0, 1, 0], [], []>} : vector<16x8xf32>, vector<16x8xf32>, vector<16x16xf32> -> vector<16x16xf32>
    %cst_19 = arith.constant dense<0xFF800000> : vector<16xf32>
    %59 = vector.multi_reduction <maximumf>, %58, %cst_19 [1] : vector<16x16xf32> to vector<16xf32>
    %60 = vector.shape_cast %59 : vector<16xf32> to vector<16x1xf32>
    %61 = vector.broadcast %60 : vector<16x1xf32> to vector<16x16xf32>
    %62 = arith.subf %58, %61 : vector<16x16xf32>
    %63 = math.exp %62 : vector<16x16xf32>
    %cst_20 = arith.constant dense<0.000000e+00> : vector<16xf32>
    %64 = vector.multi_reduction <add>, %63, %cst_20 [1] : vector<16x16xf32> to vector<16xf32>
    %65 = vector.shape_cast %64 : vector<16xf32> to vector<16x1xf32>
    %66 = tpu.reciprocal %65 {approx = true} : vector<16x1xf32> -> vector<16x1xf32>
    %67 = vector.broadcast %66 : vector<16x1xf32> to vector<16x16xf32>
    %68 = arith.mulf %63, %67 : vector<16x16xf32>
    %69 = vector.extract_strided_slice %8 {offsets = [0, 24], sizes = [16, 8], strides = [1, 1]} : vector<16x32xf32> to vector<16x8xf32>
    %cst_21 = arith.constant dense<0.000000e+00> : vector<16x8xf32>
    %70 = tpu.matmul %68, %69, %cst_21 {dimension_numbers = #tpu.dot_dimension_numbers<[1], [0], [0], [1], [0, 0, 1, 1], [], []>} : vector<16x16xf32>, vector<16x8xf32>, vector<16x8xf32> -> vector<16x8xf32>
    %71 = tpu.concatenate %25, %40, %55, %70 in 1 : vector<16x8xf32>, vector<16x8xf32>, vector<16x8xf32>, vector<16x8xf32> -> vector<16x32xf32>
    %c0_22 = arith.constant 0 : index
    %c0_23 = arith.constant 0 : index
    %72 = vector.load %arg15[%c0_22, %c0_23] : memref<64x32xf32, #tpu.memory_space<vmem>>, vector<16x32xf32>
    tpu.vector_store %arg15[%c0_22, %c0_23], %71 {strides = array<i32>} : memref<64x32xf32, #tpu.memory_space<vmem>>, vector<16x32xf32>,
    %73 = vector.extract_strided_slice %5 {offsets = [16, 0], sizes = [16, 32], strides = [1, 1]} : vector<64x96xf32> to vector<16x32xf32>
    %74 = vector.extract_strided_slice %5 {offsets = [16, 32], sizes = [16, 32], strides = [1, 1]} : vector<64x96xf32> to vector<16x32xf32>
    %75 = vector.extract_strided_slice %5 {offsets = [16, 64], sizes = [16, 32], strides = [1, 1]} : vector<64x96xf32> to vector<16x32xf32>
    %cst_24 = arith.constant 0.353553385 : f32
    %76 = vector.broadcast %cst_24 : f32 to vector<16x32xf32>
    %77 = arith.mulf %73, %76 : vector<16x32xf32>
    %78 = vector.extract_strided_slice %77 {offsets = [0, 0], sizes = [16, 8], strides = [1, 1]} : vector<16x32xf32> to vector<16x8xf32>
    %79 = vector.extract_strided_slice %74 {offsets = [0, 0], sizes = [16, 8], strides = [1, 1]} : vector<16x32xf32> to vector<16x8xf32>
    %cst_25 = arith.constant dense<0.000000e+00> : vector<16x16xf32>
    %80 = tpu.matmul %78, %79, %cst_25 {dimension_numbers = #tpu.dot_dimension_numbers<[1], [1], [0], [0], [0, 0, 1, 0], [], []>} : vector<16x8xf32>, vector<16x8xf32>, vector<16x16xf32> -> vector<16x16xf32>
    %cst_26 = arith.constant dense<0xFF800000> : vector<16xf32>
    %81 = vector.multi_reduction <maximumf>, %80, %cst_26 [1] : vector<16x16xf32> to vector<16xf32>
    %82 = vector.shape_cast %81 : vector<16xf32> to vector<16x1xf32>
    %83 = vector.broadcast %82 : vector<16x1xf32> to vector<16x16xf32>
    %84 = arith.subf %80, %83 : vector<16x16xf32>
    %85 = math.exp %84 : vector<16x16xf32>
    %cst_27 = arith.constant dense<0.000000e+00> : vector<16xf32>
    %86 = vector.multi_reduction <add>, %85, %cst_27 [1] : vector<16x16xf32> to vector<16xf32>
    %87 = vector.shape_cast %86 : vector<16xf32> to vector<16x1xf32>
    %88 = tpu.reciprocal %87 {approx = true} : vector<16x1xf32> -> vector<16x1xf32>
    %89 = vector.broadcast %88 : vector<16x1xf32> to vector<16x16xf32>
    %90 = arith.mulf %85, %89 : vector<16x16xf32>
    %91 = vector.extract_strided_slice %75 {offsets = [0, 0], sizes = [16, 8], strides = [1, 1]} : vector<16x32xf32> to vector<16x8xf32>
    %cst_28 = arith.constant dense<0.000000e+00> : vector<16x8xf32>
    %92 = tpu.matmul %90, %91, %cst_28 {dimension_numbers = #tpu.dot_dimension_numbers<[1], [0], [0], [1], [0, 0, 1, 1], [], []>} : vector<16x16xf32>, vector<16x8xf32>, vector<16x8xf32> -> vector<16x8xf32>
    %93 = vector.extract_strided_slice %77 {offsets = [0, 8], sizes = [16, 8], strides = [1, 1]} : vector<16x32xf32> to vector<16x8xf32>
    %94 = vector.extract_strided_slice %74 {offsets = [0, 8], sizes = [16, 8], strides = [1, 1]} : vector<16x32xf32> to vector<16x8xf32>
    %cst_29 = arith.constant dense<0.000000e+00> : vector<16x16xf32>
    %95 = tpu.matmul %93, %94, %cst_29 {dimension_numbers = #tpu.dot_dimension_numbers<[1], [1], [0], [0], [0, 0, 1, 0], [], []>} : vector<16x8xf32>, vector<16x8xf32>, vector<16x16xf32> -> vector<16x16xf32>
    %cst_30 = arith.constant dense<0xFF800000> : vector<16xf32>
    %96 = vector.multi_reduction <maximumf>, %95, %cst_30 [1] : vector<16x16xf32> to vector<16xf32>
    %97 = vector.shape_cast %96 : vector<16xf32> to vector<16x1xf32>
    %98 = vector.broadcast %97 : vector<16x1xf32> to vector<16x16xf32>
    %99 = arith.subf %95, %98 : vector<16x16xf32>
    %100 = math.exp %99 : vector<16x16xf32>
    %cst_31 = arith.constant dense<0.000000e+00> : vector<16xf32>
    %101 = vector.multi_reduction <add>, %100, %cst_31 [1] : vector<16x16xf32> to vector<16xf32>
    %102 = vector.shape_cast %101 : vector<16xf32> to vector<16x1xf32>
    %103 = tpu.reciprocal %102 {approx = true} : vector<16x1xf32> -> vector<16x1xf32>
    %104 = vector.broadcast %103 : vector<16x1xf32> to vector<16x16xf32>
    %105 = arith.mulf %100, %104 : vector<16x16xf32>
    %106 = vector.extract_strided_slice %75 {offsets = [0, 8], sizes = [16, 8], strides = [1, 1]} : vector<16x32xf32> to vector<16x8xf32>
    %cst_32 = arith.constant dense<0.000000e+00> : vector<16x8xf32>
    %107 = tpu.matmul %105, %106, %cst_32 {dimension_numbers = #tpu.dot_dimension_numbers<[1], [0], [0], [1], [0, 0, 1, 1], [], []>} : vector<16x16xf32>, vector<16x8xf32>, vector<16x8xf32> -> vector<16x8xf32>
    %108 = vector.extract_strided_slice %77 {offsets = [0, 16], sizes = [16, 8], strides = [1, 1]} : vector<16x32xf32> to vector<16x8xf32>
    %109 = vector.extract_strided_slice %74 {offsets = [0, 16], sizes = [16, 8], strides = [1, 1]} : vector<16x32xf32> to vector<16x8xf32>
    %cst_33 = arith.constant dense<0.000000e+00> : vector<16x16xf32>
    %110 = tpu.matmul %108, %109, %cst_33 {dimension_numbers = #tpu.dot_dimension_numbers<[1], [1], [0], [0], [0, 0, 1, 0], [], []>} : vector<16x8xf32>, vector<16x8xf32>, vector<16x16xf32> -> vector<16x16xf32>
    %cst_34 = arith.constant dense<0xFF800000> : vector<16xf32>
    %111 = vector.multi_reduction <maximumf>, %110, %cst_34 [1] : vector<16x16xf32> to vector<16xf32>
    %112 = vector.shape_cast %111 : vector<16xf32> to vector<16x1xf32>
    %113 = vector.broadcast %112 : vector<16x1xf32> to vector<16x16xf32>
    %114 = arith.subf %110, %113 : vector<16x16xf32>
    %115 = math.exp %114 : vector<16x16xf32>
    %cst_35 = arith.constant dense<0.000000e+00> : vector<16xf32>
    %116 = vector.multi_reduction <add>, %115, %cst_35 [1] : vector<16x16xf32> to vector<16xf32>
    %117 = vector.shape_cast %116 : vector<16xf32> to vector<16x1xf32>
    %118 = tpu.reciprocal %117 {approx = true} : vector<16x1xf32> -> vector<16x1xf32>
    %119 = vector.broadcast %118 : vector<16x1xf32> to vector<16x16xf32>
    %120 = arith.mulf %115, %119 : vector<16x16xf32>
    %121 = vector.extract_strided_slice %75 {offsets = [0, 16], sizes = [16, 8], strides = [1, 1]} : vector<16x32xf32> to vector<16x8xf32>
    %cst_36 = arith.constant dense<0.000000e+00> : vector<16x8xf32>
    %122 = tpu.matmul %120, %121, %cst_36 {dimension_numbers = #tpu.dot_dimension_numbers<[1], [0], [0], [1], [0, 0, 1, 1], [], []>} : vector<16x16xf32>, vector<16x8xf32>, vector<16x8xf32> -> vector<16x8xf32>
    %123 = vector.extract_strided_slice %77 {offsets = [0, 24], sizes = [16, 8], strides = [1, 1]} : vector<16x32xf32> to vector<16x8xf32>
    %124 = vector.extract_strided_slice %74 {offsets = [0, 24], sizes = [16, 8], strides = [1, 1]} : vector<16x32xf32> to vector<16x8xf32>
    %cst_37 = arith.constant dense<0.000000e+00> : vector<16x16xf32>
    %125 = tpu.matmul %123, %124, %cst_37 {dimension_numbers = #tpu.dot_dimension_numbers<[1], [1], [0], [0], [0, 0, 1, 0], [], []>} : vector<16x8xf32>, vector<16x8xf32>, vector<16x16xf32> -> vector<16x16xf32>
    %cst_38 = arith.constant dense<0xFF800000> : vector<16xf32>
    %126 = vector.multi_reduction <maximumf>, %125, %cst_38 [1] : vector<16x16xf32> to vector<16xf32>
    %127 = vector.shape_cast %126 : vector<16xf32> to vector<16x1xf32>
    %128 = vector.broadcast %127 : vector<16x1xf32> to vector<16x16xf32>
    %129 = arith.subf %125, %128 : vector<16x16xf32>
    %130 = math.exp %129 : vector<16x16xf32>
    %cst_39 = arith.constant dense<0.000000e+00> : vector<16xf32>
    %131 = vector.multi_reduction <add>, %130, %cst_39 [1] : vector<16x16xf32> to vector<16xf32>
    %132 = vector.shape_cast %131 : vector<16xf32> to vector<16x1xf32>
    %133 = tpu.reciprocal %132 {approx = true} : vector<16x1xf32> -> vector<16x1xf32>
    %134 = vector.broadcast %133 : vector<16x1xf32> to vector<16x16xf32>
    %135 = arith.mulf %130, %134 : vector<16x16xf32>
    %136 = vector.extract_strided_slice %75 {offsets = [0, 24], sizes = [16, 8], strides = [1, 1]} : vector<16x32xf32> to vector<16x8xf32>
    %cst_40 = arith.constant dense<0.000000e+00> : vector<16x8xf32>
    %137 = tpu.matmul %135, %136, %cst_40 {dimension_numbers = #tpu.dot_dimension_numbers<[1], [0], [0], [1], [0, 0, 1, 1], [], []>} : vector<16x16xf32>, vector<16x8xf32>, vector<16x8xf32> -> vector<16x8xf32>
    %138 = tpu.concatenate %92, %107, %122, %137 in 1 : vector<16x8xf32>, vector<16x8xf32>, vector<16x8xf32>, vector<16x8xf32> -> vector<16x32xf32>
    %c16 = arith.constant 16 : index
    %c0_41 = arith.constant 0 : index
    %139 = vector.load %arg15[%c16, %c0_41] : memref<64x32xf32, #tpu.memory_space<vmem>>, vector<16x32xf32>
    tpu.vector_store %arg15[%c16, %c0_41], %138 {strides = array<i32>} : memref<64x32xf32, #tpu.memory_space<vmem>>, vector<16x32xf32>,
    %140 = vector.extract_strided_slice %5 {offsets = [32, 0], sizes = [16, 32], strides = [1, 1]} : vector<64x96xf32> to vector<16x32xf32>
    %141 = vector.extract_strided_slice %5 {offsets = [32, 32], sizes = [16, 32], strides = [1, 1]} : vector<64x96xf32> to vector<16x32xf32>
    %142 = vector.extract_strided_slice %5 {offsets = [32, 64], sizes = [16, 32], strides = [1, 1]} : vector<64x96xf32> to vector<16x32xf32>
    %cst_42 = arith.constant 0.353553385 : f32
    %143 = vector.broadcast %cst_42 : f32 to vector<16x32xf32>
    %144 = arith.mulf %140, %143 : vector<16x32xf32>
    %145 = vector.extract_strided_slice %144 {offsets = [0, 0], sizes = [16, 8], strides = [1, 1]} : vector<16x32xf32> to vector<16x8xf32>
    %146 = vector.extract_strided_slice %141 {offsets = [0, 0], sizes = [16, 8], strides = [1, 1]} : vector<16x32xf32> to vector<16x8xf32>
    %cst_43 = arith.constant dense<0.000000e+00> : vector<16x16xf32>
    %147 = tpu.matmul %145, %146, %cst_43 {dimension_numbers = #tpu.dot_dimension_numbers<[1], [1], [0], [0], [0, 0, 1, 0], [], []>} : vector<16x8xf32>, vector<16x8xf32>, vector<16x16xf32> -> vector<16x16xf32>
    %cst_44 = arith.constant dense<0xFF800000> : vector<16xf32>
    %148 = vector.multi_reduction <maximumf>, %147, %cst_44 [1] : vector<16x16xf32> to vector<16xf32>
    %149 = vector.shape_cast %148 : vector<16xf32> to vector<16x1xf32>
    %150 = vector.broadcast %149 : vector<16x1xf32> to vector<16x16xf32>
    %151 = arith.subf %147, %150 : vector<16x16xf32>
    %152 = math.exp %151 : vector<16x16xf32>
    %cst_45 = arith.constant dense<0.000000e+00> : vector<16xf32>
    %153 = vector.multi_reduction <add>, %152, %cst_45 [1] : vector<16x16xf32> to vector<16xf32>
    %154 = vector.shape_cast %153 : vector<16xf32> to vector<16x1xf32>
    %155 = tpu.reciprocal %154 {approx = true} : vector<16x1xf32> -> vector<16x1xf32>
    %156 = vector.broadcast %155 : vector<16x1xf32> to vector<16x16xf32>
    %157 = arith.mulf %152, %156 : vector<16x16xf32>
    %158 = vector.extract_strided_slice %142 {offsets = [0, 0], sizes = [16, 8], strides = [1, 1]} : vector<16x32xf32> to vector<16x8xf32>
    %cst_46 = arith.constant dense<0.000000e+00> : vector<16x8xf32>
    %159 = tpu.matmul %157, %158, %cst_46 {dimension_numbers = #tpu.dot_dimension_numbers<[1], [0], [0], [1], [0, 0, 1, 1], [], []>} : vector<16x16xf32>, vector<16x8xf32>, vector<16x8xf32> -> vector<16x8xf32>
    %160 = vector.extract_strided_slice %144 {offsets = [0, 8], sizes = [16, 8], strides = [1, 1]} : vector<16x32xf32> to vector<16x8xf32>
    %161 = vector.extract_strided_slice %141 {offsets = [0, 8], sizes = [16, 8], strides = [1, 1]} : vector<16x32xf32> to vector<16x8xf32>
    %cst_47 = arith.constant dense<0.000000e+00> : vector<16x16xf32>
    %162 = tpu.matmul %160, %161, %cst_47 {dimension_numbers = #tpu.dot_dimension_numbers<[1], [1], [0], [0], [0, 0, 1, 0], [], []>} : vector<16x8xf32>, vector<16x8xf32>, vector<16x16xf32> -> vector<16x16xf32>
    %cst_48 = arith.constant dense<0xFF800000> : vector<16xf32>
    %163 = vector.multi_reduction <maximumf>, %162, %cst_48 [1] : vector<16x16xf32> to vector<16xf32>
    %164 = vector.shape_cast %163 : vector<16xf32> to vector<16x1xf32>
    %165 = vector.broadcast %164 : vector<16x1xf32> to vector<16x16xf32>
    %166 = arith.subf %162, %165 : vector<16x16xf32>
    %167 = math.exp %166 : vector<16x16xf32>
    %cst_49 = arith.constant dense<0.000000e+00> : vector<16xf32>
    %168 = vector.multi_reduction <add>, %167, %cst_49 [1] : vector<16x16xf32> to vector<16xf32>
    %169 = vector.shape_cast %168 : vector<16xf32> to vector<16x1xf32>
    %170 = tpu.reciprocal %169 {approx = true} : vector<16x1xf32> -> vector<16x1xf32>
    %171 = vector.broadcast %170 : vector<16x1xf32> to vector<16x16xf32>
    %172 = arith.mulf %167, %171 : vector<16x16xf32>
    %173 = vector.extract_strided_slice %142 {offsets = [0, 8], sizes = [16, 8], strides = [1, 1]} : vector<16x32xf32> to vector<16x8xf32>
    %cst_50 = arith.constant dense<0.000000e+00> : vector<16x8xf32>
    %174 = tpu.matmul %172, %173, %cst_50 {dimension_numbers = #tpu.dot_dimension_numbers<[1], [0], [0], [1], [0, 0, 1, 1], [], []>} : vector<16x16xf32>, vector<16x8xf32>, vector<16x8xf32> -> vector<16x8xf32>
    %175 = vector.extract_strided_slice %144 {offsets = [0, 16], sizes = [16, 8], strides = [1, 1]} : vector<16x32xf32> to vector<16x8xf32>
    %176 = vector.extract_strided_slice %141 {offsets = [0, 16], sizes = [16, 8], strides = [1, 1]} : vector<16x32xf32> to vector<16x8xf32>
    %cst_51 = arith.constant dense<0.000000e+00> : vector<16x16xf32>
    %177 = tpu.matmul %175, %176, %cst_51 {dimension_numbers = #tpu.dot_dimension_numbers<[1], [1], [0], [0], [0, 0, 1, 0], [], []>} : vector<16x8xf32>, vector<16x8xf32>, vector<16x16xf32> -> vector<16x16xf32>
    %cst_52 = arith.constant dense<0xFF800000> : vector<16xf32>
    %178 = vector.multi_reduction <maximumf>, %177, %cst_52 [1] : vector<16x16xf32> to vector<16xf32>
    %179 = vector.shape_cast %178 : vector<16xf32> to vector<16x1xf32>
    %180 = vector.broadcast %179 : vector<16x1xf32> to vector<16x16xf32>
    %181 = arith.subf %177, %180 : vector<16x16xf32>
    %182 = math.exp %181 : vector<16x16xf32>
    %cst_53 = arith.constant dense<0.000000e+00> : vector<16xf32>
    %183 = vector.multi_reduction <add>, %182, %cst_53 [1] : vector<16x16xf32> to vector<16xf32>
    %184 = vector.shape_cast %183 : vector<16xf32> to vector<16x1xf32>
    %185 = tpu.reciprocal %184 {approx = true} : vector<16x1xf32> -> vector<16x1xf32>
    %186 = vector.broadcast %185 : vector<16x1xf32> to vector<16x16xf32>
    %187 = arith.mulf %182, %186 : vector<16x16xf32>
    %188 = vector.extract_strided_slice %142 {offsets = [0, 16], sizes = [16, 8], strides = [1, 1]} : vector<16x32xf32> to vector<16x8xf32>
    %cst_54 = arith.constant dense<0.000000e+00> : vector<16x8xf32>
    %189 = tpu.matmul %187, %188, %cst_54 {dimension_numbers = #tpu.dot_dimension_numbers<[1], [0], [0], [1], [0, 0, 1, 1], [], []>} : vector<16x16xf32>, vector<16x8xf32>, vector<16x8xf32> -> vector<16x8xf32>
    %190 = vector.extract_strided_slice %144 {offsets = [0, 24], sizes = [16, 8], strides = [1, 1]} : vector<16x32xf32> to vector<16x8xf32>
    %191 = vector.extract_strided_slice %141 {offsets = [0, 24], sizes = [16, 8], strides = [1, 1]} : vector<16x32xf32> to vector<16x8xf32>
    %cst_55 = arith.constant dense<0.000000e+00> : vector<16x16xf32>
    %192 = tpu.matmul %190, %191, %cst_55 {dimension_numbers = #tpu.dot_dimension_numbers<[1], [1], [0], [0], [0, 0, 1, 0], [], []>} : vector<16x8xf32>, vector<16x8xf32>, vector<16x16xf32> -> vector<16x16xf32>
    %cst_56 = arith.constant dense<0xFF800000> : vector<16xf32>
    %193 = vector.multi_reduction <maximumf>, %192, %cst_56 [1] : vector<16x16xf32> to vector<16xf32>
    %194 = vector.shape_cast %193 : vector<16xf32> to vector<16x1xf32>
    %195 = vector.broadcast %194 : vector<16x1xf32> to vector<16x16xf32>
    %196 = arith.subf %192, %195 : vector<16x16xf32>
    %197 = math.exp %196 : vector<16x16xf32>
    %cst_57 = arith.constant dense<0.000000e+00> : vector<16xf32>
    %198 = vector.multi_reduction <add>, %197, %cst_57 [1] : vector<16x16xf32> to vector<16xf32>
    %199 = vector.shape_cast %198 : vector<16xf32> to vector<16x1xf32>
    %200 = tpu.reciprocal %199 {approx = true} : vector<16x1xf32> -> vector<16x1xf32>
    %201 = vector.broadcast %200 : vector<16x1xf32> to vector<16x16xf32>
    %202 = arith.mulf %197, %201 : vector<16x16xf32>
    %203 = vector.extract_strided_slice %142 {offsets = [0, 24], sizes = [16, 8], strides = [1, 1]} : vector<16x32xf32> to vector<16x8xf32>
    %cst_58 = arith.constant dense<0.000000e+00> : vector<16x8xf32>
    %204 = tpu.matmul %202, %203, %cst_58 {dimension_numbers = #tpu.dot_dimension_numbers<[1], [0], [0], [1], [0, 0, 1, 1], [], []>} : vector<16x16xf32>, vector<16x8xf32>, vector<16x8xf32> -> vector<16x8xf32>
    %205 = tpu.concatenate %159, %174, %189, %204 in 1 : vector<16x8xf32>, vector<16x8xf32>, vector<16x8xf32>, vector<16x8xf32> -> vector<16x32xf32>
    %c32 = arith.constant 32 : index
    %c0_59 = arith.constant 0 : index
    %206 = vector.load %arg15[%c32, %c0_59] : memref<64x32xf32, #tpu.memory_space<vmem>>, vector<16x32xf32>
    tpu.vector_store %arg15[%c32, %c0_59], %205 {strides = array<i32>} : memref<64x32xf32, #tpu.memory_space<vmem>>, vector<16x32xf32>,
    %207 = vector.extract_strided_slice %5 {offsets = [48, 0], sizes = [16, 32], strides = [1, 1]} : vector<64x96xf32> to vector<16x32xf32>
    %208 = vector.extract_strided_slice %5 {offsets = [48, 32], sizes = [16, 32], strides = [1, 1]} : vector<64x96xf32> to vector<16x32xf32>
    %209 = vector.extract_strided_slice %5 {offsets = [48, 64], sizes = [16, 32], strides = [1, 1]} : vector<64x96xf32> to vector<16x32xf32>
    %cst_60 = arith.constant 0.353553385 : f32
    %210 = vector.broadcast %cst_60 : f32 to vector<16x32xf32>
    %211 = arith.mulf %207, %210 : vector<16x32xf32>
    %212 = vector.extract_strided_slice %211 {offsets = [0, 0], sizes = [16, 8], strides = [1, 1]} : vector<16x32xf32> to vector<16x8xf32>
    %213 = vector.extract_strided_slice %208 {offsets = [0, 0], sizes = [16, 8], strides = [1, 1]} : vector<16x32xf32> to vector<16x8xf32>
    %cst_61 = arith.constant dense<0.000000e+00> : vector<16x16xf32>
    %214 = tpu.matmul %212, %213, %cst_61 {dimension_numbers = #tpu.dot_dimension_numbers<[1], [1], [0], [0], [0, 0, 1, 0], [], []>} : vector<16x8xf32>, vector<16x8xf32>, vector<16x16xf32> -> vector<16x16xf32>
    %cst_62 = arith.constant dense<0xFF800000> : vector<16xf32>
    %215 = vector.multi_reduction <maximumf>, %214, %cst_62 [1] : vector<16x16xf32> to vector<16xf32>
    %216 = vector.shape_cast %215 : vector<16xf32> to vector<16x1xf32>
    %217 = vector.broadcast %216 : vector<16x1xf32> to vector<16x16xf32>
    %218 = arith.subf %214, %217 : vector<16x16xf32>
    %219 = math.exp %218 : vector<16x16xf32>
    %cst_63 = arith.constant dense<0.000000e+00> : vector<16xf32>
    %220 = vector.multi_reduction <add>, %219, %cst_63 [1] : vector<16x16xf32> to vector<16xf32>
    %221 = vector.shape_cast %220 : vector<16xf32> to vector<16x1xf32>
    %222 = tpu.reciprocal %221 {approx = true} : vector<16x1xf32> -> vector<16x1xf32>
    %223 = vector.broadcast %222 : vector<16x1xf32> to vector<16x16xf32>
    %224 = arith.mulf %219, %223 : vector<16x16xf32>
    %225 = vector.extract_strided_slice %209 {offsets = [0, 0], sizes = [16, 8], strides = [1, 1]} : vector<16x32xf32> to vector<16x8xf32>
    %cst_64 = arith.constant dense<0.000000e+00> : vector<16x8xf32>
    %226 = tpu.matmul %224, %225, %cst_64 {dimension_numbers = #tpu.dot_dimension_numbers<[1], [0], [0], [1], [0, 0, 1, 1], [], []>} : vector<16x16xf32>, vector<16x8xf32>, vector<16x8xf32> -> vector<16x8xf32>
    %227 = vector.extract_strided_slice %211 {offsets = [0, 8], sizes = [16, 8], strides = [1, 1]} : vector<16x32xf32> to vector<16x8xf32>
    %228 = vector.extract_strided_slice %208 {offsets = [0, 8], sizes = [16, 8], strides = [1, 1]} : vector<16x32xf32> to vector<16x8xf32>
    %cst_65 = arith.constant dense<0.000000e+00> : vector<16x16xf32>
    %229 = tpu.matmul %227, %228, %cst_65 {dimension_numbers = #tpu.dot_dimension_numbers<[1], [1], [0], [0], [0, 0, 1, 0], [], []>} : vector<16x8xf32>, vector<16x8xf32>, vector<16x16xf32> -> vector<16x16xf32>
    %cst_66 = arith.constant dense<0xFF800000> : vector<16xf32>
    %230 = vector.multi_reduction <maximumf>, %229, %cst_66 [1] : vector<16x16xf32> to vector<16xf32>
    %231 = vector.shape_cast %230 : vector<16xf32> to vector<16x1xf32>
    %232 = vector.broadcast %231 : vector<16x1xf32> to vector<16x16xf32>
    %233 = arith.subf %229, %232 : vector<16x16xf32>
    %234 = math.exp %233 : vector<16x16xf32>
    %cst_67 = arith.constant dense<0.000000e+00> : vector<16xf32>
    %235 = vector.multi_reduction <add>, %234, %cst_67 [1] : vector<16x16xf32> to vector<16xf32>
    %236 = vector.shape_cast %235 : vector<16xf32> to vector<16x1xf32>
    %237 = tpu.reciprocal %236 {approx = true} : vector<16x1xf32> -> vector<16x1xf32>
    %238 = vector.broadcast %237 : vector<16x1xf32> to vector<16x16xf32>
    %239 = arith.mulf %234, %238 : vector<16x16xf32>
    %240 = vector.extract_strided_slice %209 {offsets = [0, 8], sizes = [16, 8], strides = [1, 1]} : vector<16x32xf32> to vector<16x8xf32>
    %cst_68 = arith.constant dense<0.000000e+00> : vector<16x8xf32>
    %241 = tpu.matmul %239, %240, %cst_68 {dimension_numbers = #tpu.dot_dimension_numbers<[1], [0], [0], [1], [0, 0, 1, 1], [], []>} : vector<16x16xf32>, vector<16x8xf32>, vector<16x8xf32> -> vector<16x8xf32>
    %242 = vector.extract_strided_slice %211 {offsets = [0, 16], sizes = [16, 8], strides = [1, 1]} : vector<16x32xf32> to vector<16x8xf32>
    %243 = vector.extract_strided_slice %208 {offsets = [0, 16], sizes = [16, 8], strides = [1, 1]} : vector<16x32xf32> to vector<16x8xf32>
    %cst_69 = arith.constant dense<0.000000e+00> : vector<16x16xf32>
    %244 = tpu.matmul %242, %243, %cst_69 {dimension_numbers = #tpu.dot_dimension_numbers<[1], [1], [0], [0], [0, 0, 1, 0], [], []>} : vector<16x8xf32>, vector<16x8xf32>, vector<16x16xf32> -> vector<16x16xf32>
    %cst_70 = arith.constant dense<0xFF800000> : vector<16xf32>
    %245 = vector.multi_reduction <maximumf>, %244, %cst_70 [1] : vector<16x16xf32> to vector<16xf32>
    %246 = vector.shape_cast %245 : vector<16xf32> to vector<16x1xf32>
    %247 = vector.broadcast %246 : vector<16x1xf32> to vector<16x16xf32>
    %248 = arith.subf %244, %247 : vector<16x16xf32>
    %249 = math.exp %248 : vector<16x16xf32>
    %cst_71 = arith.constant dense<0.000000e+00> : vector<16xf32>
    %250 = vector.multi_reduction <add>, %249, %cst_71 [1] : vector<16x16xf32> to vector<16xf32>
    %251 = vector.shape_cast %250 : vector<16xf32> to vector<16x1xf32>
    %252 = tpu.reciprocal %251 {approx = true} : vector<16x1xf32> -> vector<16x1xf32>
    %253 = vector.broadcast %252 : vector<16x1xf32> to vector<16x16xf32>
    %254 = arith.mulf %249, %253 : vector<16x16xf32>
    %255 = vector.extract_strided_slice %209 {offsets = [0, 16], sizes = [16, 8], strides = [1, 1]} : vector<16x32xf32> to vector<16x8xf32>
    %cst_72 = arith.constant dense<0.000000e+00> : vector<16x8xf32>
    %256 = tpu.matmul %254, %255, %cst_72 {dimension_numbers = #tpu.dot_dimension_numbers<[1], [0], [0], [1], [0, 0, 1, 1], [], []>} : vector<16x16xf32>, vector<16x8xf32>, vector<16x8xf32> -> vector<16x8xf32>
    %257 = vector.extract_strided_slice %211 {offsets = [0, 24], sizes = [16, 8], strides = [1, 1]} : vector<16x32xf32> to vector<16x8xf32>
    %258 = vector.extract_strided_slice %208 {offsets = [0, 24], sizes = [16, 8], strides = [1, 1]} : vector<16x32xf32> to vector<16x8xf32>
    %cst_73 = arith.constant dense<0.000000e+00> : vector<16x16xf32>
    %259 = tpu.matmul %257, %258, %cst_73 {dimension_numbers = #tpu.dot_dimension_numbers<[1], [1], [0], [0], [0, 0, 1, 0], [], []>} : vector<16x8xf32>, vector<16x8xf32>, vector<16x16xf32> -> vector<16x16xf32>
    %cst_74 = arith.constant dense<0xFF800000> : vector<16xf32>
    %260 = vector.multi_reduction <maximumf>, %259, %cst_74 [1] : vector<16x16xf32> to vector<16xf32>
    %261 = vector.shape_cast %260 : vector<16xf32> to vector<16x1xf32>
    %262 = vector.broadcast %261 : vector<16x1xf32> to vector<16x16xf32>
    %263 = arith.subf %259, %262 : vector<16x16xf32>
    %264 = math.exp %263 : vector<16x16xf32>
    %cst_75 = arith.constant dense<0.000000e+00> : vector<16xf32>
    %265 = vector.multi_reduction <add>, %264, %cst_75 [1] : vector<16x16xf32> to vector<16xf32>
    %266 = vector.shape_cast %265 : vector<16xf32> to vector<16x1xf32>
    %267 = tpu.reciprocal %266 {approx = true} : vector<16x1xf32> -> vector<16x1xf32>
    %268 = vector.broadcast %267 : vector<16x1xf32> to vector<16x16xf32>
    %269 = arith.mulf %264, %268 : vector<16x16xf32>
    %270 = vector.extract_strided_slice %209 {offsets = [0, 24], sizes = [16, 8], strides = [1, 1]} : vector<16x32xf32> to vector<16x8xf32>
    %cst_76 = arith.constant dense<0.000000e+00> : vector<16x8xf32>
    %271 = tpu.matmul %269, %270, %cst_76 {dimension_numbers = #tpu.dot_dimension_numbers<[1], [0], [0], [1], [0, 0, 1, 1], [], []>} : vector<16x16xf32>, vector<16x8xf32>, vector<16x8xf32> -> vector<16x8xf32>
    %272 = tpu.concatenate %226, %241, %256, %271 in 1 : vector<16x8xf32>, vector<16x8xf32>, vector<16x8xf32>, vector<16x8xf32> -> vector<16x32xf32>
    %c48 = arith.constant 48 : index
    %c0_77 = arith.constant 0 : index
    %273 = vector.load %arg15[%c48, %c0_77] : memref<64x32xf32, #tpu.memory_space<vmem>>, vector<16x32xf32>
    tpu.vector_store %arg15[%c48, %c0_77], %272 {strides = array<i32>} : memref<64x32xf32, #tpu.memory_space<vmem>>, vector<16x32xf32>,
    %c0_78 = arith.constant 0 : index
    %c0_79 = arith.constant 0 : index
    %274 = vector.load %arg15[%c0_78, %c0_79] : memref<64x32xf32, #tpu.memory_space<vmem>>, vector<64x32xf32>
    %c0_80 = arith.constant 0 : index
    %c0_81 = arith.constant 0 : index
    %275 = vector.load %arg4[%c0_80, %c0_81] : memref<32x32xf32, #tpu.memory_space<vmem>>, vector<32x32xf32>
    %cst_82 = arith.constant dense<0.000000e+00> : vector<64x32xf32>
    %276 = tpu.matmul %274, %275, %cst_82 {dimension_numbers = #tpu.dot_dimension_numbers<[1], [0], [0], [1], [0, 0, 1, 1], [], []>} : vector<64x32xf32>, vector<32x32xf32>, vector<64x32xf32> -> vector<64x32xf32>
    %c0_83 = arith.constant 0 : index
    %c0_84 = arith.constant 0 : index
    %277 = vector.load %arg5[%c0_83, %c0_84] : memref<1x32xf32, #tpu.memory_space<vmem>>, vector<1x32xf32>
    %278 = vector.broadcast %277 : vector<1x32xf32> to vector<64x32xf32>
    %279 = arith.addf %276, %278 : vector<64x32xf32>
    %280 = arith.addf %0, %279 : vector<64x32xf32>
    %c0_85 = arith.constant 0 : index
    %c0_86 = arith.constant 0 : index
    %281 = vector.load %arg6[%c0_85, %c0_86] : memref<1x32xf32, #tpu.memory_space<vmem>>, vector<1x32xf32>
    %c0_87 = arith.constant 0 : index
    %c0_88 = arith.constant 0 : index
    %282 = vector.load %arg7[%c0_87, %c0_88] : memref<1x32xf32, #tpu.memory_space<vmem>>, vector<1x32xf32>
    %cst_89 = arith.constant dense<0.000000e+00> : vector<64xf32>
    %283 = vector.multi_reduction <add>, %280, %cst_89 [1] : vector<64x32xf32> to vector<64xf32>
    %284 = vector.shape_cast %283 : vector<64xf32> to vector<64x1xf32>
    %cst_90 = arith.constant 3.200000e+01 : f32
    %285 = vector.broadcast %cst_90 : f32 to vector<64x1xf32>
    %286 = arith.divf %284, %285 : vector<64x1xf32>
    %287 = vector.broadcast %286 : vector<64x1xf32> to vector<64x32xf32>
    %288 = arith.subf %280, %287 : vector<64x32xf32>
    %289 = arith.mulf %288, %288 : vector<64x32xf32>
    %cst_91 = arith.constant dense<0.000000e+00> : vector<64xf32>
    %290 = vector.multi_reduction <add>, %289, %cst_91 [1] : vector<64x32xf32> to vector<64xf32>
    %291 = vector.shape_cast %290 : vector<64xf32> to vector<64x1xf32>
    %cst_92 = arith.constant 3.200000e+01 : f32
    %292 = vector.broadcast %cst_92 : f32 to vector<64x1xf32>
    %293 = arith.divf %291, %292 : vector<64x1xf32>
    %294 = vector.broadcast %286 : vector<64x1xf32> to vector<64x32xf32>
    %295 = arith.subf %280, %294 : vector<64x32xf32>
    %cst_93 = arith.constant 9.99999974E-6 : f32
    %296 = vector.broadcast %cst_93 : f32 to vector<64x1xf32>
    %297 = arith.addf %293, %296 : vector<64x1xf32>
    %298 = math.rsqrt %297 : vector<64x1xf32>
    %299 = vector.broadcast %298 : vector<64x1xf32> to vector<64x32xf32>
    %300 = arith.mulf %295, %299 : vector<64x32xf32>
    %301 = vector.broadcast %281 : vector<1x32xf32> to vector<64x32xf32>
    %302 = arith.mulf %300, %301 : vector<64x32xf32>
    %303 = vector.broadcast %282 : vector<1x32xf32> to vector<64x32xf32>
    %304 = arith.addf %302, %303 : vector<64x32xf32>
    %c0_94 = arith.constant 0 : index
    %c0_95 = arith.constant 0 : index
    %305 = vector.load %arg8[%c0_94, %c0_95] : memref<32x64xf32, #tpu.memory_space<vmem>>, vector<32x64xf32>
    %cst_96 = arith.constant dense<0.000000e+00> : vector<64x64xf32>
    %306 = tpu.matmul %304, %305, %cst_96 {dimension_numbers = #tpu.dot_dimension_numbers<[1], [0], [0], [1], [0, 0, 1, 1], [], []>} : vector<64x32xf32>, vector<32x64xf32>, vector<64x64xf32> -> vector<64x64xf32>
    %c0_97 = arith.constant 0 : index
    %c0_98 = arith.constant 0 : index
    %307 = vector.load %arg9[%c0_97, %c0_98] : memref<1x64xf32, #tpu.memory_space<vmem>>, vector<1x64xf32>
    %308 = vector.broadcast %307 : vector<1x64xf32> to vector<64x64xf32>
    %309 = arith.addf %306, %308 : vector<64x64xf32>
    %cst_99 = arith.constant 0.000000e+00 : f32
    %310 = vector.broadcast %cst_99 : f32 to vector<64x64xf32>
    %311 = arith.maximumf %309, %310 : vector<64x64xf32>
    %c0_100 = arith.constant 0 : index
    %c0_101 = arith.constant 0 : index
    %312 = vector.load %arg10[%c0_100, %c0_101] : memref<64x32xf32, #tpu.memory_space<vmem>>, vector<64x32xf32>
    %cst_102 = arith.constant dense<0.000000e+00> : vector<64x32xf32>
    %313 = tpu.matmul %311, %312, %cst_102 {dimension_numbers = #tpu.dot_dimension_numbers<[1], [0], [0], [1], [0, 0, 1, 1], [], []>} : vector<64x64xf32>, vector<64x32xf32>, vector<64x32xf32> -> vector<64x32xf32>
    %314 = arith.addf %304, %313 : vector<64x32xf32>
    %c0_103 = arith.constant 0 : index
    %c0_104 = arith.constant 0 : index
    %315 = vector.load %arg11[%c0_103, %c0_104] : memref<1x32xf32, #tpu.memory_space<vmem>>, vector<1x32xf32>
    %316 = vector.broadcast %315 : vector<1x32xf32> to vector<64x32xf32>
    %317 = arith.addf %314, %316 : vector<64x32xf32>
    %c0_105 = arith.constant 0 : index
    %c0_106 = arith.constant 0 : index
    %318 = vector.load %arg12[%c0_105, %c0_106] : memref<1x32xf32, #tpu.memory_space<vmem>>, vector<1x32xf32>
    %c0_107 = arith.constant 0 : index
    %c0_108 = arith.constant 0 : index
    %319 = vector.load %arg13[%c0_107, %c0_108] : memref<1x32xf32, #tpu.memory_space<vmem>>, vector<1x32xf32>
    %cst_109 = arith.constant dense<0.000000e+00> : vector<64xf32>
    %320 = vector.multi_reduction <add>, %317, %cst_109 [1] : vector<64x32xf32> to vector<64xf32>
    %321 = vector.shape_cast %320 : vector<64xf32> to vector<64x1xf32>
    %cst_110 = arith.constant 3.200000e+01 : f32
    %322 = vector.broadcast %cst_110 : f32 to vector<64x1xf32>
    %323 = arith.divf %321, %322 : vector<64x1xf32>
    %324 = vector.broadcast %323 : vector<64x1xf32> to vector<64x32xf32>
    %325 = arith.subf %317, %324 : vector<64x32xf32>
    %326 = arith.mulf %325, %325 : vector<64x32xf32>
    %cst_111 = arith.constant dense<0.000000e+00> : vector<64xf32>
    %327 = vector.multi_reduction <add>, %326, %cst_111 [1] : vector<64x32xf32> to vector<64xf32>
    %328 = vector.shape_cast %327 : vector<64xf32> to vector<64x1xf32>
    %cst_112 = arith.constant 3.200000e+01 : f32
    %329 = vector.broadcast %cst_112 : f32 to vector<64x1xf32>
    %330 = arith.divf %328, %329 : vector<64x1xf32>
    %331 = vector.broadcast %323 : vector<64x1xf32> to vector<64x32xf32>
    %332 = arith.subf %317, %331 : vector<64x32xf32>
    %cst_113 = arith.constant 9.99999974E-6 : f32
    %333 = vector.broadcast %cst_113 : f32 to vector<64x1xf32>
    %334 = arith.addf %330, %333 : vector<64x1xf32>
    %335 = math.rsqrt %334 : vector<64x1xf32>
    %336 = vector.broadcast %335 : vector<64x1xf32> to vector<64x32xf32>
    %337 = arith.mulf %332, %336 : vector<64x32xf32>
    %338 = vector.broadcast %318 : vector<1x32xf32> to vector<64x32xf32>
    %339 = arith.mulf %337, %338 : vector<64x32xf32>
    %340 = vector.broadcast %319 : vector<1x32xf32> to vector<64x32xf32>
    %341 = arith.addf %339, %340 : vector<64x32xf32>
    %c0_114 = arith.constant 0 : index
    %c0_115 = arith.constant 0 : index
    %342 = vector.load %arg14[%c0_114, %c0_115] : memref<64x32xf32, #tpu.memory_space<vmem>>, vector<64x32xf32>
    tpu.vector_store %arg14[%c0_114, %c0_115], %341 {strides = array<i32>} : memref<64x32xf32, #tpu.memory_space<vmem>>, vector<64x32xf32>,
    return
  }
  func.func @transform_0(%arg0: i32) -> (i32, i32) {
    %c0_i32 = arith.constant 0 : i32
    %c0_i32_0 = arith.constant 0 : i32
    return %arg0, %c0_i32 : i32, i32
  }
  func.func @transform_1(%arg0: i32) -> (i32, i32) {
    %c0_i32 = arith.constant 0 : i32
    %c0_i32_0 = arith.constant 0 : i32
    %c0_i32_1 = arith.constant 0 : i32
    return %c0_i32, %c0_i32_0 : i32, i32
  }
  func.func @transform_2(%arg0: i32) -> (i32, i32) {
    %c0_i32 = arith.constant 0 : i32
    %c0_i32_0 = arith.constant 0 : i32
    %c0_i32_1 = arith.constant 0 : i32
    return %c0_i32, %c0_i32_0 : i32, i32
  }
  func.func @transform_3(%arg0: i32) -> (i32, i32) {
    %c0_i32 = arith.constant 0 : i32
    %c0_i32_0 = arith.constant 0 : i32
    %c0_i32_1 = arith.constant 0 : i32
    return %c0_i32, %c0_i32_0 : i32, i32
  }
  func.func @transform_4(%arg0: i32) -> (i32, i32) {
    %c0_i32 = arith.constant 0 : i32
    %c0_i32_0 = arith.constant 0 : i32
    %c0_i32_1 = arith.constant 0 : i32
    return %c0_i32, %c0_i32_0 : i32, i32
  }
  func.func @transform_5(%arg0: i32) -> (i32, i32) {
    %c0_i32 = arith.constant 0 : i32
    %c0_i32_0 = arith.constant 0 : i32
    %c0_i32_1 = arith.constant 0 : i32
    return %c0_i32, %c0_i32_0 : i32, i32
  }
  func.func @transform_6(%arg0: i32) -> (i32, i32) {
    %c0_i32 = arith.constant 0 : i32
    %c0_i32_0 = arith.constant 0 : i32
    %c0_i32_1 = arith.constant 0 : i32
    return %c0_i32, %c0_i32_0 : i32, i32
  }
  func.func @transform_7(%arg0: i32) -> (i32, i32) {
    %c0_i32 = arith.constant 0 : i32
    %c0_i32_0 = arith.constant 0 : i32
    %c0_i32_1 = arith.constant 0 : i32
    return %c0_i32, %c0_i32_0 : i32, i32
  }
  func.func @transform_8(%arg0: i32) -> (i32, i32) {
    %c0_i32 = arith.constant 0 : i32
    %c0_i32_0 = arith.constant 0 : i32
    %c0_i32_1 = arith.constant 0 : i32
    return %c0_i32, %c0_i32_0 : i32, i32
  }
  func.func @transform_9(%arg0: i32) -> (i32, i32) {
    %c0_i32 = arith.constant 0 : i32
    %c0_i32_0 = arith.constant 0 : i32
    %c0_i32_1 = arith.constant 0 : i32
    return %c0_i32, %c0_i32_0 : i32, i32
  }
  func.func @transform_10(%arg0: i32) -> (i32, i32) {
    %c0_i32 = arith.constant 0 : i32
    %c0_i32_0 = arith.constant 0 : i32
    %c0_i32_1 = arith.constant 0 : i32
    return %c0_i32, %c0_i32_0 : i32, i32
  }
  func.func @transform_11(%arg0: i32) -> (i32, i32) {
    %c0_i32 = arith.constant 0 : i32
    %c0_i32_0 = arith.constant 0 : i32
    %c0_i32_1 = arith.constant 0 : i32
    return %c0_i32, %c0_i32_0 : i32, i32
  }
  func.func @transform_12(%arg0: i32) -> (i32, i32) {
    %c0_i32 = arith.constant 0 : i32
    %c0_i32_0 = arith.constant 0 : i32
    %c0_i32_1 = arith.constant 0 : i32
    return %c0_i32, %c0_i32_0 : i32, i32
  }
  func.func @transform_13(%arg0: i32) -> (i32, i32) {
    %c0_i32 = arith.constant 0 : i32
    %c0_i32_0 = arith.constant 0 : i32
    return %arg0, %c0_i32 : i32, i32
  }
}

module attributes {stable_mosaic.version = 11 : i64} {
  func.func @_decoder_layer_kernel(%arg0: i32, %arg1: memref<64x32xf32, #tpu.memory_space<vmem>>, %arg2: memref<64x64xf32, #tpu.memory_space<vmem>>, %arg3: memref<32x96xf32, #tpu.memory_space<vmem>>, %arg4: memref<1x96xf32, #tpu.memory_space<vmem>>, %arg5: memref<32x32xf32, #tpu.memory_space<vmem>>, %arg6: memref<1x32xf32, #tpu.memory_space<vmem>>, %arg7: memref<1x32xf32, #tpu.memory_space<vmem>>, %arg8: memref<1x32xf32, #tpu.memory_space<vmem>>, %arg9: memref<32x32xf32, #tpu.memory_space<vmem>>, %arg10: memref<1x32xf32, #tpu.memory_space<vmem>>, %arg11: memref<32x32xf32, #tpu.memory_space<vmem>>, %arg12: memref<1x32xf32, #tpu.memory_space<vmem>>, %arg13: memref<1x32xf32, #tpu.memory_space<vmem>>, %arg14: memref<1x32xf32, #tpu.memory_space<vmem>>, %arg15: memref<32x64xf32, #tpu.memory_space<vmem>>, %arg16: memref<1x64xf32, #tpu.memory_space<vmem>>, %arg17: memref<64x32xf32, #tpu.memory_space<vmem>>, %arg18: memref<1x32xf32, #tpu.memory_space<vmem>>, %arg19: memref<1x32xf32, #tpu.memory_space<vmem>>, %arg20: memref<1x32xf32, #tpu.memory_space<vmem>>, %arg21: memref<64x32xf32, #tpu.memory_space<vmem>>, %arg22: memref<64x32xf32, #tpu.memory_space<vmem>>) attributes {dimension_semantics = [#tpu.dimension_semantics<parallel>], iteration_bounds = array<i64: 2>, scalar_prefetch = 0 : i64, scratch_operands = 1 : i64, tpu.core_type = #tpu.core_type<tc>, window_params = [{transform_indices = @transform_0, window_bounds = array<i64: 64, 32>}, {transform_indices = @transform_1, window_bounds = array<i64: 64, 64>}, {pipeline_mode = #tpu.pipeline_mode<synchronous>, transform_indices = @transform_2, window_bounds = array<i64: 32, 96>}, {pipeline_mode = #tpu.pipeline_mode<synchronous>, transform_indices = @transform_3, window_bounds = array<i64: 1, 96>}, {pipeline_mode = #tpu.pipeline_mode<synchronous>, transform_indices = @transform_4, window_bounds = array<i64: 32, 32>}, {pipeline_mode = #tpu.pipeline_mode<synchronous>, transform_indices = @transform_5, window_bounds = array<i64: 1, 32>}, {pipeline_mode = #tpu.pipeline_mode<synchronous>, transform_indices = @transform_6, window_bounds = array<i64: 1, 32>}, {pipeline_mode = #tpu.pipeline_mode<synchronous>, transform_indices = @transform_7, window_bounds = array<i64: 1, 32>}, {pipeline_mode = #tpu.pipeline_mode<synchronous>, transform_indices = @transform_8, window_bounds = array<i64: 32, 32>}, {pipeline_mode = #tpu.pipeline_mode<synchronous>, transform_indices = @transform_9, window_bounds = array<i64: 1, 32>}, {pipeline_mode = #tpu.pipeline_mode<synchronous>, transform_indices = @transform_10, window_bounds = array<i64: 32, 32>}, {pipeline_mode = #tpu.pipeline_mode<synchronous>, transform_indices = @transform_11, window_bounds = array<i64: 1, 32>}, {pipeline_mode = #tpu.pipeline_mode<synchronous>, transform_indices = @transform_12, window_bounds = array<i64: 1, 32>}, {pipeline_mode = #tpu.pipeline_mode<synchronous>, transform_indices = @transform_13, window_bounds = array<i64: 1, 32>}, {pipeline_mode = #tpu.pipeline_mode<synchronous>, transform_indices = @transform_14, window_bounds = array<i64: 32, 64>}, {pipeline_mode = #tpu.pipeline_mode<synchronous>, transform_indices = @transform_15, window_bounds = array<i64: 1, 64>}, {pipeline_mode = #tpu.pipeline_mode<synchronous>, transform_indices = @transform_16, window_bounds = array<i64: 64, 32>}, {pipeline_mode = #tpu.pipeline_mode<synchronous>, transform_indices = @transform_17, window_bounds = array<i64: 1, 32>}, {pipeline_mode = #tpu.pipeline_mode<synchronous>, transform_indices = @transform_18, window_bounds = array<i64: 1, 32>}, {pipeline_mode = #tpu.pipeline_mode<synchronous>, transform_indices = @transform_19, window_bounds = array<i64: 1, 32>}, {transform_indices = @transform_20, window_bounds = array<i64: 64, 32>}]} {
    %c0 = arith.constant 0 : index
    %c0_0 = arith.constant 0 : index
    %0 = vector.load %arg1[%c0, %c0_0] : memref<64x32xf32, #tpu.memory_space<vmem>>, vector<64x32xf32>
    %c0_1 = arith.constant 0 : index
    %c0_2 = arith.constant 0 : index
    %1 = vector.load %arg2[%c0_1, %c0_2] : memref<64x64xf32, #tpu.memory_space<vmem>>, vector<64x64xf32>
    %c0_3 = arith.constant 0 : index
    %c0_4 = arith.constant 0 : index
    %2 = vector.load %arg3[%c0_3, %c0_4] : memref<32x96xf32, #tpu.memory_space<vmem>>, vector<32x96xf32>
    %cst = arith.constant dense<0.000000e+00> : vector<64x96xf32>
    %3 = tpu.matmul %0, %2, %cst {dimension_numbers = #tpu.dot_dimension_numbers<[1], [0], [0], [1], [0, 0, 1, 1], [], []>} : vector<64x32xf32>, vector<32x96xf32>, vector<64x96xf32> -> vector<64x96xf32>
    %c0_5 = arith.constant 0 : index
    %c0_6 = arith.constant 0 : index
    %4 = vector.load %arg4[%c0_5, %c0_6] : memref<1x96xf32, #tpu.memory_space<vmem>>, vector<1x96xf32>
    %5 = vector.broadcast %4 : vector<1x96xf32> to vector<64x96xf32>
    %6 = arith.addf %3, %5 : vector<64x96xf32>
    %7 = vector.extract_strided_slice %6 {offsets = [0, 0], sizes = [16, 32], strides = [1, 1]} : vector<64x96xf32> to vector<16x32xf32>
    %8 = vector.extract_strided_slice %6 {offsets = [0, 32], sizes = [16, 32], strides = [1, 1]} : vector<64x96xf32> to vector<16x32xf32>
    %9 = vector.extract_strided_slice %6 {offsets = [0, 64], sizes = [16, 32], strides = [1, 1]} : vector<64x96xf32> to vector<16x32xf32>
    %cst_7 = arith.constant 0.353553385 : f32
    %10 = vector.broadcast %cst_7 : f32 to vector<16x32xf32>
    %11 = arith.mulf %7, %10 : vector<16x32xf32>
    %12 = vector.extract_strided_slice %11 {offsets = [0, 0], sizes = [16, 8], strides = [1, 1]} : vector<16x32xf32> to vector<16x8xf32>
    %13 = vector.extract_strided_slice %8 {offsets = [0, 0], sizes = [16, 8], strides = [1, 1]} : vector<16x32xf32> to vector<16x8xf32>
    %cst_8 = arith.constant dense<0.000000e+00> : vector<16x16xf32>
    %14 = tpu.matmul %12, %13, %cst_8 {dimension_numbers = #tpu.dot_dimension_numbers<[1], [1], [0], [0], [0, 0, 1, 0], [], []>} : vector<16x8xf32>, vector<16x8xf32>, vector<16x16xf32> -> vector<16x16xf32>
    %cst_9 = arith.constant dense<0xFF800000> : vector<16xf32>
    %15 = vector.multi_reduction <maximumf>, %14, %cst_9 [1] : vector<16x16xf32> to vector<16xf32>
    %16 = vector.shape_cast %15 : vector<16xf32> to vector<16x1xf32>
    %17 = vector.broadcast %16 : vector<16x1xf32> to vector<16x16xf32>
    %18 = arith.subf %14, %17 : vector<16x16xf32>
    %19 = math.exp %18 : vector<16x16xf32>
    %cst_10 = arith.constant dense<0.000000e+00> : vector<16xf32>
    %20 = vector.multi_reduction <add>, %19, %cst_10 [1] : vector<16x16xf32> to vector<16xf32>
    %21 = vector.shape_cast %20 : vector<16xf32> to vector<16x1xf32>
    %22 = tpu.reciprocal %21 {approx = true} : vector<16x1xf32> -> vector<16x1xf32>
    %23 = vector.broadcast %22 : vector<16x1xf32> to vector<16x16xf32>
    %24 = arith.mulf %19, %23 : vector<16x16xf32>
    %25 = vector.extract_strided_slice %9 {offsets = [0, 0], sizes = [16, 8], strides = [1, 1]} : vector<16x32xf32> to vector<16x8xf32>
    %cst_11 = arith.constant dense<0.000000e+00> : vector<16x8xf32>
    %26 = tpu.matmul %24, %25, %cst_11 {dimension_numbers = #tpu.dot_dimension_numbers<[1], [0], [0], [1], [0, 0, 1, 1], [], []>} : vector<16x16xf32>, vector<16x8xf32>, vector<16x8xf32> -> vector<16x8xf32>
    %27 = vector.extract_strided_slice %11 {offsets = [0, 8], sizes = [16, 8], strides = [1, 1]} : vector<16x32xf32> to vector<16x8xf32>
    %28 = vector.extract_strided_slice %8 {offsets = [0, 8], sizes = [16, 8], strides = [1, 1]} : vector<16x32xf32> to vector<16x8xf32>
    %cst_12 = arith.constant dense<0.000000e+00> : vector<16x16xf32>
    %29 = tpu.matmul %27, %28, %cst_12 {dimension_numbers = #tpu.dot_dimension_numbers<[1], [1], [0], [0], [0, 0, 1, 0], [], []>} : vector<16x8xf32>, vector<16x8xf32>, vector<16x16xf32> -> vector<16x16xf32>
    %cst_13 = arith.constant dense<0xFF800000> : vector<16xf32>
    %30 = vector.multi_reduction <maximumf>, %29, %cst_13 [1] : vector<16x16xf32> to vector<16xf32>
    %31 = vector.shape_cast %30 : vector<16xf32> to vector<16x1xf32>
    %32 = vector.broadcast %31 : vector<16x1xf32> to vector<16x16xf32>
    %33 = arith.subf %29, %32 : vector<16x16xf32>
    %34 = math.exp %33 : vector<16x16xf32>
    %cst_14 = arith.constant dense<0.000000e+00> : vector<16xf32>
    %35 = vector.multi_reduction <add>, %34, %cst_14 [1] : vector<16x16xf32> to vector<16xf32>
    %36 = vector.shape_cast %35 : vector<16xf32> to vector<16x1xf32>
    %37 = tpu.reciprocal %36 {approx = true} : vector<16x1xf32> -> vector<16x1xf32>
    %38 = vector.broadcast %37 : vector<16x1xf32> to vector<16x16xf32>
    %39 = arith.mulf %34, %38 : vector<16x16xf32>
    %40 = vector.extract_strided_slice %9 {offsets = [0, 8], sizes = [16, 8], strides = [1, 1]} : vector<16x32xf32> to vector<16x8xf32>
    %cst_15 = arith.constant dense<0.000000e+00> : vector<16x8xf32>
    %41 = tpu.matmul %39, %40, %cst_15 {dimension_numbers = #tpu.dot_dimension_numbers<[1], [0], [0], [1], [0, 0, 1, 1], [], []>} : vector<16x16xf32>, vector<16x8xf32>, vector<16x8xf32> -> vector<16x8xf32>
    %42 = vector.extract_strided_slice %11 {offsets = [0, 16], sizes = [16, 8], strides = [1, 1]} : vector<16x32xf32> to vector<16x8xf32>
    %43 = vector.extract_strided_slice %8 {offsets = [0, 16], sizes = [16, 8], strides = [1, 1]} : vector<16x32xf32> to vector<16x8xf32>
    %cst_16 = arith.constant dense<0.000000e+00> : vector<16x16xf32>
    %44 = tpu.matmul %42, %43, %cst_16 {dimension_numbers = #tpu.dot_dimension_numbers<[1], [1], [0], [0], [0, 0, 1, 0], [], []>} : vector<16x8xf32>, vector<16x8xf32>, vector<16x16xf32> -> vector<16x16xf32>
    %cst_17 = arith.constant dense<0xFF800000> : vector<16xf32>
    %45 = vector.multi_reduction <maximumf>, %44, %cst_17 [1] : vector<16x16xf32> to vector<16xf32>
    %46 = vector.shape_cast %45 : vector<16xf32> to vector<16x1xf32>
    %47 = vector.broadcast %46 : vector<16x1xf32> to vector<16x16xf32>
    %48 = arith.subf %44, %47 : vector<16x16xf32>
    %49 = math.exp %48 : vector<16x16xf32>
    %cst_18 = arith.constant dense<0.000000e+00> : vector<16xf32>
    %50 = vector.multi_reduction <add>, %49, %cst_18 [1] : vector<16x16xf32> to vector<16xf32>
    %51 = vector.shape_cast %50 : vector<16xf32> to vector<16x1xf32>
    %52 = tpu.reciprocal %51 {approx = true} : vector<16x1xf32> -> vector<16x1xf32>
    %53 = vector.broadcast %52 : vector<16x1xf32> to vector<16x16xf32>
    %54 = arith.mulf %49, %53 : vector<16x16xf32>
    %55 = vector.extract_strided_slice %9 {offsets = [0, 16], sizes = [16, 8], strides = [1, 1]} : vector<16x32xf32> to vector<16x8xf32>
    %cst_19 = arith.constant dense<0.000000e+00> : vector<16x8xf32>
    %56 = tpu.matmul %54, %55, %cst_19 {dimension_numbers = #tpu.dot_dimension_numbers<[1], [0], [0], [1], [0, 0, 1, 1], [], []>} : vector<16x16xf32>, vector<16x8xf32>, vector<16x8xf32> -> vector<16x8xf32>
    %57 = vector.extract_strided_slice %11 {offsets = [0, 24], sizes = [16, 8], strides = [1, 1]} : vector<16x32xf32> to vector<16x8xf32>
    %58 = vector.extract_strided_slice %8 {offsets = [0, 24], sizes = [16, 8], strides = [1, 1]} : vector<16x32xf32> to vector<16x8xf32>
    %cst_20 = arith.constant dense<0.000000e+00> : vector<16x16xf32>
    %59 = tpu.matmul %57, %58, %cst_20 {dimension_numbers = #tpu.dot_dimension_numbers<[1], [1], [0], [0], [0, 0, 1, 0], [], []>} : vector<16x8xf32>, vector<16x8xf32>, vector<16x16xf32> -> vector<16x16xf32>
    %cst_21 = arith.constant dense<0xFF800000> : vector<16xf32>
    %60 = vector.multi_reduction <maximumf>, %59, %cst_21 [1] : vector<16x16xf32> to vector<16xf32>
    %61 = vector.shape_cast %60 : vector<16xf32> to vector<16x1xf32>
    %62 = vector.broadcast %61 : vector<16x1xf32> to vector<16x16xf32>
    %63 = arith.subf %59, %62 : vector<16x16xf32>
    %64 = math.exp %63 : vector<16x16xf32>
    %cst_22 = arith.constant dense<0.000000e+00> : vector<16xf32>
    %65 = vector.multi_reduction <add>, %64, %cst_22 [1] : vector<16x16xf32> to vector<16xf32>
    %66 = vector.shape_cast %65 : vector<16xf32> to vector<16x1xf32>
    %67 = tpu.reciprocal %66 {approx = true} : vector<16x1xf32> -> vector<16x1xf32>
    %68 = vector.broadcast %67 : vector<16x1xf32> to vector<16x16xf32>
    %69 = arith.mulf %64, %68 : vector<16x16xf32>
    %70 = vector.extract_strided_slice %9 {offsets = [0, 24], sizes = [16, 8], strides = [1, 1]} : vector<16x32xf32> to vector<16x8xf32>
    %cst_23 = arith.constant dense<0.000000e+00> : vector<16x8xf32>
    %71 = tpu.matmul %69, %70, %cst_23 {dimension_numbers = #tpu.dot_dimension_numbers<[1], [0], [0], [1], [0, 0, 1, 1], [], []>} : vector<16x16xf32>, vector<16x8xf32>, vector<16x8xf32> -> vector<16x8xf32>
    %72 = tpu.concatenate %26, %41, %56, %71 in 1 : vector<16x8xf32>, vector<16x8xf32>, vector<16x8xf32>, vector<16x8xf32> -> vector<16x32xf32>
    %c0_24 = arith.constant 0 : index
    %c0_25 = arith.constant 0 : index
    %73 = vector.load %arg22[%c0_24, %c0_25] : memref<64x32xf32, #tpu.memory_space<vmem>>, vector<16x32xf32>
    tpu.vector_store %arg22[%c0_24, %c0_25], %72 {strides = array<i32>} : memref<64x32xf32, #tpu.memory_space<vmem>>, vector<16x32xf32>,
    %74 = vector.extract_strided_slice %6 {offsets = [16, 0], sizes = [16, 32], strides = [1, 1]} : vector<64x96xf32> to vector<16x32xf32>
    %75 = vector.extract_strided_slice %6 {offsets = [16, 32], sizes = [16, 32], strides = [1, 1]} : vector<64x96xf32> to vector<16x32xf32>
    %76 = vector.extract_strided_slice %6 {offsets = [16, 64], sizes = [16, 32], strides = [1, 1]} : vector<64x96xf32> to vector<16x32xf32>
    %cst_26 = arith.constant 0.353553385 : f32
    %77 = vector.broadcast %cst_26 : f32 to vector<16x32xf32>
    %78 = arith.mulf %74, %77 : vector<16x32xf32>
    %79 = vector.extract_strided_slice %78 {offsets = [0, 0], sizes = [16, 8], strides = [1, 1]} : vector<16x32xf32> to vector<16x8xf32>
    %80 = vector.extract_strided_slice %75 {offsets = [0, 0], sizes = [16, 8], strides = [1, 1]} : vector<16x32xf32> to vector<16x8xf32>
    %cst_27 = arith.constant dense<0.000000e+00> : vector<16x16xf32>
    %81 = tpu.matmul %79, %80, %cst_27 {dimension_numbers = #tpu.dot_dimension_numbers<[1], [1], [0], [0], [0, 0, 1, 0], [], []>} : vector<16x8xf32>, vector<16x8xf32>, vector<16x16xf32> -> vector<16x16xf32>
    %cst_28 = arith.constant dense<0xFF800000> : vector<16xf32>
    %82 = vector.multi_reduction <maximumf>, %81, %cst_28 [1] : vector<16x16xf32> to vector<16xf32>
    %83 = vector.shape_cast %82 : vector<16xf32> to vector<16x1xf32>
    %84 = vector.broadcast %83 : vector<16x1xf32> to vector<16x16xf32>
    %85 = arith.subf %81, %84 : vector<16x16xf32>
    %86 = math.exp %85 : vector<16x16xf32>
    %cst_29 = arith.constant dense<0.000000e+00> : vector<16xf32>
    %87 = vector.multi_reduction <add>, %86, %cst_29 [1] : vector<16x16xf32> to vector<16xf32>
    %88 = vector.shape_cast %87 : vector<16xf32> to vector<16x1xf32>
    %89 = tpu.reciprocal %88 {approx = true} : vector<16x1xf32> -> vector<16x1xf32>
    %90 = vector.broadcast %89 : vector<16x1xf32> to vector<16x16xf32>
    %91 = arith.mulf %86, %90 : vector<16x16xf32>
    %92 = vector.extract_strided_slice %76 {offsets = [0, 0], sizes = [16, 8], strides = [1, 1]} : vector<16x32xf32> to vector<16x8xf32>
    %cst_30 = arith.constant dense<0.000000e+00> : vector<16x8xf32>
    %93 = tpu.matmul %91, %92, %cst_30 {dimension_numbers = #tpu.dot_dimension_numbers<[1], [0], [0], [1], [0, 0, 1, 1], [], []>} : vector<16x16xf32>, vector<16x8xf32>, vector<16x8xf32> -> vector<16x8xf32>
    %94 = vector.extract_strided_slice %78 {offsets = [0, 8], sizes = [16, 8], strides = [1, 1]} : vector<16x32xf32> to vector<16x8xf32>
    %95 = vector.extract_strided_slice %75 {offsets = [0, 8], sizes = [16, 8], strides = [1, 1]} : vector<16x32xf32> to vector<16x8xf32>
    %cst_31 = arith.constant dense<0.000000e+00> : vector<16x16xf32>
    %96 = tpu.matmul %94, %95, %cst_31 {dimension_numbers = #tpu.dot_dimension_numbers<[1], [1], [0], [0], [0, 0, 1, 0], [], []>} : vector<16x8xf32>, vector<16x8xf32>, vector<16x16xf32> -> vector<16x16xf32>
    %cst_32 = arith.constant dense<0xFF800000> : vector<16xf32>
    %97 = vector.multi_reduction <maximumf>, %96, %cst_32 [1] : vector<16x16xf32> to vector<16xf32>
    %98 = vector.shape_cast %97 : vector<16xf32> to vector<16x1xf32>
    %99 = vector.broadcast %98 : vector<16x1xf32> to vector<16x16xf32>
    %100 = arith.subf %96, %99 : vector<16x16xf32>
    %101 = math.exp %100 : vector<16x16xf32>
    %cst_33 = arith.constant dense<0.000000e+00> : vector<16xf32>
    %102 = vector.multi_reduction <add>, %101, %cst_33 [1] : vector<16x16xf32> to vector<16xf32>
    %103 = vector.shape_cast %102 : vector<16xf32> to vector<16x1xf32>
    %104 = tpu.reciprocal %103 {approx = true} : vector<16x1xf32> -> vector<16x1xf32>
    %105 = vector.broadcast %104 : vector<16x1xf32> to vector<16x16xf32>
    %106 = arith.mulf %101, %105 : vector<16x16xf32>
    %107 = vector.extract_strided_slice %76 {offsets = [0, 8], sizes = [16, 8], strides = [1, 1]} : vector<16x32xf32> to vector<16x8xf32>
    %cst_34 = arith.constant dense<0.000000e+00> : vector<16x8xf32>
    %108 = tpu.matmul %106, %107, %cst_34 {dimension_numbers = #tpu.dot_dimension_numbers<[1], [0], [0], [1], [0, 0, 1, 1], [], []>} : vector<16x16xf32>, vector<16x8xf32>, vector<16x8xf32> -> vector<16x8xf32>
    %109 = vector.extract_strided_slice %78 {offsets = [0, 16], sizes = [16, 8], strides = [1, 1]} : vector<16x32xf32> to vector<16x8xf32>
    %110 = vector.extract_strided_slice %75 {offsets = [0, 16], sizes = [16, 8], strides = [1, 1]} : vector<16x32xf32> to vector<16x8xf32>
    %cst_35 = arith.constant dense<0.000000e+00> : vector<16x16xf32>
    %111 = tpu.matmul %109, %110, %cst_35 {dimension_numbers = #tpu.dot_dimension_numbers<[1], [1], [0], [0], [0, 0, 1, 0], [], []>} : vector<16x8xf32>, vector<16x8xf32>, vector<16x16xf32> -> vector<16x16xf32>
    %cst_36 = arith.constant dense<0xFF800000> : vector<16xf32>
    %112 = vector.multi_reduction <maximumf>, %111, %cst_36 [1] : vector<16x16xf32> to vector<16xf32>
    %113 = vector.shape_cast %112 : vector<16xf32> to vector<16x1xf32>
    %114 = vector.broadcast %113 : vector<16x1xf32> to vector<16x16xf32>
    %115 = arith.subf %111, %114 : vector<16x16xf32>
    %116 = math.exp %115 : vector<16x16xf32>
    %cst_37 = arith.constant dense<0.000000e+00> : vector<16xf32>
    %117 = vector.multi_reduction <add>, %116, %cst_37 [1] : vector<16x16xf32> to vector<16xf32>
    %118 = vector.shape_cast %117 : vector<16xf32> to vector<16x1xf32>
    %119 = tpu.reciprocal %118 {approx = true} : vector<16x1xf32> -> vector<16x1xf32>
    %120 = vector.broadcast %119 : vector<16x1xf32> to vector<16x16xf32>
    %121 = arith.mulf %116, %120 : vector<16x16xf32>
    %122 = vector.extract_strided_slice %76 {offsets = [0, 16], sizes = [16, 8], strides = [1, 1]} : vector<16x32xf32> to vector<16x8xf32>
    %cst_38 = arith.constant dense<0.000000e+00> : vector<16x8xf32>
    %123 = tpu.matmul %121, %122, %cst_38 {dimension_numbers = #tpu.dot_dimension_numbers<[1], [0], [0], [1], [0, 0, 1, 1], [], []>} : vector<16x16xf32>, vector<16x8xf32>, vector<16x8xf32> -> vector<16x8xf32>
    %124 = vector.extract_strided_slice %78 {offsets = [0, 24], sizes = [16, 8], strides = [1, 1]} : vector<16x32xf32> to vector<16x8xf32>
    %125 = vector.extract_strided_slice %75 {offsets = [0, 24], sizes = [16, 8], strides = [1, 1]} : vector<16x32xf32> to vector<16x8xf32>
    %cst_39 = arith.constant dense<0.000000e+00> : vector<16x16xf32>
    %126 = tpu.matmul %124, %125, %cst_39 {dimension_numbers = #tpu.dot_dimension_numbers<[1], [1], [0], [0], [0, 0, 1, 0], [], []>} : vector<16x8xf32>, vector<16x8xf32>, vector<16x16xf32> -> vector<16x16xf32>
    %cst_40 = arith.constant dense<0xFF800000> : vector<16xf32>
    %127 = vector.multi_reduction <maximumf>, %126, %cst_40 [1] : vector<16x16xf32> to vector<16xf32>
    %128 = vector.shape_cast %127 : vector<16xf32> to vector<16x1xf32>
    %129 = vector.broadcast %128 : vector<16x1xf32> to vector<16x16xf32>
    %130 = arith.subf %126, %129 : vector<16x16xf32>
    %131 = math.exp %130 : vector<16x16xf32>
    %cst_41 = arith.constant dense<0.000000e+00> : vector<16xf32>
    %132 = vector.multi_reduction <add>, %131, %cst_41 [1] : vector<16x16xf32> to vector<16xf32>
    %133 = vector.shape_cast %132 : vector<16xf32> to vector<16x1xf32>
    %134 = tpu.reciprocal %133 {approx = true} : vector<16x1xf32> -> vector<16x1xf32>
    %135 = vector.broadcast %134 : vector<16x1xf32> to vector<16x16xf32>
    %136 = arith.mulf %131, %135 : vector<16x16xf32>
    %137 = vector.extract_strided_slice %76 {offsets = [0, 24], sizes = [16, 8], strides = [1, 1]} : vector<16x32xf32> to vector<16x8xf32>
    %cst_42 = arith.constant dense<0.000000e+00> : vector<16x8xf32>
    %138 = tpu.matmul %136, %137, %cst_42 {dimension_numbers = #tpu.dot_dimension_numbers<[1], [0], [0], [1], [0, 0, 1, 1], [], []>} : vector<16x16xf32>, vector<16x8xf32>, vector<16x8xf32> -> vector<16x8xf32>
    %139 = tpu.concatenate %93, %108, %123, %138 in 1 : vector<16x8xf32>, vector<16x8xf32>, vector<16x8xf32>, vector<16x8xf32> -> vector<16x32xf32>
    %c16 = arith.constant 16 : index
    %c0_43 = arith.constant 0 : index
    %140 = vector.load %arg22[%c16, %c0_43] : memref<64x32xf32, #tpu.memory_space<vmem>>, vector<16x32xf32>
    tpu.vector_store %arg22[%c16, %c0_43], %139 {strides = array<i32>} : memref<64x32xf32, #tpu.memory_space<vmem>>, vector<16x32xf32>,
    %141 = vector.extract_strided_slice %6 {offsets = [32, 0], sizes = [16, 32], strides = [1, 1]} : vector<64x96xf32> to vector<16x32xf32>
    %142 = vector.extract_strided_slice %6 {offsets = [32, 32], sizes = [16, 32], strides = [1, 1]} : vector<64x96xf32> to vector<16x32xf32>
    %143 = vector.extract_strided_slice %6 {offsets = [32, 64], sizes = [16, 32], strides = [1, 1]} : vector<64x96xf32> to vector<16x32xf32>
    %cst_44 = arith.constant 0.353553385 : f32
    %144 = vector.broadcast %cst_44 : f32 to vector<16x32xf32>
    %145 = arith.mulf %141, %144 : vector<16x32xf32>
    %146 = vector.extract_strided_slice %145 {offsets = [0, 0], sizes = [16, 8], strides = [1, 1]} : vector<16x32xf32> to vector<16x8xf32>
    %147 = vector.extract_strided_slice %142 {offsets = [0, 0], sizes = [16, 8], strides = [1, 1]} : vector<16x32xf32> to vector<16x8xf32>
    %cst_45 = arith.constant dense<0.000000e+00> : vector<16x16xf32>
    %148 = tpu.matmul %146, %147, %cst_45 {dimension_numbers = #tpu.dot_dimension_numbers<[1], [1], [0], [0], [0, 0, 1, 0], [], []>} : vector<16x8xf32>, vector<16x8xf32>, vector<16x16xf32> -> vector<16x16xf32>
    %cst_46 = arith.constant dense<0xFF800000> : vector<16xf32>
    %149 = vector.multi_reduction <maximumf>, %148, %cst_46 [1] : vector<16x16xf32> to vector<16xf32>
    %150 = vector.shape_cast %149 : vector<16xf32> to vector<16x1xf32>
    %151 = vector.broadcast %150 : vector<16x1xf32> to vector<16x16xf32>
    %152 = arith.subf %148, %151 : vector<16x16xf32>
    %153 = math.exp %152 : vector<16x16xf32>
    %cst_47 = arith.constant dense<0.000000e+00> : vector<16xf32>
    %154 = vector.multi_reduction <add>, %153, %cst_47 [1] : vector<16x16xf32> to vector<16xf32>
    %155 = vector.shape_cast %154 : vector<16xf32> to vector<16x1xf32>
    %156 = tpu.reciprocal %155 {approx = true} : vector<16x1xf32> -> vector<16x1xf32>
    %157 = vector.broadcast %156 : vector<16x1xf32> to vector<16x16xf32>
    %158 = arith.mulf %153, %157 : vector<16x16xf32>
    %159 = vector.extract_strided_slice %143 {offsets = [0, 0], sizes = [16, 8], strides = [1, 1]} : vector<16x32xf32> to vector<16x8xf32>
    %cst_48 = arith.constant dense<0.000000e+00> : vector<16x8xf32>
    %160 = tpu.matmul %158, %159, %cst_48 {dimension_numbers = #tpu.dot_dimension_numbers<[1], [0], [0], [1], [0, 0, 1, 1], [], []>} : vector<16x16xf32>, vector<16x8xf32>, vector<16x8xf32> -> vector<16x8xf32>
    %161 = vector.extract_strided_slice %145 {offsets = [0, 8], sizes = [16, 8], strides = [1, 1]} : vector<16x32xf32> to vector<16x8xf32>
    %162 = vector.extract_strided_slice %142 {offsets = [0, 8], sizes = [16, 8], strides = [1, 1]} : vector<16x32xf32> to vector<16x8xf32>
    %cst_49 = arith.constant dense<0.000000e+00> : vector<16x16xf32>
    %163 = tpu.matmul %161, %162, %cst_49 {dimension_numbers = #tpu.dot_dimension_numbers<[1], [1], [0], [0], [0, 0, 1, 0], [], []>} : vector<16x8xf32>, vector<16x8xf32>, vector<16x16xf32> -> vector<16x16xf32>
    %cst_50 = arith.constant dense<0xFF800000> : vector<16xf32>
    %164 = vector.multi_reduction <maximumf>, %163, %cst_50 [1] : vector<16x16xf32> to vector<16xf32>
    %165 = vector.shape_cast %164 : vector<16xf32> to vector<16x1xf32>
    %166 = vector.broadcast %165 : vector<16x1xf32> to vector<16x16xf32>
    %167 = arith.subf %163, %166 : vector<16x16xf32>
    %168 = math.exp %167 : vector<16x16xf32>
    %cst_51 = arith.constant dense<0.000000e+00> : vector<16xf32>
    %169 = vector.multi_reduction <add>, %168, %cst_51 [1] : vector<16x16xf32> to vector<16xf32>
    %170 = vector.shape_cast %169 : vector<16xf32> to vector<16x1xf32>
    %171 = tpu.reciprocal %170 {approx = true} : vector<16x1xf32> -> vector<16x1xf32>
    %172 = vector.broadcast %171 : vector<16x1xf32> to vector<16x16xf32>
    %173 = arith.mulf %168, %172 : vector<16x16xf32>
    %174 = vector.extract_strided_slice %143 {offsets = [0, 8], sizes = [16, 8], strides = [1, 1]} : vector<16x32xf32> to vector<16x8xf32>
    %cst_52 = arith.constant dense<0.000000e+00> : vector<16x8xf32>
    %175 = tpu.matmul %173, %174, %cst_52 {dimension_numbers = #tpu.dot_dimension_numbers<[1], [0], [0], [1], [0, 0, 1, 1], [], []>} : vector<16x16xf32>, vector<16x8xf32>, vector<16x8xf32> -> vector<16x8xf32>
    %176 = vector.extract_strided_slice %145 {offsets = [0, 16], sizes = [16, 8], strides = [1, 1]} : vector<16x32xf32> to vector<16x8xf32>
    %177 = vector.extract_strided_slice %142 {offsets = [0, 16], sizes = [16, 8], strides = [1, 1]} : vector<16x32xf32> to vector<16x8xf32>
    %cst_53 = arith.constant dense<0.000000e+00> : vector<16x16xf32>
    %178 = tpu.matmul %176, %177, %cst_53 {dimension_numbers = #tpu.dot_dimension_numbers<[1], [1], [0], [0], [0, 0, 1, 0], [], []>} : vector<16x8xf32>, vector<16x8xf32>, vector<16x16xf32> -> vector<16x16xf32>
    %cst_54 = arith.constant dense<0xFF800000> : vector<16xf32>
    %179 = vector.multi_reduction <maximumf>, %178, %cst_54 [1] : vector<16x16xf32> to vector<16xf32>
    %180 = vector.shape_cast %179 : vector<16xf32> to vector<16x1xf32>
    %181 = vector.broadcast %180 : vector<16x1xf32> to vector<16x16xf32>
    %182 = arith.subf %178, %181 : vector<16x16xf32>
    %183 = math.exp %182 : vector<16x16xf32>
    %cst_55 = arith.constant dense<0.000000e+00> : vector<16xf32>
    %184 = vector.multi_reduction <add>, %183, %cst_55 [1] : vector<16x16xf32> to vector<16xf32>
    %185 = vector.shape_cast %184 : vector<16xf32> to vector<16x1xf32>
    %186 = tpu.reciprocal %185 {approx = true} : vector<16x1xf32> -> vector<16x1xf32>
    %187 = vector.broadcast %186 : vector<16x1xf32> to vector<16x16xf32>
    %188 = arith.mulf %183, %187 : vector<16x16xf32>
    %189 = vector.extract_strided_slice %143 {offsets = [0, 16], sizes = [16, 8], strides = [1, 1]} : vector<16x32xf32> to vector<16x8xf32>
    %cst_56 = arith.constant dense<0.000000e+00> : vector<16x8xf32>
    %190 = tpu.matmul %188, %189, %cst_56 {dimension_numbers = #tpu.dot_dimension_numbers<[1], [0], [0], [1], [0, 0, 1, 1], [], []>} : vector<16x16xf32>, vector<16x8xf32>, vector<16x8xf32> -> vector<16x8xf32>
    %191 = vector.extract_strided_slice %145 {offsets = [0, 24], sizes = [16, 8], strides = [1, 1]} : vector<16x32xf32> to vector<16x8xf32>
    %192 = vector.extract_strided_slice %142 {offsets = [0, 24], sizes = [16, 8], strides = [1, 1]} : vector<16x32xf32> to vector<16x8xf32>
    %cst_57 = arith.constant dense<0.000000e+00> : vector<16x16xf32>
    %193 = tpu.matmul %191, %192, %cst_57 {dimension_numbers = #tpu.dot_dimension_numbers<[1], [1], [0], [0], [0, 0, 1, 0], [], []>} : vector<16x8xf32>, vector<16x8xf32>, vector<16x16xf32> -> vector<16x16xf32>
    %cst_58 = arith.constant dense<0xFF800000> : vector<16xf32>
    %194 = vector.multi_reduction <maximumf>, %193, %cst_58 [1] : vector<16x16xf32> to vector<16xf32>
    %195 = vector.shape_cast %194 : vector<16xf32> to vector<16x1xf32>
    %196 = vector.broadcast %195 : vector<16x1xf32> to vector<16x16xf32>
    %197 = arith.subf %193, %196 : vector<16x16xf32>
    %198 = math.exp %197 : vector<16x16xf32>
    %cst_59 = arith.constant dense<0.000000e+00> : vector<16xf32>
    %199 = vector.multi_reduction <add>, %198, %cst_59 [1] : vector<16x16xf32> to vector<16xf32>
    %200 = vector.shape_cast %199 : vector<16xf32> to vector<16x1xf32>
    %201 = tpu.reciprocal %200 {approx = true} : vector<16x1xf32> -> vector<16x1xf32>
    %202 = vector.broadcast %201 : vector<16x1xf32> to vector<16x16xf32>
    %203 = arith.mulf %198, %202 : vector<16x16xf32>
    %204 = vector.extract_strided_slice %143 {offsets = [0, 24], sizes = [16, 8], strides = [1, 1]} : vector<16x32xf32> to vector<16x8xf32>
    %cst_60 = arith.constant dense<0.000000e+00> : vector<16x8xf32>
    %205 = tpu.matmul %203, %204, %cst_60 {dimension_numbers = #tpu.dot_dimension_numbers<[1], [0], [0], [1], [0, 0, 1, 1], [], []>} : vector<16x16xf32>, vector<16x8xf32>, vector<16x8xf32> -> vector<16x8xf32>
    %206 = tpu.concatenate %160, %175, %190, %205 in 1 : vector<16x8xf32>, vector<16x8xf32>, vector<16x8xf32>, vector<16x8xf32> -> vector<16x32xf32>
    %c32 = arith.constant 32 : index
    %c0_61 = arith.constant 0 : index
    %207 = vector.load %arg22[%c32, %c0_61] : memref<64x32xf32, #tpu.memory_space<vmem>>, vector<16x32xf32>
    tpu.vector_store %arg22[%c32, %c0_61], %206 {strides = array<i32>} : memref<64x32xf32, #tpu.memory_space<vmem>>, vector<16x32xf32>,
    %208 = vector.extract_strided_slice %6 {offsets = [48, 0], sizes = [16, 32], strides = [1, 1]} : vector<64x96xf32> to vector<16x32xf32>
    %209 = vector.extract_strided_slice %6 {offsets = [48, 32], sizes = [16, 32], strides = [1, 1]} : vector<64x96xf32> to vector<16x32xf32>
    %210 = vector.extract_strided_slice %6 {offsets = [48, 64], sizes = [16, 32], strides = [1, 1]} : vector<64x96xf32> to vector<16x32xf32>
    %cst_62 = arith.constant 0.353553385 : f32
    %211 = vector.broadcast %cst_62 : f32 to vector<16x32xf32>
    %212 = arith.mulf %208, %211 : vector<16x32xf32>
    %213 = vector.extract_strided_slice %212 {offsets = [0, 0], sizes = [16, 8], strides = [1, 1]} : vector<16x32xf32> to vector<16x8xf32>
    %214 = vector.extract_strided_slice %209 {offsets = [0, 0], sizes = [16, 8], strides = [1, 1]} : vector<16x32xf32> to vector<16x8xf32>
    %cst_63 = arith.constant dense<0.000000e+00> : vector<16x16xf32>
    %215 = tpu.matmul %213, %214, %cst_63 {dimension_numbers = #tpu.dot_dimension_numbers<[1], [1], [0], [0], [0, 0, 1, 0], [], []>} : vector<16x8xf32>, vector<16x8xf32>, vector<16x16xf32> -> vector<16x16xf32>
    %cst_64 = arith.constant dense<0xFF800000> : vector<16xf32>
    %216 = vector.multi_reduction <maximumf>, %215, %cst_64 [1] : vector<16x16xf32> to vector<16xf32>
    %217 = vector.shape_cast %216 : vector<16xf32> to vector<16x1xf32>
    %218 = vector.broadcast %217 : vector<16x1xf32> to vector<16x16xf32>
    %219 = arith.subf %215, %218 : vector<16x16xf32>
    %220 = math.exp %219 : vector<16x16xf32>
    %cst_65 = arith.constant dense<0.000000e+00> : vector<16xf32>
    %221 = vector.multi_reduction <add>, %220, %cst_65 [1] : vector<16x16xf32> to vector<16xf32>
    %222 = vector.shape_cast %221 : vector<16xf32> to vector<16x1xf32>
    %223 = tpu.reciprocal %222 {approx = true} : vector<16x1xf32> -> vector<16x1xf32>
    %224 = vector.broadcast %223 : vector<16x1xf32> to vector<16x16xf32>
    %225 = arith.mulf %220, %224 : vector<16x16xf32>
    %226 = vector.extract_strided_slice %210 {offsets = [0, 0], sizes = [16, 8], strides = [1, 1]} : vector<16x32xf32> to vector<16x8xf32>
    %cst_66 = arith.constant dense<0.000000e+00> : vector<16x8xf32>
    %227 = tpu.matmul %225, %226, %cst_66 {dimension_numbers = #tpu.dot_dimension_numbers<[1], [0], [0], [1], [0, 0, 1, 1], [], []>} : vector<16x16xf32>, vector<16x8xf32>, vector<16x8xf32> -> vector<16x8xf32>
    %228 = vector.extract_strided_slice %212 {offsets = [0, 8], sizes = [16, 8], strides = [1, 1]} : vector<16x32xf32> to vector<16x8xf32>
    %229 = vector.extract_strided_slice %209 {offsets = [0, 8], sizes = [16, 8], strides = [1, 1]} : vector<16x32xf32> to vector<16x8xf32>
    %cst_67 = arith.constant dense<0.000000e+00> : vector<16x16xf32>
    %230 = tpu.matmul %228, %229, %cst_67 {dimension_numbers = #tpu.dot_dimension_numbers<[1], [1], [0], [0], [0, 0, 1, 0], [], []>} : vector<16x8xf32>, vector<16x8xf32>, vector<16x16xf32> -> vector<16x16xf32>
    %cst_68 = arith.constant dense<0xFF800000> : vector<16xf32>
    %231 = vector.multi_reduction <maximumf>, %230, %cst_68 [1] : vector<16x16xf32> to vector<16xf32>
    %232 = vector.shape_cast %231 : vector<16xf32> to vector<16x1xf32>
    %233 = vector.broadcast %232 : vector<16x1xf32> to vector<16x16xf32>
    %234 = arith.subf %230, %233 : vector<16x16xf32>
    %235 = math.exp %234 : vector<16x16xf32>
    %cst_69 = arith.constant dense<0.000000e+00> : vector<16xf32>
    %236 = vector.multi_reduction <add>, %235, %cst_69 [1] : vector<16x16xf32> to vector<16xf32>
    %237 = vector.shape_cast %236 : vector<16xf32> to vector<16x1xf32>
    %238 = tpu.reciprocal %237 {approx = true} : vector<16x1xf32> -> vector<16x1xf32>
    %239 = vector.broadcast %238 : vector<16x1xf32> to vector<16x16xf32>
    %240 = arith.mulf %235, %239 : vector<16x16xf32>
    %241 = vector.extract_strided_slice %210 {offsets = [0, 8], sizes = [16, 8], strides = [1, 1]} : vector<16x32xf32> to vector<16x8xf32>
    %cst_70 = arith.constant dense<0.000000e+00> : vector<16x8xf32>
    %242 = tpu.matmul %240, %241, %cst_70 {dimension_numbers = #tpu.dot_dimension_numbers<[1], [0], [0], [1], [0, 0, 1, 1], [], []>} : vector<16x16xf32>, vector<16x8xf32>, vector<16x8xf32> -> vector<16x8xf32>
    %243 = vector.extract_strided_slice %212 {offsets = [0, 16], sizes = [16, 8], strides = [1, 1]} : vector<16x32xf32> to vector<16x8xf32>
    %244 = vector.extract_strided_slice %209 {offsets = [0, 16], sizes = [16, 8], strides = [1, 1]} : vector<16x32xf32> to vector<16x8xf32>
    %cst_71 = arith.constant dense<0.000000e+00> : vector<16x16xf32>
    %245 = tpu.matmul %243, %244, %cst_71 {dimension_numbers = #tpu.dot_dimension_numbers<[1], [1], [0], [0], [0, 0, 1, 0], [], []>} : vector<16x8xf32>, vector<16x8xf32>, vector<16x16xf32> -> vector<16x16xf32>
    %cst_72 = arith.constant dense<0xFF800000> : vector<16xf32>
    %246 = vector.multi_reduction <maximumf>, %245, %cst_72 [1] : vector<16x16xf32> to vector<16xf32>
    %247 = vector.shape_cast %246 : vector<16xf32> to vector<16x1xf32>
    %248 = vector.broadcast %247 : vector<16x1xf32> to vector<16x16xf32>
    %249 = arith.subf %245, %248 : vector<16x16xf32>
    %250 = math.exp %249 : vector<16x16xf32>
    %cst_73 = arith.constant dense<0.000000e+00> : vector<16xf32>
    %251 = vector.multi_reduction <add>, %250, %cst_73 [1] : vector<16x16xf32> to vector<16xf32>
    %252 = vector.shape_cast %251 : vector<16xf32> to vector<16x1xf32>
    %253 = tpu.reciprocal %252 {approx = true} : vector<16x1xf32> -> vector<16x1xf32>
    %254 = vector.broadcast %253 : vector<16x1xf32> to vector<16x16xf32>
    %255 = arith.mulf %250, %254 : vector<16x16xf32>
    %256 = vector.extract_strided_slice %210 {offsets = [0, 16], sizes = [16, 8], strides = [1, 1]} : vector<16x32xf32> to vector<16x8xf32>
    %cst_74 = arith.constant dense<0.000000e+00> : vector<16x8xf32>
    %257 = tpu.matmul %255, %256, %cst_74 {dimension_numbers = #tpu.dot_dimension_numbers<[1], [0], [0], [1], [0, 0, 1, 1], [], []>} : vector<16x16xf32>, vector<16x8xf32>, vector<16x8xf32> -> vector<16x8xf32>
    %258 = vector.extract_strided_slice %212 {offsets = [0, 24], sizes = [16, 8], strides = [1, 1]} : vector<16x32xf32> to vector<16x8xf32>
    %259 = vector.extract_strided_slice %209 {offsets = [0, 24], sizes = [16, 8], strides = [1, 1]} : vector<16x32xf32> to vector<16x8xf32>
    %cst_75 = arith.constant dense<0.000000e+00> : vector<16x16xf32>
    %260 = tpu.matmul %258, %259, %cst_75 {dimension_numbers = #tpu.dot_dimension_numbers<[1], [1], [0], [0], [0, 0, 1, 0], [], []>} : vector<16x8xf32>, vector<16x8xf32>, vector<16x16xf32> -> vector<16x16xf32>
    %cst_76 = arith.constant dense<0xFF800000> : vector<16xf32>
    %261 = vector.multi_reduction <maximumf>, %260, %cst_76 [1] : vector<16x16xf32> to vector<16xf32>
    %262 = vector.shape_cast %261 : vector<16xf32> to vector<16x1xf32>
    %263 = vector.broadcast %262 : vector<16x1xf32> to vector<16x16xf32>
    %264 = arith.subf %260, %263 : vector<16x16xf32>
    %265 = math.exp %264 : vector<16x16xf32>
    %cst_77 = arith.constant dense<0.000000e+00> : vector<16xf32>
    %266 = vector.multi_reduction <add>, %265, %cst_77 [1] : vector<16x16xf32> to vector<16xf32>
    %267 = vector.shape_cast %266 : vector<16xf32> to vector<16x1xf32>
    %268 = tpu.reciprocal %267 {approx = true} : vector<16x1xf32> -> vector<16x1xf32>
    %269 = vector.broadcast %268 : vector<16x1xf32> to vector<16x16xf32>
    %270 = arith.mulf %265, %269 : vector<16x16xf32>
    %271 = vector.extract_strided_slice %210 {offsets = [0, 24], sizes = [16, 8], strides = [1, 1]} : vector<16x32xf32> to vector<16x8xf32>
    %cst_78 = arith.constant dense<0.000000e+00> : vector<16x8xf32>
    %272 = tpu.matmul %270, %271, %cst_78 {dimension_numbers = #tpu.dot_dimension_numbers<[1], [0], [0], [1], [0, 0, 1, 1], [], []>} : vector<16x16xf32>, vector<16x8xf32>, vector<16x8xf32> -> vector<16x8xf32>
    %273 = tpu.concatenate %227, %242, %257, %272 in 1 : vector<16x8xf32>, vector<16x8xf32>, vector<16x8xf32>, vector<16x8xf32> -> vector<16x32xf32>
    %c48 = arith.constant 48 : index
    %c0_79 = arith.constant 0 : index
    %274 = vector.load %arg22[%c48, %c0_79] : memref<64x32xf32, #tpu.memory_space<vmem>>, vector<16x32xf32>
    tpu.vector_store %arg22[%c48, %c0_79], %273 {strides = array<i32>} : memref<64x32xf32, #tpu.memory_space<vmem>>, vector<16x32xf32>,
    %c0_80 = arith.constant 0 : index
    %c0_81 = arith.constant 0 : index
    %275 = vector.load %arg22[%c0_80, %c0_81] : memref<64x32xf32, #tpu.memory_space<vmem>>, vector<64x32xf32>
    %c0_82 = arith.constant 0 : index
    %c0_83 = arith.constant 0 : index
    %276 = vector.load %arg5[%c0_82, %c0_83] : memref<32x32xf32, #tpu.memory_space<vmem>>, vector<32x32xf32>
    %cst_84 = arith.constant dense<0.000000e+00> : vector<64x32xf32>
    %277 = tpu.matmul %275, %276, %cst_84 {dimension_numbers = #tpu.dot_dimension_numbers<[1], [0], [0], [1], [0, 0, 1, 1], [], []>} : vector<64x32xf32>, vector<32x32xf32>, vector<64x32xf32> -> vector<64x32xf32>
    %c0_85 = arith.constant 0 : index
    %c0_86 = arith.constant 0 : index
    %278 = vector.load %arg6[%c0_85, %c0_86] : memref<1x32xf32, #tpu.memory_space<vmem>>, vector<1x32xf32>
    %279 = vector.broadcast %278 : vector<1x32xf32> to vector<64x32xf32>
    %280 = arith.addf %277, %279 : vector<64x32xf32>
    %281 = arith.addf %0, %280 : vector<64x32xf32>
    %c0_87 = arith.constant 0 : index
    %c0_88 = arith.constant 0 : index
    %282 = vector.load %arg7[%c0_87, %c0_88] : memref<1x32xf32, #tpu.memory_space<vmem>>, vector<1x32xf32>
    %c0_89 = arith.constant 0 : index
    %c0_90 = arith.constant 0 : index
    %283 = vector.load %arg8[%c0_89, %c0_90] : memref<1x32xf32, #tpu.memory_space<vmem>>, vector<1x32xf32>
    %cst_91 = arith.constant dense<0.000000e+00> : vector<64xf32>
    %284 = vector.multi_reduction <add>, %281, %cst_91 [1] : vector<64x32xf32> to vector<64xf32>
    %285 = vector.shape_cast %284 : vector<64xf32> to vector<64x1xf32>
    %cst_92 = arith.constant 3.200000e+01 : f32
    %286 = vector.broadcast %cst_92 : f32 to vector<64x1xf32>
    %287 = arith.divf %285, %286 : vector<64x1xf32>
    %288 = vector.broadcast %287 : vector<64x1xf32> to vector<64x32xf32>
    %289 = arith.subf %281, %288 : vector<64x32xf32>
    %290 = arith.mulf %289, %289 : vector<64x32xf32>
    %cst_93 = arith.constant dense<0.000000e+00> : vector<64xf32>
    %291 = vector.multi_reduction <add>, %290, %cst_93 [1] : vector<64x32xf32> to vector<64xf32>
    %292 = vector.shape_cast %291 : vector<64xf32> to vector<64x1xf32>
    %cst_94 = arith.constant 3.200000e+01 : f32
    %293 = vector.broadcast %cst_94 : f32 to vector<64x1xf32>
    %294 = arith.divf %292, %293 : vector<64x1xf32>
    %295 = vector.broadcast %287 : vector<64x1xf32> to vector<64x32xf32>
    %296 = arith.subf %281, %295 : vector<64x32xf32>
    %cst_95 = arith.constant 9.99999974E-6 : f32
    %297 = vector.broadcast %cst_95 : f32 to vector<64x1xf32>
    %298 = arith.addf %294, %297 : vector<64x1xf32>
    %299 = math.rsqrt %298 : vector<64x1xf32>
    %300 = vector.broadcast %299 : vector<64x1xf32> to vector<64x32xf32>
    %301 = arith.mulf %296, %300 : vector<64x32xf32>
    %302 = vector.broadcast %282 : vector<1x32xf32> to vector<64x32xf32>
    %303 = arith.mulf %301, %302 : vector<64x32xf32>
    %304 = vector.broadcast %283 : vector<1x32xf32> to vector<64x32xf32>
    %305 = arith.addf %303, %304 : vector<64x32xf32>
    %c0_96 = arith.constant 0 : index
    %c0_97 = arith.constant 0 : index
    %306 = vector.load %arg9[%c0_96, %c0_97] : memref<32x32xf32, #tpu.memory_space<vmem>>, vector<32x32xf32>
    %cst_98 = arith.constant dense<0.000000e+00> : vector<64x32xf32>
    %307 = tpu.matmul %305, %306, %cst_98 {dimension_numbers = #tpu.dot_dimension_numbers<[1], [0], [0], [1], [0, 0, 1, 1], [], []>} : vector<64x32xf32>, vector<32x32xf32>, vector<64x32xf32> -> vector<64x32xf32>
    %c0_99 = arith.constant 0 : index
    %c0_100 = arith.constant 0 : index
    %308 = vector.load %arg10[%c0_99, %c0_100] : memref<1x32xf32, #tpu.memory_space<vmem>>, vector<1x32xf32>
    %309 = vector.broadcast %308 : vector<1x32xf32> to vector<64x32xf32>
    %310 = arith.addf %307, %309 : vector<64x32xf32>
    %311 = vector.extract_strided_slice %310 {offsets = [0, 0], sizes = [16, 32], strides = [1, 1]} : vector<64x32xf32> to vector<16x32xf32>
    %312 = vector.extract_strided_slice %1 {offsets = [0, 0], sizes = [16, 32], strides = [1, 1]} : vector<64x64xf32> to vector<16x32xf32>
    %313 = vector.extract_strided_slice %1 {offsets = [0, 32], sizes = [16, 32], strides = [1, 1]} : vector<64x64xf32> to vector<16x32xf32>
    %cst_101 = arith.constant 0.353553385 : f32
    %314 = vector.broadcast %cst_101 : f32 to vector<16x32xf32>
    %315 = arith.mulf %311, %314 : vector<16x32xf32>
    %316 = vector.extract_strided_slice %315 {offsets = [0, 0], sizes = [16, 8], strides = [1, 1]} : vector<16x32xf32> to vector<16x8xf32>
    %317 = vector.extract_strided_slice %312 {offsets = [0, 0], sizes = [16, 8], strides = [1, 1]} : vector<16x32xf32> to vector<16x8xf32>
    %cst_102 = arith.constant dense<0.000000e+00> : vector<16x16xf32>
    %318 = tpu.matmul %316, %317, %cst_102 {dimension_numbers = #tpu.dot_dimension_numbers<[1], [1], [0], [0], [0, 0, 1, 0], [], []>} : vector<16x8xf32>, vector<16x8xf32>, vector<16x16xf32> -> vector<16x16xf32>
    %cst_103 = arith.constant dense<0xFF800000> : vector<16xf32>
    %319 = vector.multi_reduction <maximumf>, %318, %cst_103 [1] : vector<16x16xf32> to vector<16xf32>
    %320 = vector.shape_cast %319 : vector<16xf32> to vector<16x1xf32>
    %321 = vector.broadcast %320 : vector<16x1xf32> to vector<16x16xf32>
    %322 = arith.subf %318, %321 : vector<16x16xf32>
    %323 = math.exp %322 : vector<16x16xf32>
    %cst_104 = arith.constant dense<0.000000e+00> : vector<16xf32>
    %324 = vector.multi_reduction <add>, %323, %cst_104 [1] : vector<16x16xf32> to vector<16xf32>
    %325 = vector.shape_cast %324 : vector<16xf32> to vector<16x1xf32>
    %326 = tpu.reciprocal %325 {approx = true} : vector<16x1xf32> -> vector<16x1xf32>
    %327 = vector.broadcast %326 : vector<16x1xf32> to vector<16x16xf32>
    %328 = arith.mulf %323, %327 : vector<16x16xf32>
    %329 = vector.extract_strided_slice %313 {offsets = [0, 0], sizes = [16, 8], strides = [1, 1]} : vector<16x32xf32> to vector<16x8xf32>
    %cst_105 = arith.constant dense<0.000000e+00> : vector<16x8xf32>
    %330 = tpu.matmul %328, %329, %cst_105 {dimension_numbers = #tpu.dot_dimension_numbers<[1], [0], [0], [1], [0, 0, 1, 1], [], []>} : vector<16x16xf32>, vector<16x8xf32>, vector<16x8xf32> -> vector<16x8xf32>
    %331 = vector.extract_strided_slice %315 {offsets = [0, 8], sizes = [16, 8], strides = [1, 1]} : vector<16x32xf32> to vector<16x8xf32>
    %332 = vector.extract_strided_slice %312 {offsets = [0, 8], sizes = [16, 8], strides = [1, 1]} : vector<16x32xf32> to vector<16x8xf32>
    %cst_106 = arith.constant dense<0.000000e+00> : vector<16x16xf32>
    %333 = tpu.matmul %331, %332, %cst_106 {dimension_numbers = #tpu.dot_dimension_numbers<[1], [1], [0], [0], [0, 0, 1, 0], [], []>} : vector<16x8xf32>, vector<16x8xf32>, vector<16x16xf32> -> vector<16x16xf32>
    %cst_107 = arith.constant dense<0xFF800000> : vector<16xf32>
    %334 = vector.multi_reduction <maximumf>, %333, %cst_107 [1] : vector<16x16xf32> to vector<16xf32>
    %335 = vector.shape_cast %334 : vector<16xf32> to vector<16x1xf32>
    %336 = vector.broadcast %335 : vector<16x1xf32> to vector<16x16xf32>
    %337 = arith.subf %333, %336 : vector<16x16xf32>
    %338 = math.exp %337 : vector<16x16xf32>
    %cst_108 = arith.constant dense<0.000000e+00> : vector<16xf32>
    %339 = vector.multi_reduction <add>, %338, %cst_108 [1] : vector<16x16xf32> to vector<16xf32>
    %340 = vector.shape_cast %339 : vector<16xf32> to vector<16x1xf32>
    %341 = tpu.reciprocal %340 {approx = true} : vector<16x1xf32> -> vector<16x1xf32>
    %342 = vector.broadcast %341 : vector<16x1xf32> to vector<16x16xf32>
    %343 = arith.mulf %338, %342 : vector<16x16xf32>
    %344 = vector.extract_strided_slice %313 {offsets = [0, 8], sizes = [16, 8], strides = [1, 1]} : vector<16x32xf32> to vector<16x8xf32>
    %cst_109 = arith.constant dense<0.000000e+00> : vector<16x8xf32>
    %345 = tpu.matmul %343, %344, %cst_109 {dimension_numbers = #tpu.dot_dimension_numbers<[1], [0], [0], [1], [0, 0, 1, 1], [], []>} : vector<16x16xf32>, vector<16x8xf32>, vector<16x8xf32> -> vector<16x8xf32>
    %346 = vector.extract_strided_slice %315 {offsets = [0, 16], sizes = [16, 8], strides = [1, 1]} : vector<16x32xf32> to vector<16x8xf32>
    %347 = vector.extract_strided_slice %312 {offsets = [0, 16], sizes = [16, 8], strides = [1, 1]} : vector<16x32xf32> to vector<16x8xf32>
    %cst_110 = arith.constant dense<0.000000e+00> : vector<16x16xf32>
    %348 = tpu.matmul %346, %347, %cst_110 {dimension_numbers = #tpu.dot_dimension_numbers<[1], [1], [0], [0], [0, 0, 1, 0], [], []>} : vector<16x8xf32>, vector<16x8xf32>, vector<16x16xf32> -> vector<16x16xf32>
    %cst_111 = arith.constant dense<0xFF800000> : vector<16xf32>
    %349 = vector.multi_reduction <maximumf>, %348, %cst_111 [1] : vector<16x16xf32> to vector<16xf32>
    %350 = vector.shape_cast %349 : vector<16xf32> to vector<16x1xf32>
    %351 = vector.broadcast %350 : vector<16x1xf32> to vector<16x16xf32>
    %352 = arith.subf %348, %351 : vector<16x16xf32>
    %353 = math.exp %352 : vector<16x16xf32>
    %cst_112 = arith.constant dense<0.000000e+00> : vector<16xf32>
    %354 = vector.multi_reduction <add>, %353, %cst_112 [1] : vector<16x16xf32> to vector<16xf32>
    %355 = vector.shape_cast %354 : vector<16xf32> to vector<16x1xf32>
    %356 = tpu.reciprocal %355 {approx = true} : vector<16x1xf32> -> vector<16x1xf32>
    %357 = vector.broadcast %356 : vector<16x1xf32> to vector<16x16xf32>
    %358 = arith.mulf %353, %357 : vector<16x16xf32>
    %359 = vector.extract_strided_slice %313 {offsets = [0, 16], sizes = [16, 8], strides = [1, 1]} : vector<16x32xf32> to vector<16x8xf32>
    %cst_113 = arith.constant dense<0.000000e+00> : vector<16x8xf32>
    %360 = tpu.matmul %358, %359, %cst_113 {dimension_numbers = #tpu.dot_dimension_numbers<[1], [0], [0], [1], [0, 0, 1, 1], [], []>} : vector<16x16xf32>, vector<16x8xf32>, vector<16x8xf32> -> vector<16x8xf32>
    %361 = vector.extract_strided_slice %315 {offsets = [0, 24], sizes = [16, 8], strides = [1, 1]} : vector<16x32xf32> to vector<16x8xf32>
    %362 = vector.extract_strided_slice %312 {offsets = [0, 24], sizes = [16, 8], strides = [1, 1]} : vector<16x32xf32> to vector<16x8xf32>
    %cst_114 = arith.constant dense<0.000000e+00> : vector<16x16xf32>
    %363 = tpu.matmul %361, %362, %cst_114 {dimension_numbers = #tpu.dot_dimension_numbers<[1], [1], [0], [0], [0, 0, 1, 0], [], []>} : vector<16x8xf32>, vector<16x8xf32>, vector<16x16xf32> -> vector<16x16xf32>
    %cst_115 = arith.constant dense<0xFF800000> : vector<16xf32>
    %364 = vector.multi_reduction <maximumf>, %363, %cst_115 [1] : vector<16x16xf32> to vector<16xf32>
    %365 = vector.shape_cast %364 : vector<16xf32> to vector<16x1xf32>
    %366 = vector.broadcast %365 : vector<16x1xf32> to vector<16x16xf32>
    %367 = arith.subf %363, %366 : vector<16x16xf32>
    %368 = math.exp %367 : vector<16x16xf32>
    %cst_116 = arith.constant dense<0.000000e+00> : vector<16xf32>
    %369 = vector.multi_reduction <add>, %368, %cst_116 [1] : vector<16x16xf32> to vector<16xf32>
    %370 = vector.shape_cast %369 : vector<16xf32> to vector<16x1xf32>
    %371 = tpu.reciprocal %370 {approx = true} : vector<16x1xf32> -> vector<16x1xf32>
    %372 = vector.broadcast %371 : vector<16x1xf32> to vector<16x16xf32>
    %373 = arith.mulf %368, %372 : vector<16x16xf32>
    %374 = vector.extract_strided_slice %313 {offsets = [0, 24], sizes = [16, 8], strides = [1, 1]} : vector<16x32xf32> to vector<16x8xf32>
    %cst_117 = arith.constant dense<0.000000e+00> : vector<16x8xf32>
    %375 = tpu.matmul %373, %374, %cst_117 {dimension_numbers = #tpu.dot_dimension_numbers<[1], [0], [0], [1], [0, 0, 1, 1], [], []>} : vector<16x16xf32>, vector<16x8xf32>, vector<16x8xf32> -> vector<16x8xf32>
    %376 = tpu.concatenate %330, %345, %360, %375 in 1 : vector<16x8xf32>, vector<16x8xf32>, vector<16x8xf32>, vector<16x8xf32> -> vector<16x32xf32>
    %c0_118 = arith.constant 0 : index
    %c0_119 = arith.constant 0 : index
    %377 = vector.load %arg22[%c0_118, %c0_119] : memref<64x32xf32, #tpu.memory_space<vmem>>, vector<16x32xf32>
    tpu.vector_store %arg22[%c0_118, %c0_119], %376 {strides = array<i32>} : memref<64x32xf32, #tpu.memory_space<vmem>>, vector<16x32xf32>,
    %378 = vector.extract_strided_slice %310 {offsets = [16, 0], sizes = [16, 32], strides = [1, 1]} : vector<64x32xf32> to vector<16x32xf32>
    %379 = vector.extract_strided_slice %1 {offsets = [16, 0], sizes = [16, 32], strides = [1, 1]} : vector<64x64xf32> to vector<16x32xf32>
    %380 = vector.extract_strided_slice %1 {offsets = [16, 32], sizes = [16, 32], strides = [1, 1]} : vector<64x64xf32> to vector<16x32xf32>
    %cst_120 = arith.constant 0.353553385 : f32
    %381 = vector.broadcast %cst_120 : f32 to vector<16x32xf32>
    %382 = arith.mulf %378, %381 : vector<16x32xf32>
    %383 = vector.extract_strided_slice %382 {offsets = [0, 0], sizes = [16, 8], strides = [1, 1]} : vector<16x32xf32> to vector<16x8xf32>
    %384 = vector.extract_strided_slice %379 {offsets = [0, 0], sizes = [16, 8], strides = [1, 1]} : vector<16x32xf32> to vector<16x8xf32>
    %cst_121 = arith.constant dense<0.000000e+00> : vector<16x16xf32>
    %385 = tpu.matmul %383, %384, %cst_121 {dimension_numbers = #tpu.dot_dimension_numbers<[1], [1], [0], [0], [0, 0, 1, 0], [], []>} : vector<16x8xf32>, vector<16x8xf32>, vector<16x16xf32> -> vector<16x16xf32>
    %cst_122 = arith.constant dense<0xFF800000> : vector<16xf32>
    %386 = vector.multi_reduction <maximumf>, %385, %cst_122 [1] : vector<16x16xf32> to vector<16xf32>
    %387 = vector.shape_cast %386 : vector<16xf32> to vector<16x1xf32>
    %388 = vector.broadcast %387 : vector<16x1xf32> to vector<16x16xf32>
    %389 = arith.subf %385, %388 : vector<16x16xf32>
    %390 = math.exp %389 : vector<16x16xf32>
    %cst_123 = arith.constant dense<0.000000e+00> : vector<16xf32>
    %391 = vector.multi_reduction <add>, %390, %cst_123 [1] : vector<16x16xf32> to vector<16xf32>
    %392 = vector.shape_cast %391 : vector<16xf32> to vector<16x1xf32>
    %393 = tpu.reciprocal %392 {approx = true} : vector<16x1xf32> -> vector<16x1xf32>
    %394 = vector.broadcast %393 : vector<16x1xf32> to vector<16x16xf32>
    %395 = arith.mulf %390, %394 : vector<16x16xf32>
    %396 = vector.extract_strided_slice %380 {offsets = [0, 0], sizes = [16, 8], strides = [1, 1]} : vector<16x32xf32> to vector<16x8xf32>
    %cst_124 = arith.constant dense<0.000000e+00> : vector<16x8xf32>
    %397 = tpu.matmul %395, %396, %cst_124 {dimension_numbers = #tpu.dot_dimension_numbers<[1], [0], [0], [1], [0, 0, 1, 1], [], []>} : vector<16x16xf32>, vector<16x8xf32>, vector<16x8xf32> -> vector<16x8xf32>
    %398 = vector.extract_strided_slice %382 {offsets = [0, 8], sizes = [16, 8], strides = [1, 1]} : vector<16x32xf32> to vector<16x8xf32>
    %399 = vector.extract_strided_slice %379 {offsets = [0, 8], sizes = [16, 8], strides = [1, 1]} : vector<16x32xf32> to vector<16x8xf32>
    %cst_125 = arith.constant dense<0.000000e+00> : vector<16x16xf32>
    %400 = tpu.matmul %398, %399, %cst_125 {dimension_numbers = #tpu.dot_dimension_numbers<[1], [1], [0], [0], [0, 0, 1, 0], [], []>} : vector<16x8xf32>, vector<16x8xf32>, vector<16x16xf32> -> vector<16x16xf32>
    %cst_126 = arith.constant dense<0xFF800000> : vector<16xf32>
    %401 = vector.multi_reduction <maximumf>, %400, %cst_126 [1] : vector<16x16xf32> to vector<16xf32>
    %402 = vector.shape_cast %401 : vector<16xf32> to vector<16x1xf32>
    %403 = vector.broadcast %402 : vector<16x1xf32> to vector<16x16xf32>
    %404 = arith.subf %400, %403 : vector<16x16xf32>
    %405 = math.exp %404 : vector<16x16xf32>
    %cst_127 = arith.constant dense<0.000000e+00> : vector<16xf32>
    %406 = vector.multi_reduction <add>, %405, %cst_127 [1] : vector<16x16xf32> to vector<16xf32>
    %407 = vector.shape_cast %406 : vector<16xf32> to vector<16x1xf32>
    %408 = tpu.reciprocal %407 {approx = true} : vector<16x1xf32> -> vector<16x1xf32>
    %409 = vector.broadcast %408 : vector<16x1xf32> to vector<16x16xf32>
    %410 = arith.mulf %405, %409 : vector<16x16xf32>
    %411 = vector.extract_strided_slice %380 {offsets = [0, 8], sizes = [16, 8], strides = [1, 1]} : vector<16x32xf32> to vector<16x8xf32>
    %cst_128 = arith.constant dense<0.000000e+00> : vector<16x8xf32>
    %412 = tpu.matmul %410, %411, %cst_128 {dimension_numbers = #tpu.dot_dimension_numbers<[1], [0], [0], [1], [0, 0, 1, 1], [], []>} : vector<16x16xf32>, vector<16x8xf32>, vector<16x8xf32> -> vector<16x8xf32>
    %413 = vector.extract_strided_slice %382 {offsets = [0, 16], sizes = [16, 8], strides = [1, 1]} : vector<16x32xf32> to vector<16x8xf32>
    %414 = vector.extract_strided_slice %379 {offsets = [0, 16], sizes = [16, 8], strides = [1, 1]} : vector<16x32xf32> to vector<16x8xf32>
    %cst_129 = arith.constant dense<0.000000e+00> : vector<16x16xf32>
    %415 = tpu.matmul %413, %414, %cst_129 {dimension_numbers = #tpu.dot_dimension_numbers<[1], [1], [0], [0], [0, 0, 1, 0], [], []>} : vector<16x8xf32>, vector<16x8xf32>, vector<16x16xf32> -> vector<16x16xf32>
    %cst_130 = arith.constant dense<0xFF800000> : vector<16xf32>
    %416 = vector.multi_reduction <maximumf>, %415, %cst_130 [1] : vector<16x16xf32> to vector<16xf32>
    %417 = vector.shape_cast %416 : vector<16xf32> to vector<16x1xf32>
    %418 = vector.broadcast %417 : vector<16x1xf32> to vector<16x16xf32>
    %419 = arith.subf %415, %418 : vector<16x16xf32>
    %420 = math.exp %419 : vector<16x16xf32>
    %cst_131 = arith.constant dense<0.000000e+00> : vector<16xf32>
    %421 = vector.multi_reduction <add>, %420, %cst_131 [1] : vector<16x16xf32> to vector<16xf32>
    %422 = vector.shape_cast %421 : vector<16xf32> to vector<16x1xf32>
    %423 = tpu.reciprocal %422 {approx = true} : vector<16x1xf32> -> vector<16x1xf32>
    %424 = vector.broadcast %423 : vector<16x1xf32> to vector<16x16xf32>
    %425 = arith.mulf %420, %424 : vector<16x16xf32>
    %426 = vector.extract_strided_slice %380 {offsets = [0, 16], sizes = [16, 8], strides = [1, 1]} : vector<16x32xf32> to vector<16x8xf32>
    %cst_132 = arith.constant dense<0.000000e+00> : vector<16x8xf32>
    %427 = tpu.matmul %425, %426, %cst_132 {dimension_numbers = #tpu.dot_dimension_numbers<[1], [0], [0], [1], [0, 0, 1, 1], [], []>} : vector<16x16xf32>, vector<16x8xf32>, vector<16x8xf32> -> vector<16x8xf32>
    %428 = vector.extract_strided_slice %382 {offsets = [0, 24], sizes = [16, 8], strides = [1, 1]} : vector<16x32xf32> to vector<16x8xf32>
    %429 = vector.extract_strided_slice %379 {offsets = [0, 24], sizes = [16, 8], strides = [1, 1]} : vector<16x32xf32> to vector<16x8xf32>
    %cst_133 = arith.constant dense<0.000000e+00> : vector<16x16xf32>
    %430 = tpu.matmul %428, %429, %cst_133 {dimension_numbers = #tpu.dot_dimension_numbers<[1], [1], [0], [0], [0, 0, 1, 0], [], []>} : vector<16x8xf32>, vector<16x8xf32>, vector<16x16xf32> -> vector<16x16xf32>
    %cst_134 = arith.constant dense<0xFF800000> : vector<16xf32>
    %431 = vector.multi_reduction <maximumf>, %430, %cst_134 [1] : vector<16x16xf32> to vector<16xf32>
    %432 = vector.shape_cast %431 : vector<16xf32> to vector<16x1xf32>
    %433 = vector.broadcast %432 : vector<16x1xf32> to vector<16x16xf32>
    %434 = arith.subf %430, %433 : vector<16x16xf32>
    %435 = math.exp %434 : vector<16x16xf32>
    %cst_135 = arith.constant dense<0.000000e+00> : vector<16xf32>
    %436 = vector.multi_reduction <add>, %435, %cst_135 [1] : vector<16x16xf32> to vector<16xf32>
    %437 = vector.shape_cast %436 : vector<16xf32> to vector<16x1xf32>
    %438 = tpu.reciprocal %437 {approx = true} : vector<16x1xf32> -> vector<16x1xf32>
    %439 = vector.broadcast %438 : vector<16x1xf32> to vector<16x16xf32>
    %440 = arith.mulf %435, %439 : vector<16x16xf32>
    %441 = vector.extract_strided_slice %380 {offsets = [0, 24], sizes = [16, 8], strides = [1, 1]} : vector<16x32xf32> to vector<16x8xf32>
    %cst_136 = arith.constant dense<0.000000e+00> : vector<16x8xf32>
    %442 = tpu.matmul %440, %441, %cst_136 {dimension_numbers = #tpu.dot_dimension_numbers<[1], [0], [0], [1], [0, 0, 1, 1], [], []>} : vector<16x16xf32>, vector<16x8xf32>, vector<16x8xf32> -> vector<16x8xf32>
    %443 = tpu.concatenate %397, %412, %427, %442 in 1 : vector<16x8xf32>, vector<16x8xf32>, vector<16x8xf32>, vector<16x8xf32> -> vector<16x32xf32>
    %c16_137 = arith.constant 16 : index
    %c0_138 = arith.constant 0 : index
    %444 = vector.load %arg22[%c16_137, %c0_138] : memref<64x32xf32, #tpu.memory_space<vmem>>, vector<16x32xf32>
    tpu.vector_store %arg22[%c16_137, %c0_138], %443 {strides = array<i32>} : memref<64x32xf32, #tpu.memory_space<vmem>>, vector<16x32xf32>,
    %445 = vector.extract_strided_slice %310 {offsets = [32, 0], sizes = [16, 32], strides = [1, 1]} : vector<64x32xf32> to vector<16x32xf32>
    %446 = vector.extract_strided_slice %1 {offsets = [32, 0], sizes = [16, 32], strides = [1, 1]} : vector<64x64xf32> to vector<16x32xf32>
    %447 = vector.extract_strided_slice %1 {offsets = [32, 32], sizes = [16, 32], strides = [1, 1]} : vector<64x64xf32> to vector<16x32xf32>
    %cst_139 = arith.constant 0.353553385 : f32
    %448 = vector.broadcast %cst_139 : f32 to vector<16x32xf32>
    %449 = arith.mulf %445, %448 : vector<16x32xf32>
    %450 = vector.extract_strided_slice %449 {offsets = [0, 0], sizes = [16, 8], strides = [1, 1]} : vector<16x32xf32> to vector<16x8xf32>
    %451 = vector.extract_strided_slice %446 {offsets = [0, 0], sizes = [16, 8], strides = [1, 1]} : vector<16x32xf32> to vector<16x8xf32>
    %cst_140 = arith.constant dense<0.000000e+00> : vector<16x16xf32>
    %452 = tpu.matmul %450, %451, %cst_140 {dimension_numbers = #tpu.dot_dimension_numbers<[1], [1], [0], [0], [0, 0, 1, 0], [], []>} : vector<16x8xf32>, vector<16x8xf32>, vector<16x16xf32> -> vector<16x16xf32>
    %cst_141 = arith.constant dense<0xFF800000> : vector<16xf32>
    %453 = vector.multi_reduction <maximumf>, %452, %cst_141 [1] : vector<16x16xf32> to vector<16xf32>
    %454 = vector.shape_cast %453 : vector<16xf32> to vector<16x1xf32>
    %455 = vector.broadcast %454 : vector<16x1xf32> to vector<16x16xf32>
    %456 = arith.subf %452, %455 : vector<16x16xf32>
    %457 = math.exp %456 : vector<16x16xf32>
    %cst_142 = arith.constant dense<0.000000e+00> : vector<16xf32>
    %458 = vector.multi_reduction <add>, %457, %cst_142 [1] : vector<16x16xf32> to vector<16xf32>
    %459 = vector.shape_cast %458 : vector<16xf32> to vector<16x1xf32>
    %460 = tpu.reciprocal %459 {approx = true} : vector<16x1xf32> -> vector<16x1xf32>
    %461 = vector.broadcast %460 : vector<16x1xf32> to vector<16x16xf32>
    %462 = arith.mulf %457, %461 : vector<16x16xf32>
    %463 = vector.extract_strided_slice %447 {offsets = [0, 0], sizes = [16, 8], strides = [1, 1]} : vector<16x32xf32> to vector<16x8xf32>
    %cst_143 = arith.constant dense<0.000000e+00> : vector<16x8xf32>
    %464 = tpu.matmul %462, %463, %cst_143 {dimension_numbers = #tpu.dot_dimension_numbers<[1], [0], [0], [1], [0, 0, 1, 1], [], []>} : vector<16x16xf32>, vector<16x8xf32>, vector<16x8xf32> -> vector<16x8xf32>
    %465 = vector.extract_strided_slice %449 {offsets = [0, 8], sizes = [16, 8], strides = [1, 1]} : vector<16x32xf32> to vector<16x8xf32>
    %466 = vector.extract_strided_slice %446 {offsets = [0, 8], sizes = [16, 8], strides = [1, 1]} : vector<16x32xf32> to vector<16x8xf32>
    %cst_144 = arith.constant dense<0.000000e+00> : vector<16x16xf32>
    %467 = tpu.matmul %465, %466, %cst_144 {dimension_numbers = #tpu.dot_dimension_numbers<[1], [1], [0], [0], [0, 0, 1, 0], [], []>} : vector<16x8xf32>, vector<16x8xf32>, vector<16x16xf32> -> vector<16x16xf32>
    %cst_145 = arith.constant dense<0xFF800000> : vector<16xf32>
    %468 = vector.multi_reduction <maximumf>, %467, %cst_145 [1] : vector<16x16xf32> to vector<16xf32>
    %469 = vector.shape_cast %468 : vector<16xf32> to vector<16x1xf32>
    %470 = vector.broadcast %469 : vector<16x1xf32> to vector<16x16xf32>
    %471 = arith.subf %467, %470 : vector<16x16xf32>
    %472 = math.exp %471 : vector<16x16xf32>
    %cst_146 = arith.constant dense<0.000000e+00> : vector<16xf32>
    %473 = vector.multi_reduction <add>, %472, %cst_146 [1] : vector<16x16xf32> to vector<16xf32>
    %474 = vector.shape_cast %473 : vector<16xf32> to vector<16x1xf32>
    %475 = tpu.reciprocal %474 {approx = true} : vector<16x1xf32> -> vector<16x1xf32>
    %476 = vector.broadcast %475 : vector<16x1xf32> to vector<16x16xf32>
    %477 = arith.mulf %472, %476 : vector<16x16xf32>
    %478 = vector.extract_strided_slice %447 {offsets = [0, 8], sizes = [16, 8], strides = [1, 1]} : vector<16x32xf32> to vector<16x8xf32>
    %cst_147 = arith.constant dense<0.000000e+00> : vector<16x8xf32>
    %479 = tpu.matmul %477, %478, %cst_147 {dimension_numbers = #tpu.dot_dimension_numbers<[1], [0], [0], [1], [0, 0, 1, 1], [], []>} : vector<16x16xf32>, vector<16x8xf32>, vector<16x8xf32> -> vector<16x8xf32>
    %480 = vector.extract_strided_slice %449 {offsets = [0, 16], sizes = [16, 8], strides = [1, 1]} : vector<16x32xf32> to vector<16x8xf32>
    %481 = vector.extract_strided_slice %446 {offsets = [0, 16], sizes = [16, 8], strides = [1, 1]} : vector<16x32xf32> to vector<16x8xf32>
    %cst_148 = arith.constant dense<0.000000e+00> : vector<16x16xf32>
    %482 = tpu.matmul %480, %481, %cst_148 {dimension_numbers = #tpu.dot_dimension_numbers<[1], [1], [0], [0], [0, 0, 1, 0], [], []>} : vector<16x8xf32>, vector<16x8xf32>, vector<16x16xf32> -> vector<16x16xf32>
    %cst_149 = arith.constant dense<0xFF800000> : vector<16xf32>
    %483 = vector.multi_reduction <maximumf>, %482, %cst_149 [1] : vector<16x16xf32> to vector<16xf32>
    %484 = vector.shape_cast %483 : vector<16xf32> to vector<16x1xf32>
    %485 = vector.broadcast %484 : vector<16x1xf32> to vector<16x16xf32>
    %486 = arith.subf %482, %485 : vector<16x16xf32>
    %487 = math.exp %486 : vector<16x16xf32>
    %cst_150 = arith.constant dense<0.000000e+00> : vector<16xf32>
    %488 = vector.multi_reduction <add>, %487, %cst_150 [1] : vector<16x16xf32> to vector<16xf32>
    %489 = vector.shape_cast %488 : vector<16xf32> to vector<16x1xf32>
    %490 = tpu.reciprocal %489 {approx = true} : vector<16x1xf32> -> vector<16x1xf32>
    %491 = vector.broadcast %490 : vector<16x1xf32> to vector<16x16xf32>
    %492 = arith.mulf %487, %491 : vector<16x16xf32>
    %493 = vector.extract_strided_slice %447 {offsets = [0, 16], sizes = [16, 8], strides = [1, 1]} : vector<16x32xf32> to vector<16x8xf32>
    %cst_151 = arith.constant dense<0.000000e+00> : vector<16x8xf32>
    %494 = tpu.matmul %492, %493, %cst_151 {dimension_numbers = #tpu.dot_dimension_numbers<[1], [0], [0], [1], [0, 0, 1, 1], [], []>} : vector<16x16xf32>, vector<16x8xf32>, vector<16x8xf32> -> vector<16x8xf32>
    %495 = vector.extract_strided_slice %449 {offsets = [0, 24], sizes = [16, 8], strides = [1, 1]} : vector<16x32xf32> to vector<16x8xf32>
    %496 = vector.extract_strided_slice %446 {offsets = [0, 24], sizes = [16, 8], strides = [1, 1]} : vector<16x32xf32> to vector<16x8xf32>
    %cst_152 = arith.constant dense<0.000000e+00> : vector<16x16xf32>
    %497 = tpu.matmul %495, %496, %cst_152 {dimension_numbers = #tpu.dot_dimension_numbers<[1], [1], [0], [0], [0, 0, 1, 0], [], []>} : vector<16x8xf32>, vector<16x8xf32>, vector<16x16xf32> -> vector<16x16xf32>
    %cst_153 = arith.constant dense<0xFF800000> : vector<16xf32>
    %498 = vector.multi_reduction <maximumf>, %497, %cst_153 [1] : vector<16x16xf32> to vector<16xf32>
    %499 = vector.shape_cast %498 : vector<16xf32> to vector<16x1xf32>
    %500 = vector.broadcast %499 : vector<16x1xf32> to vector<16x16xf32>
    %501 = arith.subf %497, %500 : vector<16x16xf32>
    %502 = math.exp %501 : vector<16x16xf32>
    %cst_154 = arith.constant dense<0.000000e+00> : vector<16xf32>
    %503 = vector.multi_reduction <add>, %502, %cst_154 [1] : vector<16x16xf32> to vector<16xf32>
    %504 = vector.shape_cast %503 : vector<16xf32> to vector<16x1xf32>
    %505 = tpu.reciprocal %504 {approx = true} : vector<16x1xf32> -> vector<16x1xf32>
    %506 = vector.broadcast %505 : vector<16x1xf32> to vector<16x16xf32>
    %507 = arith.mulf %502, %506 : vector<16x16xf32>
    %508 = vector.extract_strided_slice %447 {offsets = [0, 24], sizes = [16, 8], strides = [1, 1]} : vector<16x32xf32> to vector<16x8xf32>
    %cst_155 = arith.constant dense<0.000000e+00> : vector<16x8xf32>
    %509 = tpu.matmul %507, %508, %cst_155 {dimension_numbers = #tpu.dot_dimension_numbers<[1], [0], [0], [1], [0, 0, 1, 1], [], []>} : vector<16x16xf32>, vector<16x8xf32>, vector<16x8xf32> -> vector<16x8xf32>
    %510 = tpu.concatenate %464, %479, %494, %509 in 1 : vector<16x8xf32>, vector<16x8xf32>, vector<16x8xf32>, vector<16x8xf32> -> vector<16x32xf32>
    %c32_156 = arith.constant 32 : index
    %c0_157 = arith.constant 0 : index
    %511 = vector.load %arg22[%c32_156, %c0_157] : memref<64x32xf32, #tpu.memory_space<vmem>>, vector<16x32xf32>
    tpu.vector_store %arg22[%c32_156, %c0_157], %510 {strides = array<i32>} : memref<64x32xf32, #tpu.memory_space<vmem>>, vector<16x32xf32>,
    %512 = vector.extract_strided_slice %310 {offsets = [48, 0], sizes = [16, 32], strides = [1, 1]} : vector<64x32xf32> to vector<16x32xf32>
    %513 = vector.extract_strided_slice %1 {offsets = [48, 0], sizes = [16, 32], strides = [1, 1]} : vector<64x64xf32> to vector<16x32xf32>
    %514 = vector.extract_strided_slice %1 {offsets = [48, 32], sizes = [16, 32], strides = [1, 1]} : vector<64x64xf32> to vector<16x32xf32>
    %cst_158 = arith.constant 0.353553385 : f32
    %515 = vector.broadcast %cst_158 : f32 to vector<16x32xf32>
    %516 = arith.mulf %512, %515 : vector<16x32xf32>
    %517 = vector.extract_strided_slice %516 {offsets = [0, 0], sizes = [16, 8], strides = [1, 1]} : vector<16x32xf32> to vector<16x8xf32>
    %518 = vector.extract_strided_slice %513 {offsets = [0, 0], sizes = [16, 8], strides = [1, 1]} : vector<16x32xf32> to vector<16x8xf32>
    %cst_159 = arith.constant dense<0.000000e+00> : vector<16x16xf32>
    %519 = tpu.matmul %517, %518, %cst_159 {dimension_numbers = #tpu.dot_dimension_numbers<[1], [1], [0], [0], [0, 0, 1, 0], [], []>} : vector<16x8xf32>, vector<16x8xf32>, vector<16x16xf32> -> vector<16x16xf32>
    %cst_160 = arith.constant dense<0xFF800000> : vector<16xf32>
    %520 = vector.multi_reduction <maximumf>, %519, %cst_160 [1] : vector<16x16xf32> to vector<16xf32>
    %521 = vector.shape_cast %520 : vector<16xf32> to vector<16x1xf32>
    %522 = vector.broadcast %521 : vector<16x1xf32> to vector<16x16xf32>
    %523 = arith.subf %519, %522 : vector<16x16xf32>
    %524 = math.exp %523 : vector<16x16xf32>
    %cst_161 = arith.constant dense<0.000000e+00> : vector<16xf32>
    %525 = vector.multi_reduction <add>, %524, %cst_161 [1] : vector<16x16xf32> to vector<16xf32>
    %526 = vector.shape_cast %525 : vector<16xf32> to vector<16x1xf32>
    %527 = tpu.reciprocal %526 {approx = true} : vector<16x1xf32> -> vector<16x1xf32>
    %528 = vector.broadcast %527 : vector<16x1xf32> to vector<16x16xf32>
    %529 = arith.mulf %524, %528 : vector<16x16xf32>
    %530 = vector.extract_strided_slice %514 {offsets = [0, 0], sizes = [16, 8], strides = [1, 1]} : vector<16x32xf32> to vector<16x8xf32>
    %cst_162 = arith.constant dense<0.000000e+00> : vector<16x8xf32>
    %531 = tpu.matmul %529, %530, %cst_162 {dimension_numbers = #tpu.dot_dimension_numbers<[1], [0], [0], [1], [0, 0, 1, 1], [], []>} : vector<16x16xf32>, vector<16x8xf32>, vector<16x8xf32> -> vector<16x8xf32>
    %532 = vector.extract_strided_slice %516 {offsets = [0, 8], sizes = [16, 8], strides = [1, 1]} : vector<16x32xf32> to vector<16x8xf32>
    %533 = vector.extract_strided_slice %513 {offsets = [0, 8], sizes = [16, 8], strides = [1, 1]} : vector<16x32xf32> to vector<16x8xf32>
    %cst_163 = arith.constant dense<0.000000e+00> : vector<16x16xf32>
    %534 = tpu.matmul %532, %533, %cst_163 {dimension_numbers = #tpu.dot_dimension_numbers<[1], [1], [0], [0], [0, 0, 1, 0], [], []>} : vector<16x8xf32>, vector<16x8xf32>, vector<16x16xf32> -> vector<16x16xf32>
    %cst_164 = arith.constant dense<0xFF800000> : vector<16xf32>
    %535 = vector.multi_reduction <maximumf>, %534, %cst_164 [1] : vector<16x16xf32> to vector<16xf32>
    %536 = vector.shape_cast %535 : vector<16xf32> to vector<16x1xf32>
    %537 = vector.broadcast %536 : vector<16x1xf32> to vector<16x16xf32>
    %538 = arith.subf %534, %537 : vector<16x16xf32>
    %539 = math.exp %538 : vector<16x16xf32>
    %cst_165 = arith.constant dense<0.000000e+00> : vector<16xf32>
    %540 = vector.multi_reduction <add>, %539, %cst_165 [1] : vector<16x16xf32> to vector<16xf32>
    %541 = vector.shape_cast %540 : vector<16xf32> to vector<16x1xf32>
    %542 = tpu.reciprocal %541 {approx = true} : vector<16x1xf32> -> vector<16x1xf32>
    %543 = vector.broadcast %542 : vector<16x1xf32> to vector<16x16xf32>
    %544 = arith.mulf %539, %543 : vector<16x16xf32>
    %545 = vector.extract_strided_slice %514 {offsets = [0, 8], sizes = [16, 8], strides = [1, 1]} : vector<16x32xf32> to vector<16x8xf32>
    %cst_166 = arith.constant dense<0.000000e+00> : vector<16x8xf32>
    %546 = tpu.matmul %544, %545, %cst_166 {dimension_numbers = #tpu.dot_dimension_numbers<[1], [0], [0], [1], [0, 0, 1, 1], [], []>} : vector<16x16xf32>, vector<16x8xf32>, vector<16x8xf32> -> vector<16x8xf32>
    %547 = vector.extract_strided_slice %516 {offsets = [0, 16], sizes = [16, 8], strides = [1, 1]} : vector<16x32xf32> to vector<16x8xf32>
    %548 = vector.extract_strided_slice %513 {offsets = [0, 16], sizes = [16, 8], strides = [1, 1]} : vector<16x32xf32> to vector<16x8xf32>
    %cst_167 = arith.constant dense<0.000000e+00> : vector<16x16xf32>
    %549 = tpu.matmul %547, %548, %cst_167 {dimension_numbers = #tpu.dot_dimension_numbers<[1], [1], [0], [0], [0, 0, 1, 0], [], []>} : vector<16x8xf32>, vector<16x8xf32>, vector<16x16xf32> -> vector<16x16xf32>
    %cst_168 = arith.constant dense<0xFF800000> : vector<16xf32>
    %550 = vector.multi_reduction <maximumf>, %549, %cst_168 [1] : vector<16x16xf32> to vector<16xf32>
    %551 = vector.shape_cast %550 : vector<16xf32> to vector<16x1xf32>
    %552 = vector.broadcast %551 : vector<16x1xf32> to vector<16x16xf32>
    %553 = arith.subf %549, %552 : vector<16x16xf32>
    %554 = math.exp %553 : vector<16x16xf32>
    %cst_169 = arith.constant dense<0.000000e+00> : vector<16xf32>
    %555 = vector.multi_reduction <add>, %554, %cst_169 [1] : vector<16x16xf32> to vector<16xf32>
    %556 = vector.shape_cast %555 : vector<16xf32> to vector<16x1xf32>
    %557 = tpu.reciprocal %556 {approx = true} : vector<16x1xf32> -> vector<16x1xf32>
    %558 = vector.broadcast %557 : vector<16x1xf32> to vector<16x16xf32>
    %559 = arith.mulf %554, %558 : vector<16x16xf32>
    %560 = vector.extract_strided_slice %514 {offsets = [0, 16], sizes = [16, 8], strides = [1, 1]} : vector<16x32xf32> to vector<16x8xf32>
    %cst_170 = arith.constant dense<0.000000e+00> : vector<16x8xf32>
    %561 = tpu.matmul %559, %560, %cst_170 {dimension_numbers = #tpu.dot_dimension_numbers<[1], [0], [0], [1], [0, 0, 1, 1], [], []>} : vector<16x16xf32>, vector<16x8xf32>, vector<16x8xf32> -> vector<16x8xf32>
    %562 = vector.extract_strided_slice %516 {offsets = [0, 24], sizes = [16, 8], strides = [1, 1]} : vector<16x32xf32> to vector<16x8xf32>
    %563 = vector.extract_strided_slice %513 {offsets = [0, 24], sizes = [16, 8], strides = [1, 1]} : vector<16x32xf32> to vector<16x8xf32>
    %cst_171 = arith.constant dense<0.000000e+00> : vector<16x16xf32>
    %564 = tpu.matmul %562, %563, %cst_171 {dimension_numbers = #tpu.dot_dimension_numbers<[1], [1], [0], [0], [0, 0, 1, 0], [], []>} : vector<16x8xf32>, vector<16x8xf32>, vector<16x16xf32> -> vector<16x16xf32>
    %cst_172 = arith.constant dense<0xFF800000> : vector<16xf32>
    %565 = vector.multi_reduction <maximumf>, %564, %cst_172 [1] : vector<16x16xf32> to vector<16xf32>
    %566 = vector.shape_cast %565 : vector<16xf32> to vector<16x1xf32>
    %567 = vector.broadcast %566 : vector<16x1xf32> to vector<16x16xf32>
    %568 = arith.subf %564, %567 : vector<16x16xf32>
    %569 = math.exp %568 : vector<16x16xf32>
    %cst_173 = arith.constant dense<0.000000e+00> : vector<16xf32>
    %570 = vector.multi_reduction <add>, %569, %cst_173 [1] : vector<16x16xf32> to vector<16xf32>
    %571 = vector.shape_cast %570 : vector<16xf32> to vector<16x1xf32>
    %572 = tpu.reciprocal %571 {approx = true} : vector<16x1xf32> -> vector<16x1xf32>
    %573 = vector.broadcast %572 : vector<16x1xf32> to vector<16x16xf32>
    %574 = arith.mulf %569, %573 : vector<16x16xf32>
    %575 = vector.extract_strided_slice %514 {offsets = [0, 24], sizes = [16, 8], strides = [1, 1]} : vector<16x32xf32> to vector<16x8xf32>
    %cst_174 = arith.constant dense<0.000000e+00> : vector<16x8xf32>
    %576 = tpu.matmul %574, %575, %cst_174 {dimension_numbers = #tpu.dot_dimension_numbers<[1], [0], [0], [1], [0, 0, 1, 1], [], []>} : vector<16x16xf32>, vector<16x8xf32>, vector<16x8xf32> -> vector<16x8xf32>
    %577 = tpu.concatenate %531, %546, %561, %576 in 1 : vector<16x8xf32>, vector<16x8xf32>, vector<16x8xf32>, vector<16x8xf32> -> vector<16x32xf32>
    %c48_175 = arith.constant 48 : index
    %c0_176 = arith.constant 0 : index
    %578 = vector.load %arg22[%c48_175, %c0_176] : memref<64x32xf32, #tpu.memory_space<vmem>>, vector<16x32xf32>
    tpu.vector_store %arg22[%c48_175, %c0_176], %577 {strides = array<i32>} : memref<64x32xf32, #tpu.memory_space<vmem>>, vector<16x32xf32>,
    %c0_177 = arith.constant 0 : index
    %c0_178 = arith.constant 0 : index
    %579 = vector.load %arg22[%c0_177, %c0_178] : memref<64x32xf32, #tpu.memory_space<vmem>>, vector<64x32xf32>
    %c0_179 = arith.constant 0 : index
    %c0_180 = arith.constant 0 : index
    %580 = vector.load %arg11[%c0_179, %c0_180] : memref<32x32xf32, #tpu.memory_space<vmem>>, vector<32x32xf32>
    %cst_181 = arith.constant dense<0.000000e+00> : vector<64x32xf32>
    %581 = tpu.matmul %579, %580, %cst_181 {dimension_numbers = #tpu.dot_dimension_numbers<[1], [0], [0], [1], [0, 0, 1, 1], [], []>} : vector<64x32xf32>, vector<32x32xf32>, vector<64x32xf32> -> vector<64x32xf32>
    %c0_182 = arith.constant 0 : index
    %c0_183 = arith.constant 0 : index
    %582 = vector.load %arg12[%c0_182, %c0_183] : memref<1x32xf32, #tpu.memory_space<vmem>>, vector<1x32xf32>
    %583 = vector.broadcast %582 : vector<1x32xf32> to vector<64x32xf32>
    %584 = arith.addf %581, %583 : vector<64x32xf32>
    %585 = arith.addf %305, %584 : vector<64x32xf32>
    %c0_184 = arith.constant 0 : index
    %c0_185 = arith.constant 0 : index
    %586 = vector.load %arg13[%c0_184, %c0_185] : memref<1x32xf32, #tpu.memory_space<vmem>>, vector<1x32xf32>
    %c0_186 = arith.constant 0 : index
    %c0_187 = arith.constant 0 : index
    %587 = vector.load %arg14[%c0_186, %c0_187] : memref<1x32xf32, #tpu.memory_space<vmem>>, vector<1x32xf32>
    %cst_188 = arith.constant dense<0.000000e+00> : vector<64xf32>
    %588 = vector.multi_reduction <add>, %585, %cst_188 [1] : vector<64x32xf32> to vector<64xf32>
    %589 = vector.shape_cast %588 : vector<64xf32> to vector<64x1xf32>
    %cst_189 = arith.constant 3.200000e+01 : f32
    %590 = vector.broadcast %cst_189 : f32 to vector<64x1xf32>
    %591 = arith.divf %589, %590 : vector<64x1xf32>
    %592 = vector.broadcast %591 : vector<64x1xf32> to vector<64x32xf32>
    %593 = arith.subf %585, %592 : vector<64x32xf32>
    %594 = arith.mulf %593, %593 : vector<64x32xf32>
    %cst_190 = arith.constant dense<0.000000e+00> : vector<64xf32>
    %595 = vector.multi_reduction <add>, %594, %cst_190 [1] : vector<64x32xf32> to vector<64xf32>
    %596 = vector.shape_cast %595 : vector<64xf32> to vector<64x1xf32>
    %cst_191 = arith.constant 3.200000e+01 : f32
    %597 = vector.broadcast %cst_191 : f32 to vector<64x1xf32>
    %598 = arith.divf %596, %597 : vector<64x1xf32>
    %599 = vector.broadcast %591 : vector<64x1xf32> to vector<64x32xf32>
    %600 = arith.subf %585, %599 : vector<64x32xf32>
    %cst_192 = arith.constant 9.99999974E-6 : f32
    %601 = vector.broadcast %cst_192 : f32 to vector<64x1xf32>
    %602 = arith.addf %598, %601 : vector<64x1xf32>
    %603 = math.rsqrt %602 : vector<64x1xf32>
    %604 = vector.broadcast %603 : vector<64x1xf32> to vector<64x32xf32>
    %605 = arith.mulf %600, %604 : vector<64x32xf32>
    %606 = vector.broadcast %586 : vector<1x32xf32> to vector<64x32xf32>
    %607 = arith.mulf %605, %606 : vector<64x32xf32>
    %608 = vector.broadcast %587 : vector<1x32xf32> to vector<64x32xf32>
    %609 = arith.addf %607, %608 : vector<64x32xf32>
    %c0_193 = arith.constant 0 : index
    %c0_194 = arith.constant 0 : index
    %610 = vector.load %arg15[%c0_193, %c0_194] : memref<32x64xf32, #tpu.memory_space<vmem>>, vector<32x64xf32>
    %cst_195 = arith.constant dense<0.000000e+00> : vector<64x64xf32>
    %611 = tpu.matmul %609, %610, %cst_195 {dimension_numbers = #tpu.dot_dimension_numbers<[1], [0], [0], [1], [0, 0, 1, 1], [], []>} : vector<64x32xf32>, vector<32x64xf32>, vector<64x64xf32> -> vector<64x64xf32>
    %c0_196 = arith.constant 0 : index
    %c0_197 = arith.constant 0 : index
    %612 = vector.load %arg16[%c0_196, %c0_197] : memref<1x64xf32, #tpu.memory_space<vmem>>, vector<1x64xf32>
    %613 = vector.broadcast %612 : vector<1x64xf32> to vector<64x64xf32>
    %614 = arith.addf %611, %613 : vector<64x64xf32>
    %cst_198 = arith.constant 0.000000e+00 : f32
    %615 = vector.broadcast %cst_198 : f32 to vector<64x64xf32>
    %616 = arith.maximumf %614, %615 : vector<64x64xf32>
    %c0_199 = arith.constant 0 : index
    %c0_200 = arith.constant 0 : index
    %617 = vector.load %arg17[%c0_199, %c0_200] : memref<64x32xf32, #tpu.memory_space<vmem>>, vector<64x32xf32>
    %cst_201 = arith.constant dense<0.000000e+00> : vector<64x32xf32>
    %618 = tpu.matmul %616, %617, %cst_201 {dimension_numbers = #tpu.dot_dimension_numbers<[1], [0], [0], [1], [0, 0, 1, 1], [], []>} : vector<64x64xf32>, vector<64x32xf32>, vector<64x32xf32> -> vector<64x32xf32>
    %619 = arith.addf %609, %618 : vector<64x32xf32>
    %c0_202 = arith.constant 0 : index
    %c0_203 = arith.constant 0 : index
    %620 = vector.load %arg18[%c0_202, %c0_203] : memref<1x32xf32, #tpu.memory_space<vmem>>, vector<1x32xf32>
    %621 = vector.broadcast %620 : vector<1x32xf32> to vector<64x32xf32>
    %622 = arith.addf %619, %621 : vector<64x32xf32>
    %c0_204 = arith.constant 0 : index
    %c0_205 = arith.constant 0 : index
    %623 = vector.load %arg19[%c0_204, %c0_205] : memref<1x32xf32, #tpu.memory_space<vmem>>, vector<1x32xf32>
    %c0_206 = arith.constant 0 : index
    %c0_207 = arith.constant 0 : index
    %624 = vector.load %arg20[%c0_206, %c0_207] : memref<1x32xf32, #tpu.memory_space<vmem>>, vector<1x32xf32>
    %cst_208 = arith.constant dense<0.000000e+00> : vector<64xf32>
    %625 = vector.multi_reduction <add>, %622, %cst_208 [1] : vector<64x32xf32> to vector<64xf32>
    %626 = vector.shape_cast %625 : vector<64xf32> to vector<64x1xf32>
    %cst_209 = arith.constant 3.200000e+01 : f32
    %627 = vector.broadcast %cst_209 : f32 to vector<64x1xf32>
    %628 = arith.divf %626, %627 : vector<64x1xf32>
    %629 = vector.broadcast %628 : vector<64x1xf32> to vector<64x32xf32>
    %630 = arith.subf %622, %629 : vector<64x32xf32>
    %631 = arith.mulf %630, %630 : vector<64x32xf32>
    %cst_210 = arith.constant dense<0.000000e+00> : vector<64xf32>
    %632 = vector.multi_reduction <add>, %631, %cst_210 [1] : vector<64x32xf32> to vector<64xf32>
    %633 = vector.shape_cast %632 : vector<64xf32> to vector<64x1xf32>
    %cst_211 = arith.constant 3.200000e+01 : f32
    %634 = vector.broadcast %cst_211 : f32 to vector<64x1xf32>
    %635 = arith.divf %633, %634 : vector<64x1xf32>
    %636 = vector.broadcast %628 : vector<64x1xf32> to vector<64x32xf32>
    %637 = arith.subf %622, %636 : vector<64x32xf32>
    %cst_212 = arith.constant 9.99999974E-6 : f32
    %638 = vector.broadcast %cst_212 : f32 to vector<64x1xf32>
    %639 = arith.addf %635, %638 : vector<64x1xf32>
    %640 = math.rsqrt %639 : vector<64x1xf32>
    %641 = vector.broadcast %640 : vector<64x1xf32> to vector<64x32xf32>
    %642 = arith.mulf %637, %641 : vector<64x32xf32>
    %643 = vector.broadcast %623 : vector<1x32xf32> to vector<64x32xf32>
    %644 = arith.mulf %642, %643 : vector<64x32xf32>
    %645 = vector.broadcast %624 : vector<1x32xf32> to vector<64x32xf32>
    %646 = arith.addf %644, %645 : vector<64x32xf32>
    %c0_213 = arith.constant 0 : index
    %c0_214 = arith.constant 0 : index
    %647 = vector.load %arg21[%c0_213, %c0_214] : memref<64x32xf32, #tpu.memory_space<vmem>>, vector<64x32xf32>
    tpu.vector_store %arg21[%c0_213, %c0_214], %646 {strides = array<i32>} : memref<64x32xf32, #tpu.memory_space<vmem>>, vector<64x32xf32>,
    return
  }
  func.func @transform_0(%arg0: i32) -> (i32, i32) {
    %c0_i32 = arith.constant 0 : i32
    %c0_i32_0 = arith.constant 0 : i32
    return %arg0, %c0_i32 : i32, i32
  }
  func.func @transform_1(%arg0: i32) -> (i32, i32) {
    %c0_i32 = arith.constant 0 : i32
    %c0_i32_0 = arith.constant 0 : i32
    return %arg0, %c0_i32 : i32, i32
  }
  func.func @transform_2(%arg0: i32) -> (i32, i32) {
    %c0_i32 = arith.constant 0 : i32
    %c0_i32_0 = arith.constant 0 : i32
    %c0_i32_1 = arith.constant 0 : i32
    return %c0_i32, %c0_i32_0 : i32, i32
  }
  func.func @transform_3(%arg0: i32) -> (i32, i32) {
    %c0_i32 = arith.constant 0 : i32
    %c0_i32_0 = arith.constant 0 : i32
    %c0_i32_1 = arith.constant 0 : i32
    return %c0_i32, %c0_i32_0 : i32, i32
  }
  func.func @transform_4(%arg0: i32) -> (i32, i32) {
    %c0_i32 = arith.constant 0 : i32
    %c0_i32_0 = arith.constant 0 : i32
    %c0_i32_1 = arith.constant 0 : i32
    return %c0_i32, %c0_i32_0 : i32, i32
  }
  func.func @transform_5(%arg0: i32) -> (i32, i32) {
    %c0_i32 = arith.constant 0 : i32
    %c0_i32_0 = arith.constant 0 : i32
    %c0_i32_1 = arith.constant 0 : i32
    return %c0_i32, %c0_i32_0 : i32, i32
  }
  func.func @transform_6(%arg0: i32) -> (i32, i32) {
    %c0_i32 = arith.constant 0 : i32
    %c0_i32_0 = arith.constant 0 : i32
    %c0_i32_1 = arith.constant 0 : i32
    return %c0_i32, %c0_i32_0 : i32, i32
  }
  func.func @transform_7(%arg0: i32) -> (i32, i32) {
    %c0_i32 = arith.constant 0 : i32
    %c0_i32_0 = arith.constant 0 : i32
    %c0_i32_1 = arith.constant 0 : i32
    return %c0_i32, %c0_i32_0 : i32, i32
  }
  func.func @transform_8(%arg0: i32) -> (i32, i32) {
    %c0_i32 = arith.constant 0 : i32
    %c0_i32_0 = arith.constant 0 : i32
    %c0_i32_1 = arith.constant 0 : i32
    return %c0_i32, %c0_i32_0 : i32, i32
  }
  func.func @transform_9(%arg0: i32) -> (i32, i32) {
    %c0_i32 = arith.constant 0 : i32
    %c0_i32_0 = arith.constant 0 : i32
    %c0_i32_1 = arith.constant 0 : i32
    return %c0_i32, %c0_i32_0 : i32, i32
  }
  func.func @transform_10(%arg0: i32) -> (i32, i32) {
    %c0_i32 = arith.constant 0 : i32
    %c0_i32_0 = arith.constant 0 : i32
    %c0_i32_1 = arith.constant 0 : i32
    return %c0_i32, %c0_i32_0 : i32, i32
  }
  func.func @transform_11(%arg0: i32) -> (i32, i32) {
    %c0_i32 = arith.constant 0 : i32
    %c0_i32_0 = arith.constant 0 : i32
    %c0_i32_1 = arith.constant 0 : i32
    return %c0_i32, %c0_i32_0 : i32, i32
  }
  func.func @transform_12(%arg0: i32) -> (i32, i32) {
    %c0_i32 = arith.constant 0 : i32
    %c0_i32_0 = arith.constant 0 : i32
    %c0_i32_1 = arith.constant 0 : i32
    return %c0_i32, %c0_i32_0 : i32, i32
  }
  func.func @transform_13(%arg0: i32) -> (i32, i32) {
    %c0_i32 = arith.constant 0 : i32
    %c0_i32_0 = arith.constant 0 : i32
    %c0_i32_1 = arith.constant 0 : i32
    return %c0_i32, %c0_i32_0 : i32, i32
  }
  func.func @transform_14(%arg0: i32) -> (i32, i32) {
    %c0_i32 = arith.constant 0 : i32
    %c0_i32_0 = arith.constant 0 : i32
    %c0_i32_1 = arith.constant 0 : i32
    return %c0_i32, %c0_i32_0 : i32, i32
  }
  func.func @transform_15(%arg0: i32) -> (i32, i32) {
    %c0_i32 = arith.constant 0 : i32
    %c0_i32_0 = arith.constant 0 : i32
    %c0_i32_1 = arith.constant 0 : i32
    return %c0_i32, %c0_i32_0 : i32, i32
  }
  func.func @transform_16(%arg0: i32) -> (i32, i32) {
    %c0_i32 = arith.constant 0 : i32
    %c0_i32_0 = arith.constant 0 : i32
    %c0_i32_1 = arith.constant 0 : i32
    return %c0_i32, %c0_i32_0 : i32, i32
  }
  func.func @transform_17(%arg0: i32) -> (i32, i32) {
    %c0_i32 = arith.constant 0 : i32
    %c0_i32_0 = arith.constant 0 : i32
    %c0_i32_1 = arith.constant 0 : i32
    return %c0_i32, %c0_i32_0 : i32, i32
  }
  func.func @transform_18(%arg0: i32) -> (i32, i32) {
    %c0_i32 = arith.constant 0 : i32
    %c0_i32_0 = arith.constant 0 : i32
    %c0_i32_1 = arith.constant 0 : i32
    return %c0_i32, %c0_i32_0 : i32, i32
  }
  func.func @transform_19(%arg0: i32) -> (i32, i32) {
    %c0_i32 = arith.constant 0 : i32
    %c0_i32_0 = arith.constant 0 : i32
    %c0_i32_1 = arith.constant 0 : i32
    return %c0_i32, %c0_i32_0 : i32, i32
  }
  func.func @transform_20(%arg0: i32) -> (i32, i32) {
    %c0_i32 = arith.constant 0 : i32
    %c0_i32_0 = arith.constant 0 : i32
    return %arg0, %c0_i32 : i32, i32
  }
}

module attributes {stable_mosaic.version = 11 : i64} {
  func.func @_final_linear_kernel(%arg0: i32, %arg1: memref<8x512xf32, #tpu.memory_space<vmem>>, %arg2: memref<512x16xf32, #tpu.memory_space<vmem>>, %arg3: memref<1x16xf32, #tpu.memory_space<vmem>>, %arg4: memref<8x16xf32, #tpu.memory_space<vmem>>) attributes {dimension_semantics = [#tpu.dimension_semantics<arbitrary>], iteration_bounds = array<i64: 1>, scalar_prefetch = 0 : i64, scratch_operands = 0 : i64, tpu.core_type = #tpu.core_type<tc>, window_params = [{pipeline_mode = #tpu.pipeline_mode<synchronous>, transform_indices = @transform_0, window_bounds = array<i64: 8, 512>}, {pipeline_mode = #tpu.pipeline_mode<synchronous>, transform_indices = @transform_1, window_bounds = array<i64: 512, 16>}, {pipeline_mode = #tpu.pipeline_mode<synchronous>, transform_indices = @transform_2, window_bounds = array<i64: 1, 16>}, {pipeline_mode = #tpu.pipeline_mode<synchronous>, transform_indices = @transform_3, window_bounds = array<i64: 8, 16>}]} {
    %c0 = arith.constant 0 : index
    %c0_0 = arith.constant 0 : index
    %0 = vector.load %arg1[%c0, %c0_0] : memref<8x512xf32, #tpu.memory_space<vmem>>, vector<8x512xf32>
    %c0_1 = arith.constant 0 : index
    %c0_2 = arith.constant 0 : index
    %1 = vector.load %arg2[%c0_1, %c0_2] : memref<512x16xf32, #tpu.memory_space<vmem>>, vector<512x16xf32>
    %cst = arith.constant dense<0.000000e+00> : vector<8x16xf32>
    %2 = tpu.matmul %0, %1, %cst {dimension_numbers = #tpu.dot_dimension_numbers<[1], [0], [0], [1], [0, 0, 1, 1], [], []>} : vector<8x512xf32>, vector<512x16xf32>, vector<8x16xf32> -> vector<8x16xf32>
    %c0_3 = arith.constant 0 : index
    %c0_4 = arith.constant 0 : index
    %3 = vector.load %arg3[%c0_3, %c0_4] : memref<1x16xf32, #tpu.memory_space<vmem>>, vector<1x16xf32>
    %4 = vector.broadcast %3 : vector<1x16xf32> to vector<8x16xf32>
    %5 = arith.addf %2, %4 : vector<8x16xf32>
    %c0_5 = arith.constant 0 : index
    %c0_6 = arith.constant 0 : index
    %6 = vector.load %arg4[%c0_5, %c0_6] : memref<8x16xf32, #tpu.memory_space<vmem>>, vector<8x16xf32>
    tpu.vector_store %arg4[%c0_5, %c0_6], %5 {strides = array<i32>} : memref<8x16xf32, #tpu.memory_space<vmem>>, vector<8x16xf32>,
    return
  }
  func.func @transform_0(%arg0: i32) -> (i32, i32) {
    %c0_i32 = arith.constant 0 : i32
    %c0_i32_0 = arith.constant 0 : i32
    %c0_i32_1 = arith.constant 0 : i32
    return %c0_i32, %c0_i32_0 : i32, i32
  }
  func.func @transform_1(%arg0: i32) -> (i32, i32) {
    %c0_i32 = arith.constant 0 : i32
    %c0_i32_0 = arith.constant 0 : i32
    %c0_i32_1 = arith.constant 0 : i32
    return %c0_i32, %c0_i32_0 : i32, i32
  }
  func.func @transform_2(%arg0: i32) -> (i32, i32) {
    %c0_i32 = arith.constant 0 : i32
    %c0_i32_0 = arith.constant 0 : i32
    %c0_i32_1 = arith.constant 0 : i32
    return %c0_i32, %c0_i32_0 : i32, i32
  }
  func.func @transform_3(%arg0: i32) -> (i32, i32) {
    %c0_i32 = arith.constant 0 : i32
    %c0_i32_0 = arith.constant 0 : i32
    %c0_i32_1 = arith.constant 0 : i32
    return %c0_i32, %c0_i32_0 : i32, i32
  }
}

</mosaic_0001>

<bundles_post_ra>
// kernel: _lambda_.8
= control target key start
LH: loop header
LB: loop body
LE: loop exit
PB: predicated region body
PF: predicated region fallthrough
CT: control target
= control target key end

     0   :  { %s488_s12 = smov 0   ;;  %s536_s0 = inlined_call_operand.vmem [shape: f32[128,32], index: 0, kind: input, shape index: {}]   ;;  %s537_s1 = inlined_call_operand.vmem [shape: f32[32,64], index: 1, kind: input, shape index: {}]   ;;  %s538_s2 = inlined_call_operand.vmem [shape: f32[1,64], index: 2, kind: input, shape index: {}]   ;;  %s539_s3 = inlined_call_operand.vmem [shape: f32[128,64], index: 3, kind: output, shape index: {}]  }
   0x1 LB: > { %s388_s13 = sadd.s32 4294967295, %s466_s12   ;;  %p392_p0 = scmp.ge.s32.totalorder %s466_s12, 1  ;;  %s466_s12 = sphi %s488_s12, %s13_s12  }
   0x2   : > { %p138_p1 = scmp.lt.s32.totalorder %s466_s12, 3 }
   0x4   : > { %p139_p2 = pnand %p392_p0, %p138_p1 }
   0x5   : > { %v182_v0 = vld [vmem:[%s537_s1] sm:$0xff] (!%p139_p2)  ;;  %v183_v1 = vld [vmem:[%s537_s1 + $0x8] sm:$0xff] (!%p139_p2)  ;;  %v184_v2 = vld [vmem:[%s537_s1 + $0x10] sm:$0xff] (!%p139_p2)  ;;  %s393_s20 = sshll.u32 (!%p139_p2), %s388_s13, 3  ;;  %vm193_vm0 = vcmask (!%p139_p2), 261120   ;;  %vm323_vm1 = vcmask (!%p139_p2), 523264  }
   0x6   : > { %142 = sbr.rel (%p139_p2) target bundleno = 239 (0xef), region = 32  ;;  %v440_v3 = vpack.c.bf16 (!%p139_p2), %v183_v1, %v182_v0  ;;  %v185_v4 = vld [vmem:[%s537_s1 + $0x18] sm:$0xff] (!%p139_p2)  ;;  %p163_p3 = scmp.lt.s32.totalorder (!%p139_p2), %s393_s20, 15  ;;  %v397_v14 = vld [vmem:[%s538_s2] ss:$0 sm:$0xff] (!%p139_p2) }
   0x7   : > { %v444_v5 = vpack.c.bf16 (!%p139_p2), %v185_v4, %v184_v2 }
   0x8   : > { %441 = vmatprep.subr.bf16.mxu0 (!%p139_p2), %v440_v3  ;;  %448 = vmatprep.subr.bf16.mxu1 (!%p139_p2), %v440_v3 }
   0x9   : > { %443 = vmatpush3.bf16.msra.mxu0 (!%p139_p2), %v440_v3  ;;  %450 = vmatpush3.bf16.msra.mxu1 (!%p139_p2), %v440_v3 }
   0xa   : > { %445 = vmatprep.subr.bf16.mxu0 (!%p139_p2), %v444_v5  ;;  %449 = vmatprep.subr.bf16.mxu1 (!%p139_p2), %v444_v5 }
   0xd   : > { %s541_s20 = smov (!%p163_p3, %s393_s20), 15  ;;  %447 = vmatpush3.bf16.msra.mxu0 %v444_v5  ;;  %451 = vmatpush3.bf16.msra.mxu1 %v444_v5 }
   0xe   : > { %s394_s23 = sshll.u32 %s541_s20, 3 }
   0xf   : > { %s166_s26 = scalar_lea.vmem %s536_s0, %s394_s23  ;;  %s172_s4 = scalar_lea.vmem %s539_s3, %s394_s23 }
  0x10   : > { %v174_v6 = vld [vmem:[%s166_s26] sm:$0xff]  ;;  %v175_v8 = vld [vmem:[%s166_s26 + $0x8] sm:$0xff]  ;;  %v176_v10 = vld [vmem:[%s166_s26 + $0x10] sm:$0xff] }
  0x11   : > { %v178_v7 = vld [vmem:[%s166_s26 + $0x20] sm:$0xff]  ;;  %v179_v9 = vld [vmem:[%s166_s26 + $0x28] sm:$0xff]  ;;  %428 = vmatprep.mubr.msk.f32.mxu0 %vm193_vm0, %v174_v6  ;;  %v180_v11 = vld [vmem:[%s166_s26 + $0x30] sm:$0xff] }
  0x12   : > { %434 = vmatprep.mubr.msk.f32.mxu1 %vm193_vm0, %v178_v7  ;;  %429 = vmatmul.mubr.msk.f32.vlgmr.msra.gmra.mrb[0].mxu0 %vm193_vm0, %v175_v8  ;;  %v177_v12 = vld [vmem:[%s166_s26 + $0x18] sm:$0xff] }
  0x13   : > { %435 = vmatmul.mubr.msk.f32.vlgmr.msra.gmra.mrb[0].mxu1 %vm193_vm0, %v179_v9  ;;  %431 = vmatprep.mubr.msk.f32.mxu0 %vm193_vm0, %v176_v10  ;;  %v181_v13 = vld [vmem:[%s166_s26 + $0x38] sm:$0xff] }
  0x14   : > { %437 = vmatprep.mubr.msk.f32.mxu1 %vm193_vm0, %v180_v11 }
  0x16   : > { %432 = vmatmul.mubr.msk.f32.gmra.mrb[2].mxu0 %vm193_vm0, %v177_v12 }
  0x17   : > { %438 = vmatmul.mubr.msk.f32.gmra.mrb[2].mxu1 %vm193_vm0, %v181_v13 }
  0xe5   : > { %v430_v15 = vpop.f32.mrb[0].mxu0 }
  0xe6   : > { %v436_v16 = vpop.f32.mrb[0].mxu1  ;;  %v290_v17 = vadd.f32 %v430_v15, %v397_v14  ;;  %v284_v19 = vpop.f32.mrb[1].mxu0 }
  0xe7   : > { %v310_v18 = vadd.f32 %v436_v16, %v397_v14  ;;  %v304_v20 = vpop.f32.mrb[1].mxu1  ;;  %v285_v21 = vadd.f32 %v397_v14, %v284_v19 }
  0xe8   : > { %v305_v22 = vadd.f32 %v397_v14, %v304_v20  ;;  %325 = vst.msk [vmem:[%s172_s4 + $0x8] sm:$0xff] %vm323_vm1, %v290_v17 }
  0xe9   : > { %329 = vst.msk [vmem:[%s172_s4 + $0x28] sm:$0xff] %vm323_vm1, %v310_v18  ;;  %324 = vst.msk [vmem:[%s172_s4] sm:$0xff] %vm323_vm1, %v285_v21  ;;  %v433_v23 = vpop.f32.mrb[2].mxu0 }
  0xea   : > { %328 = vst.msk [vmem:[%s172_s4 + $0x20] sm:$0xff] %vm323_vm1, %v305_v22  ;;  %v439_v24 = vpop.f32.mrb[2].mxu1  ;;  %v300_v25 = vadd.f32 %v433_v23, %v397_v14  ;;  %v294_v27 = vpop.f32.mrb[3].mxu0 }
  0xeb   : > { %v320_v26 = vadd.f32 %v439_v24, %v397_v14  ;;  %v314_v28 = vpop.f32.mrb[3].mxu1  ;;  %v295_v29 = vadd.f32 %v397_v14, %v294_v27 }
  0xec   : > { %v315_v30 = vadd.f32 %v397_v14, %v314_v28  ;;  %327 = vst.msk [vmem:[%s172_s4 + $0x18] sm:$0xff] %vm323_vm1, %v300_v25 }
  0xed   : > { %331 = vst.msk [vmem:[%s172_s4 + $0x38] sm:$0xff] %vm323_vm1, %v320_v26  ;;  %326 = vst.msk [vmem:[%s172_s4 + $0x10] sm:$0xff] %vm323_vm1, %v295_v29 }
  0xee   : > { %330 = vst.msk [vmem:[%s172_s4 + $0x30] sm:$0xff] %vm323_vm1, %v315_v30 }
  0xef PF: > { %s13_s12 = sadd.s32 1, %s466_s12  }
  0xf0   : > { %p10_p4 = scmp.ge.s32.totalorder %s13_s12, 4  }
  0xf2   :  { %12 = sbr.rel (!%p10_p4) target bundleno = 1 (0x1), region = 62 }

// kernel: _lambda_.11
= control target key start
LH: loop header
LB: loop body
LE: loop exit
PB: predicated region body
PF: predicated region fallthrough
CT: control target
= control target key end

     0   :  { %s646_s0 = inlined_call_operand.vmem [shape: f32[8,512], index: 0, kind: input, shape index: {}]   ;;  %s647_s1 = inlined_call_operand.vmem [shape: f32[512,16], index: 1, kind: input, shape index: {}]   ;;  %s648_s2 = inlined_call_operand.vmem [shape: f32[1,16], index: 2, kind: input, shape index: {}]   ;;  %s649_s3 = inlined_call_operand.hbm [shape: f32[8,16], index: 3, kind: output, shape index: {}]  }
   0x1   :  { %v35_v0 = vld [vmem:[%s647_s1 + $0x80] sm:$0xff]  ;;  %v36_v1 = vld [vmem:[%s647_s1 + $0x88] sm:$0xff]  ;;  %v37_v11 = vld [vmem:[%s647_s1 + $0x90] sm:$0xff] }
   0x2   :  { %v19_v2 = vld [vmem:[%s647_s1] sm:$0xff]  ;;  %v317_v3 = vpack.c.bf16 %v36_v1, %v35_v0  ;;  %v20_v4 = vld [vmem:[%s647_s1 + $0x8] sm:$0xff]  ;;  %v38_v13 = vld [vmem:[%s647_s1 + $0x98] sm:$0xff] }
   0x3   :  { %v67_v5 = vld [vmem:[%s647_s1 + $0x180] sm:$0xff]  ;;  %v68_v6 = vld [vmem:[%s647_s1 + $0x188] sm:$0xff]  ;;  %v319_v7 = vpack.c.bf16 %v20_v4, %v19_v2  ;;  %v21_v14 = vld [vmem:[%s647_s1 + $0x10] sm:$0xff]  ;;  %v321_v16 = vpack.c.bf16 %v38_v13, %v37_v11 }
   0x4   :  { %v349_v8 = vpack.c.bf16 %v68_v6, %v67_v5  ;;  %v51_v9 = vld [vmem:[%s647_s1 + $0x100] sm:$0xff]  ;;  %v52_v10 = vld [vmem:[%s647_s1 + $0x108] sm:$0xff]  ;;  %318 = vmatprep.subr.bf16.mxu0 %v317_v3  ;;  %v22_v15 = vld [vmem:[%s647_s1 + $0x18] sm:$0xff] }
   0x5   :  { %v351_v12 = vpack.c.bf16 %v52_v10, %v51_v9  ;;  %320 = vmatpush3.bf16.msra.mxu0 %v319_v7  ;;  %v323_v17 = vpack.c.bf16 %v22_v15, %v21_v14  ;;  %v69_v18 = vld [vmem:[%s647_s1 + $0x190] sm:$0xff]  ;;  %v70_v19 = vld [vmem:[%s647_s1 + $0x198] sm:$0xff]  ;;  %v39_v23 = vld [vmem:[%s647_s1 + $0xa0] sm:$0xff] }
   0x6   :  { %350 = vmatprep.subr.bf16.mxu1 %v349_v8  ;;  %v53_v20 = vld [vmem:[%s647_s1 + $0x110] sm:$0xff]  ;;  %v353_v21 = vpack.c.bf16 %v70_v19, %v69_v18  ;;  %v54_v22 = vld [vmem:[%s647_s1 + $0x118] sm:$0xff]  ;;  %v40_v24 = vld [vmem:[%s647_s1 + $0xa8] sm:$0xff]  ;;  %322 = vmatprep.subr.bf16.mxu0 %v321_v16 }
   0x7   :  { %352 = vmatpush3.bf16.msra.mxu1 %v351_v12  ;;  %v355_v25 = vpack.c.bf16 %v54_v22, %v53_v20  ;;  %v325_v26 = vpack.c.bf16 %v40_v24, %v39_v23  ;;  %v23_v27 = vld [vmem:[%s647_s1 + $0x20] sm:$0xff]  ;;  %v24_v28 = vld [vmem:[%s647_s1 + $0x28] sm:$0xff]  ;;  %v41_v35 = vld [vmem:[%s647_s1 + $0xb0] sm:$0xff] }
   0x8   :  { %v71_v29 = vld [vmem:[%s647_s1 + $0x1a0] sm:$0xff]  ;;  %354 = vmatprep.subr.bf16.mxu1 %v353_v21  ;;  %v72_v30 = vld [vmem:[%s647_s1 + $0x1a8] sm:$0xff]  ;;  %v327_v33 = vpack.c.bf16 %v24_v28, %v23_v27  ;;  %v42_v36 = vld [vmem:[%s647_s1 + $0xb8] sm:$0xff] }
   0x9   :  { %v55_v31 = vld [vmem:[%s647_s1 + $0x120] sm:$0xff]  ;;  %v56_v32 = vld [vmem:[%s647_s1 + $0x128] sm:$0xff]  ;;  %324 = vmatpush3.bf16.msra.mxu0 %v323_v17  ;;  %v357_v34 = vpack.c.bf16 %v72_v30, %v71_v29  ;;  %v25_v37 = vld [vmem:[%s647_s1 + $0x30] sm:$0xff]  ;;  %v329_v39 = vpack.c.bf16 %v42_v36, %v41_v35 }
   0xa   :  { %326 = vmatprep.subr.bf16.mxu0 %v325_v26  ;;  %v359_v38 = vpack.c.bf16 %v56_v32, %v55_v31  ;;  %v26_v40 = vld [vmem:[%s647_s1 + $0x38] sm:$0xff]  ;;  %v73_v41 = vld [vmem:[%s647_s1 + $0x1b0] sm:$0xff]  ;;  %v43_v46 = vld [vmem:[%s647_s1 + $0xc0] sm:$0xff] }
   0xb   :  { %356 = vmatpush3.bf16.msra.mxu1 %v355_v25  ;;  %v74_v42 = vld [vmem:[%s647_s1 + $0x1b8] sm:$0xff]  ;;  %v57_v44 = vld [vmem:[%s647_s1 + $0x130] sm:$0xff]  ;;  %v44_v47 = vld [vmem:[%s647_s1 + $0xc8] sm:$0xff]  ;;  %v331_v48 = vpack.c.bf16 %v26_v40, %v25_v37 }
   0xc   :  { %358 = vmatprep.subr.bf16.mxu1 %v357_v34  ;;  %v361_v43 = vpack.c.bf16 %v74_v42, %v73_v41  ;;  %v58_v45 = vld [vmem:[%s647_s1 + $0x138] sm:$0xff]  ;;  %v75_v49 = vld [vmem:[%s647_s1 + $0x1c0] sm:$0xff]  ;;  %v76_v50 = vld [vmem:[%s647_s1 + $0x1c8] sm:$0xff]  ;;  %v333_v52 = vpack.c.bf16 %v44_v47, %v43_v46 }
   0xd   :  { %328 = vmatpush3.bf16.msra.mxu0 %v327_v33  ;;  %v363_v51 = vpack.c.bf16 %v58_v45, %v57_v44  ;;  %v27_v53 = vld [vmem:[%s647_s1 + $0x40] sm:$0xff]  ;;  %v28_v54 = vld [vmem:[%s647_s1 + $0x48] sm:$0xff]  ;;  %v365_v56 = vpack.c.bf16 %v76_v50, %v75_v49  ;;  %v45_v58 = vld [vmem:[%s647_s1 + $0xd0] sm:$0xff] }
   0xe   :  { %330 = vmatprep.subr.bf16.mxu0 %v329_v39  ;;  %v59_v55 = vld [vmem:[%s647_s1 + $0x140] sm:$0xff]  ;;  %v60_v57 = vld [vmem:[%s647_s1 + $0x148] sm:$0xff]  ;;  %v46_v59 = vld [vmem:[%s647_s1 + $0xd8] sm:$0xff]  ;;  %v335_v62 = vpack.c.bf16 %v28_v54, %v27_v53 }
   0xf   :  { %360 = vmatpush3.bf16.msra.mxu1 %v359_v38  ;;  %v77_v60 = vld [vmem:[%s647_s1 + $0x1d0] sm:$0xff]  ;;  %v78_v61 = vld [vmem:[%s647_s1 + $0x1d8] sm:$0xff]  ;;  %v367_v63 = vpack.c.bf16 %v60_v57, %v59_v55  ;;  %v337_v0 = vpack.c.bf16 %v46_v59, %v45_v58  ;;  %v47_v6 = vld [vmem:[%s647_s1 + $0xe0] sm:$0xff] }
  0x10   :  { %362 = vmatprep.subr.bf16.mxu1 %v361_v43  ;;  %v29_v1 = vld [vmem:[%s647_s1 + $0x50] sm:$0xff]  ;;  %v30_v2 = vld [vmem:[%s647_s1 + $0x58] sm:$0xff]  ;;  %v369_v4 = vpack.c.bf16 %v78_v61, %v77_v60  ;;  %v48_v7 = vld [vmem:[%s647_s1 + $0xe8] sm:$0xff] }
  0x11   :  { %332 = vmatpush3.bf16.msra.mxu0 %v331_v48  ;;  %v61_v3 = vld [vmem:[%s647_s1 + $0x150] sm:$0xff]  ;;  %v62_v5 = vld [vmem:[%s647_s1 + $0x158] sm:$0xff]  ;;  %v79_v8 = vld [vmem:[%s647_s1 + $0x1e0] sm:$0xff]  ;;  %v339_v10 = vpack.c.bf16 %v30_v2, %v29_v1  ;;  %v341_v15 = vpack.c.bf16 %v48_v7, %v47_v6 }
  0x12   :  { %334 = vmatprep.subr.bf16.mxu0 %v333_v52  ;;  %v80_v9 = vld [vmem:[%s647_s1 + $0x1e8] sm:$0xff]  ;;  %v31_v11 = vld [vmem:[%s647_s1 + $0x60] sm:$0xff]  ;;  %v371_v14 = vpack.c.bf16 %v62_v5, %v61_v3  ;;  %v49_v17 = vld [vmem:[%s647_s1 + $0xf0] sm:$0xff] }
  0x13   :  { %364 = vmatpush3.bf16.msra.mxu1 %v363_v51  ;;  %v32_v12 = vld [vmem:[%s647_s1 + $0x68] sm:$0xff]  ;;  %v63_v13 = vld [vmem:[%s647_s1 + $0x160] sm:$0xff]  ;;  %v373_v19 = vpack.c.bf16 %v80_v9, %v79_v8  ;;  %v50_v20 = vld [vmem:[%s647_s1 + $0xf8] sm:$0xff] }
  0x14   :  { %366 = vmatprep.subr.bf16.mxu1 %v365_v56  ;;  %v64_v16 = vld [vmem:[%s647_s1 + $0x168] sm:$0xff]  ;;  %v18_v21 = vld [vmem:[%s646_s0 + $0x18] sm:$0xff] }
  0x15   :  { %336 = vmatpush3.bf16.msra.mxu0 %v335_v62  ;;  %v16_v18 = vld [vmem:[%s646_s0 + $0x8] sm:$0xff] }
  0x16   :  { %338 = vmatprep.subr.bf16.mxu0 %v337_v0  ;;  %154 = vmatprep.mubr.f32.mxu0 %v16_v18 }
  0x17   :  { %368 = vmatpush3.bf16.msra.mxu1 %v367_v63 }
  0x18   :  { %370 = vmatprep.subr.bf16.mxu1 %v369_v4 }
  0x19   :  { %8 = vsyncpa [#allocation3], 0  ;;  %v81_v22 = vld [vmem:[%s647_s1 + $0x1f0] sm:$0xff]  ;;  %v82_v23 = vld [vmem:[%s647_s1 + $0x1f8] sm:$0xff]  ;;  %224 = vmatprep.mubr.f32.mxu1 %v18_v21  ;;  %340 = vmatpush3.bf16.msra.mxu0 %v339_v10  ;;  %v343_v24 = vpack.c.bf16 %v32_v12, %v31_v11  ;;  %v375_v25 = vpack.c.bf16 %v64_v16, %v63_v13  ;;  %v345_v26 = vpack.c.bf16 %v50_v20, %v49_v17  ;;  %s406_s14 = smov [#allocation2]   ;;  %vm230_vm0 = vcmask 130048  }
  0x1a   :  { %342 = vmatprep.subr.bf16.mxu0 %v341_v15  ;;  %v33_v27 = vld [vmem:[%s647_s1 + $0x70] sm:$0xff]  ;;  %v34_v28 = vld [vmem:[%s647_s1 + $0x78] sm:$0xff]  ;;  %v377_v29 = vpack.c.bf16 %v82_v23, %v81_v22  ;;  %v15_v34 = vld [vmem:[%s646_s0] sm:$0xff]  ;;  %s238_s15 = sshll.u32 %s406_s14, 4  ;;  %s239_s15 = int_to_ptr.vmem [resolvable:$true] %s238_s15 }
  0x1b   :  { %372 = vmatpush3.bf16.msra.mxu1 %v371_v14  ;;  %v65_v30 = vld [vmem:[%s647_s1 + $0x170] sm:$0xff]  ;;  %v66_v31 = vld [vmem:[%s647_s1 + $0x178] sm:$0xff]  ;;  %v347_v32 = vpack.c.bf16 %v34_v28, %v33_v27  ;;  %v246_v37 = vld [vmem:[%s648_s2] ss:$0 sm:$0xff]  ;;  %p387_p1 = scmp.lt.s32.totalorder %s239_s15, %s239_s15 }
  0x1c   :  { %374 = vmatprep.subr.bf16.mxu1 %v373_v19  ;;  %v379_v33 = vpack.c.bf16 %v66_v31, %v65_v30  ;;  %v17_v35 = vld [vmem:[%s646_s0 + $0x10] sm:$0xff]  ;;  %s382_s0 = scalar_lea.vmem %s239_s15, 128 }
  0x1d   :  { %344 = vmatpush3.bf16.msra.mxu0 %v343_v24  ;;  %p383_p0 = scmp.ne.s32.totalorder %s239_s15, %s382_s0  ;;  %p388_p2 = scmp.lt.s32.totalorder %s382_s0, %s382_s0 }
  0x1e   :  { %346 = vmatprep.subr.bf16.mxu0 %v345_v26 }
  0x1f   :  { %376 = vmatpush3.bf16.msra.mxu1 %v375_v25  ;;  %p389_p3 = por %p388_p2, %p387_p1 }
  0x20   :  { %378 = vmatprep.subr.bf16.mxu1 %v377_v29 }
  0x21   :  { %348 = vmatpush3.bf16.msra.mxu0 %v347_v32  ;;  %p390_p4 = pnand %p389_p3, %p383_p0 }
  0x23   :  { %380 = vmatpush3.bf16.msra.mxu1 %v379_v33 }
  0x24   :  { %155 = vmatmul.mubr.f32.vlgmr.msra.gmra.mrb[0].mxu0 %v15_v34 }
  0x26   :  { %225 = vmatmul.mubr.f32.vlgmr.msra.gmra.mrb[0].mxu1 %v17_v35 }
  0xf7   :  { %v279_v36 = vpop.f32.mrb[0].mxu0 }
  0xf8   :  { %v280_v38 = vpop.f32.mrb[1].mxu0 }
  0xf9   :  { %v314_v39 = vpop.f32.mrb[0].mxu1  ;;  %v281_v40 = vadd.f32 %v280_v38, %v279_v36 }
  0xfa   :  { %v315_v41 = vpop.f32.mrb[1].mxu1 }
  0xfb   :  { %v316_v42 = vadd.f32 %v315_v41, %v314_v39  ;;  %v157_v43 = vadd.f32 %v281_v40, %v246_v37 }
  0xfd   :  { %v227_v44 = vadd.f32 %v316_v42, %v157_v43 }
  0xff   :  { %231 = vst.msk [vmem:[#allocation2] sm:$0xff] %vm230_vm0, %v227_v44 }
 0x100   :  { %393 = shalt.err (!%p390_p4)
}
 0x101   :  { %s394_s17 = scalar_lea.hbm %s649_s3, 128 }
 0x102   :  { %p395_p5 = scmp.ne.s32.totalorder %s649_s3, %s394_s17  ;;  %p398_p6 = scmp.lt.u32.totalorder %s394_s17, %s649_s3 }
 0x104   :  { %p400_p7 = pnand %p398_p6, %p395_p5 }
 0x106   :  { %403 = shalt.err (!%p400_p7)
}
 0x107   :  { %241 = dma.vmem_to_hbm [thread:$0]  %s239_s15, 128, %s649_s3, [#allocation3]  }
 0x108   :  { %404 = dma.done.wait [#allocation3], 128  }
 0x109   :  { %405 = vsyncadd [#allocation3], 4294967168 }
 0x10a   :  { %245 = vsyncpa [#allocation3], 1 }

// kernel: _lambda_.6
= control target key start
LH: loop header
LB: loop body
LE: loop exit
PB: predicated region body
PF: predicated region fallthrough
CT: control target
= control target key end

     0   :  { %s6011_s25 = smov 0   ;;  %s6845_s0 = inlined_call_operand.vmem [shape: f32[128,32], index: 0, kind: input, shape index: {}]   ;;  %s6846_s1 = inlined_call_operand.vmem [shape: f32[32,96], index: 1, kind: input, shape index: {}]   ;;  %s6847_s2 = inlined_call_operand.vmem [shape: f32[1,96], index: 2, kind: input, shape index: {}]   ;;  %s6848_s3 = inlined_call_operand.vmem [shape: f32[32,32], index: 3, kind: input, shape index: {}]   ;;  %s6849_s4 = inlined_call_operand.vmem [shape: f32[1,32], index: 4, kind: input, shape index: {}]   ;;  %s6850_s5 = inlined_call_operand.vmem [shape: f32[1,32], index: 5, kind: input, shape index: {}]   ;;  %s6851_s6 = inlined_call_operand.vmem [shape: f32[1,32], index: 6, kind: input, shape index: {}]   ;;  %s6852_s7 = inlined_call_operand.vmem [shape: f32[32,64], index: 7, kind: input, shape index: {}]   ;;  %s6853_s8 = inlined_call_operand.vmem [shape: f32[1,64], index: 8, kind: input, shape index: {}]   ;;  %s6854_s9 = inlined_call_operand.vmem [shape: f32[64,32], index: 9, kind: input, shape index: {}]   ;;  %s6855_s10 = inlined_call_operand.vmem [shape: f32[1,32], index: 10, kind: input, shape index: {}]   ;;  %s6856_s11 = inlined_call_operand.vmem [shape: f32[1,32], index: 11, kind: input, shape index: {}]   ;;  %s6857_s12 = inlined_call_operand.vmem [shape: f32[1,32], index: 12, kind: input, shape index: {}]   ;;  %s6858_s13 = inlined_call_operand.vmem [shape: f32[128,32], index: 13, kind: output, shape index: {}]  }
   0x1 LB: > { %s4730_s26 = sadd.s32 4294967295, %s5925_s25   ;;  %p4734_p0 = scmp.ge.s32.totalorder %s5925_s25, 1  ;;  %s5925_s25 = sphi %s6011_s25, %s23_s25  }
   0x2   : > { %p388_p1 = scmp.lt.s32.totalorder %s5925_s25, 3 }
   0x4   : > { %p389_p2 = pnand %p4734_p0, %p388_p1 }
   0x5   : > { %v452_v0 = vld [vmem:[%s6846_s1] sm:$0xff] (!%p389_p2)  ;;  %v453_v1 = vld [vmem:[%s6846_s1 + $0x8] sm:$0xff] (!%p389_p2)  ;;  %v454_v2 = vld [vmem:[%s6846_s1 + $0x10] sm:$0xff] (!%p389_p2)  ;;  %s4735_s16 = sshll.u32 (!%p389_p2), %s4730_s26, 3  ;;  %vm463_vm0 = vcmask (!%p389_p2), 261120   ;;  %vm601_vm1 = vcmask (!%p389_p2), 64512  }
   0x6   : > { %392 = sbr.rel (%p389_p2) target bundleno = 10104 (0x2778), region = 72  ;;  %v5369_v3 = vpack.c.bf16 (!%p389_p2), %v453_v1, %v452_v0  ;;  %v455_v4 = vld [vmem:[%s6846_s1 + $0x18] sm:$0xff] (!%p389_p2)  ;;  %p433_p3 = scmp.lt.s32.totalorder (!%p389_p2), %s4735_s16, 15  ;;  %v4739_v14 = vld [vmem:[%s6847_s2] ss:$0 sm:$0xff] (!%p389_p2)  ;;  %vm6070_vm2 = vmpackc.low (!%p389_p2), %vm601_vm1, %vm601_vm1  ;;  %vm687_vm3 = vcmask (!%p389_p2), 130048  }
   0x7   : > { %v5373_v5 = vpack.c.bf16 (!%p389_p2), %v455_v4, %v454_v2  ;;  %s5927_s26 = smov (!%p389_p2), 96   ;;  %s5928_s27 = smov (!%p389_p2), 64   ;;  %vm1425_vm4 = vcmask (!%p389_p2), 195584   ;;  %vm4379_vm5 = vcmask (!%p389_p2), 523264  }
   0x8   : > { %5370 = vmatprep.subr.bf16.mxu0 (!%p389_p2), %v5369_v3  ;;  %s5929_s28 = smov (!%p389_p2), 88   ;;  %s5930_s29 = smov (!%p389_p2), 80  }
   0x9   : > { %5372 = vmatpush3.bf16.msra.mxu0 (!%p389_p2), %v5369_v3  ;;  %s5931_s30 = smov (!%p389_p2), 120   ;;  %s5932_s14 = smov (!%p389_p2), 112  }
   0xa   : > { %5374 = vmatprep.subr.bf16.mxu0 (!%p389_p2), %v5373_v5  ;;  %s5933_s15 = smov (!%p389_p2), 56   ;;  %s5934_s17 = smov (!%p389_p2), 72  }
   0xb   : > { %s5935_s18 = smov (!%p389_p2), 48   ;;  %s5936_s20 = smov (!%p389_p2), 104  }
   0xc   : > { %s5937_s21 = smov (!%p389_p2), 40   ;;  %s5938_s23 = smov (!%p389_p2), 8  }
   0xd   : > { %s6862_s16 = smov (!%p433_p3, %s4735_s16), 15  ;;  %5376 = vmatpush3.bf16.msra.mxu0 %v5373_v5  ;;  %s5939_s24 = smov 16  }
   0xe   : > { %s4736_s19 = sshll.u32 %s6862_s16, 3 }
   0xf   : > { %s6039_s22 = scalar_lea.vmem %s6845_s0, %s4736_s19 }
  0x10   : > { %v444_v6 = vld [vmem:[%s6039_s22] sm:$0xff]  ;;  %v445_v7 = vld [vmem:[%s6039_s22 + $0x8] sm:$0xff]  ;;  %v446_v8 = vld [vmem:[%s6039_s22 + $0x10] sm:$0xff] }
  0x11   : > { %5065 = vmatprep.mubr.msk.f32.mxu0 %vm463_vm0, %v444_v6  ;;  %v447_v9 = vld [vmem:[%s6039_s22 + $0x18] sm:$0xff]  ;;  %v448_v10 = vld [vmem:[%s6039_s22 + $0x20] sm:$0xff]  ;;  %v449_v11 = vld [vmem:[%s6039_s22 + $0x28] sm:$0xff] }
  0x12   : > { %5066 = vmatmul.mubr.msk.f32.vlgmr.msra.gmra.mrb[0].mxu0 %vm463_vm0, %v445_v7  ;;  %v450_v12 = vld [vmem:[%s6039_s22 + $0x30] sm:$0xff]  ;;  %v451_v13 = vld [vmem:[%s6039_s22 + $0x38] sm:$0xff] }
  0x13   : > { %5068 = vmatprep.mubr.msk.f32.mxu0 %vm463_vm0, %v446_v8 }
  0x16   : > { %5069 = vmatmul.mubr.msk.f32.gmra.mrb[2].mxu0 %vm463_vm0, %v447_v9 }
  0x17   : > { %5071 = vmatprep.mubr.msk.f32.mxu0 %vm463_vm0, %v448_v10 }
  0x1a   : > { %5072 = vmatmul.mubr.msk.f32.gmra.mrb[4].mxu0 %vm463_vm0, %v449_v11 }
  0x1b   : > { %5074 = vmatprep.mubr.msk.f32.mxu0 %vm463_vm0, %v450_v12 }
  0x1e   : > { %5075 = vmatmul.mubr.msk.f32.gmra.mrb[6].mxu0 %vm463_vm0, %v451_v13 }
  0xe5   : > { %v5067_v15 = vpop.f32.mrb[0].mxu0 }
  0xe6   : > { %v560_v16 = vadd.f32 %v5067_v15, %v4739_v14  ;;  %v554_v17 = vpop.f32.mrb[1].mxu0 }
  0xe7   : > { %v555_v18 = vadd.f32 %v4739_v14, %v554_v17 }
  0xe8   : > { %v6078_v32 = vmul.f32 0.35355338, %v560_v16 }
  0xe9   : > { %v6060_v19 = vpack.i.bf16 %v560_v16, %v555_v18  ;;  %v6062_v20 = vmul.f32 0.35355338, %v555_v18  ;;  %v5070_v21 = vpop.f32.mrb[2].mxu0 }
  0xea   : > { %v564_v22 = vpop.f32.mrb[3].mxu0  ;;  %v6082_v33 = vadd.f32 %v5070_v21, %v4739_v14 }
  0xeb   : > { %5592 = vrot.lane.b32.xlu0 %v6060_v19, %s5927_s26  ;;  %5081 = vmatprep.mubr.msk.f32.mxu0 %vm601_vm1, %v6062_v20  ;;  %v6084_v34 = vadd.f32 %v4739_v14, %v564_v22 }
  0xed   : > { %v5073_v23 = vpop.f32.mrb[4].mxu0  ;;  %v6092_v37 = vpack.i.bf16 %v6082_v33, %v6084_v34 }
  0xee   : > { %v574_v24 = vpop.f32.mrb[5].mxu0  ;;  %v6086_v35 = vadd.f32 %v5073_v23, %v4739_v14 }
  0xef   : > { %v6088_v36 = vadd.f32 %v4739_v14, %v574_v24 }
  0xf1   : > { %v5076_v25 = vpop.f32.mrb[6].mxu0  ;;  %v6100_v40 = vpack.i.bf16 %v6086_v35, %v6088_v36 }
  0xf2   : > { %v584_v26 = vpop.f32.mrb[7].mxu0  ;;  %v6094_v38 = vadd.f32 %v5076_v25, %v4739_v14 }
  0xf3   : > { %v6096_v39 = vadd.f32 %v4739_v14, %v584_v26 }
  0xf5   : > { %v6104_v41 = vpack.i.bf16 %v6094_v38, %v6096_v39 }
 0x15d   : > { %v5593_v27 = vpop.permute.xlu0 %5592 }
 0x15e   : > { %v5595_v28 = vunpack.i.h.bf16 %v5593_v27  ;;  %v5594_v29 = vunpack.i.l.bf16 %v5593_v27 }
 0x160   : > { %v5377_v31 = vpack.c.bf16 %v5595_v28, %v5594_v29 }
 0x162   : > { %5379 = vmatprep.subr.msk.bf16.mxu0 %vm6070_vm2, %v5377_v31 }
 0x163   : > { %5382 = vmatpush3.bf16.xpose.msk.msra.mxu0 %vm6070_vm2, %v5377_v31 }
 0x16a   : > { %5082 = vmatmul.mubr.msk.f32.vlgmr.msra.gmra.mrb[8].mxu0 %vm601_vm1, %v6078_v32 }
 0x23d   : > { %v5083_v42 = vpop.f32.mrb[8].mxu0 }
 0x23e   : > { %v678_v43 = vpop.f32.mrb[9].mxu0  ;;  %v691_v44 = vsel %vm687_vm3, %v5083_v42, -inf }
 0x23f   : > { %692 = vmax.xlane.f32.xlu1 %v691_v44  ;;  %v688_v45 = vsel %vm687_vm3, %v678_v43, -inf }
 0x240   : > { %689 = vmax.xlane.f32.xlu0 %v688_v45 }
 0x250   : > { %5597 = vrot.lane.b32.xlu1 %v6060_v19, %s5928_s27 }
 0x254   : > { %5602 = vrot.lane.b32.xlu1 %v6060_v19, %s5929_s28 }
 0x256   : > { %5607 = vrot.lane.b32.xlu0 %v6060_v19, %s5930_s29 }
 0x258   : > { %797 = vrot.lane.b32.xlu1 %v6062_v20, %s5931_s30 }
 0x2cc   : > { %v693_v46 = vpop.xlane.xlu1 %692 }
 0x2cd   : > { %v695_v47 = vsub.f32 %v5083_v42, %v693_v46  ;;  %v690_v48 = vpop.xlane.xlu0 %689 }
 0x2ce   : > { %v694_v49 = vsub.f32 %v678_v43, %v690_v48 }
 0x2cf   : > { %v698_v50 = vmul.f32 1.442695, %v695_v47 }
 0x2d0   : > { %v696_v51 = vmul.f32 1.442695, %v694_v49  ;;  %v5598_v52 = vpop.permute.xlu1 %5597 }
 0x2d1   : > { %5751 = vpow2.f32 %v698_v50  ;;  %v5600_v53 = vunpack.i.h.bf16 %v5598_v52  ;;  %v5599_v54 = vunpack.i.l.bf16 %v5598_v52  ;;  %v5608_v3 = vpop.permute.xlu0 %5607 }
 0x2d2   : > { %5753 = vpow2.f32 %v696_v51  ;;  %v5610_v6 = vunpack.i.h.bf16 %v5608_v3  ;;  %v5609_v7 = vunpack.i.l.bf16 %v5608_v3 }
 0x2d3   : > { %v5383_v55 = vpack.c.bf16 %v5600_v53, %v5599_v54 }
 0x2d4   : > { %v5603_v56 = vpop.permute.xlu1 %5602  ;;  %v5397_v10 = vpack.c.bf16 %v5610_v6, %v5609_v7 }
 0x2d5   : > { %v5605_v57 = vunpack.i.h.bf16 %v5603_v56  ;;  %v5604_v58 = vunpack.i.l.bf16 %v5603_v56  ;;  %5384 = vmatprep.subr.bf16.mxu1 %v5383_v55 }
 0x2d6   : > { %5386 = vmatpush3.bf16.msra.mxu1 %v5383_v55 }
 0x2d7   : > { %v5387_v59 = vpack.c.bf16 %v5605_v57, %v5604_v58 }
 0x2d8   : > { %v798_v0 = vpop.permute.xlu1 %797 }
 0x2d9   : > { %5389 = vmatprep.subr.msk.bf16.mxu1 %vm6070_vm2, %v5387_v59 }
 0x2db   : > { %v5752_v60 = vpop.eup %5751 }
 0x2dc   : > { %v703_v61 = vsel %vm687_vm3, %v5752_v60, 0.0  ;;  %v5754_v62 = vpop.eup %5753 }
 0x2dd   : > { %704 = vadd.xlane.f32.xlu1 %v703_v61  ;;  %v700_v63 = vsel %vm687_vm3, %v5754_v62, 0.0 }
 0x2e1   : > { %701 = vadd.xlane.f32.xlu1 %v700_v63 }
 0x2f2   : > { %799 = vrot.lane.b32.xlu1 %v6078_v32, %s5931_s30 }
 0x2f6   : > { %997 = vrot.lane.b32.xlu1 %v6062_v20, %s5932_s14 }
 0x2fa   : > { %999 = vrot.lane.b32.xlu1 %v6078_v32, %s5932_s14 }
 0x36a   : > { %v705_v1 = vpop.xlane.xlu1 %704 }
 0x36b   : > { %5755 = vrcp.f32 %v705_v1 }
 0x36e   : > { %v702_v2 = vpop.xlane.xlu1 %701 }
 0x36f   : > { %5757 = vrcp.f32 %v702_v2 }
 0x372   : > { %v800_v11 = vpop.permute.xlu1 %799 }
 0x375   : > { %v5756_v4 = vpop.eup %5755 }
 0x376   : > { %v709_v9 = vmul.f32 %v5756_v4, %v5752_v60  ;;  %v998_v12 = vpop.permute.xlu1 %997 }
 0x379   : > { %v5758_v5 = vpop.eup %5757 }
 0x37a   : > { %v708_v8 = vmul.f32 %v5758_v5, %v5754_v62  ;;  %v1000_v13 = vpop.permute.xlu1 %999 }
 0x37c   : > { %5088 = vmatprep.mubr.msk.f32.mxu1 %vm687_vm3, %v708_v8 }
 0x37d   : > { %5089 = vmatmul.mubr.msk.f32.vlgmr.msra.gmra.mrb[0].mxu1 %vm687_vm3, %v709_v9 }
 0x37e   : > { %5392 = vmatpush3.bf16.xpose.msk.msra.mxu1 %vm6070_vm2, %v5387_v59  ;;  %5095 = vmatprep.mubr.msk.f32.mxu1 %vm601_vm1, %v798_v0 }
 0x37f   : > { %5399 = vmatprep.subr.msk.bf16.mxu1 %vm6070_vm2, %v5397_v10 }
 0x385   : > { %5096 = vmatmul.mubr.msk.f32.vlgmr.msra.gmra.mrb[2].mxu1 %vm601_vm1, %v800_v11 }
 0x386   : > { %5402 = vmatpush3.bf16.xpose.msk.msra.mxu1 %vm6070_vm2, %v5397_v10  ;;  %5109 = vmatprep.mubr.msk.f32.mxu1 %vm601_vm1, %v998_v12 }
 0x38d   : > { %5110 = vmatmul.mubr.msk.f32.vlgmr.msra.gmra.mrb[4].mxu1 %vm601_vm1, %v1000_v13 }
 0x450   : > { %v6138_v14 = vpop.f32.mrb[0].mxu1 }
 0x451   : > { %v6140_v15 = vpop.f32.mrb[1].mxu1 }
 0x458   : > { %v5097_v16 = vpop.f32.mrb[2].mxu1 }
 0x459   : > { %v879_v17 = vpop.f32.mrb[3].mxu1  ;;  %v891_v18 = vsel %vm687_vm3, %v5097_v16, -inf }
 0x45a   : > { %892 = vmax.xlane.f32.xlu0 %v891_v18  ;;  %v888_v21 = vsel %vm687_vm3, %v879_v17, -inf }
 0x45b   : > { %889 = vmax.xlane.f32.xlu1 %v888_v21 }
 0x460   : > { %v5111_v22 = vpop.f32.mrb[4].mxu1 }
 0x461   : > { %v1079_v23 = vpop.f32.mrb[5].mxu1  ;;  %v1091_v24 = vsel %vm687_vm3, %v5111_v22, -inf }
 0x462   : > { %1092 = vmax.xlane.f32.xlu0 %v1091_v24  ;;  %v1088_v25 = vsel %vm687_vm3, %v1079_v23, -inf }
 0x463   : > { %1089 = vmax.xlane.f32.xlu1 %v1088_v25 }
 0x474   : > { %5612 = vrot.lane.b32.xlu1 %v6060_v19, %s5933_s15 }
 0x4e7   : > { %v893_v26 = vpop.xlane.xlu0 %892 }
 0x4e8   : > { %v895_v27 = vsub.f32 %v5097_v16, %v893_v26  ;;  %v890_v28 = vpop.xlane.xlu1 %889 }
 0x4e9   : > { %v894_v29 = vsub.f32 %v879_v17, %v890_v28 }
 0x4ea   : > { %v898_v31 = vmul.f32 1.442695, %v895_v27 }
 0x4eb   : > { %v896_v42 = vmul.f32 1.442695, %v894_v29 }
 0x4ec   : > { %5759 = vpow2.f32 %v898_v31 }
 0x4ed   : > { %5761 = vpow2.f32 %v896_v42 }
 0x4ef   : > { %v1093_v43 = vpop.xlane.xlu0 %1092 }
 0x4f0   : > { %v1095_v44 = vsub.f32 %v5111_v22, %v1093_v43  ;;  %v1090_v45 = vpop.xlane.xlu1 %1089 }
 0x4f1   : > { %v1094_v57 = vsub.f32 %v1079_v23, %v1090_v45 }
 0x4f2   : > { %v1098_v46 = vmul.f32 1.442695, %v1095_v44 }
 0x4f3   : > { %v1096_v58 = vmul.f32 1.442695, %v1094_v57 }
 0x4f4   : > { %5763 = vpow2.f32 %v1098_v46  ;;  %v5613_v47 = vpop.permute.xlu1 %5612 }
 0x4f5   : > { %v5615_v48 = vunpack.i.h.bf16 %v5613_v47  ;;  %v5614_v49 = vunpack.i.l.bf16 %v5613_v47  ;;  %5765 = vpow2.f32 %v1096_v58 }
 0x4f6   : > { %v5760_v50 = vpop.eup %5759 }
 0x4f7   : > { %v5762_v51 = vpop.eup %5761  ;;  %v903_v52 = vsel %vm687_vm3, %v5760_v50, 0.0  ;;  %v5393_v53 = vpack.c.bf16 %v5615_v48, %v5614_v49 }
 0x4f8   : > { %904 = vadd.xlane.f32.xlu0 %v903_v52  ;;  %v900_v54 = vsel %vm687_vm3, %v5762_v51, 0.0 }
 0x4f9   : > { %901 = vadd.xlane.f32.xlu1 %v900_v54  ;;  %5394 = vmatprep.subr.bf16.mxu0 %v5393_v53 }
 0x4fa   : > { %5396 = vmatpush3.bf16.msra.mxu0 %v5393_v53 }
 0x4fe   : > { %v5764_v55 = vpop.eup %5763 }
 0x4ff   : > { %v1103_v56 = vsel %vm687_vm3, %v5764_v55, 0.0  ;;  %v5766_v59 = vpop.eup %5765 }
 0x500   : > { %1104 = vadd.xlane.f32.xlu0 %v1103_v56  ;;  %v1100_v60 = vsel %vm687_vm3, %v5766_v59, 0.0 }
 0x50a   : > { %5622 = vrot.lane.b32.xlu1 %v6060_v19, %s5934_s17 }
 0x516   : > { %5617 = vrot.lane.b32.xlu0 %v6060_v19, %s5935_s18 }
 0x51a   : > { %1199 = vrot.lane.b32.xlu0 %v6078_v32, %s5936_s20 }
 0x52e   : > { %1101 = vadd.xlane.f32.xlu1 %v1100_v60 }
 0x53f   : > { %1197 = vrot.lane.b32.xlu1 %v6062_v20, %s5936_s20 }
 0x585   : > { %v905_v61 = vpop.xlane.xlu0 %904 }
 0x586   : > { %5767 = vrcp.f32 %v905_v61  ;;  %v902_v62 = vpop.xlane.xlu1 %901 }
 0x587   : > { %5769 = vrcp.f32 %v902_v62 }
 0x58a   : > { %v5623_v0 = vpop.permute.xlu1 %5622 }
 0x58b   : > { %v5625_v3 = vunpack.i.h.bf16 %v5623_v0  ;;  %v5624_v32 = vunpack.i.l.bf16 %v5623_v0  ;;  %v6198_v0 = vmul.f32 0.35355338, %v6082_v33 }
 0x58d   : > { %v1105_v63 = vpop.xlane.xlu0 %1104  ;;  %v5407_v20 = vpack.c.bf16 %v5625_v3, %v5624_v32 }
 0x58e   : > { %5771 = vrcp.f32 %v1105_v63  ;;  %v6190_v63 = vmul.f32 0.35355338, %v6084_v34 }
 0x590   : > { %v5768_v1 = vpop.eup %5767 }
 0x591   : > { %v5770_v2 = vpop.eup %5769  ;;  %v5618_v4 = vpop.permute.xlu0 %5617  ;;  %v909_v8 = vmul.f32 %v5768_v1, %v5760_v50 }
 0x592   : > { %v5620_v5 = vunpack.i.h.bf16 %v5618_v4  ;;  %v5619_v6 = vunpack.i.l.bf16 %v5618_v4  ;;  %v908_v7 = vmul.f32 %v5770_v2, %v5762_v51 }
 0x594   : > { %5102 = vmatprep.mubr.msk.f32.mxu0 %vm687_vm3, %v908_v7  ;;  %v5403_v9 = vpack.c.bf16 %v5620_v5, %v5619_v6 }
 0x595   : > { %5103 = vmatmul.mubr.msk.f32.vlgmr.msra.gmra.mrb[10].mxu0 %vm687_vm3, %v909_v8  ;;  %v1200_v18 = vpop.permute.xlu0 %1199 }
 0x596   : > { %5404 = vmatprep.subr.bf16.mxu0 %v5403_v9 }
 0x597   : > { %5406 = vmatpush3.bf16.msra.mxu0 %v5403_v9 }
 0x598   : > { %5409 = vmatprep.subr.msk.bf16.mxu0 %vm6070_vm2, %v5407_v20  ;;  %v5772_v11 = vpop.eup %5771 }
 0x599   : > { %v1109_v16 = vmul.f32 %v5772_v11, %v5764_v55 }
 0x5bb   : > { %v1102_v10 = vpop.xlane.xlu1 %1101 }
 0x5bc   : > { %5773 = vrcp.f32 %v1102_v10 }
 0x5bf   : > { %v1198_v17 = vpop.permute.xlu1 %1197 }
 0x5c6   : > { %v5774_v12 = vpop.eup %5773 }
 0x5c7   : > { %v1108_v13 = vmul.f32 %v5774_v12, %v5766_v59 }
 0x5c9   : > { %5116 = vmatprep.mubr.msk.f32.mxu0 %vm687_vm3, %v1108_v13 }
 0x5ca   : > { %5117 = vmatmul.mubr.msk.f32.vlgmr.msra.gmra.mrb[12].mxu0 %vm687_vm3, %v1109_v16 }
 0x5cb   : > { %5412 = vmatpush3.bf16.xpose.msk.msra.mxu0 %vm6070_vm2, %v5407_v20  ;;  %5123 = vmatprep.mubr.msk.f32.mxu0 %vm601_vm1, %v1198_v17 }
 0x5d2   : > { %5124 = vmatmul.mubr.msk.f32.vlgmr.msra.gmra.mrb[14].mxu0 %vm601_vm1, %v1200_v18 }
 0x668   : > { %v6170_v21 = vpop.f32.mrb[10].mxu0 }
 0x669   : > { %v6172_v22 = vpop.f32.mrb[11].mxu0 }
 0x69d   : > { %v6174_v23 = vpop.f32.mrb[12].mxu0 }
 0x69e   : > { %v6176_v24 = vpop.f32.mrb[13].mxu0 }
 0x6a5   : > { %v5125_v25 = vpop.f32.mrb[14].mxu0 }
 0x6a6   : > { %v1279_v26 = vpop.f32.mrb[15].mxu0  ;;  %v1291_v27 = vsel %vm687_vm3, %v5125_v25, -inf }
 0x6a7   : > { %1292 = vmax.xlane.f32.xlu0 %v1291_v27  ;;  %v1288_v28 = vsel %vm687_vm3, %v1279_v26, -inf }
 0x6a8   : > { %1289 = vmax.xlane.f32.xlu1 %v1288_v28 }
 0x734   : > { %v1293_v29 = vpop.xlane.xlu0 %1292 }
 0x735   : > { %v1295_v31 = vsub.f32 %v5125_v25, %v1293_v29  ;;  %v1290_v42 = vpop.xlane.xlu1 %1289 }
 0x736   : > { %v1294_v43 = vsub.f32 %v1279_v26, %v1290_v42 }
 0x737   : > { %v1298_v44 = vmul.f32 1.442695, %v1295_v31 }
 0x738   : > { %v1296_v45 = vmul.f32 1.442695, %v1294_v43 }
 0x739   : > { %5775 = vpow2.f32 %v1298_v44 }
 0x73a   : > { %5777 = vpow2.f32 %v1296_v45 }
 0x743   : > { %v5776_v46 = vpop.eup %5775 }
 0x744   : > { %v5778_v47 = vpop.eup %5777  ;;  %v1303_v48 = vsel %vm687_vm3, %v5776_v46, 0.0 }
 0x745   : > { %1304 = vadd.xlane.f32.xlu1 %v1303_v48  ;;  %v1300_v49 = vsel %vm687_vm3, %v5778_v47, 0.0 }
 0x746   : > { %1301 = vadd.xlane.f32.xlu0 %v1300_v49 }
 0x756   : > { %5632 = vrot.lane.b32.xlu1 %v6092_v37, %s5927_s26 }
 0x75c   : > { %5627 = vrot.lane.b32.xlu0 %v6060_v19, %s5937_s21 }
 0x7d2   : > { %v1305_v50 = vpop.xlane.xlu1 %1304 }
 0x7d3   : > { %5779 = vrcp.f32 %v1305_v50  ;;  %v1302_v51 = vpop.xlane.xlu0 %1301 }
 0x7d4   : > { %5781 = vrcp.f32 %v1302_v51 }
 0x7d6   : > { %v5633_v52 = vpop.permute.xlu1 %5632 }
 0x7d7   : > { %v5628_v53 = vpop.permute.xlu0 %5627  ;;  %v5635_v54 = vunpack.i.h.bf16 %v5633_v52  ;;  %v5634_v55 = vunpack.i.l.bf16 %v5633_v52 }
 0x7d8   : > { %v5630_v56 = vunpack.i.h.bf16 %v5628_v53  ;;  %v5629_v57 = vunpack.i.l.bf16 %v5628_v53 }
 0x7d9   : > { %v5417_v59 = vpack.c.bf16 %v5635_v54, %v5634_v55 }
 0x7da   : > { %v5413_v58 = vpack.c.bf16 %v5630_v56, %v5629_v57 }
 0x7dc   : > { %5414 = vmatprep.subr.bf16.mxu1 %v5413_v58 }
 0x7dd   : > { %v5780_v60 = vpop.eup %5779  ;;  %5416 = vmatpush3.bf16.msra.mxu1 %v5413_v58 }
 0x7de   : > { %v5782_v61 = vpop.eup %5781  ;;  %5419 = vmatprep.subr.msk.bf16.mxu1 %vm6070_vm2, %v5417_v59  ;;  %v1309_v62 = vmul.f32 %v5780_v60, %v5776_v46 }
 0x7df   : > { %v1308_v19 = vmul.f32 %v5782_v61, %v5778_v47 }
 0x7e1   : > { %5130 = vmatprep.mubr.msk.f32.mxu1 %vm687_vm3, %v1308_v19 }
 0x7e2   : > { %5131 = vmatmul.mubr.msk.f32.vlgmr.msra.gmra.mrb[6].mxu1 %vm687_vm3, %v1309_v62 }
 0x7e3   : > { %5137 = vmatprep.mubr.msk.f32.mxu1 %vm601_vm1, %v6190_v63 }
 0x7e6   : > { %5422 = vmatpush3.bf16.xpose.msk.msra.mxu1 %vm6070_vm2, %v5417_v59 }
 0x7ed   : > { %5138 = vmatmul.mubr.msk.f32.vlgmr.msra.gmra.mrb[8].mxu1 %vm601_vm1, %v6198_v0 }
 0x8b5   : > { %v6202_v1 = vpop.f32.mrb[6].mxu1 }
 0x8b6   : > { %v6204_v2 = vpop.f32.mrb[7].mxu1 }
 0x8c0   : > { %v5139_v34 = vpop.f32.mrb[8].mxu1 }
 0x8c1   : > { %v1514_v3 = vpop.f32.mrb[9].mxu1  ;;  %v1526_v4 = vsel %vm687_vm3, %v5139_v34, -inf }
 0x8c2   : > { %1527 = vmax.xlane.f32.xlu0 %v1526_v4  ;;  %v1523_v32 = vsel %vm687_vm3, %v1514_v3, -inf }
 0x8c3   : > { %1524 = vmax.xlane.f32.xlu1 %v1523_v32 }
 0x94f   : > { %v1528_v5 = vpop.xlane.xlu0 %1527 }
 0x950   : > { %v1530_v6 = vsub.f32 %v5139_v34, %v1528_v5  ;;  %v1525_v7 = vpop.xlane.xlu1 %1524 }
 0x951   : > { %v1529_v33 = vsub.f32 %v1514_v3, %v1525_v7 }
 0x952   : > { %v1533_v8 = vmul.f32 1.442695, %v1530_v6 }
 0x953   : > { %v1531_v9 = vmul.f32 1.442695, %v1529_v33 }
 0x954   : > { %5783 = vpow2.f32 %v1533_v8 }
 0x955   : > { %5785 = vpow2.f32 %v1531_v9 }
 0x95e   : > { %v5784_v20 = vpop.eup %5783 }
 0x95f   : > { %v5786_v10 = vpop.eup %5785  ;;  %v1538_v11 = vsel %vm687_vm3, %v5784_v20, 0.0 }
 0x960   : > { %1539 = vadd.xlane.f32.xlu1 %v1538_v11  ;;  %v1535_v12 = vsel %vm687_vm3, %v5786_v10, 0.0 }
 0x961   : > { %1536 = vadd.xlane.f32.xlu0 %v1535_v12 }
 0x971   : > { %5642 = vrot.lane.b32.xlu1 %v6092_v37, %s5929_s28 }
 0x975   : > { %1632 = vrot.lane.b32.xlu1 %v6190_v63, %s5931_s30 }
 0x977   : > { %5637 = vrot.lane.b32.xlu0 %v6092_v37, %s5928_s27 }
 0x97b   : > { %1634 = vrot.lane.b32.xlu0 %v6198_v0, %s5931_s30 }
 0x9ed   : > { %v1540_v13 = vpop.xlane.xlu1 %1539 }
 0x9ee   : > { %5787 = vrcp.f32 %v1540_v13  ;;  %v1537_v16 = vpop.xlane.xlu0 %1536 }
 0x9ef   : > { %5789 = vrcp.f32 %v1537_v16 }
 0x9f1   : > { %v5643_v17 = vpop.permute.xlu1 %5642 }
 0x9f2   : > { %v5638_v18 = vpop.permute.xlu0 %5637  ;;  %v5645_v25 = vunpack.i.h.bf16 %v5643_v17  ;;  %v5644_v26 = vunpack.i.l.bf16 %v5643_v17 }
 0x9f3   : > { %v5640_v27 = vunpack.i.h.bf16 %v5638_v18  ;;  %v5639_v28 = vunpack.i.l.bf16 %v5638_v18 }
 0x9f4   : > { %v5427_v31 = vpack.c.bf16 %v5645_v25, %v5644_v26 }
 0x9f5   : > { %v5423_v29 = vpack.c.bf16 %v5640_v27, %v5639_v28  ;;  %v1633_v46 = vpop.permute.xlu1 %1632 }
 0x9f6   : > { %v1635_v47 = vpop.permute.xlu0 %1634 }
 0x9f7   : > { %5424 = vmatprep.subr.bf16.mxu0 %v5423_v29 }
 0x9f8   : > { %v5788_v42 = vpop.eup %5787  ;;  %5426 = vmatpush3.bf16.msra.mxu0 %v5423_v29 }
 0x9f9   : > { %v5790_v43 = vpop.eup %5789  ;;  %5429 = vmatprep.subr.msk.bf16.mxu0 %vm6070_vm2, %v5427_v31  ;;  %v1544_v45 = vmul.f32 %v5788_v42, %v5784_v20 }
 0x9fa   : > { %v1543_v44 = vmul.f32 %v5790_v43, %v5786_v10 }
 0x9fc   : > { %5144 = vmatprep.mubr.msk.f32.mxu0 %vm687_vm3, %v1543_v44 }
 0x9fd   : > { %5145 = vmatmul.mubr.msk.f32.vlgmr.msra.gmra.mrb[16].mxu0 %vm687_vm3, %v1544_v45 }
 0x9fe   : > { %5151 = vmatprep.mubr.msk.f32.mxu0 %vm601_vm1, %v1633_v46 }
 0xa01   : > { %5432 = vmatpush3.bf16.xpose.msk.msra.mxu0 %vm6070_vm2, %v5427_v31 }
 0xa08   : > { %5152 = vmatmul.mubr.msk.f32.vlgmr.msra.gmra.mrb[18].mxu0 %vm601_vm1, %v1635_v47 }
 0xad0   : > { %v6226_v48 = vpop.f32.mrb[16].mxu0 }
 0xad1   : > { %v6228_v49 = vpop.f32.mrb[17].mxu0 }
 0xadb   : > { %v5153_v50 = vpop.f32.mrb[18].mxu0 }
 0xadc   : > { %v1714_v51 = vpop.f32.mrb[19].mxu0  ;;  %v1726_v52 = vsel %vm687_vm3, %v5153_v50, -inf }
 0xadd   : > { %1727 = vmax.xlane.f32.xlu0 %v1726_v52  ;;  %v1723_v53 = vsel %vm687_vm3, %v1714_v51, -inf }
 0xade   : > { %1724 = vmax.xlane.f32.xlu1 %v1723_v53 }
 0xb6a   : > { %v1728_v54 = vpop.xlane.xlu0 %1727 }
 0xb6b   : > { %v1730_v55 = vsub.f32 %v5153_v50, %v1728_v54  ;;  %v1725_v56 = vpop.xlane.xlu1 %1724 }
 0xb6c   : > { %v1729_v57 = vsub.f32 %v1714_v51, %v1725_v56 }
 0xb6d   : > { %v1733_v58 = vmul.f32 1.442695, %v1730_v55 }
 0xb6e   : > { %v1731_v59 = vmul.f32 1.442695, %v1729_v57 }
 0xb6f   : > { %5791 = vpow2.f32 %v1733_v58 }
 0xb70   : > { %5793 = vpow2.f32 %v1731_v59 }
 0xb79   : > { %v5792_v60 = vpop.eup %5791 }
 0xb7a   : > { %v5794_v61 = vpop.eup %5793  ;;  %v1738_v19 = vsel %vm687_vm3, %v5792_v60, 0.0 }
 0xb7b   : > { %1739 = vadd.xlane.f32.xlu1 %v1738_v19  ;;  %v1735_v62 = vsel %vm687_vm3, %v5794_v61, 0.0 }
 0xb7c   : > { %1736 = vadd.xlane.f32.xlu0 %v1735_v62 }
 0xb8c   : > { %5652 = vrot.lane.b32.xlu1 %v6092_v37, %s5930_s29 }
 0xb90   : > { %1832 = vrot.lane.b32.xlu1 %v6190_v63, %s5932_s14 }
 0xb92   : > { %5647 = vrot.lane.b32.xlu0 %v6092_v37, %s5933_s15 }
 0xb96   : > { %1834 = vrot.lane.b32.xlu0 %v6198_v0, %s5932_s14 }
 0xc08   : > { %v1740_v34 = vpop.xlane.xlu1 %1739 }
 0xc09   : > { %5795 = vrcp.f32 %v1740_v34  ;;  %v1737_v3 = vpop.xlane.xlu0 %1736 }
 0xc0a   : > { %5797 = vrcp.f32 %v1737_v3 }
 0xc0c   : > { %v5653_v4 = vpop.permute.xlu1 %5652 }
 0xc0d   : > { %v5648_v32 = vpop.permute.xlu0 %5647  ;;  %v5655_v5 = vunpack.i.h.bf16 %v5653_v4  ;;  %v5654_v6 = vunpack.i.l.bf16 %v5653_v4 }
 0xc0e   : > { %v5650_v7 = vunpack.i.h.bf16 %v5648_v32  ;;  %v5649_v33 = vunpack.i.l.bf16 %v5648_v32 }
 0xc0f   : > { %v5437_v9 = vpack.c.bf16 %v5655_v5, %v5654_v6 }
 0xc10   : > { %v5433_v8 = vpack.c.bf16 %v5650_v7, %v5649_v33  ;;  %v1833_v13 = vpop.permute.xlu1 %1832 }
 0xc11   : > { %v1835_v16 = vpop.permute.xlu0 %1834 }
 0xc12   : > { %5434 = vmatprep.subr.bf16.mxu1 %v5433_v8 }
 0xc13   : > { %v5796_v20 = vpop.eup %5795  ;;  %5436 = vmatpush3.bf16.msra.mxu1 %v5433_v8 }
 0xc14   : > { %v5798_v10 = vpop.eup %5797  ;;  %5439 = vmatprep.subr.msk.bf16.mxu1 %vm6070_vm2, %v5437_v9  ;;  %v1744_v12 = vmul.f32 %v5796_v20, %v5792_v60 }
 0xc15   : > { %v1743_v11 = vmul.f32 %v5798_v10, %v5794_v61 }
 0xc17   : > { %5158 = vmatprep.mubr.msk.f32.mxu1 %vm687_vm3, %v1743_v11 }
 0xc18   : > { %5159 = vmatmul.mubr.msk.f32.vlgmr.msra.gmra.mrb[10].mxu1 %vm687_vm3, %v1744_v12 }
 0xc19   : > { %5165 = vmatprep.mubr.msk.f32.mxu1 %vm601_vm1, %v1833_v13 }
 0xc1c   : > { %5442 = vmatpush3.bf16.xpose.msk.msra.mxu1 %vm6070_vm2, %v5437_v9 }
 0xc23   : > { %5166 = vmatmul.mubr.msk.f32.vlgmr.msra.gmra.mrb[12].mxu1 %vm601_vm1, %v1835_v16 }
 0xceb   : > { %v6250_v17 = vpop.f32.mrb[10].mxu1 }
 0xcec   : > { %v6252_v18 = vpop.f32.mrb[11].mxu1 }
 0xcf6   : > { %v5167_v25 = vpop.f32.mrb[12].mxu1 }
 0xcf7   : > { %v1914_v26 = vpop.f32.mrb[13].mxu1  ;;  %v1926_v27 = vsel %vm687_vm3, %v5167_v25, -inf }
 0xcf8   : > { %1927 = vmax.xlane.f32.xlu0 %v1926_v27  ;;  %v1923_v28 = vsel %vm687_vm3, %v1914_v26, -inf }
 0xcf9   : > { %1924 = vmax.xlane.f32.xlu1 %v1923_v28 }
 0xd85   : > { %v1928_v29 = vpop.xlane.xlu0 %1927 }
 0xd86   : > { %v1930_v31 = vsub.f32 %v5167_v25, %v1928_v29  ;;  %v1925_v42 = vpop.xlane.xlu1 %1924 }
 0xd87   : > { %v1929_v43 = vsub.f32 %v1914_v26, %v1925_v42 }
 0xd88   : > { %v1933_v44 = vmul.f32 1.442695, %v1930_v31 }
 0xd89   : > { %v1931_v45 = vmul.f32 1.442695, %v1929_v43 }
 0xd8a   : > { %5799 = vpow2.f32 %v1933_v44 }
 0xd8b   : > { %5801 = vpow2.f32 %v1931_v45 }
 0xd94   : > { %v5800_v46 = vpop.eup %5799 }
 0xd95   : > { %v5802_v47 = vpop.eup %5801  ;;  %v1938_v50 = vsel %vm687_vm3, %v5800_v46, 0.0 }
 0xd96   : > { %1939 = vadd.xlane.f32.xlu1 %v1938_v50  ;;  %v1935_v51 = vsel %vm687_vm3, %v5802_v47, 0.0 }
 0xd97   : > { %1936 = vadd.xlane.f32.xlu0 %v1935_v51 }
 0xda7   : > { %5662 = vrot.lane.b32.xlu1 %v6092_v37, %s5934_s17 }
 0xdab   : > { %2032 = vrot.lane.b32.xlu1 %v6190_v63, %s5936_s20 }
 0xdad   : > { %5657 = vrot.lane.b32.xlu0 %v6092_v37, %s5935_s18 }
 0xdb1   : > { %2034 = vrot.lane.b32.xlu0 %v6198_v0, %s5936_s20 }
 0xe23   : > { %v1940_v52 = vpop.xlane.xlu1 %1939 }
 0xe24   : > { %5803 = vrcp.f32 %v1940_v52  ;;  %v1937_v53 = vpop.xlane.xlu0 %1936 }
 0xe25   : > { %5805 = vrcp.f32 %v1937_v53  ;;  %v6290_v53 = vmul.f32 0.35355338, %v6088_v36 }
 0xe27   : > { %v5663_v54 = vpop.permute.xlu1 %5662 }
 0xe28   : > { %v5658_v55 = vpop.permute.xlu0 %5657  ;;  %v5665_v56 = vunpack.i.h.bf16 %v5663_v54  ;;  %v5664_v57 = vunpack.i.l.bf16 %v5663_v54  ;;  %v6298_v54 = vmul.f32 0.35355338, %v6086_v35 }
 0xe29   : > { %v5660_v58 = vunpack.i.h.bf16 %v5658_v55  ;;  %v5659_v59 = vunpack.i.l.bf16 %v5658_v55 }
 0xe2a   : > { %v5447_v61 = vpack.c.bf16 %v5665_v56, %v5664_v57 }
 0xe2b   : > { %v5443_v60 = vpack.c.bf16 %v5660_v58, %v5659_v59  ;;  %v2033_v34 = vpop.permute.xlu1 %2032 }
 0xe2c   : > { %v2035_v3 = vpop.permute.xlu0 %2034 }
 0xe2d   : > { %5444 = vmatprep.subr.bf16.mxu0 %v5443_v60 }
 0xe2e   : > { %v5804_v63 = vpop.eup %5803  ;;  %5446 = vmatpush3.bf16.msra.mxu0 %v5443_v60 }
 0xe2f   : > { %v5806_v19 = vpop.eup %5805  ;;  %5449 = vmatprep.subr.msk.bf16.mxu0 %vm6070_vm2, %v5447_v61  ;;  %v1944_v62 = vmul.f32 %v5804_v63, %v5800_v46 }
 0xe30   : > { %v1943_v0 = vmul.f32 %v5806_v19, %v5802_v47 }
 0xe32   : > { %5172 = vmatprep.mubr.msk.f32.mxu0 %vm687_vm3, %v1943_v0 }
 0xe33   : > { %5173 = vmatmul.mubr.msk.f32.vlgmr.msra.gmra.mrb[20].mxu0 %vm687_vm3, %v1944_v62 }
 0xe34   : > { %5179 = vmatprep.mubr.msk.f32.mxu0 %vm601_vm1, %v2033_v34 }
 0xe37   : > { %5452 = vmatpush3.bf16.xpose.msk.msra.mxu0 %vm6070_vm2, %v5447_v61 }
 0xe3e   : > { %5180 = vmatmul.mubr.msk.f32.vlgmr.msra.gmra.mrb[22].mxu0 %vm601_vm1, %v2035_v3 }
 0xf06   : > { %v6274_v4 = vpop.f32.mrb[20].mxu0 }
 0xf07   : > { %v6276_v32 = vpop.f32.mrb[21].mxu0 }
 0xf11   : > { %v5181_v5 = vpop.f32.mrb[22].mxu0 }
 0xf12   : > { %v2114_v6 = vpop.f32.mrb[23].mxu0  ;;  %v2126_v7 = vsel %vm687_vm3, %v5181_v5, -inf }
 0xf13   : > { %2127 = vmax.xlane.f32.xlu0 %v2126_v7  ;;  %v2123_v33 = vsel %vm687_vm3, %v2114_v6, -inf }
 0xf14   : > { %2124 = vmax.xlane.f32.xlu1 %v2123_v33 }
 0xfa0   : > { %v2128_v8 = vpop.xlane.xlu0 %2127 }
 0xfa1   : > { %v2130_v9 = vsub.f32 %v5181_v5, %v2128_v8  ;;  %v2125_v20 = vpop.xlane.xlu1 %2124 }
 0xfa2   : > { %v2129_v10 = vsub.f32 %v2114_v6, %v2125_v20 }
 0xfa3   : > { %v2133_v11 = vmul.f32 1.442695, %v2130_v9 }
 0xfa4   : > { %v2131_v12 = vmul.f32 1.442695, %v2129_v10 }
 0xfa5   : > { %5807 = vpow2.f32 %v2133_v11 }
 0xfa6   : > { %5809 = vpow2.f32 %v2131_v12 }
 0xfaf   : > { %v5808_v13 = vpop.eup %5807 }
 0xfb0   : > { %v5810_v16 = vpop.eup %5809  ;;  %v2138_v25 = vsel %vm687_vm3, %v5808_v13, 0.0 }
 0xfb1   : > { %2139 = vadd.xlane.f32.xlu1 %v2138_v25  ;;  %v2135_v26 = vsel %vm687_vm3, %v5810_v16, 0.0 }
 0xfb2   : > { %2136 = vadd.xlane.f32.xlu0 %v2135_v26 }
 0xfc2   : > { %5672 = vrot.lane.b32.xlu1 %v6100_v40, %s5927_s26 }
 0xfc8   : > { %5667 = vrot.lane.b32.xlu0 %v6092_v37, %s5937_s21 }
0x103e   : > { %v2140_v27 = vpop.xlane.xlu1 %2139 }
0x103f   : > { %5811 = vrcp.f32 %v2140_v27  ;;  %v2137_v28 = vpop.xlane.xlu0 %2136 }
0x1040   : > { %5813 = vrcp.f32 %v2137_v28 }
0x1042   : > { %v5673_v29 = vpop.permute.xlu1 %5672 }
0x1043   : > { %v5668_v31 = vpop.permute.xlu0 %5667  ;;  %v5675_v42 = vunpack.i.h.bf16 %v5673_v29  ;;  %v5674_v43 = vunpack.i.l.bf16 %v5673_v29 }
0x1044   : > { %v5670_v44 = vunpack.i.h.bf16 %v5668_v31  ;;  %v5669_v45 = vunpack.i.l.bf16 %v5668_v31 }
0x1045   : > { %v5457_v47 = vpack.c.bf16 %v5675_v42, %v5674_v43 }
0x1046   : > { %v5453_v46 = vpack.c.bf16 %v5670_v44, %v5669_v45 }
0x1048   : > { %5454 = vmatprep.subr.bf16.mxu1 %v5453_v46 }
0x1049   : > { %v5812_v50 = vpop.eup %5811  ;;  %5456 = vmatpush3.bf16.msra.mxu1 %v5453_v46 }
0x104a   : > { %v5814_v51 = vpop.eup %5813  ;;  %5459 = vmatprep.subr.msk.bf16.mxu1 %vm6070_vm2, %v5457_v47  ;;  %v2144_v52 = vmul.f32 %v5812_v50, %v5808_v13 }
0x104b   : > { %v2143_v37 = vmul.f32 %v5814_v51, %v5810_v16 }
0x104d   : > { %5186 = vmatprep.mubr.msk.f32.mxu1 %vm687_vm3, %v2143_v37 }
0x104e   : > { %5187 = vmatmul.mubr.msk.f32.vlgmr.msra.gmra.mrb[14].mxu1 %vm687_vm3, %v2144_v52 }
0x104f   : > { %5193 = vmatprep.mubr.msk.f32.mxu1 %vm601_vm1, %v6290_v53 }
0x1052   : > { %5462 = vmatpush3.bf16.xpose.msk.msra.mxu1 %vm6070_vm2, %v5457_v47 }
0x1059   : > { %5194 = vmatmul.mubr.msk.f32.vlgmr.msra.gmra.mrb[16].mxu1 %vm601_vm1, %v6298_v54 }
0x1121   : > { %v6302_v55 = vpop.f32.mrb[14].mxu1 }
0x1122   : > { %v6304_v56 = vpop.f32.mrb[15].mxu1 }
0x112c   : > { %v5195_v36 = vpop.f32.mrb[16].mxu1 }
0x112d   : > { %v2348_v57 = vpop.f32.mrb[17].mxu1  ;;  %v2360_v58 = vsel %vm687_vm3, %v5195_v36, -inf }
0x112e   : > { %2361 = vmax.xlane.f32.xlu0 %v2360_v58  ;;  %v2357_v59 = vsel %vm687_vm3, %v2348_v57, -inf }
0x112f   : > { %2358 = vmax.xlane.f32.xlu1 %v2357_v59 }
0x11bb   : > { %v2362_v60 = vpop.xlane.xlu0 %2361 }
0x11bc   : > { %v2364_v61 = vsub.f32 %v5195_v36, %v2362_v60  ;;  %v2359_v63 = vpop.xlane.xlu1 %2358 }
0x11bd   : > { %v2363_v35 = vsub.f32 %v2348_v57, %v2359_v63 }
0x11be   : > { %v2367_v19 = vmul.f32 1.442695, %v2364_v61 }
0x11bf   : > { %v2365_v0 = vmul.f32 1.442695, %v2363_v35 }
0x11c0   : > { %5815 = vpow2.f32 %v2367_v19 }
0x11c1   : > { %5817 = vpow2.f32 %v2365_v0 }
0x11ca   : > { %v5816_v62 = vpop.eup %5815 }
0x11cb   : > { %v5818_v34 = vpop.eup %5817  ;;  %v2372_v3 = vsel %vm687_vm3, %v5816_v62, 0.0 }
0x11cc   : > { %2373 = vadd.xlane.f32.xlu1 %v2372_v3  ;;  %v2369_v5 = vsel %vm687_vm3, %v5818_v34, 0.0 }
0x11cd   : > { %2370 = vadd.xlane.f32.xlu0 %v2369_v5 }
0x11dd   : > { %5682 = vrot.lane.b32.xlu1 %v6100_v40, %s5929_s28 }
0x11e1   : > { %2466 = vrot.lane.b32.xlu1 %v6290_v53, %s5931_s30 }
0x11e3   : > { %5677 = vrot.lane.b32.xlu0 %v6100_v40, %s5928_s27 }
0x11e7   : > { %2468 = vrot.lane.b32.xlu0 %v6298_v54, %s5931_s30 }
0x1259   : > { %v2374_v6 = vpop.xlane.xlu1 %2373 }
0x125a   : > { %5819 = vrcp.f32 %v2374_v6  ;;  %v2371_v7 = vpop.xlane.xlu0 %2370 }
0x125b   : > { %5821 = vrcp.f32 %v2371_v7 }
0x125d   : > { %v5683_v33 = vpop.permute.xlu1 %5682 }
0x125e   : > { %v5678_v8 = vpop.permute.xlu0 %5677  ;;  %v5685_v9 = vunpack.i.h.bf16 %v5683_v33  ;;  %v5684_v20 = vunpack.i.l.bf16 %v5683_v33 }
0x125f   : > { %v5680_v10 = vunpack.i.h.bf16 %v5678_v8  ;;  %v5679_v11 = vunpack.i.l.bf16 %v5678_v8 }
0x1260   : > { %v5467_v13 = vpack.c.bf16 %v5685_v9, %v5684_v20 }
0x1261   : > { %v5463_v12 = vpack.c.bf16 %v5680_v10, %v5679_v11  ;;  %v2467_v28 = vpop.permute.xlu1 %2466 }
0x1262   : > { %v2469_v29 = vpop.permute.xlu0 %2468 }
0x1263   : > { %5464 = vmatprep.subr.bf16.mxu0 %v5463_v12 }
0x1264   : > { %v5820_v16 = vpop.eup %5819  ;;  %5466 = vmatpush3.bf16.msra.mxu0 %v5463_v12 }
0x1265   : > { %v5822_v25 = vpop.eup %5821  ;;  %5469 = vmatprep.subr.msk.bf16.mxu0 %vm6070_vm2, %v5467_v13  ;;  %v2378_v27 = vmul.f32 %v5820_v16, %v5816_v62 }
0x1266   : > { %v2377_v26 = vmul.f32 %v5822_v25, %v5818_v34 }
0x1268   : > { %5200 = vmatprep.mubr.msk.f32.mxu0 %vm687_vm3, %v2377_v26 }
0x1269   : > { %5201 = vmatmul.mubr.msk.f32.vlgmr.msra.gmra.mrb[24].mxu0 %vm687_vm3, %v2378_v27 }
0x126a   : > { %5207 = vmatprep.mubr.msk.f32.mxu0 %vm601_vm1, %v2467_v28 }
0x126d   : > { %5472 = vmatpush3.bf16.xpose.msk.msra.mxu0 %vm6070_vm2, %v5467_v13 }
0x1274   : > { %5208 = vmatmul.mubr.msk.f32.vlgmr.msra.gmra.mrb[26].mxu0 %vm601_vm1, %v2469_v29 }
0x133c   : > { %v6326_v31 = vpop.f32.mrb[24].mxu0 }
0x133d   : > { %v6328_v42 = vpop.f32.mrb[25].mxu0 }
0x1347   : > { %v5209_v43 = vpop.f32.mrb[26].mxu0 }
0x1348   : > { %v2548_v44 = vpop.f32.mrb[27].mxu0  ;;  %v2560_v45 = vsel %vm687_vm3, %v5209_v43, -inf }
0x1349   : > { %2561 = vmax.xlane.f32.xlu0 %v2560_v45  ;;  %v2557_v46 = vsel %vm687_vm3, %v2548_v44, -inf }
0x134a   : > { %2558 = vmax.xlane.f32.xlu1 %v2557_v46 }
0x13d6   : > { %v2562_v47 = vpop.xlane.xlu0 %2561 }
0x13d7   : > { %v2564_v50 = vsub.f32 %v5209_v43, %v2562_v47  ;;  %v2559_v51 = vpop.xlane.xlu1 %2558 }
0x13d8   : > { %v2563_v37 = vsub.f32 %v2548_v44, %v2559_v51 }
0x13d9   : > { %v2567_v52 = vmul.f32 1.442695, %v2564_v50 }
0x13da   : > { %v2565_v36 = vmul.f32 1.442695, %v2563_v37 }
0x13db   : > { %5823 = vpow2.f32 %v2567_v52 }
0x13dc   : > { %5825 = vpow2.f32 %v2565_v36 }
0x13e5   : > { %v5824_v57 = vpop.eup %5823 }
0x13e6   : > { %v5826_v58 = vpop.eup %5825  ;;  %v2572_v59 = vsel %vm687_vm3, %v5824_v57, 0.0 }
0x13e7   : > { %2573 = vadd.xlane.f32.xlu1 %v2572_v59  ;;  %v2569_v60 = vsel %vm687_vm3, %v5826_v58, 0.0 }
0x13e8   : > { %2570 = vadd.xlane.f32.xlu0 %v2569_v60 }
0x13f8   : > { %5692 = vrot.lane.b32.xlu1 %v6100_v40, %s5930_s29 }
0x13fc   : > { %2666 = vrot.lane.b32.xlu1 %v6290_v53, %s5932_s14 }
0x13fe   : > { %5687 = vrot.lane.b32.xlu0 %v6100_v40, %s5933_s15 }
0x1402   : > { %2668 = vrot.lane.b32.xlu0 %v6298_v54, %s5932_s14 }
0x1474   : > { %v2574_v61 = vpop.xlane.xlu1 %2573 }
0x1475   : > { %5827 = vrcp.f32 %v2574_v61  ;;  %v2571_v63 = vpop.xlane.xlu0 %2570 }
0x1476   : > { %5829 = vrcp.f32 %v2571_v63 }
0x1478   : > { %v5693_v35 = vpop.permute.xlu1 %5692 }
0x1479   : > { %v5688_v19 = vpop.permute.xlu0 %5687  ;;  %v5695_v0 = vunpack.i.h.bf16 %v5693_v35  ;;  %v5694_v62 = vunpack.i.l.bf16 %v5693_v35 }
0x147a   : > { %v5690_v34 = vunpack.i.h.bf16 %v5688_v19  ;;  %v5689_v3 = vunpack.i.l.bf16 %v5688_v19 }
0x147b   : > { %v5477_v6 = vpack.c.bf16 %v5695_v0, %v5694_v62 }
0x147c   : > { %v5473_v5 = vpack.c.bf16 %v5690_v34, %v5689_v3  ;;  %v2667_v20 = vpop.permute.xlu1 %2666 }
0x147d   : > { %v2669_v10 = vpop.permute.xlu0 %2668 }
0x147e   : > { %5474 = vmatprep.subr.bf16.mxu1 %v5473_v5 }
0x147f   : > { %v5828_v7 = vpop.eup %5827  ;;  %5476 = vmatpush3.bf16.msra.mxu1 %v5473_v5 }
0x1480   : > { %v5830_v33 = vpop.eup %5829  ;;  %5479 = vmatprep.subr.msk.bf16.mxu1 %vm6070_vm2, %v5477_v6  ;;  %v2578_v9 = vmul.f32 %v5828_v7, %v5824_v57 }
0x1481   : > { %v2577_v8 = vmul.f32 %v5830_v33, %v5826_v58 }
0x1483   : > { %5214 = vmatprep.mubr.msk.f32.mxu1 %vm687_vm3, %v2577_v8 }
0x1484   : > { %5215 = vmatmul.mubr.msk.f32.vlgmr.msra.gmra.mrb[18].mxu1 %vm687_vm3, %v2578_v9 }
0x1485   : > { %5221 = vmatprep.mubr.msk.f32.mxu1 %vm601_vm1, %v2667_v20 }
0x1488   : > { %5482 = vmatpush3.bf16.xpose.msk.msra.mxu1 %vm6070_vm2, %v5477_v6 }
0x148f   : > { %5222 = vmatmul.mubr.msk.f32.vlgmr.msra.gmra.mrb[20].mxu1 %vm601_vm1, %v2669_v10 }
0x1557   : > { %v6350_v11 = vpop.f32.mrb[18].mxu1 }
0x1558   : > { %v6352_v12 = vpop.f32.mrb[19].mxu1 }
0x1562   : > { %v5223_v13 = vpop.f32.mrb[20].mxu1 }
0x1563   : > { %v2748_v16 = vpop.f32.mrb[21].mxu1  ;;  %v2760_v25 = vsel %vm687_vm3, %v5223_v13, -inf }
0x1564   : > { %2761 = vmax.xlane.f32.xlu0 %v2760_v25  ;;  %v2757_v26 = vsel %vm687_vm3, %v2748_v16, -inf }
0x1565   : > { %2758 = vmax.xlane.f32.xlu1 %v2757_v26 }
0x15f1   : > { %v2762_v27 = vpop.xlane.xlu0 %2761 }
0x15f2   : > { %v2764_v28 = vsub.f32 %v5223_v13, %v2762_v27  ;;  %v2759_v29 = vpop.xlane.xlu1 %2758 }
0x15f3   : > { %v2763_v43 = vsub.f32 %v2748_v16, %v2759_v29 }
0x15f4   : > { %v2767_v44 = vmul.f32 1.442695, %v2764_v28 }
0x15f5   : > { %v2765_v45 = vmul.f32 1.442695, %v2763_v43 }
0x15f6   : > { %5831 = vpow2.f32 %v2767_v44 }
0x15f7   : > { %5833 = vpow2.f32 %v2765_v45 }
0x1600   : > { %v5832_v46 = vpop.eup %5831 }
0x1601   : > { %v5834_v47 = vpop.eup %5833  ;;  %v2772_v50 = vsel %vm687_vm3, %v5832_v46, 0.0 }
0x1602   : > { %2773 = vadd.xlane.f32.xlu1 %v2772_v50  ;;  %v2769_v51 = vsel %vm687_vm3, %v5834_v47, 0.0 }
0x1603   : > { %2770 = vadd.xlane.f32.xlu0 %v2769_v51 }
0x1613   : > { %5702 = vrot.lane.b32.xlu1 %v6100_v40, %s5934_s17 }
0x1617   : > { %2866 = vrot.lane.b32.xlu1 %v6290_v53, %s5936_s20 }
0x1619   : > { %5697 = vrot.lane.b32.xlu0 %v6100_v40, %s5935_s18 }
0x161d   : > { %2868 = vrot.lane.b32.xlu0 %v6298_v54, %s5936_s20 }
0x168f   : > { %v2774_v37 = vpop.xlane.xlu1 %2773 }
0x1690   : > { %5835 = vrcp.f32 %v2774_v37  ;;  %v2771_v52 = vpop.xlane.xlu0 %2770 }
0x1691   : > { %5837 = vrcp.f32 %v2771_v52 }
0x1693   : > { %v5703_v36 = vpop.permute.xlu1 %5702 }
0x1694   : > { %v5698_v57 = vpop.permute.xlu0 %5697  ;;  %v5705_v58 = vunpack.i.h.bf16 %v5703_v36  ;;  %v5704_v59 = vunpack.i.l.bf16 %v5703_v36 }
0x1695   : > { %v5700_v60 = vunpack.i.h.bf16 %v5698_v57  ;;  %v5699_v61 = vunpack.i.l.bf16 %v5698_v57 }
0x1696   : > { %v5487_v35 = vpack.c.bf16 %v5705_v58, %v5704_v59 }
0x1697   : > { %v5483_v63 = vpack.c.bf16 %v5700_v60, %v5699_v61  ;;  %v2867_v62 = vpop.permute.xlu1 %2866  ;;  %v6390_v60 = vmul.f32 0.35355338, %v6096_v39  ;;  %v6398_v61 = vmul.f32 0.35355338, %v6094_v38 }
0x1698   : > { %v2869_v34 = vpop.permute.xlu0 %2868 }
0x1699   : > { %5484 = vmatprep.subr.bf16.mxu0 %v5483_v63 }
0x169a   : > { %v5836_v53 = vpop.eup %5835  ;;  %5486 = vmatpush3.bf16.msra.mxu0 %v5483_v63 }
0x169b   : > { %v5838_v19 = vpop.eup %5837  ;;  %5489 = vmatprep.subr.msk.bf16.mxu0 %vm6070_vm2, %v5487_v35  ;;  %v2778_v0 = vmul.f32 %v5836_v53, %v5832_v46 }
0x169c   : > { %v2777_v54 = vmul.f32 %v5838_v19, %v5834_v47 }
0x169e   : > { %5228 = vmatprep.mubr.msk.f32.mxu0 %vm687_vm3, %v2777_v54 }
0x169f   : > { %5229 = vmatmul.mubr.msk.f32.vlgmr.msra.gmra.mrb[28].mxu0 %vm687_vm3, %v2778_v0 }
0x16a0   : > { %5235 = vmatprep.mubr.msk.f32.mxu0 %vm601_vm1, %v2867_v62 }
0x16a3   : > { %5492 = vmatpush3.bf16.xpose.msk.msra.mxu0 %vm6070_vm2, %v5487_v35 }
0x16aa   : > { %5236 = vmatmul.mubr.msk.f32.vlgmr.msra.gmra.mrb[30].mxu0 %vm601_vm1, %v2869_v34 }
0x1772   : > { %v6374_v3 = vpop.f32.mrb[28].mxu0 }
0x1773   : > { %v6376_v5 = vpop.f32.mrb[29].mxu0 }
0x177d   : > { %v5237_v6 = vpop.f32.mrb[30].mxu0 }
0x177e   : > { %v2948_v7 = vpop.f32.mrb[31].mxu0  ;;  %v2960_v33 = vsel %vm687_vm3, %v5237_v6, -inf }
0x177f   : > { %2961 = vmax.xlane.f32.xlu0 %v2960_v33  ;;  %v2957_v8 = vsel %vm687_vm3, %v2948_v7, -inf }
0x1780   : > { %2958 = vmax.xlane.f32.xlu1 %v2957_v8 }
0x180c   : > { %v2962_v9 = vpop.xlane.xlu0 %2961 }
0x180d   : > { %v2964_v20 = vsub.f32 %v5237_v6, %v2962_v9  ;;  %v2959_v10 = vpop.xlane.xlu1 %2958 }
0x180e   : > { %v2963_v13 = vsub.f32 %v2948_v7, %v2959_v10 }
0x180f   : > { %v2967_v16 = vmul.f32 1.442695, %v2964_v20 }
0x1810   : > { %v2965_v25 = vmul.f32 1.442695, %v2963_v13 }
0x1811   : > { %5839 = vpow2.f32 %v2967_v16 }
0x1812   : > { %5841 = vpow2.f32 %v2965_v25 }
0x181b   : > { %v5840_v26 = vpop.eup %5839 }
0x181c   : > { %v5842_v27 = vpop.eup %5841  ;;  %v2972_v28 = vsel %vm687_vm3, %v5840_v26, 0.0 }
0x181d   : > { %2973 = vadd.xlane.f32.xlu1 %v2972_v28  ;;  %v2969_v29 = vsel %vm687_vm3, %v5842_v27, 0.0 }
0x181e   : > { %2970 = vadd.xlane.f32.xlu0 %v2969_v29 }
0x182e   : > { %5712 = vrot.lane.b32.xlu1 %v6104_v41, %s5927_s26  ;;  %s5940_s26 = smov 24  }
0x1834   : > { %5707 = vrot.lane.b32.xlu0 %v6100_v40, %s5937_s21 }
0x18aa   : > { %v2974_v43 = vpop.xlane.xlu1 %2973 }
0x18ab   : > { %5843 = vrcp.f32 %v2974_v43  ;;  %v2971_v44 = vpop.xlane.xlu0 %2970 }
0x18ac   : > { %5845 = vrcp.f32 %v2971_v44 }
0x18ae   : > { %v5713_v45 = vpop.permute.xlu1 %5712 }
0x18af   : > { %v5708_v46 = vpop.permute.xlu0 %5707  ;;  %v5715_v47 = vunpack.i.h.bf16 %v5713_v45  ;;  %v5714_v50 = vunpack.i.l.bf16 %v5713_v45 }
0x18b0   : > { %v5710_v51 = vunpack.i.h.bf16 %v5708_v46  ;;  %v5709_v37 = vunpack.i.l.bf16 %v5708_v46 }
0x18b1   : > { %v5497_v36 = vpack.c.bf16 %v5715_v47, %v5714_v50 }
0x18b2   : > { %v5493_v52 = vpack.c.bf16 %v5710_v51, %v5709_v37 }
0x18b4   : > { %5494 = vmatprep.subr.bf16.mxu1 %v5493_v52 }
0x18b5   : > { %v5844_v57 = vpop.eup %5843  ;;  %5496 = vmatpush3.bf16.msra.mxu1 %v5493_v52 }
0x18b6   : > { %v5846_v58 = vpop.eup %5845  ;;  %5499 = vmatprep.subr.msk.bf16.mxu1 %vm6070_vm2, %v5497_v36  ;;  %v2978_v59 = vmul.f32 %v5844_v57, %v5840_v26 }
0x18b7   : > { %v2977_v40 = vmul.f32 %v5846_v58, %v5842_v27 }
0x18b9   : > { %5242 = vmatprep.mubr.msk.f32.mxu1 %vm687_vm3, %v2977_v40 }
0x18ba   : > { %5243 = vmatmul.mubr.msk.f32.vlgmr.msra.gmra.mrb[22].mxu1 %vm687_vm3, %v2978_v59 }
0x18bb   : > { %5249 = vmatprep.mubr.msk.f32.mxu1 %vm601_vm1, %v6390_v60 }
0x18be   : > { %5502 = vmatpush3.bf16.xpose.msk.msra.mxu1 %vm6070_vm2, %v5497_v36 }
0x18c5   : > { %5250 = vmatmul.mubr.msk.f32.vlgmr.msra.gmra.mrb[24].mxu1 %vm601_vm1, %v6398_v61 }
0x198d   : > { %v6402_v63 = vpop.f32.mrb[22].mxu1 }
0x198e   : > { %v6404_v35 = vpop.f32.mrb[23].mxu1 }
0x1998   : > { %v5251_v39 = vpop.f32.mrb[24].mxu1 }
0x1999   : > { %v3182_v53 = vpop.f32.mrb[25].mxu1  ;;  %v3194_v19 = vsel %vm687_vm3, %v5251_v39, -inf }
0x199a   : > { %3195 = vmax.xlane.f32.xlu0 %v3194_v19  ;;  %v3191_v54 = vsel %vm687_vm3, %v3182_v53, -inf }
0x199b   : > { %3192 = vmax.xlane.f32.xlu1 %v3191_v54 }
0x1a27   : > { %v3196_v0 = vpop.xlane.xlu0 %3195 }
0x1a28   : > { %v3198_v62 = vsub.f32 %v5251_v39, %v3196_v0  ;;  %v3193_v34 = vpop.xlane.xlu1 %3192 }
0x1a29   : > { %v3197_v38 = vsub.f32 %v3182_v53, %v3193_v34 }
0x1a2a   : > { %v3201_v6 = vmul.f32 1.442695, %v3198_v62 }
0x1a2b   : > { %v3199_v7 = vmul.f32 1.442695, %v3197_v38 }
0x1a2c   : > { %5847 = vpow2.f32 %v3201_v6 }
0x1a2d   : > { %5849 = vpow2.f32 %v3199_v7 }
0x1a36   : > { %v5848_v33 = vpop.eup %5847 }
0x1a37   : > { %v5850_v8 = vpop.eup %5849  ;;  %v3206_v9 = vsel %vm687_vm3, %v5848_v33, 0.0 }
0x1a38   : > { %3207 = vadd.xlane.f32.xlu1 %v3206_v9  ;;  %v3203_v20 = vsel %vm687_vm3, %v5850_v8, 0.0 }
0x1a39   : > { %3204 = vadd.xlane.f32.xlu0 %v3203_v20 }
0x1a49   : > { %5722 = vrot.lane.b32.xlu1 %v6104_v41, %s5929_s28 }
0x1a4d   : > { %3300 = vrot.lane.b32.xlu1 %v6390_v60, %s5931_s30 }
0x1a4f   : > { %5717 = vrot.lane.b32.xlu0 %v6104_v41, %s5928_s27 }
0x1a53   : > { %3302 = vrot.lane.b32.xlu0 %v6398_v61, %s5931_s30 }
0x1ac5   : > { %v3208_v10 = vpop.xlane.xlu1 %3207 }
0x1ac6   : > { %5851 = vrcp.f32 %v3208_v10  ;;  %v3205_v13 = vpop.xlane.xlu0 %3204 }
0x1ac7   : > { %5853 = vrcp.f32 %v3205_v13 }
0x1ac9   : > { %v5723_v16 = vpop.permute.xlu1 %5722 }
0x1aca   : > { %v5718_v25 = vpop.permute.xlu0 %5717  ;;  %v5725_v26 = vunpack.i.h.bf16 %v5723_v16  ;;  %v5724_v27 = vunpack.i.l.bf16 %v5723_v16 }
0x1acb   : > { %v5720_v28 = vunpack.i.h.bf16 %v5718_v25  ;;  %v5719_v29 = vunpack.i.l.bf16 %v5718_v25 }
0x1acc   : > { %v5507_v44 = vpack.c.bf16 %v5725_v26, %v5724_v27 }
0x1acd   : > { %v5503_v43 = vpack.c.bf16 %v5720_v28, %v5719_v29  ;;  %v3301_v51 = vpop.permute.xlu1 %3300 }
0x1ace   : > { %v3303_v37 = vpop.permute.xlu0 %3302 }
0x1acf   : > { %5504 = vmatprep.subr.bf16.mxu0 %v5503_v43 }
0x1ad0   : > { %v5852_v45 = vpop.eup %5851  ;;  %5506 = vmatpush3.bf16.msra.mxu0 %v5503_v43 }
0x1ad1   : > { %v5854_v46 = vpop.eup %5853  ;;  %5509 = vmatprep.subr.msk.bf16.mxu0 %vm6070_vm2, %v5507_v44  ;;  %v3212_v50 = vmul.f32 %v5852_v45, %v5848_v33 }
0x1ad2   : > { %v3211_v47 = vmul.f32 %v5854_v46, %v5850_v8 }
0x1ad4   : > { %5256 = vmatprep.mubr.msk.f32.mxu0 %vm687_vm3, %v3211_v47 }
0x1ad5   : > { %5257 = vmatmul.mubr.msk.f32.vlgmr.msra.gmra.mrb[32].mxu0 %vm687_vm3, %v3212_v50 }
0x1ad6   : > { %5263 = vmatprep.mubr.msk.f32.mxu0 %vm601_vm1, %v3301_v51 }
0x1ad9   : > { %5512 = vmatpush3.bf16.xpose.msk.msra.mxu0 %vm6070_vm2, %v5507_v44 }
0x1ae0   : > { %5264 = vmatmul.mubr.msk.f32.vlgmr.msra.gmra.mrb[34].mxu0 %vm601_vm1, %v3303_v37 }
0x1ba8   : > { %v6426_v52 = vpop.f32.mrb[32].mxu0 }
0x1ba9   : > { %v6428_v36 = vpop.f32.mrb[33].mxu0 }
0x1bb3   : > { %v5265_v57 = vpop.f32.mrb[34].mxu0 }
0x1bb4   : > { %v3382_v58 = vpop.f32.mrb[35].mxu0  ;;  %v3394_v40 = vsel %vm687_vm3, %v5265_v57, -inf }
0x1bb5   : > { %3395 = vmax.xlane.f32.xlu0 %v3394_v40  ;;  %v3391_v59 = vsel %vm687_vm3, %v3382_v58, -inf }
0x1bb6   : > { %3392 = vmax.xlane.f32.xlu1 %v3391_v59 }
0x1c42   : > { %v3396_v39 = vpop.xlane.xlu0 %3395 }
0x1c43   : > { %v3398_v53 = vsub.f32 %v5265_v57, %v3396_v39  ;;  %v3393_v19 = vpop.xlane.xlu1 %3392 }
0x1c44   : > { %v3397_v54 = vsub.f32 %v3382_v58, %v3393_v19 }
0x1c45   : > { %v3401_v0 = vmul.f32 1.442695, %v3398_v53 }
0x1c46   : > { %v3399_v62 = vmul.f32 1.442695, %v3397_v54 }
0x1c47   : > { %5855 = vpow2.f32 %v3401_v0 }
0x1c48   : > { %5857 = vpow2.f32 %v3399_v62 }
0x1c51   : > { %v5856_v34 = vpop.eup %5855 }
0x1c52   : > { %v5858_v38 = vpop.eup %5857  ;;  %v3406_v6 = vsel %vm687_vm3, %v5856_v34, 0.0 }
0x1c53   : > { %3407 = vadd.xlane.f32.xlu1 %v3406_v6  ;;  %v3403_v7 = vsel %vm687_vm3, %v5858_v38, 0.0 }
0x1c54   : > { %3404 = vadd.xlane.f32.xlu0 %v3403_v7 }
0x1c64   : > { %5732 = vrot.lane.b32.xlu1 %v6104_v41, %s5930_s29 }
0x1c68   : > { %3500 = vrot.lane.b32.xlu1 %v6390_v60, %s5932_s14 }
0x1c6a   : > { %5727 = vrot.lane.b32.xlu0 %v6104_v41, %s5933_s15 }
0x1c6e   : > { %3502 = vrot.lane.b32.xlu0 %v6398_v61, %s5932_s14 }
0x1ce0   : > { %v3408_v33 = vpop.xlane.xlu1 %3407 }
0x1ce1   : > { %5859 = vrcp.f32 %v3408_v33  ;;  %v3405_v8 = vpop.xlane.xlu0 %3404 }
0x1ce2   : > { %5861 = vrcp.f32 %v3405_v8 }
0x1ce4   : > { %v5733_v9 = vpop.permute.xlu1 %5732 }
0x1ce5   : > { %v5728_v20 = vpop.permute.xlu0 %5727  ;;  %v5735_v10 = vunpack.i.h.bf16 %v5733_v9  ;;  %v5734_v13 = vunpack.i.l.bf16 %v5733_v9 }
0x1ce6   : > { %v5730_v16 = vunpack.i.h.bf16 %v5728_v20  ;;  %v5729_v25 = vunpack.i.l.bf16 %v5728_v20 }
0x1ce7   : > { %v5517_v27 = vpack.c.bf16 %v5735_v10, %v5734_v13 }
0x1ce8   : > { %v5513_v26 = vpack.c.bf16 %v5730_v16, %v5729_v25  ;;  %v3501_v45 = vpop.permute.xlu1 %3500 }
0x1ce9   : > { %v3503_v46 = vpop.permute.xlu0 %3502 }
0x1cea   : > { %5514 = vmatprep.subr.bf16.mxu1 %v5513_v26 }
0x1ceb   : > { %v5860_v28 = vpop.eup %5859  ;;  %5516 = vmatpush3.bf16.msra.mxu1 %v5513_v26 }
0x1cec   : > { %v5862_v29 = vpop.eup %5861  ;;  %5519 = vmatprep.subr.msk.bf16.mxu1 %vm6070_vm2, %v5517_v27  ;;  %v3412_v44 = vmul.f32 %v5860_v28, %v5856_v34 }
0x1ced   : > { %v3411_v43 = vmul.f32 %v5862_v29, %v5858_v38 }
0x1cef   : > { %5270 = vmatprep.mubr.msk.f32.mxu1 %vm687_vm3, %v3411_v43 }
0x1cf0   : > { %5271 = vmatmul.mubr.msk.f32.vlgmr.msra.gmra.mrb[26].mxu1 %vm687_vm3, %v3412_v44 }
0x1cf1   : > { %5277 = vmatprep.mubr.msk.f32.mxu1 %vm601_vm1, %v3501_v45 }
0x1cf4   : > { %5522 = vmatpush3.bf16.xpose.msk.msra.mxu1 %vm6070_vm2, %v5517_v27 }
0x1cfb   : > { %5278 = vmatmul.mubr.msk.f32.vlgmr.msra.gmra.mrb[28].mxu1 %vm601_vm1, %v3503_v46 }
0x1dc3   : > { %v6450_v47 = vpop.f32.mrb[26].mxu1 }
0x1dc4   : > { %v6452_v50 = vpop.f32.mrb[27].mxu1 }
0x1dce   : > { %v5279_v51 = vpop.f32.mrb[28].mxu1 }
0x1dcf   : > { %v3582_v37 = vpop.f32.mrb[29].mxu1  ;;  %v3594_v57 = vsel %vm687_vm3, %v5279_v51, -inf }
0x1dd0   : > { %3595 = vmax.xlane.f32.xlu0 %v3594_v57  ;;  %v3591_v58 = vsel %vm687_vm3, %v3582_v37, -inf }
0x1dd1   : > { %3592 = vmax.xlane.f32.xlu1 %v3591_v58 }
0x1e5d   : > { %v3596_v40 = vpop.xlane.xlu0 %3595 }
0x1e5e   : > { %v3598_v59 = vsub.f32 %v5279_v51, %v3596_v40  ;;  %v3593_v39 = vpop.xlane.xlu1 %3592 }
0x1e5f   : > { %v3597_v53 = vsub.f32 %v3582_v37, %v3593_v39 }
0x1e60   : > { %v3601_v19 = vmul.f32 1.442695, %v3598_v59 }
0x1e61   : > { %v3599_v54 = vmul.f32 1.442695, %v3597_v53 }
0x1e62   : > { %5863 = vpow2.f32 %v3601_v19 }
0x1e63   : > { %5865 = vpow2.f32 %v3599_v54 }
0x1e6c   : > { %v5864_v0 = vpop.eup %5863 }
0x1e6d   : > { %v5866_v62 = vpop.eup %5865  ;;  %v3606_v34 = vsel %vm687_vm3, %v5864_v0, 0.0 }
0x1e6e   : > { %3607 = vadd.xlane.f32.xlu1 %v3606_v34  ;;  %v3603_v38 = vsel %vm687_vm3, %v5866_v62, 0.0 }
0x1e6f   : > { %3604 = vadd.xlane.f32.xlu0 %v3603_v38 }
0x1e7f   : > { %5742 = vrot.lane.b32.xlu1 %v6104_v41, %s5934_s17  ;;  %s6818_s17 = scalar_lea.vmem %s6858_s13, %s4736_s19 }
0x1e83   : > { %3700 = vrot.lane.b32.xlu1 %v6390_v60, %s5936_s20 }
0x1e85   : > { %5737 = vrot.lane.b32.xlu0 %v6104_v41, %s5935_s18 }
0x1e89   : > { %3702 = vrot.lane.b32.xlu0 %v6398_v61, %s5936_s20 }
0x1efb   : > { %v3608_v6 = vpop.xlane.xlu1 %3607 }
0x1efc   : > { %5867 = vrcp.f32 %v3608_v6  ;;  %v3605_v7 = vpop.xlane.xlu0 %3604 }
0x1efd   : > { %5869 = vrcp.f32 %v3605_v7 }
0x1eff   : > { %v5743_v33 = vpop.permute.xlu1 %5742 }
0x1f00   : > { %v5738_v8 = vpop.permute.xlu0 %5737  ;;  %v5745_v9 = vunpack.i.h.bf16 %v5743_v33  ;;  %v5744_v20 = vunpack.i.l.bf16 %v5743_v33 }
0x1f01   : > { %v5740_v10 = vunpack.i.h.bf16 %v5738_v8  ;;  %v5739_v13 = vunpack.i.l.bf16 %v5738_v8 }
0x1f02   : > { %v5527_v25 = vpack.c.bf16 %v5745_v9, %v5744_v20 }
0x1f03   : > { %v5523_v16 = vpack.c.bf16 %v5740_v10, %v5739_v13  ;;  %v3701_v28 = vpop.permute.xlu1 %3700 }
0x1f04   : > { %v3703_v29 = vpop.permute.xlu0 %3702 }
0x1f05   : > { %5524 = vmatprep.subr.bf16.mxu0 %v5523_v16 }
0x1f06   : > { %v5868_v60 = vpop.eup %5867  ;;  %5526 = vmatpush3.bf16.msra.mxu0 %v5523_v16 }
0x1f07   : > { %v5870_v26 = vpop.eup %5869  ;;  %5529 = vmatprep.subr.msk.bf16.mxu0 %vm6070_vm2, %v5527_v25  ;;  %v3612_v27 = vmul.f32 %v5868_v60, %v5864_v0 }
0x1f08   : > { %v3611_v61 = vmul.f32 %v5870_v26, %v5866_v62 }
0x1f0a   : > { %5284 = vmatprep.mubr.msk.f32.mxu0 %vm687_vm3, %v3611_v61 }
0x1f0b   : > { %5285 = vmatmul.mubr.msk.f32.vlgmr.msra.gmra.mrb[36].mxu0 %vm687_vm3, %v3612_v27 }
0x1f0c   : > { %5291 = vmatprep.mubr.msk.f32.mxu0 %vm601_vm1, %v3701_v28 }
0x1f0f   : > { %5532 = vmatpush3.bf16.xpose.msk.msra.mxu0 %vm6070_vm2, %v5527_v25 }
0x1f16   : > { %5292 = vmatmul.mubr.msk.f32.vlgmr.msra.gmra.mrb[38].mxu0 %vm601_vm1, %v3703_v29 }
0x1fde   : > { %v5286_v43 = vpop.f32.mrb[36].mxu0 }
0x1fdf   : > { %v3691_v44 = vpop.f32.mrb[37].mxu0 }
0x1fe9   : > { %v5293_v45 = vpop.f32.mrb[38].mxu0 }
0x1fea   : > { %v3782_v46 = vpop.f32.mrb[39].mxu0  ;;  %v3794_v51 = vsel %vm687_vm3, %v5293_v45, -inf }
0x1feb   : > { %3795 = vmax.xlane.f32.xlu0 %v3794_v51  ;;  %v3791_v37 = vsel %vm687_vm3, %v3782_v46, -inf }
0x1fec   : > { %3792 = vmax.xlane.f32.xlu1 %v3791_v37 }
0x2078   : > { %v3796_v57 = vpop.xlane.xlu0 %3795 }
0x2079   : > { %v3798_v58 = vsub.f32 %v5293_v45, %v3796_v57  ;;  %v3793_v40 = vpop.xlane.xlu1 %3792 }
0x207a   : > { %v3797_v59 = vsub.f32 %v3782_v46, %v3793_v40 }
0x207b   : > { %v3801_v39 = vmul.f32 1.442695, %v3798_v58 }
0x207c   : > { %v3799_v30 = vmul.f32 1.442695, %v3797_v59 }
0x207d   : > { %5871 = vpow2.f32 %v3801_v39 }
0x207e   : > { %5873 = vpow2.f32 %v3799_v30 }
0x2087   : > { %v5872_v53 = vpop.eup %5871 }
0x2088   : > { %v5874_v19 = vpop.eup %5873  ;;  %v3806_v54 = vsel %vm687_vm3, %v5872_v53, 0.0 }
0x2089   : > { %3807 = vadd.xlane.f32.xlu1 %v3806_v54  ;;  %v3803_v0 = vsel %vm687_vm3, %v5874_v19, 0.0 }
0x208a   : > { %3804 = vadd.xlane.f32.xlu0 %v3803_v0 }
0x209a   : > { %1399 = vrot.lane.b32.xlu1 %v6172_v22, %s5938_s23 }
0x209e   : > { %1401 = vrot.lane.b32.xlu1 %v6170_v21, %s5938_s23 }
0x20a0   : > { %5747 = vrot.lane.b32.xlu0 %v6104_v41, %s5937_s21 }
0x20a2   : > { %1409 = vrot.lane.b32.xlu1 %v6174_v23, %s5939_s24 }
0x20a4   : > { %1407 = vrot.lane.b32.xlu0 %v6176_v24, %s5939_s24  ;;  %v3940_v24 = vld [vmem:[%s6848_s3] sm:$0xff] }
0x20a6   : > { %1417 = vrot.lane.b32.xlu1 %v6202_v1, %s5940_s26  ;;  %v3941_v1 = vld [vmem:[%s6848_s3 + $0x8] sm:$0xff] }
0x20a8   : > { %1415 = vrot.lane.b32.xlu0 %v6204_v2, %s5940_s26 }
0x20aa   : > { %2236 = vrot.lane.b32.xlu1 %v6250_v17, %s5938_s23 }
0x20ac   : > { %2234 = vrot.lane.b32.xlu0 %v6252_v18, %s5938_s23 }
0x20ae   : > { %2244 = vrot.lane.b32.xlu1 %v6274_v4, %s5939_s24 }
0x20b0   : > { %2242 = vrot.lane.b32.xlu0 %v6276_v32, %s5939_s24  ;;  %v5537_v32 = vpack.c.bf16 %v3941_v1, %v3940_v24  ;;  %v5911_v1 = vld [vmem:[%s6039_s22] sm:$0xff] }
0x20b2   : > { %2252 = vrot.lane.b32.xlu1 %v6302_v55, %s5940_s26 }
0x20b4   : > { %2250 = vrot.lane.b32.xlu0 %v6304_v56, %s5940_s26 }
0x20b6   : > { %3070 = vrot.lane.b32.xlu1 %v6350_v11, %s5938_s23  ;;  %v3942_v11 = vld [vmem:[%s6848_s3 + $0x10] sm:$0xff] }
0x20b8   : > { %3068 = vrot.lane.b32.xlu0 %v6352_v12, %s5938_s23  ;;  %v3943_v12 = vld [vmem:[%s6848_s3 + $0x18] sm:$0xff] }
0x20b9   : > { %v5541_v38 = vpack.c.bf16 %v3943_v12, %v3942_v11 }
0x20ba   : > { %3078 = vrot.lane.b32.xlu1 %v6374_v3, %s5939_s24 }
0x20bc   : > { %3076 = vrot.lane.b32.xlu0 %v6376_v5, %s5939_s24 }
0x20be   : > { %3086 = vrot.lane.b32.xlu1 %v6402_v63, %s5940_s26 }
0x20c0   : > { %3084 = vrot.lane.b32.xlu0 %v6404_v35, %s5940_s26 }
0x20c2   : > { %3904 = vrot.lane.b32.xlu1 %v6450_v47, %s5938_s23 }
0x20c4   : > { %3902 = vrot.lane.b32.xlu0 %v6452_v50, %s5938_s23 }
0x20c6   : > { %3912 = vrot.lane.b32.xlu1 %v5286_v43, %s5939_s24 }
0x20c8   : > { %3910 = vrot.lane.b32.xlu0 %v3691_v44, %s5939_s24 }
0x2116   : > { %v3808_v41 = vpop.xlane.xlu1 %3807 }
0x2117   : > { %5875 = vrcp.f32 %v3808_v41  ;;  %v3805_v21 = vpop.xlane.xlu0 %3804  ;;  %v6561_v41 = vld [vmem:[%s6849_s4] ss:$0 sm:$0xff] }
0x2118   : > { %5877 = vrcp.f32 %v3805_v21 }
0x211a   : > { %v1400_v22 = vpop.permute.xlu1 %1399 }
0x211b   : > { %v5748_v23 = vpop.permute.xlu0 %5747  ;;  %v1421_v5 = vsel %vm601_vm1, %v6140_v15, %v1400_v22 }
0x211c   : > { %v5750_v2 = vunpack.i.h.bf16 %v5748_v23  ;;  %v5749_v17 = vunpack.i.l.bf16 %v5748_v23 }
0x211e   : > { %v5533_v18 = vpack.c.bf16 %v5750_v2, %v5749_v17  ;;  %v1402_v4 = vpop.permute.xlu1 %1401 }
0x211f   : > { %v1408_v55 = vpop.permute.xlu0 %1407  ;;  %v1422_v6 = vsel %vm601_vm1, %v6138_v14, %v1402_v4 }
0x2120   : > { %5534 = vmatprep.subr.bf16.mxu1 %v5533_v18  ;;  %v1423_v35 = vsel %vm687_vm3, %v1421_v5, %v1408_v55  ;;  %v5913_v55 = vld [vmem:[%s6039_s22 + $0x10] sm:$0xff] }
0x2121   : > { %v5876_v56 = vpop.eup %5875  ;;  %5536 = vmatpush3.bf16.msra.mxu1 %v5533_v18  ;;  %v5912_v18 = vld [vmem:[%s6039_s22 + $0x8] sm:$0xff] }
0x2122   : > { %v5878_v3 = vpop.eup %5877  ;;  %v1410_v63 = vpop.permute.xlu1 %1409  ;;  %5538 = vmatprep.subr.bf16.mxu1 %v5537_v32  ;;  %v3812_v62 = vmul.f32 %v5876_v56, %v5872_v53 }
0x2123   : > { %v1416_v47 = vpop.permute.xlu0 %1415  ;;  %v3811_v50 = vmul.f32 %v5878_v3, %v5874_v19  ;;  %v1424_v7 = vsel %vm687_vm3, %v1422_v6, %v1410_v63  ;;  %v5914_v63 = vld [vmem:[%s6039_s22 + $0x18] sm:$0xff]  ;;  %v5916_v6 = vld [vmem:[%s6039_s22 + $0x28] sm:$0xff] }
0x2124   : > { %v1426_v34 = vsel %vm1425_vm4, %v1423_v35, %v1416_v47 }
0x2125   : > { %1428 = vst.msk [vmem:[#allocation2] sm:$0xff] %vm463_vm0, %v1426_v34  ;;  %5298 = vmatprep.mubr.msk.f32.mxu1 %vm687_vm3, %v3811_v50  ;;  %v5915_v34 = vld [vmem:[%s6039_s22 + $0x20] sm:$0xff] }
0x2126   : > { %5299 = vmatmul.mubr.msk.f32.vlgmr.msra.gmra.mrb[30].mxu1 %vm687_vm3, %v3812_v62  ;;  %v1418_v15 = vpop.permute.xlu1 %1417 }
0x2127   : > { %v1427_v33 = vsel %vm1425_vm4, %v1424_v7, %v1418_v15  ;;  %v2235_v8 = vpop.permute.xlu0 %2234  ;;  %5540 = vmatpush3.bf16.msra.mxu1 %v5537_v32 }
0x2128   : > { %1429 = vst.msk [vmem:[#allocation2 + $0x8] sm:$0xff] %vm463_vm0, %v1427_v33  ;;  %5542 = vmatprep.subr.bf16.mxu1 %v5541_v38  ;;  %v2256_v10 = vsel %vm601_vm1, %v6228_v49, %v2235_v8 }
0x212a   : > { %v2237_v9 = vpop.permute.xlu1 %2236 }
0x212b   : > { %v2243_v20 = vpop.permute.xlu0 %2242  ;;  %5544 = vmatpush3.bf16.msra.mxu1 %v5541_v38  ;;  %v2257_v61 = vsel %vm601_vm1, %v6226_v48, %v2237_v9 }
0x212c   : > { %v3932_v14 = vld [vmem:[#allocation2] sm:$0xff]  ;;  %v2258_v16 = vsel %vm687_vm3, %v2256_v10, %v2243_v20 }
0x212d   : > { %5309 = vmatprep.mubr.msk.f32.mxu1 %vm463_vm0, %v3932_v14 }
0x212e   : > { %v2245_v13 = vpop.permute.xlu1 %2244 }
0x212f   : > { %v2251_v25 = vpop.permute.xlu0 %2250  ;;  %v3933_v60 = vld [vmem:[#allocation2 + $0x8] sm:$0xff]  ;;  %v2259_v27 = vsel %vm687_vm3, %v2257_v61, %v2245_v13 }
0x2130   : > { %v2260_v26 = vsel %vm1425_vm4, %v2258_v16, %v2251_v25  ;;  %5310 = vmatmul.mubr.msk.f32.vlgmr.msra.gmra.mrb[32].mxu1 %vm463_vm0, %v3933_v60 }
0x2131   : > { %2262 = vst.msk [vmem:[#allocation2 + $0x10] sm:$0xff] %vm463_vm0, %v2260_v26 }
0x2132   : > { %v2253_v28 = vpop.permute.xlu1 %2252 }
0x2133   : > { %v2261_v29 = vsel %vm1425_vm4, %v2259_v27, %v2253_v28  ;;  %v3069_v49 = vpop.permute.xlu0 %3068 }
0x2134   : > { %2263 = vst.msk [vmem:[#allocation2 + $0x18] sm:$0xff] %vm463_vm0, %v2261_v29  ;;  %v3090_v46 = vsel %vm601_vm1, %v6328_v42, %v3069_v49 }
0x2136   : > { %v3071_v43 = vpop.permute.xlu1 %3070 }
0x2137   : > { %v3077_v44 = vpop.permute.xlu0 %3076  ;;  %v3091_v40 = vsel %vm601_vm1, %v6326_v31, %v3071_v43 }
0x2138   : > { %v3934_v45 = vld [vmem:[#allocation2 + $0x10] sm:$0xff]  ;;  %v3092_v48 = vsel %vm687_vm3, %v3090_v46, %v3077_v44 }
0x2139   : > { %5312 = vmatprep.mubr.msk.f32.mxu1 %vm463_vm0, %v3934_v45 }
0x213a   : > { %v3079_v51 = vpop.permute.xlu1 %3078 }
0x213b   : > { %v3085_v37 = vpop.permute.xlu0 %3084  ;;  %v3935_v57 = vld [vmem:[#allocation2 + $0x18] sm:$0xff]  ;;  %v3093_v59 = vsel %vm687_vm3, %v3091_v40, %v3079_v51 }
0x213c   : > { %v3094_v58 = vsel %vm1425_vm4, %v3092_v48, %v3085_v37  ;;  %5313 = vmatmul.mubr.msk.f32.gmra.mrb[34].mxu1 %vm463_vm0, %v3935_v57 }
0x213d   : > { %3096 = vst.msk [vmem:[#allocation2 + $0x20] sm:$0xff] %vm463_vm0, %v3094_v58 }
0x213e   : > { %v3087_v39 = vpop.permute.xlu1 %3086 }
0x213f   : > { %v3095_v30 = vsel %vm1425_vm4, %v3093_v59, %v3087_v39  ;;  %v3903_v20 = vpop.permute.xlu0 %3902 }
0x2140   : > { %3097 = vst.msk [vmem:[#allocation2 + $0x28] sm:$0xff] %vm463_vm0, %v3095_v30  ;;  %v3924_v16 = vsel %vm601_vm1, %v6428_v36, %v3903_v20 }
0x2142   : > { %v3905_v9 = vpop.permute.xlu1 %3904 }
0x2143   : > { %v3911_v10 = vpop.permute.xlu0 %3910  ;;  %v3925_v13 = vsel %vm601_vm1, %v6426_v52, %v3905_v9 }
0x2144   : > { %v3936_v42 = vld [vmem:[#allocation2 + $0x20] sm:$0xff]  ;;  %v3926_v26 = vsel %vm687_vm3, %v3924_v16, %v3911_v10 }
0x2145   : > { %5315 = vmatprep.mubr.msk.f32.mxu1 %vm463_vm0, %v3936_v42 }
0x2146   : > { %v3913_v14 = vpop.permute.xlu1 %3912 }
0x2147   : > { %v3937_v53 = vld [vmem:[#allocation2 + $0x28] sm:$0xff]  ;;  %v3927_v25 = vsel %vm687_vm3, %v3925_v13, %v3913_v14 }
0x2148   : > { %5316 = vmatmul.mubr.msk.f32.gmra.mrb[36].mxu1 %vm463_vm0, %v3937_v53  ;;  %v5917_v53 = vld [vmem:[%s6039_s22 + $0x38] sm:$0xff] }
0x21f9   : > { %v5300_v19 = vpop.f32.mrb[30].mxu1 }
0x21fa   : > { %3920 = vrot.lane.b32.xlu1 %v5300_v19, %s5940_s26  ;;  %v3891_v31 = vpop.f32.mrb[31].mxu1 }
0x21fb   : > { %3918 = vrot.lane.b32.xlu0 %v3891_v31, %s5940_s26  ;;  %v5918_v31 = vld [vmem:[%s6039_s22 + $0x30] sm:$0xff] }
0x2203   : > { %v5311_v54 = vpop.f32.mrb[32].mxu1 }
0x2204   : > { %v4041_v0 = vpop.f32.mrb[33].mxu1  ;;  %v4047_v24 = vadd.f32 %v5311_v54, %v6561_v41 }
0x2205   : > { %v4042_v23 = vadd.f32 %v6561_v41, %v4041_v0 }
0x2206   : > { %v4081_v4 = vadd.f32 %v5912_v18, %v4047_v24 }
0x2207   : > { %v4080_v2 = vadd.f32 %v5911_v1, %v4042_v23 }
0x2208   : > { %v4093_v5 = vsel %vm463_vm0, %v4081_v4, 0.0 }
0x2209   : > { %v4090_v11 = vsel %vm463_vm0, %v4080_v2, 0.0 }
0x220f   : > { %v5314_v21 = vpop.f32.mrb[34].mxu1 }
0x2210   : > { %v4051_v22 = vpop.f32.mrb[35].mxu1  ;;  %v4057_v32 = vadd.f32 %v5314_v21, %v6561_v41 }
0x2211   : > { %v4052_v17 = vadd.f32 %v6561_v41, %v4051_v22 }
0x2212   : > { %v4083_v35 = vadd.f32 %v5914_v63, %v4057_v32 }
0x2213   : > { %v6570_v56 = vadd.f32 %v5913_v55, %v4052_v17 }
0x2214   : > { %v4099_v15 = vsel %vm463_vm0, %v4083_v35, 0.0 }
0x2215   : > { %v4096_v62 = vsel %vm463_vm0, %v6570_v56, 0.0 }
0x221a   : > { %4091 = vadd.xlane.f32.xlu0 %v4090_v11 }
0x221b   : > { %v5317_v12 = vpop.f32.mrb[36].mxu1 }
0x221c   : > { %v4061_v3 = vpop.f32.mrb[37].mxu1  ;;  %v4067_v47 = vadd.f32 %v5317_v12, %v6561_v41 }
0x221d   : > { %v4062_v50 = vadd.f32 %v6561_v41, %v4061_v3 }
0x221e   : > { %4094 = vadd.xlane.f32.xlu1 %v4093_v5  ;;  %4097 = vadd.xlane.f32.xlu0 %v4096_v62  ;;  %v4085_v7 = vadd.f32 %v5916_v6, %v4067_v47  ;;  %v4223_v47 = vld [vmem:[%s6852_s7] sm:$0xff] }
0x221f   : > { %v4084_v38 = vadd.f32 %v5915_v34, %v4062_v50  ;;  %v4224_v50 = vld [vmem:[%s6852_s7 + $0x8] sm:$0xff]  ;;  %v4225_v34 = vld [vmem:[%s6852_s7 + $0x10] sm:$0xff] }
0x2220   : > { %v4105_v8 = vsel %vm463_vm0, %v4085_v7, 0.0  ;;  %v5545_v62 = vpack.c.bf16 %v4224_v50, %v4223_v47  ;;  %v4374_v47 = vld [vmem:[%s6854_s9 + $0x18] sm:$0xff] }
0x2221   : > { %v4102_v33 = vsel %vm463_vm0, %v4084_v38, 0.0 }
0x2222   : > { %4100 = vadd.xlane.f32.xlu0 %v4099_v15  ;;  %4103 = vadd.xlane.f32.xlu1 %v4102_v33 }
0x2223   : > { %5546 = vmatprep.subr.bf16.mxu0 %v5545_v62 }
0x2224   : > { %5548 = vmatpush3.bf16.msra.mxu0 %v5545_v62  ;;  %v4375_v62 = vld [vmem:[%s6854_s9 + $0x20] sm:$0xff] }
0x2226   : > { %4106 = vadd.xlane.f32.xlu0 %v4105_v8 }
0x226c   : > { %v3921_v60 = vpop.permute.xlu1 %3920 }
0x226d   : > { %v3929_v61 = vsel %vm1425_vm4, %v3927_v25, %v3921_v60  ;;  %v3919_v27 = vpop.permute.xlu0 %3918 }
0x226e   : > { %3931 = vst.msk [vmem:[#allocation2 + $0x38] sm:$0xff] %vm463_vm0, %v3929_v61  ;;  %v3928_v28 = vsel %vm1425_vm4, %v3926_v26, %v3919_v27 }
0x226f   : > { %3930 = vst.msk [vmem:[#allocation2 + $0x30] sm:$0xff] %vm463_vm0, %v3928_v28 }
0x2275   : > { %v3939_v52 = vld [vmem:[#allocation2 + $0x38] sm:$0xff] }
0x2276   : > { %v3938_v29 = vld [vmem:[#allocation2 + $0x30] sm:$0xff] }
0x2277   : > { %5318 = vmatprep.mubr.msk.f32.mxu1 %vm463_vm0, %v3938_v29 }
0x2278   : > { %5319 = vmatmul.mubr.msk.f32.gmra.mrb[38].mxu1 %vm463_vm0, %v3939_v52 }
0x22a7   : > { %v4092_v36 = vpop.xlane.xlu0 %4091 }
0x22a8   : > { %v4115_v46 = vmul.f32 0.03125, %v4092_v36 }
0x22aa   : > { %v6599_v40 = vsub.f32 %v4080_v2, %v4115_v46 }
0x22ab   : > { %v4098_v49 = vpop.xlane.xlu0 %4097  ;;  %v4095_v43 = vpop.xlane.xlu1 %4094 }
0x22ac   : > { %v4116_v45 = vmul.f32 0.03125, %v4095_v43  ;;  %v4117_v59 = vmul.f32 0.03125, %v4098_v49  ;;  %v4131_v2 = vmul.f32 %v6599_v40, %v6599_v40 }
0x22ae   : > { %v6596_v48 = vsub.f32 %v4081_v4, %v4116_v45  ;;  %v6610_v24 = vsub.f32 %v6570_v56, %v4117_v59  ;;  %v4139_v55 = vsel %vm463_vm0, %v4131_v2, 0.0 }
0x22af   : > { %v4101_v44 = vpop.xlane.xlu0 %4100  ;;  %v4104_v42 = vpop.xlane.xlu1 %4103 }
0x22b0   : > { %v4118_v37 = vmul.f32 0.03125, %v4101_v44  ;;  %v4132_v23 = vmul.f32 %v6596_v48, %v6596_v48  ;;  %v4119_v1 = vmul.f32 0.03125, %v4104_v42  ;;  %v4133_v56 = vmul.f32 %v6610_v24, %v6610_v24 }
0x22b2   : > { %v6604_v0 = vsub.f32 %v4083_v35, %v4118_v37  ;;  %v4142_v18 = vsel %vm463_vm0, %v4132_v23, 0.0  ;;  %v6620_v32 = vsub.f32 %v4084_v38, %v4119_v1  ;;  %v4145_v3 = vsel %vm463_vm0, %v4133_v56, 0.0  ;;  %v4226_v38 = vld [vmem:[%s6852_s7 + $0x18] sm:$0xff] }
0x22b3   : > { %v4107_v39 = vpop.xlane.xlu0 %4106  ;;  %v5549_v6 = vpack.c.bf16 %v4226_v38, %v4225_v34  ;;  %v4376_v34 = vld [vmem:[%s6854_s9 + $0x28] sm:$0xff] }
0x22b4   : > { %v4120_v21 = vmul.f32 0.03125, %v4107_v39  ;;  %v4134_v4 = vmul.f32 %v6604_v0, %v6604_v0  ;;  %v4135_v5 = vmul.f32 %v6620_v32, %v6620_v32  ;;  %v6658_v39 = vld [vmem:[%s6850_s5] ss:$0 sm:$0xff]  ;;  %v5561_v38 = vpack.c.bf16 %v4376_v34, %v4375_v62 }
0x22b5   : > { %5550 = vmatprep.subr.bf16.mxu0 %v5549_v6 }
0x22b6   : > { %v6615_v17 = vsub.f32 %v4085_v7, %v4120_v21  ;;  %v4148_v11 = vsel %vm463_vm0, %v4134_v4, 0.0  ;;  %v4151_v35 = vsel %vm463_vm0, %v4135_v5, 0.0  ;;  %5552 = vmatpush3.bf16.msra.mxu0 %v5549_v6  ;;  %v4377_v6 = vld [vmem:[%s6854_s9 + $0x30] sm:$0xff] }
0x22b8   : > { %v4136_v12 = vmul.f32 %v6615_v17, %v6615_v17 }
0x22ba   : > { %v4154_v63 = vsel %vm463_vm0, %v4136_v12, 0.0 }
0x234b   : > { %v5320_v51 = vpop.f32.mrb[38].mxu1 }
0x234c   : > { %v4077_v57 = vadd.f32 %v5320_v51, %v6561_v41  ;;  %v4071_v58 = vpop.f32.mrb[39].mxu1 }
0x234d   : > { %v4072_v30 = vadd.f32 %v6561_v41, %v4071_v58 }
0x234e   : > { %v4087_v19 = vadd.f32 %v5917_v53, %v4077_v57 }
0x234f   : > { %v4086_v54 = vadd.f32 %v5918_v31, %v4072_v30 }
0x2350   : > { %v4111_v22 = vsel %vm463_vm0, %v4087_v19, 0.0 }
0x2351   : > { %4112 = vadd.xlane.f32.xlu0 %v4111_v22  ;;  %v4108_v41 = vsel %vm463_vm0, %v4086_v54, 0.0 }
0x2352   : > { %4109 = vadd.xlane.f32.xlu1 %v4108_v41 }
0x2355   : > { %4143 = vadd.xlane.f32.xlu0 %v4142_v18 }
0x2356   : > { %4140 = vadd.xlane.f32.xlu1 %v4139_v55 }
0x2359   : > { %4149 = vadd.xlane.f32.xlu0 %v4148_v11 }
0x235a   : > { %4146 = vadd.xlane.f32.xlu1 %v4145_v3 }
0x235d   : > { %4155 = vadd.xlane.f32.xlu0 %v4154_v63  ;;  %v4373_v63 = vld [vmem:[%s6854_s9 + $0x10] sm:$0xff] }
0x235e   : > { %4152 = vadd.xlane.f32.xlu1 %v4151_v35  ;;  %v5557_v50 = vpack.c.bf16 %v4374_v47, %v4373_v63 }
0x23de   : > { %v4113_v7 = vpop.xlane.xlu0 %4112 }
0x23df   : > { %v4122_v15 = vmul.f32 0.03125, %v4113_v7  ;;  %v4110_v33 = vpop.xlane.xlu1 %4109  ;;  %v4378_v7 = vld [vmem:[%s6854_s9 + $0x38] sm:$0xff] }
0x23e0   : > { %v4121_v8 = vmul.f32 0.03125, %v4110_v33 }
0x23e1   : > { %v6645_v9 = vsub.f32 %v4087_v19, %v4122_v15  ;;  %v4854_v19 = vld [vmem:[%s6851_s6] ss:$0 sm:$0xff]  ;;  %v5565_v15 = vpack.c.bf16 %v4378_v7, %v4377_v6 }
0x23e2   : > { %v6647_v20 = vsub.f32 %v4086_v54, %v4121_v8  ;;  %v4144_v14 = vpop.xlane.xlu0 %4143 }
0x23e3   : > { %v4164_v10 = vmul.f32 0.03125, %v4144_v14  ;;  %v4141_v13 = vpop.xlane.xlu1 %4140  ;;  %v4138_v16 = vmul.f32 %v6645_v9, %v6645_v9 }
0x23e4   : > { %v4163_v25 = vmul.f32 0.03125, %v4141_v13  ;;  %v4137_v60 = vmul.f32 %v6647_v20, %v6647_v20 }
0x23e5   : > { %v4172_v26 = vadd.f32 1e-05, %v4164_v10  ;;  %v4160_v61 = vsel %vm463_vm0, %v4138_v16, 0.0 }
0x23e6   : > { %v4171_v27 = vadd.f32 1e-05, %v4163_v25  ;;  %4161 = vadd.xlane.f32.xlu0 %v4160_v61  ;;  %v4150_v28 = vpop.xlane.xlu0 %4149  ;;  %v4157_v29 = vsel %vm463_vm0, %v4137_v60, 0.0 }
0x23e7   : > { %5879 = vrsqrt.f32 %v4172_v26  ;;  %v4166_v52 = vmul.f32 0.03125, %v4150_v28  ;;  %4158 = vadd.xlane.f32.xlu1 %v4157_v29  ;;  %v4147_v36 = vpop.xlane.xlu1 %4146 }
0x23e8   : > { %5881 = vrsqrt.f32 %v4171_v27  ;;  %v4165_v49 = vmul.f32 0.03125, %v4147_v36 }
0x23e9   : > { %v4174_v43 = vadd.f32 1e-05, %v4166_v52 }
0x23ea   : > { %v4173_v44 = vadd.f32 1e-05, %v4165_v49  ;;  %v4156_v45 = vpop.xlane.xlu0 %4155 }
0x23eb   : > { %5883 = vrsqrt.f32 %v4174_v43  ;;  %v4168_v46 = vmul.f32 0.03125, %v4156_v45  ;;  %v4153_v51 = vpop.xlane.xlu1 %4152 }
0x23ec   : > { %5885 = vrsqrt.f32 %v4173_v44  ;;  %v4167_v37 = vmul.f32 0.03125, %v4153_v51 }
0x23ed   : > { %v4176_v57 = vadd.f32 1e-05, %v4168_v46 }
0x23ee   : > { %v4175_v58 = vadd.f32 1e-05, %v4167_v37 }
0x23ef   : > { %5887 = vrsqrt.f32 %v4176_v57 }
0x23f0   : > { %5889 = vrsqrt.f32 %v4175_v58 }
0x23f1   : > { %v5880_v59 = vpop.eup %5879 }
0x23f2   : > { %v5882_v30 = vpop.eup %5881  ;;  %v4188_v42 = vmul.f32 %v5880_v59, %v6596_v48 }
0x23f3   : > { %v4187_v53 = vmul.f32 %v5882_v30, %v6599_v40 }
0x23f4   : > { %v4202_v31 = vmul.f32 %v6658_v39, %v4188_v42 }
0x23f5   : > { %v5884_v54 = vpop.eup %5883  ;;  %v4201_v21 = vmul.f32 %v6658_v39, %v4187_v53 }
0x23f6   : > { %v5886_v22 = vpop.eup %5885  ;;  %v4190_v23 = vmul.f32 %v5884_v54, %v6604_v0  ;;  %v6671_v2 = vadd.f32 %v4854_v19, %v4202_v31 }
0x23f7   : > { %v6668_v1 = vadd.f32 %v4854_v19, %v4201_v21  ;;  %v4189_v41 = vmul.f32 %v5886_v22, %v6610_v24 }
0x23f8   : > { %v4204_v48 = vmul.f32 %v6658_v39, %v4190_v23 }
0x23f9   : > { %v5888_v40 = vpop.eup %5887  ;;  %5329 = vmatprep.mubr.msk.f32.mxu0 %vm463_vm0, %v6668_v1  ;;  %v4203_v18 = vmul.f32 %v6658_v39, %v4189_v41 }
0x23fa   : > { %v5890_v4 = vpop.eup %5889  ;;  %5330 = vmatmul.mubr.msk.f32.vlgmr.msra.gmra.mrb[40].mxu0 %vm463_vm0, %v6671_v2  ;;  %v4192_v0 = vmul.f32 %v5888_v40, %v6615_v17  ;;  %v6683_v56 = vadd.f32 %v4854_v19, %v4204_v48  ;;  %v4371_v17 = vld [vmem:[%s6854_s9] sm:$0xff] }
0x23fb   : > { %v6680_v55 = vadd.f32 %v4854_v19, %v4203_v18  ;;  %v4191_v24 = vmul.f32 %v5890_v4, %v6620_v32  ;;  %v4372_v32 = vld [vmem:[%s6854_s9 + $0x8] sm:$0xff]  ;;  %v4872_v18 = vld [vmem:[%s6855_s10] ss:$0 sm:$0xff] }
0x23fc   : > { %v4206_v11 = vmul.f32 %v6658_v39, %v4192_v0  ;;  %v5553_v35 = vpack.c.bf16 %v4372_v32, %v4371_v17 }
0x23fd   : > { %5332 = vmatprep.mubr.msk.f32.mxu0 %vm463_vm0, %v6680_v55  ;;  %v4205_v12 = vmul.f32 %v6658_v39, %v4191_v24 }
0x23fe   : > { %5333 = vmatmul.mubr.msk.f32.gmra.mrb[42].mxu0 %vm463_vm0, %v6683_v56  ;;  %v6693_v5 = vadd.f32 %v4854_v19, %v4206_v11  ;;  %5554 = vmatprep.subr.bf16.mxu1 %v5553_v35 }
0x23ff   : > { %v6691_v3 = vadd.f32 %v4854_v19, %v4205_v12  ;;  %5556 = vmatpush3.bf16.msra.mxu1 %v5553_v35 }
0x2400   : > { %5558 = vmatprep.subr.bf16.mxu1 %v5557_v50 }
0x2401   : > { %5335 = vmatprep.mubr.msk.f32.mxu0 %vm463_vm0, %v6691_v3 }
0x2402   : > { %5336 = vmatmul.mubr.msk.f32.gmra.mrb[44].mxu0 %vm463_vm0, %v6693_v5 }
0x2403   : > { %5560 = vmatpush3.bf16.msra.mxu1 %v5557_v50 }
0x2404   : > { %5562 = vmatprep.subr.bf16.mxu1 %v5561_v38 }
0x2407   : > { %5564 = vmatpush3.bf16.msra.mxu1 %v5561_v38 }
0x2408   : > { %5566 = vmatprep.subr.bf16.mxu1 %v5565_v15 }
0x240b   : > { %5568 = vmatpush3.bf16.msra.mxu1 %v5565_v15 }
0x2473   : > { %v4162_v33 = vpop.xlane.xlu0 %4161 }
0x2474   : > { %v4170_v8 = vmul.f32 0.03125, %v4162_v33  ;;  %v4159_v14 = vpop.xlane.xlu1 %4158 }
0x2475   : > { %v4169_v10 = vmul.f32 0.03125, %v4159_v14 }
0x2476   : > { %v4178_v13 = vadd.f32 1e-05, %v4170_v8 }
0x2477   : > { %v4177_v16 = vadd.f32 1e-05, %v4169_v10 }
0x2478   : > { %5891 = vrsqrt.f32 %v4178_v13 }
0x2479   : > { %5893 = vrsqrt.f32 %v4177_v16 }
0x2482   : > { %v5892_v25 = vpop.eup %5891 }
0x2483   : > { %v5894_v60 = vpop.eup %5893  ;;  %v4194_v26 = vmul.f32 %v5892_v25, %v6645_v9  ;;  %v4855_v9 = vld [vmem:[%s6853_s8] ss:$0 sm:$0xff] }
0x2484   : > { %v4193_v61 = vmul.f32 %v5894_v60, %v6647_v20 }
0x2485   : > { %v4208_v27 = vmul.f32 %v6658_v39, %v4194_v26 }
0x2486   : > { %v4207_v28 = vmul.f32 %v6658_v39, %v4193_v61 }
0x2487   : > { %v6729_v52 = vadd.f32 %v4854_v19, %v4208_v27 }
0x2488   : > { %v6727_v29 = vadd.f32 %v4854_v19, %v4207_v28 }
0x248a   : > { %5338 = vmatprep.mubr.msk.f32.mxu0 %vm463_vm0, %v6727_v29 }
0x248b   : > { %5339 = vmatmul.mubr.msk.f32.gmra.mrb[46].mxu0 %vm463_vm0, %v6729_v52 }
0x24cd   : > { %v5331_v36 = vpop.f32.mrb[40].mxu0 }
0x24ce   : > { %v4330_v20 = vadd.f32 %v5331_v36, %v4855_v9  ;;  %v4324_v49 = vpop.f32.mrb[41].mxu0 }
0x24cf   : > { %v4325_v43 = vadd.f32 %v4855_v9, %v4324_v49 }
0x24d0   : > { %v4364_v46 = vmax.f32 %v4330_v20, 0.0 }
0x24d1   : > { %v4363_v44 = vmax.f32 %v4325_v43, 0.0  ;;  %v5334_v45 = vpop.f32.mrb[42].mxu0 }
0x24d2   : > { %v4340_v51 = vadd.f32 %v5334_v45, %v4855_v9  ;;  %v4334_v37 = vpop.f32.mrb[43].mxu0 }
0x24d3   : > { %v4335_v57 = vadd.f32 %v4855_v9, %v4334_v37  ;;  %5357 = vmatprep.mubr.msk.f32.mxu1 %vm4379_vm5, %v4363_v44 }
0x24d4   : > { %5358 = vmatmul.mubr.msk.f32.vlgmr.msra.gmra.mrb[40].mxu1 %vm4379_vm5, %v4364_v46  ;;  %v4366_v39 = vmax.f32 %v4340_v51, 0.0 }
0x24d5   : > { %v4365_v58 = vmax.f32 %v4335_v57, 0.0  ;;  %v5337_v59 = vpop.f32.mrb[44].mxu0 }
0x24d6   : > { %v4350_v30 = vadd.f32 %v5337_v59, %v4855_v9  ;;  %v4344_v42 = vpop.f32.mrb[45].mxu0 }
0x24d7   : > { %v4345_v53 = vadd.f32 %v4855_v9, %v4344_v42  ;;  %5360 = vmatprep.mubr.msk.f32.mxu1 %vm4379_vm5, %v4365_v58 }
0x24d8   : > { %5361 = vmatmul.mubr.msk.f32.gmra.mrb[42].mxu1 %vm4379_vm5, %v4366_v39  ;;  %v4368_v31 = vmax.f32 %v4350_v30, 0.0 }
0x24d9   : > { %v4367_v19 = vmax.f32 %v4345_v53, 0.0 }
0x24db   : > { %5363 = vmatprep.mubr.msk.f32.mxu1 %vm4379_vm5, %v4367_v19 }
0x24dc   : > { %5364 = vmatmul.mubr.msk.f32.gmra.mrb[44].mxu1 %vm4379_vm5, %v4368_v31 }
0x255e   : > { %v5340_v54 = vpop.f32.mrb[46].mxu0 }
0x255f   : > { %v4360_v21 = vadd.f32 %v5340_v54, %v4855_v9  ;;  %v4354_v22 = vpop.f32.mrb[47].mxu0 }
0x2560   : > { %v4355_v23 = vadd.f32 %v4855_v9, %v4354_v22 }
0x2561   : > { %v4370_v48 = vmax.f32 %v4360_v21, 0.0 }
0x2562   : > { %v4369_v41 = vmax.f32 %v4355_v23, 0.0 }
0x2564   : > { %5366 = vmatprep.mubr.msk.f32.mxu1 %vm4379_vm5, %v4369_v41 }
0x2565   : > { %5367 = vmatmul.mubr.msk.f32.gmra.mrb[46].mxu1 %vm4379_vm5, %v4370_v48 }
0x25a7   : > { %v5359_v40 = vpop.f32.mrb[40].mxu1 }
0x25a8   : > { %v4510_v4 = vadd.f32 %v5359_v40, %v6671_v2  ;;  %v4470_v0 = vpop.f32.mrb[41].mxu1 }
0x25a9   : > { %v4509_v24 = vadd.f32 %v4470_v0, %v6668_v1 }
0x25aa   : > { %v4525_v11 = vadd.f32 %v4872_v18, %v4510_v4 }
0x25ab   : > { %v4524_v12 = vadd.f32 %v4872_v18, %v4509_v24  ;;  %v5362_v17 = vpop.f32.mrb[42].mxu1 }
0x25ac   : > { %v4512_v32 = vadd.f32 %v5362_v17, %v6683_v56  ;;  %v4480_v63 = vpop.f32.mrb[43].mxu1  ;;  %v4537_v35 = vsel %vm463_vm0, %v4525_v11, 0.0 }
0x25ad   : > { %v4511_v47 = vadd.f32 %v4480_v63, %v6680_v55  ;;  %4538 = vadd.xlane.f32.xlu0 %v4537_v35  ;;  %v4534_v50 = vsel %vm463_vm0, %v4524_v12, 0.0 }
0x25ae   : > { %v4527_v62 = vadd.f32 %v4872_v18, %v4512_v32  ;;  %4535 = vadd.xlane.f32.xlu1 %v4534_v50 }
0x25af   : > { %v4526_v34 = vadd.f32 %v4872_v18, %v4511_v47  ;;  %v5365_v2 = vpop.f32.mrb[44].mxu1 }
0x25b0   : > { %v4514_v38 = vadd.f32 %v5365_v2, %v6693_v5  ;;  %v4490_v1 = vpop.f32.mrb[45].mxu1  ;;  %v4543_v6 = vsel %vm463_vm0, %v4527_v62, 0.0 }
0x25b1   : > { %v4513_v7 = vadd.f32 %v4490_v1, %v6691_v3  ;;  %4544 = vadd.xlane.f32.xlu0 %v4543_v6  ;;  %v4540_v56 = vsel %vm463_vm0, %v4526_v34, 0.0 }
0x25b2   : > { %v4529_v15 = vadd.f32 %v4872_v18, %v4514_v38  ;;  %4541 = vadd.xlane.f32.xlu1 %v4540_v56 }
0x25b3   : > { %v4528_v55 = vadd.f32 %v4872_v18, %v4513_v7 }
0x25b4   : > { %v4549_v33 = vsel %vm463_vm0, %v4529_v15, 0.0 }
0x25b5   : > { %4550 = vadd.xlane.f32.xlu0 %v4549_v33  ;;  %v4546_v8 = vsel %vm463_vm0, %v4528_v55, 0.0 }
0x25b6   : > { %4547 = vadd.xlane.f32.xlu1 %v4546_v8 }
0x2638   : > { %v5368_v14 = vpop.f32.mrb[46].mxu1 }
0x2639   : > { %v4516_v5 = vadd.f32 %v5368_v14, %v6729_v52  ;;  %v4500_v10 = vpop.f32.mrb[47].mxu1 }
0x263a   : > { %v4515_v13 = vadd.f32 %v4500_v10, %v6727_v29  ;;  %v4539_v16 = vpop.xlane.xlu0 %4538 }
0x263b   : > { %v4531_v3 = vadd.f32 %v4872_v18, %v4516_v5  ;;  %v4559_v25 = vmul.f32 0.03125, %v4539_v16  ;;  %v4536_v60 = vpop.xlane.xlu1 %4535 }
0x263c   : > { %v4530_v26 = vadd.f32 %v4872_v18, %v4515_v13  ;;  %v4558_v61 = vmul.f32 0.03125, %v4536_v60  ;;  %v4873_v13 = vld [vmem:[%s6856_s11] ss:$0 sm:$0xff] }
0x263d   : > { %v6763_v27 = vsub.f32 %v4525_v11, %v4559_v25  ;;  %v4555_v28 = vsel %vm463_vm0, %v4531_v3, 0.0  ;;  %v4874_v25 = vld [vmem:[%s6857_s12] ss:$0 sm:$0xff] }
0x263e   : > { %v6766_v9 = vsub.f32 %v4524_v12, %v4558_v61  ;;  %v4545_v36 = vpop.xlane.xlu0 %4544  ;;  %4556 = vadd.xlane.f32.xlu0 %v4555_v28  ;;  %v4552_v20 = vsel %vm463_vm0, %v4530_v26, 0.0 }
0x263f   : > { %v4561_v52 = vmul.f32 0.03125, %v4545_v36  ;;  %4553 = vadd.xlane.f32.xlu1 %v4552_v20  ;;  %v4542_v49 = vpop.xlane.xlu1 %4541  ;;  %v4575_v29 = vmul.f32 %v6763_v27, %v6763_v27 }
0x2640   : > { %v4560_v43 = vmul.f32 0.03125, %v4542_v49  ;;  %v4574_v44 = vmul.f32 %v6766_v9, %v6766_v9 }
0x2641   : > { %v6773_v45 = vsub.f32 %v4527_v62, %v4561_v52  ;;  %v4585_v46 = vsel %vm463_vm0, %v4575_v29, 0.0 }
0x2642   : > { %v6776_v51 = vsub.f32 %v4526_v34, %v4560_v43  ;;  %v4551_v37 = vpop.xlane.xlu0 %4550  ;;  %4586 = vadd.xlane.f32.xlu0 %v4585_v46  ;;  %v4582_v57 = vsel %vm463_vm0, %v4574_v44, 0.0 }
0x2643   : > { %v4563_v58 = vmul.f32 0.03125, %v4551_v37  ;;  %4583 = vadd.xlane.f32.xlu1 %v4582_v57  ;;  %v4548_v59 = vpop.xlane.xlu1 %4547  ;;  %v4577_v39 = vmul.f32 %v6773_v45, %v6773_v45 }
0x2644   : > { %v4562_v30 = vmul.f32 0.03125, %v4548_v59  ;;  %v4576_v42 = vmul.f32 %v6776_v51, %v6776_v51 }
0x2645   : > { %v6783_v53 = vsub.f32 %v4529_v15, %v4563_v58  ;;  %v4591_v19 = vsel %vm463_vm0, %v4577_v39, 0.0 }
0x2646   : > { %v6786_v31 = vsub.f32 %v4528_v55, %v4562_v30  ;;  %4592 = vadd.xlane.f32.xlu0 %v4591_v19  ;;  %v4588_v54 = vsel %vm463_vm0, %v4576_v42, 0.0 }
0x2647   : > { %4589 = vadd.xlane.f32.xlu1 %v4588_v54  ;;  %v4579_v21 = vmul.f32 %v6783_v53, %v6783_v53 }
0x2648   : > { %v4578_v22 = vmul.f32 %v6786_v31, %v6786_v31 }
0x2649   : > { %v4597_v23 = vsel %vm463_vm0, %v4579_v21, 0.0 }
0x264a   : > { %4598 = vadd.xlane.f32.xlu0 %v4597_v23  ;;  %v4594_v41 = vsel %vm463_vm0, %v4578_v22, 0.0 }
0x264b   : > { %4595 = vadd.xlane.f32.xlu1 %v4594_v41 }
0x26cb   : > { %v4557_v48 = vpop.xlane.xlu0 %4556 }
0x26cc   : > { %v4565_v40 = vmul.f32 0.03125, %v4557_v48  ;;  %v4554_v18 = vpop.xlane.xlu1 %4553 }
0x26cd   : > { %v4564_v4 = vmul.f32 0.03125, %v4554_v18 }
0x26ce   : > { %v6795_v0 = vsub.f32 %v4531_v3, %v4565_v40 }
0x26cf   : > { %v6797_v24 = vsub.f32 %v4530_v26, %v4564_v4  ;;  %v4587_v11 = vpop.xlane.xlu0 %4586 }
0x26d0   : > { %v4607_v12 = vmul.f32 0.03125, %v4587_v11  ;;  %v4584_v17 = vpop.xlane.xlu1 %4583  ;;  %v4581_v32 = vmul.f32 %v6795_v0, %v6795_v0 }
0x26d1   : > { %v4606_v63 = vmul.f32 0.03125, %v4584_v17  ;;  %v4580_v35 = vmul.f32 %v6797_v24, %v6797_v24 }
0x26d2   : > { %v4615_v47 = vadd.f32 1e-05, %v4607_v12  ;;  %v4603_v50 = vsel %vm463_vm0, %v4581_v32, 0.0 }
0x26d3   : > { %v4614_v62 = vadd.f32 1e-05, %v4606_v63  ;;  %4604 = vadd.xlane.f32.xlu0 %v4603_v50  ;;  %v4593_v34 = vpop.xlane.xlu0 %4592  ;;  %v4600_v2 = vsel %vm463_vm0, %v4580_v35, 0.0 }
0x26d4   : > { %5895 = vrsqrt.f32 %v4615_v47  ;;  %v4609_v38 = vmul.f32 0.03125, %v4593_v34  ;;  %4601 = vadd.xlane.f32.xlu1 %v4600_v2  ;;  %v4590_v1 = vpop.xlane.xlu1 %4589 }
0x26d5   : > { %5897 = vrsqrt.f32 %v4614_v62  ;;  %v4608_v6 = vmul.f32 0.03125, %v4590_v1 }
0x26d6   : > { %v4617_v7 = vadd.f32 1e-05, %v4609_v38 }
0x26d7   : > { %v4616_v56 = vadd.f32 1e-05, %v4608_v6  ;;  %v4599_v15 = vpop.xlane.xlu0 %4598 }
0x26d8   : > { %5899 = vrsqrt.f32 %v4617_v7  ;;  %v4611_v55 = vmul.f32 0.03125, %v4599_v15  ;;  %v4596_v33 = vpop.xlane.xlu1 %4595 }
0x26d9   : > { %5901 = vrsqrt.f32 %v4616_v56  ;;  %v4610_v8 = vmul.f32 0.03125, %v4596_v33 }
0x26da   : > { %v4619_v14 = vadd.f32 1e-05, %v4611_v55 }
0x26db   : > { %v4618_v5 = vadd.f32 1e-05, %v4610_v8 }
0x26dc   : > { %5903 = vrsqrt.f32 %v4619_v14 }
0x26dd   : > { %5905 = vrsqrt.f32 %v4618_v5 }
0x26de   : > { %v5896_v10 = vpop.eup %5895 }
0x26df   : > { %v5898_v16 = vpop.eup %5897  ;;  %v4631_v3 = vmul.f32 %v5896_v10, %v6763_v27 }
0x26e0   : > { %v4630_v60 = vmul.f32 %v5898_v16, %v6766_v9 }
0x26e1   : > { %v4645_v26 = vmul.f32 %v4873_v13, %v4631_v3 }
0x26e2   : > { %v5900_v61 = vpop.eup %5899  ;;  %v4644_v28 = vmul.f32 %v4873_v13, %v4630_v60 }
0x26e3   : > { %v5902_v36 = vpop.eup %5901  ;;  %v4659_v27 = vadd.f32 %v4874_v25, %v4645_v26  ;;  %v4633_v20 = vmul.f32 %v5900_v61, %v6773_v45 }
0x26e4   : > { %v4658_v52 = vadd.f32 %v4874_v25, %v4644_v28  ;;  %v4632_v9 = vmul.f32 %v5902_v36, %v6776_v51 }
0x26e5   : > { %4667 = vst.msk [vmem:[%s6818_s17 + $0x8] sm:$0xff] %vm463_vm0, %v4659_v27  ;;  %v4647_v49 = vmul.f32 %v4873_v13, %v4633_v20 }
0x26e6   : > { %v5904_v29 = vpop.eup %5903  ;;  %4666 = vst.msk [vmem:[%s6818_s17] sm:$0xff] %vm463_vm0, %v4658_v52  ;;  %v4646_v43 = vmul.f32 %v4873_v13, %v4632_v9 }
0x26e7   : > { %v5906_v44 = vpop.eup %5905  ;;  %v4661_v46 = vadd.f32 %v4874_v25, %v4647_v49  ;;  %v4635_v37 = vmul.f32 %v5904_v29, %v6783_v53 }
0x26e8   : > { %v4660_v57 = vadd.f32 %v4874_v25, %v4646_v43  ;;  %v4634_v58 = vmul.f32 %v5906_v44, %v6786_v31 }
0x26e9   : > { %4669 = vst.msk [vmem:[%s6818_s17 + $0x18] sm:$0xff] %vm463_vm0, %v4661_v46  ;;  %v4649_v45 = vmul.f32 %v4873_v13, %v4635_v37 }
0x26ea   : > { %4668 = vst.msk [vmem:[%s6818_s17 + $0x10] sm:$0xff] %vm463_vm0, %v4660_v57  ;;  %v4648_v51 = vmul.f32 %v4873_v13, %v4634_v58 }
0x26eb   : > { %v4663_v59 = vadd.f32 %v4874_v25, %v4649_v45 }
0x26ec   : > { %v4662_v39 = vadd.f32 %v4874_v25, %v4648_v51 }
0x26ed   : > { %4671 = vst.msk [vmem:[%s6818_s17 + $0x28] sm:$0xff] %vm463_vm0, %v4663_v59 }
0x26ee   : > { %4670 = vst.msk [vmem:[%s6818_s17 + $0x20] sm:$0xff] %vm463_vm0, %v4662_v39 }
0x2760   : > { %v4605_v30 = vpop.xlane.xlu0 %4604 }
0x2761   : > { %v4613_v42 = vmul.f32 0.03125, %v4605_v30  ;;  %v4602_v53 = vpop.xlane.xlu1 %4601 }
0x2762   : > { %v4612_v19 = vmul.f32 0.03125, %v4602_v53 }
0x2763   : > { %v4621_v54 = vadd.f32 1e-05, %v4613_v42 }
0x2764   : > { %v4620_v31 = vadd.f32 1e-05, %v4612_v19 }
0x2765   : > { %5907 = vrsqrt.f32 %v4621_v54 }
0x2766   : > { %5909 = vrsqrt.f32 %v4620_v31 }
0x276f   : > { %v5908_v21 = vpop.eup %5907 }
0x2770   : > { %v5910_v22 = vpop.eup %5909  ;;  %v4637_v23 = vmul.f32 %v5908_v21, %v6795_v0 }
0x2771   : > { %v4636_v41 = vmul.f32 %v5910_v22, %v6797_v24 }
0x2772   : > { %v4651_v48 = vmul.f32 %v4873_v13, %v4637_v23 }
0x2773   : > { %v4650_v40 = vmul.f32 %v4873_v13, %v4636_v41 }
0x2774   : > { %v4665_v18 = vadd.f32 %v4874_v25, %v4651_v48 }
0x2775   : > { %v4664_v4 = vadd.f32 %v4874_v25, %v4650_v40 }
0x2776   : > { %4673 = vst.msk [vmem:[%s6818_s17 + $0x38] sm:$0xff] %vm463_vm0, %v4665_v18 }
0x2777   : > { %4672 = vst.msk [vmem:[%s6818_s17 + $0x30] sm:$0xff] %vm463_vm0, %v4664_v4 }
0x2778 PF: > { %s23_s25 = sadd.s32 1, %s5925_s25  }
0x2779   : > { %p20_p4 = scmp.ge.s32.totalorder %s23_s25, 4  }
0x277b   :  { %22 = sbr.rel (!%p20_p4) target bundleno = 1 (0x1), region = 102 }

// kernel: _lambda_.9
= control target key start
LH: loop header
LB: loop body
LE: loop exit
PB: predicated region body
PF: predicated region fallthrough
CT: control target
= control target key end

     0   :  { %s12571_s0 = inlined_call_operand.vmem [shape: f32[128,32], index: 0, kind: input, shape index: {}]   ;;  %s12572_s1 = inlined_call_operand.vmem [shape: f32[128,64], index: 1, kind: input, shape index: {}]   ;;  %s12573_s2 = inlined_call_operand.vmem [shape: f32[32,96], index: 2, kind: input, shape index: {}]   ;;  %s12574_s3 = inlined_call_operand.vmem [shape: f32[1,96], index: 3, kind: input, shape index: {}]   ;;  %s12575_s4 = inlined_call_operand.vmem [shape: f32[32,32], index: 4, kind: input, shape index: {}]   ;;  %s12576_s5 = inlined_call_operand.vmem [shape: f32[1,32], index: 5, kind: input, shape index: {}]   ;;  %s12577_s6 = inlined_call_operand.vmem [shape: f32[1,32], index: 6, kind: input, shape index: {}]   ;;  %s12578_s7 = inlined_call_operand.vmem [shape: f32[1,32], index: 7, kind: input, shape index: {}]   ;;  %s12579_s8 = inlined_call_operand.vmem [shape: f32[32,32], index: 8, kind: input, shape index: {}]   ;;  %s12580_s9 = inlined_call_operand.vmem [shape: f32[1,32], index: 9, kind: input, shape index: {}]   ;;  %s12581_s10 = inlined_call_operand.vmem [shape: f32[32,32], index: 10, kind: input, shape index: {}]   ;;  %s12582_s11 = inlined_call_operand.vmem [shape: f32[1,32], index: 11, kind: input, shape index: {}]   ;;  %s12583_s12 = inlined_call_operand.vmem [shape: f32[1,32], index: 12, kind: input, shape index: {}]   ;;  %s12584_s13 = inlined_call_operand.vmem [shape: f32[1,32], index: 13, kind: input, shape index: {}]   ;;  %s12585_s14 = inlined_call_operand.vmem [shape: f32[32,64], index: 14, kind: input, shape index: {}]   ;;  %s12586_s15 = inlined_call_operand.vmem [shape: f32[1,64], index: 15, kind: input, shape index: {}]   ;;  %s12587_s16 = inlined_call_operand.vmem [shape: f32[64,32], index: 16, kind: input, shape index: {}]   ;;  %s12588_s17 = inlined_call_operand.vmem [shape: f32[1,32], index: 17, kind: input, shape index: {}]   ;;  %s12589_s18 = inlined_call_operand.vmem [shape: f32[1,32], index: 18, kind: input, shape index: {}]   ;;  %s12590_s19 = inlined_call_operand.vmem [shape: f32[1,32], index: 19, kind: input, shape index: {}]   ;;  %s12591_s20 = inlined_call_operand.vmem [shape: f32[128,32], index: 20, kind: output, shape index: {}]  }
   0x1   :  { %12606 = sst [smem:[#allocation3_spill]] %s12571_s0 }
   0x2   :  { %12607 = sst [smem:[#allocation4_spill]] %s12572_s1  ;;  %s11026_s1 = smov 0  }
   0x3   :  { %12608 = sst [smem:[#allocation5_spill]] %s12573_s2 }
   0x4   :  { %12609 = sst [smem:[#allocation6_spill]] %s12574_s3 }
   0x5   :  { %12610 = sst [smem:[#allocation7_spill]] %s12575_s4 }
   0x6 LB: > { %s8711_s22 = sadd.s32 4294967295, %s10905_s1   ;;  %p8715_p0 = scmp.ge.s32.totalorder %s10905_s1, 1  ;;  %s10905_s1 = sphi %s11026_s1, %s30_s1  }
   0x7   : > { %p574_p1 = scmp.lt.s32.totalorder %s10905_s1, 3 }
   0x9   : > { %p575_p2 = pnand %p8715_p0, %p574_p1 }
   0xa   : > { %s12611_s2 = sld [smem:[#allocation5_spill]] (!%p575_p2)  ;;  %s8716_s28 = sshll.u32 (!%p575_p2), %s8711_s22, 3  ;;  %vm682_vm0 = vcmask (!%p575_p2), 261120   ;;  %vm820_vm1 = vcmask (!%p575_p2), 64512   ;;  %vm906_vm3 = vcmask (!%p575_p2), 130048   ;;  %vm1644_vm4 = vcmask (!%p575_p2), 195584  }
   0xb   : > { %578 = sbr.rel (%p575_p2) target bundleno = 19084 (0x4a8c), region = 100  ;;  %p638_p3 = scmp.lt.s32.totalorder (!%p575_p2), %s8716_s28, 15  ;;  %vm11083_vm2 = vmpackc.low (!%p575_p2), %vm820_vm1, %vm820_vm1  ;;  %vm8348_vm5 = vcmask (!%p575_p2), 523264  }
   0xc   : > { %s12612_s22 = sld [smem:[#allocation3_spill]] (!%p575_p2)  ;;  %s12613_s3 = sld [smem:[#allocation6_spill]] (!%p575_p2) }
   0xd   : > { %s12600_s26 = smov (!%p575_p2), 96   ;;  %s10908_s27 = smov (!%p575_p2), 64  }
   0xe   : > { %s12598_s4 = smov (!%p575_p2), 80   ;;  %s10911_s29 = smov (!%p575_p2), 120  }
   0xf   : > { %s10912_s0 = smov (!%p575_p2), 112   ;;  %s10913_s21 = smov (!%p575_p2), 56  }
  0x10   : > { %v671_v0 = vld [vmem:[%s12611_s2] sm:$0xff] (!%p575_p2)  ;;  %v672_v1 = vld [vmem:[%s12611_s2 + $0x8] sm:$0xff] (!%p575_p2)  ;;  %v673_v2 = vld [vmem:[%s12611_s2 + $0x10] sm:$0xff] (!%p575_p2)  ;;  %s10915_s24 = smov (!%p575_p2), 48   ;;  %s12596_s25 = smov (!%p575_p2), 104  }
  0x11   : > { %v9884_v3 = vpack.c.bf16 (!%p575_p2), %v672_v1, %v671_v0  ;;  %v674_v4 = vld [vmem:[%s12611_s2 + $0x18] sm:$0xff] (!%p575_p2) }
  0x12   : > { %v9888_v5 = vpack.c.bf16 %v674_v4, %v673_v2  ;;  %s12625_s28 = smov (!%p638_p3, %s8716_s28), 15  ;;  %v11069_v12 = vld [vmem:[%s12613_s3] ss:$0 sm:$0xff]  ;;  %s10917_s3 = smov 40  }
  0x13   : > { %9885 = vmatprep.subr.bf16.mxu0 %v9884_v3  ;;  %10260 = vmatprep.subr.bf16.mxu1 %v9884_v3  ;;  %s11046_s30 = sshll.u32 %s12625_s28, 3  ;;  %s10909_s28 = smov 88  }
  0x14   : > { %9887 = vmatpush3.bf16.msra.mxu0 %v9884_v3  ;;  %10262 = vmatpush3.bf16.msra.mxu1 %v9884_v3  ;;  %s11052_s23 = scalar_lea.vmem %s12612_s22, %s11046_s30  ;;  %s12594_s22 = smov 72  }
  0x15   : > { %9889 = vmatprep.subr.bf16.mxu0 %v9888_v5  ;;  %10261 = vmatprep.subr.bf16.mxu1 %v9888_v5  ;;  %v655_v6 = vld [vmem:[%s11052_s23] sm:$0xff]  ;;  %v656_v7 = vld [vmem:[%s11052_s23 + $0x8] sm:$0xff]  ;;  %v661_v10 = vld [vmem:[%s11052_s23 + $0x30] sm:$0xff] }
  0x16   : > { %9316 = vmatprep.mubr.msk.f32.mxu0 %vm682_vm0, %v655_v6  ;;  %v659_v8 = vld [vmem:[%s11052_s23 + $0x20] sm:$0xff]  ;;  %v660_v9 = vld [vmem:[%s11052_s23 + $0x28] sm:$0xff]  ;;  %v662_v11 = vld [vmem:[%s11052_s23 + $0x38] sm:$0xff] }
  0x17   : > { %9322 = vmatprep.mubr.msk.f32.mxu1 %vm682_vm0, %v659_v8 }
  0x18   : > { %9891 = vmatpush3.bf16.msra.mxu0 %v9888_v5  ;;  %10263 = vmatpush3.bf16.msra.mxu1 %v9888_v5 }
  0x1b   : > { %9317 = vmatmul.mubr.msk.f32.vlgmr.msra.gmra.mrb[0].mxu0 %vm682_vm0, %v656_v7  ;;  %9323 = vmatmul.mubr.msk.f32.vlgmr.msra.gmra.mrb[0].mxu1 %vm682_vm0, %v660_v9 }
  0x1c   : > { %9325 = vmatprep.mubr.msk.f32.mxu1 %vm682_vm0, %v661_v10 }
  0x1f   : > { %9326 = vmatmul.mubr.msk.f32.gmra.mrb[2].mxu1 %vm682_vm0, %v662_v11 }
  0xee   : > { %v9318_v13 = vpop.f32.mrb[0].mxu0  ;;  %v9324_v19 = vpop.f32.mrb[0].mxu1 }
  0xef   : > { %v779_v14 = vadd.f32 %v9318_v13, %v11069_v12  ;;  %v773_v15 = vpop.f32.mrb[1].mxu0  ;;  %v793_v20 = vpop.f32.mrb[1].mxu1  ;;  %v11096_v29 = vadd.f32 %v9324_v19, %v11069_v12 }
  0xf0   : > { %v774_v16 = vadd.f32 %v11069_v12, %v773_v15  ;;  %v11099_v30 = vadd.f32 %v11069_v12, %v793_v20 }
  0xf1   : > { %v11091_v28 = vmul.f32 0.35355338, %v779_v14 }
  0xf2   : > { %v11073_v17 = vpack.i.bf16 %v779_v14, %v774_v16  ;;  %v11075_v18 = vmul.f32 0.35355338, %v774_v16  ;;  %v9327_v21 = vpop.f32.mrb[2].mxu1  ;;  %v11109_v33 = vpack.i.bf16 %v11096_v29, %v11099_v30 }
  0xf3   : > { %v803_v22 = vpop.f32.mrb[3].mxu1  ;;  %v11102_v31 = vadd.f32 %v9327_v21, %v11069_v12 }
  0xf4   : > { %10287 = vrot.lane.b32.xlu0 %v11073_v17, %s12600_s26  ;;  %9332 = vmatprep.mubr.msk.f32.mxu1 %vm820_vm1, %v11075_v18  ;;  %v11105_v32 = vadd.f32 %v11069_v12, %v803_v22 }
  0xf6   : > { %v11113_v34 = vpack.i.bf16 %v11102_v31, %v11105_v32 }
 0x166   : > { %v10288_v23 = vpop.permute.xlu0 %10287 }
 0x167   : > { %v10290_v24 = vunpack.i.h.bf16 %v10288_v23  ;;  %v10289_v25 = vunpack.i.l.bf16 %v10288_v23 }
 0x169   : > { %v9892_v27 = vpack.c.bf16 %v10290_v24, %v10289_v25 }
 0x16b   : > { %9894 = vmatprep.subr.msk.bf16.mxu1 %vm11083_vm2, %v9892_v27 }
 0x16c   : > { %9897 = vmatpush3.bf16.xpose.msk.msra.mxu1 %vm11083_vm2, %v9892_v27 }
 0x173   : > { %9333 = vmatmul.mubr.msk.f32.vlgmr.msra.gmra.mrb[4].mxu1 %vm820_vm1, %v11091_v28 }
 0x246   : > { %v9334_v35 = vpop.f32.mrb[4].mxu1 }
 0x247   : > { %v897_v36 = vpop.f32.mrb[5].mxu1  ;;  %v910_v37 = vsel %vm906_vm3, %v9334_v35, -inf }
 0x248   : > { %911 = vmax.xlane.f32.xlu1 %v910_v37  ;;  %v907_v38 = vsel %vm906_vm3, %v897_v36, -inf }
 0x249   : > { %908 = vmax.xlane.f32.xlu0 %v907_v38 }
 0x259   : > { %10292 = vrot.lane.b32.xlu1 %v11073_v17, %s10908_s27 }
 0x25d   : > { %10297 = vrot.lane.b32.xlu1 %v11073_v17, %s10909_s28 }
 0x25f   : > { %10302 = vrot.lane.b32.xlu0 %v11073_v17, %s12598_s4 }
 0x261   : > { %1016 = vrot.lane.b32.xlu1 %v11075_v18, %s10911_s29 }
 0x2d5   : > { %v912_v39 = vpop.xlane.xlu1 %911 }
 0x2d6   : > { %v914_v40 = vsub.f32 %v9334_v35, %v912_v39  ;;  %v909_v41 = vpop.xlane.xlu0 %908 }
 0x2d7   : > { %v913_v42 = vsub.f32 %v897_v36, %v909_v41 }
 0x2d8   : > { %v917_v43 = vmul.f32 1.442695, %v914_v40 }
 0x2d9   : > { %v915_v44 = vmul.f32 1.442695, %v913_v42  ;;  %v10293_v45 = vpop.permute.xlu1 %10292 }
 0x2da   : > { %10586 = vpow2.f32 %v917_v43  ;;  %v10295_v46 = vunpack.i.h.bf16 %v10293_v45  ;;  %v10294_v47 = vunpack.i.l.bf16 %v10293_v45  ;;  %v10303_v60 = vpop.permute.xlu0 %10302 }
 0x2db   : > { %10588 = vpow2.f32 %v915_v44  ;;  %v10305_v63 = vunpack.i.h.bf16 %v10303_v60  ;;  %v10304_v0 = vunpack.i.l.bf16 %v10303_v60 }
 0x2dc   : > { %v9898_v48 = vpack.c.bf16 %v10295_v46, %v10294_v47 }
 0x2dd   : > { %v10298_v49 = vpop.permute.xlu1 %10297  ;;  %v9912_v3 = vpack.c.bf16 %v10305_v63, %v10304_v0 }
 0x2de   : > { %v10300_v50 = vunpack.i.h.bf16 %v10298_v49  ;;  %v10299_v51 = vunpack.i.l.bf16 %v10298_v49  ;;  %9899 = vmatprep.subr.bf16.mxu1 %v9898_v48  ;;  %v658_v49 = vld [vmem:[%s11052_s23 + $0x18] sm:$0xff] }
 0x2df   : > { %9901 = vmatpush3.bf16.msra.mxu1 %v9898_v48  ;;  %v657_v48 = vld [vmem:[%s11052_s23 + $0x10] sm:$0xff] }
 0x2e0   : > { %v9902_v52 = vpack.c.bf16 %v10300_v50, %v10299_v51  ;;  %9319 = vmatprep.mubr.msk.f32.mxu0 %vm682_vm0, %v657_v48 }
 0x2e1   : > { %v1017_v57 = vpop.permute.xlu1 %1016  ;;  %9320 = vmatmul.mubr.msk.f32.gmra.mrb[2].mxu0 %vm682_vm0, %v658_v49 }
 0x2e2   : > { %9904 = vmatprep.subr.msk.bf16.mxu1 %vm11083_vm2, %v9902_v52 }
 0x2e4   : > { %v10587_v53 = vpop.eup %10586 }
 0x2e5   : > { %v922_v54 = vsel %vm906_vm3, %v10587_v53, 0.0  ;;  %v10589_v55 = vpop.eup %10588 }
 0x2e6   : > { %923 = vadd.xlane.f32.xlu1 %v922_v54  ;;  %v919_v56 = vsel %vm906_vm3, %v10589_v55, 0.0 }
 0x2ea   : > { %920 = vadd.xlane.f32.xlu1 %v919_v56 }
 0x2fb   : > { %1018 = vrot.lane.b32.xlu1 %v11091_v28, %s10911_s29 }
 0x2ff   : > { %1216 = vrot.lane.b32.xlu1 %v11075_v18, %s10912_s0 }
 0x303   : > { %1218 = vrot.lane.b32.xlu1 %v11091_v28, %s10912_s0 }
 0x373   : > { %v924_v58 = vpop.xlane.xlu1 %923 }
 0x374   : > { %10590 = vrcp.f32 %v924_v58 }
 0x377   : > { %v921_v59 = vpop.xlane.xlu1 %920 }
 0x378   : > { %10592 = vrcp.f32 %v921_v59 }
 0x37b   : > { %v1019_v4 = vpop.permute.xlu1 %1018 }
 0x37e   : > { %v10591_v61 = vpop.eup %10590 }
 0x37f   : > { %v928_v2 = vmul.f32 %v10591_v61, %v10587_v53  ;;  %v1217_v5 = vpop.permute.xlu1 %1216 }
 0x382   : > { %v10593_v62 = vpop.eup %10592 }
 0x383   : > { %v927_v1 = vmul.f32 %v10593_v62, %v10589_v55  ;;  %v1219_v6 = vpop.permute.xlu1 %1218 }
 0x385   : > { %9339 = vmatprep.mubr.msk.f32.mxu1 %vm906_vm3, %v927_v1 }
 0x386   : > { %9340 = vmatmul.mubr.msk.f32.vlgmr.msra.gmra.mrb[6].mxu1 %vm906_vm3, %v928_v2 }
 0x387   : > { %9907 = vmatpush3.bf16.xpose.msk.msra.mxu1 %vm11083_vm2, %v9902_v52  ;;  %9346 = vmatprep.mubr.msk.f32.mxu1 %vm820_vm1, %v1017_v57 }
 0x388   : > { %9914 = vmatprep.subr.msk.bf16.mxu1 %vm11083_vm2, %v9912_v3 }
 0x38e   : > { %9347 = vmatmul.mubr.msk.f32.vlgmr.msra.gmra.mrb[8].mxu1 %vm820_vm1, %v1019_v4 }
 0x38f   : > { %9917 = vmatpush3.bf16.xpose.msk.msra.mxu1 %vm11083_vm2, %v9912_v3  ;;  %9360 = vmatprep.mubr.msk.f32.mxu1 %vm820_vm1, %v1217_v5 }
 0x396   : > { %9361 = vmatmul.mubr.msk.f32.vlgmr.msra.gmra.mrb[10].mxu1 %vm820_vm1, %v1219_v6 }
 0x459   : > { %v11147_v7 = vpop.f32.mrb[6].mxu1 }
 0x45a   : > { %v11149_v8 = vpop.f32.mrb[7].mxu1 }
 0x461   : > { %v9348_v9 = vpop.f32.mrb[8].mxu1 }
 0x462   : > { %v1098_v10 = vpop.f32.mrb[9].mxu1  ;;  %v1110_v11 = vsel %vm906_vm3, %v9348_v9, -inf }
 0x463   : > { %1111 = vmax.xlane.f32.xlu0 %v1110_v11  ;;  %v1107_v13 = vsel %vm906_vm3, %v1098_v10, -inf }
 0x464   : > { %1108 = vmax.xlane.f32.xlu1 %v1107_v13  ;;  %v9321_v13 = vpop.f32.mrb[2].mxu0 }
 0x469   : > { %v9362_v14 = vpop.f32.mrb[10].mxu1 }
 0x46a   : > { %v1298_v15 = vpop.f32.mrb[11].mxu1  ;;  %v1310_v16 = vsel %vm906_vm3, %v9362_v14, -inf }
 0x46b   : > { %1311 = vmax.xlane.f32.xlu0 %v1310_v16  ;;  %v1307_v19 = vsel %vm906_vm3, %v1298_v15, -inf }
 0x46c   : > { %1308 = vmax.xlane.f32.xlu1 %v1307_v19 }
 0x47d   : > { %10307 = vrot.lane.b32.xlu1 %v11073_v17, %s10913_s21 }
 0x4f0   : > { %v1112_v20 = vpop.xlane.xlu0 %1111 }
 0x4f1   : > { %v1114_v21 = vsub.f32 %v9348_v9, %v1112_v20  ;;  %v1109_v22 = vpop.xlane.xlu1 %1108 }
 0x4f2   : > { %v1113_v23 = vsub.f32 %v1098_v10, %v1109_v22 }
 0x4f3   : > { %v1117_v24 = vmul.f32 1.442695, %v1114_v21 }
 0x4f4   : > { %v1115_v25 = vmul.f32 1.442695, %v1113_v23 }
 0x4f5   : > { %10594 = vpow2.f32 %v1117_v24 }
 0x4f6   : > { %10596 = vpow2.f32 %v1115_v25 }
 0x4f8   : > { %v1312_v27 = vpop.xlane.xlu0 %1311 }
 0x4f9   : > { %v1314_v35 = vsub.f32 %v9362_v14, %v1312_v27  ;;  %v1309_v36 = vpop.xlane.xlu1 %1308  ;;  %v783_v14 = vpop.f32.mrb[3].mxu0 }
 0x4fa   : > { %v1313_v50 = vsub.f32 %v1298_v15, %v1309_v36  ;;  %v789_v15 = vadd.f32 %v9321_v13, %v11069_v12  ;;  %v784_v16 = vadd.f32 %v11069_v12, %v783_v14 }
 0x4fb   : > { %v1317_v37 = vmul.f32 1.442695, %v1314_v35 }
 0x4fc   : > { %v1315_v51 = vmul.f32 1.442695, %v1313_v50  ;;  %v11185_v19 = vpack.i.bf16 %v789_v15, %v784_v16 }
 0x4fd   : > { %10598 = vpow2.f32 %v1317_v37  ;;  %v10308_v38 = vpop.permute.xlu1 %10307 }
 0x4fe   : > { %v10310_v39 = vunpack.i.h.bf16 %v10308_v38  ;;  %v10309_v40 = vunpack.i.l.bf16 %v10308_v38  ;;  %10600 = vpow2.f32 %v1315_v51 }
 0x4ff   : > { %v10595_v41 = vpop.eup %10594 }
 0x500   : > { %v10597_v42 = vpop.eup %10596  ;;  %v1122_v43 = vsel %vm906_vm3, %v10595_v41, 0.0  ;;  %v9908_v44 = vpack.c.bf16 %v10310_v39, %v10309_v40 }
 0x501   : > { %1123 = vadd.xlane.f32.xlu0 %v1122_v43  ;;  %v1119_v45 = vsel %vm906_vm3, %v10597_v42, 0.0 }
 0x502   : > { %1120 = vadd.xlane.f32.xlu1 %v1119_v45  ;;  %9909 = vmatprep.subr.bf16.mxu0 %v9908_v44 }
 0x503   : > { %9911 = vmatpush3.bf16.msra.mxu0 %v9908_v44 }
 0x507   : > { %v10599_v46 = vpop.eup %10598 }
 0x508   : > { %v1322_v47 = vsel %vm906_vm3, %v10599_v46, 0.0  ;;  %v10601_v52 = vpop.eup %10600 }
 0x509   : > { %1323 = vadd.xlane.f32.xlu0 %v1322_v47  ;;  %v1319_v53 = vsel %vm906_vm3, %v10601_v52, 0.0 }
 0x513   : > { %10317 = vrot.lane.b32.xlu1 %v11073_v17, %s12594_s22 }
 0x51f   : > { %10312 = vrot.lane.b32.xlu0 %v11073_v17, %s10915_s24 }
 0x523   : > { %1418 = vrot.lane.b32.xlu0 %v11091_v28, %s12596_s25 }
 0x537   : > { %1320 = vadd.xlane.f32.xlu1 %v1319_v53 }
 0x548   : > { %1416 = vrot.lane.b32.xlu1 %v11075_v18, %s12596_s25 }
 0x58e   : > { %v1124_v54 = vpop.xlane.xlu0 %1123 }
 0x58f   : > { %10602 = vrcp.f32 %v1124_v54  ;;  %v1121_v55 = vpop.xlane.xlu1 %1120 }
 0x590   : > { %10604 = vrcp.f32 %v1121_v55 }
 0x593   : > { %v10318_v57 = vpop.permute.xlu1 %10317 }
 0x594   : > { %v10320_v60 = vunpack.i.h.bf16 %v10318_v57  ;;  %v10319_v28 = vunpack.i.l.bf16 %v10318_v57 }
 0x596   : > { %v1324_v56 = vpop.xlane.xlu0 %1323  ;;  %v9922_v18 = vpack.c.bf16 %v10320_v60, %v10319_v28 }
 0x597   : > { %10606 = vrcp.f32 %v1324_v56 }
 0x599   : > { %v10603_v58 = vpop.eup %10602 }
 0x59a   : > { %v10605_v59 = vpop.eup %10604  ;;  %v10313_v61 = vpop.permute.xlu0 %10312  ;;  %v1128_v1 = vmul.f32 %v10603_v58, %v10595_v41  ;;  %v11206_v58 = vmul.f32 0.35355338, %v784_v16 }
 0x59b   : > { %v10315_v62 = vunpack.i.h.bf16 %v10313_v61  ;;  %v10314_v63 = vunpack.i.l.bf16 %v10313_v61  ;;  %v1127_v0 = vmul.f32 %v10605_v59, %v10597_v42  ;;  %v11213_v59 = vmul.f32 0.35355338, %v789_v15 }
 0x59d   : > { %9353 = vmatprep.mubr.msk.f32.mxu0 %vm906_vm3, %v1127_v0  ;;  %v9918_v2 = vpack.c.bf16 %v10315_v62, %v10314_v63 }
 0x59e   : > { %9354 = vmatmul.mubr.msk.f32.vlgmr.msra.gmra.mrb[4].mxu0 %vm906_vm3, %v1128_v1  ;;  %v1419_v11 = vpop.permute.xlu0 %1418 }
 0x59f   : > { %9919 = vmatprep.subr.bf16.mxu0 %v9918_v2 }
 0x5a0   : > { %9921 = vmatpush3.bf16.msra.mxu0 %v9918_v2 }
 0x5a1   : > { %9924 = vmatprep.subr.msk.bf16.mxu0 %vm11083_vm2, %v9922_v18  ;;  %v10607_v4 = vpop.eup %10606 }
 0x5a2   : > { %v1328_v9 = vmul.f32 %v10607_v4, %v10599_v46 }
 0x5c4   : > { %v1321_v3 = vpop.xlane.xlu1 %1320 }
 0x5c5   : > { %10608 = vrcp.f32 %v1321_v3 }
 0x5c8   : > { %v1417_v10 = vpop.permute.xlu1 %1416 }
 0x5cf   : > { %v10609_v5 = vpop.eup %10608 }
 0x5d0   : > { %v1327_v6 = vmul.f32 %v10609_v5, %v10601_v52 }
 0x5d2   : > { %9367 = vmatprep.mubr.msk.f32.mxu0 %vm906_vm3, %v1327_v6 }
 0x5d3   : > { %9368 = vmatmul.mubr.msk.f32.vlgmr.msra.gmra.mrb[6].mxu0 %vm906_vm3, %v1328_v9 }
 0x5d4   : > { %9927 = vmatpush3.bf16.xpose.msk.msra.mxu0 %vm11083_vm2, %v9922_v18  ;;  %9374 = vmatprep.mubr.msk.f32.mxu0 %vm820_vm1, %v1417_v10 }
 0x5db   : > { %9375 = vmatmul.mubr.msk.f32.vlgmr.msra.gmra.mrb[8].mxu0 %vm820_vm1, %v1419_v11 }
 0x671   : > { %v11187_v20 = vpop.f32.mrb[4].mxu0 }
 0x672   : > { %v11189_v21 = vpop.f32.mrb[5].mxu0 }
 0x6a6   : > { %v11191_v22 = vpop.f32.mrb[6].mxu0 }
 0x6a7   : > { %v11193_v23 = vpop.f32.mrb[7].mxu0 }
 0x6ae   : > { %v9376_v24 = vpop.f32.mrb[8].mxu0 }
 0x6af   : > { %v1498_v25 = vpop.f32.mrb[9].mxu0  ;;  %v1510_v27 = vsel %vm906_vm3, %v9376_v24, -inf }
 0x6b0   : > { %1511 = vmax.xlane.f32.xlu0 %v1510_v27  ;;  %v1507_v35 = vsel %vm906_vm3, %v1498_v25, -inf }
 0x6b1   : > { %1508 = vmax.xlane.f32.xlu1 %v1507_v35 }
 0x73d   : > { %v1512_v36 = vpop.xlane.xlu0 %1511 }
 0x73e   : > { %v1514_v12 = vsub.f32 %v9376_v24, %v1512_v36  ;;  %v1509_v37 = vpop.xlane.xlu1 %1508 }
 0x73f   : > { %v1513_v38 = vsub.f32 %v1498_v25, %v1509_v37 }
 0x740   : > { %v1517_v39 = vmul.f32 1.442695, %v1514_v12 }
 0x741   : > { %v1515_v40 = vmul.f32 1.442695, %v1513_v38 }
 0x742   : > { %10610 = vpow2.f32 %v1517_v39 }
 0x743   : > { %10612 = vpow2.f32 %v1515_v40 }
 0x74c   : > { %v10611_v41 = vpop.eup %10610 }
 0x74d   : > { %v10613_v42 = vpop.eup %10612  ;;  %v1522_v43 = vsel %vm906_vm3, %v10611_v41, 0.0 }
 0x74e   : > { %1523 = vadd.xlane.f32.xlu1 %v1522_v43  ;;  %v1519_v44 = vsel %vm906_vm3, %v10613_v42, 0.0 }
 0x74f   : > { %1520 = vadd.xlane.f32.xlu0 %v1519_v44 }
 0x75f   : > { %10327 = vrot.lane.b32.xlu1 %v11185_v19, %s12600_s26 }
 0x765   : > { %10322 = vrot.lane.b32.xlu0 %v11073_v17, %s10917_s3 }
 0x7db   : > { %v1524_v45 = vpop.xlane.xlu1 %1523 }
 0x7dc   : > { %10614 = vrcp.f32 %v1524_v45  ;;  %v1521_v46 = vpop.xlane.xlu0 %1520 }
 0x7dd   : > { %10616 = vrcp.f32 %v1521_v46 }
 0x7df   : > { %v10328_v47 = vpop.permute.xlu1 %10327 }
 0x7e0   : > { %v10323_v48 = vpop.permute.xlu0 %10322  ;;  %v10330_v49 = vunpack.i.h.bf16 %v10328_v47  ;;  %v10329_v50 = vunpack.i.l.bf16 %v10328_v47 }
 0x7e1   : > { %v10325_v51 = vunpack.i.h.bf16 %v10323_v48  ;;  %v10324_v52 = vunpack.i.l.bf16 %v10323_v48 }
 0x7e2   : > { %v9932_v54 = vpack.c.bf16 %v10330_v49, %v10329_v50 }
 0x7e3   : > { %v9928_v53 = vpack.c.bf16 %v10325_v51, %v10324_v52 }
 0x7e5   : > { %9929 = vmatprep.subr.bf16.mxu1 %v9928_v53 }
 0x7e6   : > { %v10615_v55 = vpop.eup %10614  ;;  %9931 = vmatpush3.bf16.msra.mxu1 %v9928_v53 }
 0x7e7   : > { %v10617_v56 = vpop.eup %10616  ;;  %9934 = vmatprep.subr.msk.bf16.mxu1 %vm11083_vm2, %v9932_v54  ;;  %v1528_v57 = vmul.f32 %v10615_v55, %v10611_v41 }
 0x7e8   : > { %v1527_v17 = vmul.f32 %v10617_v56, %v10613_v42 }
 0x7ea   : > { %9381 = vmatprep.mubr.msk.f32.mxu1 %vm906_vm3, %v1527_v17 }
 0x7eb   : > { %9382 = vmatmul.mubr.msk.f32.vlgmr.msra.gmra.mrb[12].mxu1 %vm906_vm3, %v1528_v57 }
 0x7ec   : > { %9388 = vmatprep.mubr.msk.f32.mxu1 %vm820_vm1, %v11206_v58 }
 0x7ef   : > { %9937 = vmatpush3.bf16.xpose.msk.msra.mxu1 %vm11083_vm2, %v9932_v54 }
 0x7f6   : > { %9389 = vmatmul.mubr.msk.f32.vlgmr.msra.gmra.mrb[14].mxu1 %vm820_vm1, %v11213_v59 }
 0x8be   : > { %v11217_v60 = vpop.f32.mrb[12].mxu1 }
 0x8bf   : > { %v11219_v61 = vpop.f32.mrb[13].mxu1 }
 0x8c9   : > { %v9390_v28 = vpop.f32.mrb[14].mxu1 }
 0x8ca   : > { %v1733_v62 = vpop.f32.mrb[15].mxu1  ;;  %v1745_v63 = vsel %vm906_vm3, %v9390_v28, -inf }
 0x8cb   : > { %1746 = vmax.xlane.f32.xlu0 %v1745_v63  ;;  %v1742_v0 = vsel %vm906_vm3, %v1733_v62, -inf }
 0x8cc   : > { %1743 = vmax.xlane.f32.xlu1 %v1742_v0 }
 0x958   : > { %v1747_v1 = vpop.xlane.xlu0 %1746 }
 0x959   : > { %v1749_v2 = vsub.f32 %v9390_v28, %v1747_v1  ;;  %v1744_v18 = vpop.xlane.xlu1 %1743 }
 0x95a   : > { %v1748_v3 = vsub.f32 %v1733_v62, %v1744_v18 }
 0x95b   : > { %v1752_v4 = vmul.f32 1.442695, %v1749_v2 }
 0x95c   : > { %v1750_v5 = vmul.f32 1.442695, %v1748_v3 }
 0x95d   : > { %10618 = vpow2.f32 %v1752_v4 }
 0x95e   : > { %10620 = vpow2.f32 %v1750_v5 }
 0x967   : > { %v10619_v6 = vpop.eup %10618 }
 0x968   : > { %v10621_v9 = vpop.eup %10620  ;;  %v1757_v10 = vsel %vm906_vm3, %v10619_v6, 0.0 }
 0x969   : > { %1758 = vadd.xlane.f32.xlu1 %v1757_v10  ;;  %v1754_v11 = vsel %vm906_vm3, %v10621_v9, 0.0 }
 0x96a   : > { %1755 = vadd.xlane.f32.xlu0 %v1754_v11 }
 0x97a   : > { %10337 = vrot.lane.b32.xlu1 %v11185_v19, %s10909_s28 }
 0x97e   : > { %1851 = vrot.lane.b32.xlu1 %v11206_v58, %s10911_s29 }
 0x980   : > { %10332 = vrot.lane.b32.xlu0 %v11185_v19, %s10908_s27 }
 0x984   : > { %1853 = vrot.lane.b32.xlu0 %v11213_v59, %s10911_s29 }
 0x9f6   : > { %v1759_v13 = vpop.xlane.xlu1 %1758 }
 0x9f7   : > { %10622 = vrcp.f32 %v1759_v13  ;;  %v1756_v14 = vpop.xlane.xlu0 %1755 }
 0x9f8   : > { %10624 = vrcp.f32 %v1756_v14 }
 0x9fa   : > { %v10338_v15 = vpop.permute.xlu1 %10337 }
 0x9fb   : > { %v10333_v16 = vpop.permute.xlu0 %10332  ;;  %v10340_v24 = vunpack.i.h.bf16 %v10338_v15  ;;  %v10339_v25 = vunpack.i.l.bf16 %v10338_v15 }
 0x9fc   : > { %v10335_v27 = vunpack.i.h.bf16 %v10333_v16  ;;  %v10334_v35 = vunpack.i.l.bf16 %v10333_v16 }
 0x9fd   : > { %v9942_v12 = vpack.c.bf16 %v10340_v24, %v10339_v25 }
 0x9fe   : > { %v9938_v36 = vpack.c.bf16 %v10335_v27, %v10334_v35  ;;  %v1852_v41 = vpop.permute.xlu1 %1851 }
 0x9ff   : > { %v1854_v42 = vpop.permute.xlu0 %1853 }
 0xa00   : > { %9939 = vmatprep.subr.bf16.mxu0 %v9938_v36 }
 0xa01   : > { %v10623_v37 = vpop.eup %10622  ;;  %9941 = vmatpush3.bf16.msra.mxu0 %v9938_v36 }
 0xa02   : > { %v10625_v38 = vpop.eup %10624  ;;  %9944 = vmatprep.subr.msk.bf16.mxu0 %vm11083_vm2, %v9942_v12  ;;  %v1763_v40 = vmul.f32 %v10623_v37, %v10619_v6 }
 0xa03   : > { %v1762_v39 = vmul.f32 %v10625_v38, %v10621_v9 }
 0xa05   : > { %9395 = vmatprep.mubr.msk.f32.mxu0 %vm906_vm3, %v1762_v39 }
 0xa06   : > { %9396 = vmatmul.mubr.msk.f32.vlgmr.msra.gmra.mrb[10].mxu0 %vm906_vm3, %v1763_v40 }
 0xa07   : > { %9402 = vmatprep.mubr.msk.f32.mxu0 %vm820_vm1, %v1852_v41 }
 0xa0a   : > { %9947 = vmatpush3.bf16.xpose.msk.msra.mxu0 %vm11083_vm2, %v9942_v12 }
 0xa11   : > { %9403 = vmatmul.mubr.msk.f32.vlgmr.msra.gmra.mrb[12].mxu0 %vm820_vm1, %v1854_v42 }
 0xad9   : > { %v11241_v43 = vpop.f32.mrb[10].mxu0 }
 0xada   : > { %v11243_v44 = vpop.f32.mrb[11].mxu0 }
 0xae4   : > { %v9404_v45 = vpop.f32.mrb[12].mxu0 }
 0xae5   : > { %v1933_v46 = vpop.f32.mrb[13].mxu0  ;;  %v1945_v47 = vsel %vm906_vm3, %v9404_v45, -inf }
 0xae6   : > { %1946 = vmax.xlane.f32.xlu0 %v1945_v47  ;;  %v1942_v48 = vsel %vm906_vm3, %v1933_v46, -inf }
 0xae7   : > { %1943 = vmax.xlane.f32.xlu1 %v1942_v48 }
 0xb73   : > { %v1947_v49 = vpop.xlane.xlu0 %1946 }
 0xb74   : > { %v1949_v50 = vsub.f32 %v9404_v45, %v1947_v49  ;;  %v1944_v51 = vpop.xlane.xlu1 %1943 }
 0xb75   : > { %v1948_v52 = vsub.f32 %v1933_v46, %v1944_v51 }
 0xb76   : > { %v1952_v53 = vmul.f32 1.442695, %v1949_v50 }
 0xb77   : > { %v1950_v54 = vmul.f32 1.442695, %v1948_v52 }
 0xb78   : > { %10626 = vpow2.f32 %v1952_v53 }
 0xb79   : > { %10628 = vpow2.f32 %v1950_v54 }
 0xb82   : > { %v10627_v55 = vpop.eup %10626 }
 0xb83   : > { %v10629_v56 = vpop.eup %10628  ;;  %v1957_v17 = vsel %vm906_vm3, %v10627_v55, 0.0 }
 0xb84   : > { %1958 = vadd.xlane.f32.xlu1 %v1957_v17  ;;  %v1954_v57 = vsel %vm906_vm3, %v10629_v56, 0.0 }
 0xb85   : > { %1955 = vadd.xlane.f32.xlu0 %v1954_v57 }
 0xb95   : > { %10347 = vrot.lane.b32.xlu1 %v11185_v19, %s12598_s4 }
 0xb99   : > { %2051 = vrot.lane.b32.xlu1 %v11206_v58, %s10912_s0 }
 0xb9b   : > { %10342 = vrot.lane.b32.xlu0 %v11185_v19, %s10913_s21 }
 0xb9f   : > { %2053 = vrot.lane.b32.xlu0 %v11213_v59, %s10912_s0 }
 0xc11   : > { %v1959_v28 = vpop.xlane.xlu1 %1958 }
 0xc12   : > { %10630 = vrcp.f32 %v1959_v28  ;;  %v1956_v62 = vpop.xlane.xlu0 %1955 }
 0xc13   : > { %10632 = vrcp.f32 %v1956_v62 }
 0xc15   : > { %v10348_v63 = vpop.permute.xlu1 %10347 }
 0xc16   : > { %v10343_v0 = vpop.permute.xlu0 %10342  ;;  %v10350_v1 = vunpack.i.h.bf16 %v10348_v63  ;;  %v10349_v2 = vunpack.i.l.bf16 %v10348_v63 }
 0xc17   : > { %v10345_v18 = vunpack.i.h.bf16 %v10343_v0  ;;  %v10344_v3 = vunpack.i.l.bf16 %v10343_v0 }
 0xc18   : > { %v9952_v5 = vpack.c.bf16 %v10350_v1, %v10349_v2 }
 0xc19   : > { %v9948_v4 = vpack.c.bf16 %v10345_v18, %v10344_v3  ;;  %v2052_v13 = vpop.permute.xlu1 %2051 }
 0xc1a   : > { %v2054_v14 = vpop.permute.xlu0 %2053 }
 0xc1b   : > { %9949 = vmatprep.subr.bf16.mxu1 %v9948_v4 }
 0xc1c   : > { %v10631_v6 = vpop.eup %10630  ;;  %9951 = vmatpush3.bf16.msra.mxu1 %v9948_v4 }
 0xc1d   : > { %v10633_v9 = vpop.eup %10632  ;;  %9954 = vmatprep.subr.msk.bf16.mxu1 %vm11083_vm2, %v9952_v5  ;;  %v1963_v11 = vmul.f32 %v10631_v6, %v10627_v55 }
 0xc1e   : > { %v1962_v10 = vmul.f32 %v10633_v9, %v10629_v56 }
 0xc20   : > { %9409 = vmatprep.mubr.msk.f32.mxu1 %vm906_vm3, %v1962_v10 }
 0xc21   : > { %9410 = vmatmul.mubr.msk.f32.vlgmr.msra.gmra.mrb[16].mxu1 %vm906_vm3, %v1963_v11 }
 0xc22   : > { %9416 = vmatprep.mubr.msk.f32.mxu1 %vm820_vm1, %v2052_v13 }
 0xc25   : > { %9957 = vmatpush3.bf16.xpose.msk.msra.mxu1 %vm11083_vm2, %v9952_v5 }
 0xc2c   : > { %9417 = vmatmul.mubr.msk.f32.vlgmr.msra.gmra.mrb[18].mxu1 %vm820_vm1, %v2054_v14 }
 0xcf4   : > { %v11265_v15 = vpop.f32.mrb[16].mxu1 }
 0xcf5   : > { %v11267_v16 = vpop.f32.mrb[17].mxu1 }
 0xcff   : > { %v9418_v24 = vpop.f32.mrb[18].mxu1 }
 0xd00   : > { %v2133_v25 = vpop.f32.mrb[19].mxu1  ;;  %v2145_v27 = vsel %vm906_vm3, %v9418_v24, -inf }
 0xd01   : > { %2146 = vmax.xlane.f32.xlu0 %v2145_v27  ;;  %v2142_v35 = vsel %vm906_vm3, %v2133_v25, -inf }
 0xd02   : > { %2143 = vmax.xlane.f32.xlu1 %v2142_v35 }
 0xd8e   : > { %v2147_v36 = vpop.xlane.xlu0 %2146 }
 0xd8f   : > { %v2149_v12 = vsub.f32 %v9418_v24, %v2147_v36  ;;  %v2144_v37 = vpop.xlane.xlu1 %2143 }
 0xd90   : > { %v2148_v38 = vsub.f32 %v2133_v25, %v2144_v37 }
 0xd91   : > { %v2152_v39 = vmul.f32 1.442695, %v2149_v12 }
 0xd92   : > { %v2150_v40 = vmul.f32 1.442695, %v2148_v38 }
 0xd93   : > { %10634 = vpow2.f32 %v2152_v39 }
 0xd94   : > { %10636 = vpow2.f32 %v2150_v40 }
 0xd9d   : > { %v10635_v41 = vpop.eup %10634 }
 0xd9e   : > { %v10637_v42 = vpop.eup %10636  ;;  %v2157_v45 = vsel %vm906_vm3, %v10635_v41, 0.0 }
 0xd9f   : > { %2158 = vadd.xlane.f32.xlu1 %v2157_v45  ;;  %v2154_v46 = vsel %vm906_vm3, %v10637_v42, 0.0 }
 0xda0   : > { %2155 = vadd.xlane.f32.xlu0 %v2154_v46 }
 0xdb0   : > { %10357 = vrot.lane.b32.xlu1 %v11185_v19, %s12594_s22 }
 0xdb4   : > { %2251 = vrot.lane.b32.xlu1 %v11206_v58, %s12596_s25 }
 0xdb6   : > { %10352 = vrot.lane.b32.xlu0 %v11185_v19, %s10915_s24 }
 0xdba   : > { %2253 = vrot.lane.b32.xlu0 %v11213_v59, %s12596_s25 }
 0xe2c   : > { %v2159_v47 = vpop.xlane.xlu1 %2158 }
 0xe2d   : > { %10638 = vrcp.f32 %v2159_v47  ;;  %v2156_v48 = vpop.xlane.xlu0 %2155 }
 0xe2e   : > { %10640 = vrcp.f32 %v2156_v48  ;;  %v11305_v48 = vmul.f32 0.35355338, %v11099_v30 }
 0xe30   : > { %v10358_v49 = vpop.permute.xlu1 %10357 }
 0xe31   : > { %v10353_v50 = vpop.permute.xlu0 %10352  ;;  %v10360_v51 = vunpack.i.h.bf16 %v10358_v49  ;;  %v10359_v52 = vunpack.i.l.bf16 %v10358_v49  ;;  %v11313_v49 = vmul.f32 0.35355338, %v11096_v29 }
 0xe32   : > { %v10355_v53 = vunpack.i.h.bf16 %v10353_v50  ;;  %v10354_v54 = vunpack.i.l.bf16 %v10353_v50 }
 0xe33   : > { %v9962_v56 = vpack.c.bf16 %v10360_v51, %v10359_v52 }
 0xe34   : > { %v9958_v55 = vpack.c.bf16 %v10355_v53, %v10354_v54  ;;  %v2252_v28 = vpop.permute.xlu1 %2251 }
 0xe35   : > { %v2254_v62 = vpop.permute.xlu0 %2253 }
 0xe36   : > { %9959 = vmatprep.subr.bf16.mxu0 %v9958_v55 }
 0xe37   : > { %v10639_v58 = vpop.eup %10638  ;;  %9961 = vmatpush3.bf16.msra.mxu0 %v9958_v55 }
 0xe38   : > { %v10641_v17 = vpop.eup %10640  ;;  %9964 = vmatprep.subr.msk.bf16.mxu0 %vm11083_vm2, %v9962_v56  ;;  %v2163_v57 = vmul.f32 %v10639_v58, %v10635_v41 }
 0xe39   : > { %v2162_v59 = vmul.f32 %v10641_v17, %v10637_v42 }
 0xe3b   : > { %9423 = vmatprep.mubr.msk.f32.mxu0 %vm906_vm3, %v2162_v59 }
 0xe3c   : > { %9424 = vmatmul.mubr.msk.f32.vlgmr.msra.gmra.mrb[14].mxu0 %vm906_vm3, %v2163_v57 }
 0xe3d   : > { %9430 = vmatprep.mubr.msk.f32.mxu0 %vm820_vm1, %v2252_v28 }
 0xe40   : > { %9967 = vmatpush3.bf16.xpose.msk.msra.mxu0 %vm11083_vm2, %v9962_v56 }
 0xe47   : > { %9431 = vmatmul.mubr.msk.f32.vlgmr.msra.gmra.mrb[16].mxu0 %vm820_vm1, %v2254_v62 }
 0xf0f   : > { %v11289_v63 = vpop.f32.mrb[14].mxu0 }
 0xf10   : > { %v11291_v0 = vpop.f32.mrb[15].mxu0 }
 0xf1a   : > { %v9432_v1 = vpop.f32.mrb[16].mxu0 }
 0xf1b   : > { %v2333_v2 = vpop.f32.mrb[17].mxu0  ;;  %v2345_v18 = vsel %vm906_vm3, %v9432_v1, -inf }
 0xf1c   : > { %2346 = vmax.xlane.f32.xlu0 %v2345_v18  ;;  %v2342_v3 = vsel %vm906_vm3, %v2333_v2, -inf }
 0xf1d   : > { %2343 = vmax.xlane.f32.xlu1 %v2342_v3 }
 0xfa9   : > { %v2347_v4 = vpop.xlane.xlu0 %2346 }
 0xfaa   : > { %v2349_v5 = vsub.f32 %v9432_v1, %v2347_v4  ;;  %v2344_v6 = vpop.xlane.xlu1 %2343 }
 0xfab   : > { %v2348_v9 = vsub.f32 %v2333_v2, %v2344_v6 }
 0xfac   : > { %v2352_v10 = vmul.f32 1.442695, %v2349_v5 }
 0xfad   : > { %v2350_v11 = vmul.f32 1.442695, %v2348_v9 }
 0xfae   : > { %10642 = vpow2.f32 %v2352_v10 }
 0xfaf   : > { %10644 = vpow2.f32 %v2350_v11 }
 0xfb8   : > { %v10643_v13 = vpop.eup %10642 }
 0xfb9   : > { %v10645_v14 = vpop.eup %10644  ;;  %v2357_v24 = vsel %vm906_vm3, %v10643_v13, 0.0 }
 0xfba   : > { %2358 = vadd.xlane.f32.xlu1 %v2357_v24  ;;  %v2354_v25 = vsel %vm906_vm3, %v10645_v14, 0.0 }
 0xfbb   : > { %2355 = vadd.xlane.f32.xlu0 %v2354_v25 }
 0xfcb   : > { %10367 = vrot.lane.b32.xlu1 %v11109_v33, %s12600_s26 }
 0xfd1   : > { %10362 = vrot.lane.b32.xlu0 %v11185_v19, %s10917_s3 }
0x1047   : > { %v2359_v27 = vpop.xlane.xlu1 %2358 }
0x1048   : > { %10646 = vrcp.f32 %v2359_v27  ;;  %v2356_v35 = vpop.xlane.xlu0 %2355 }
0x1049   : > { %10648 = vrcp.f32 %v2356_v35 }
0x104b   : > { %v10368_v36 = vpop.permute.xlu1 %10367 }
0x104c   : > { %v10363_v12 = vpop.permute.xlu0 %10362  ;;  %v10370_v37 = vunpack.i.h.bf16 %v10368_v36  ;;  %v10369_v38 = vunpack.i.l.bf16 %v10368_v36 }
0x104d   : > { %v10365_v39 = vunpack.i.h.bf16 %v10363_v12  ;;  %v10364_v40 = vunpack.i.l.bf16 %v10363_v12 }
0x104e   : > { %v9972_v42 = vpack.c.bf16 %v10370_v37, %v10369_v38 }
0x104f   : > { %v9968_v41 = vpack.c.bf16 %v10365_v39, %v10364_v40 }
0x1051   : > { %9969 = vmatprep.subr.bf16.mxu1 %v9968_v41 }
0x1052   : > { %v10647_v45 = vpop.eup %10646  ;;  %9971 = vmatpush3.bf16.msra.mxu1 %v9968_v41 }
0x1053   : > { %v10649_v46 = vpop.eup %10648  ;;  %9974 = vmatprep.subr.msk.bf16.mxu1 %vm11083_vm2, %v9972_v42  ;;  %v2363_v47 = vmul.f32 %v10647_v45, %v10643_v13 }
0x1054   : > { %v2362_v19 = vmul.f32 %v10649_v46, %v10645_v14 }
0x1056   : > { %9437 = vmatprep.mubr.msk.f32.mxu1 %vm906_vm3, %v2362_v19 }
0x1057   : > { %9438 = vmatmul.mubr.msk.f32.vlgmr.msra.gmra.mrb[20].mxu1 %vm906_vm3, %v2363_v47 }
0x1058   : > { %9444 = vmatprep.mubr.msk.f32.mxu1 %vm820_vm1, %v11305_v48 }
0x105b   : > { %9977 = vmatpush3.bf16.xpose.msk.msra.mxu1 %vm11083_vm2, %v9972_v42 }
0x1062   : > { %9445 = vmatmul.mubr.msk.f32.vlgmr.msra.gmra.mrb[22].mxu1 %vm820_vm1, %v11313_v49 }
0x112a   : > { %v11317_v50 = vpop.f32.mrb[20].mxu1 }
0x112b   : > { %v11319_v51 = vpop.f32.mrb[21].mxu1 }
0x1135   : > { %v9446_v30 = vpop.f32.mrb[22].mxu1 }
0x1136   : > { %v2567_v52 = vpop.f32.mrb[23].mxu1  ;;  %v2579_v53 = vsel %vm906_vm3, %v9446_v30, -inf }
0x1137   : > { %2580 = vmax.xlane.f32.xlu0 %v2579_v53  ;;  %v2576_v54 = vsel %vm906_vm3, %v2567_v52, -inf }
0x1138   : > { %2577 = vmax.xlane.f32.xlu1 %v2576_v54 }
0x11c4   : > { %v2581_v55 = vpop.xlane.xlu0 %2580 }
0x11c5   : > { %v2583_v56 = vsub.f32 %v9446_v30, %v2581_v55  ;;  %v2578_v58 = vpop.xlane.xlu1 %2577 }
0x11c6   : > { %v2582_v29 = vsub.f32 %v2567_v52, %v2578_v58 }
0x11c7   : > { %v2586_v17 = vmul.f32 1.442695, %v2583_v56 }
0x11c8   : > { %v2584_v59 = vmul.f32 1.442695, %v2582_v29 }
0x11c9   : > { %10650 = vpow2.f32 %v2586_v17 }
0x11ca   : > { %10652 = vpow2.f32 %v2584_v59 }
0x11d3   : > { %v10651_v57 = vpop.eup %10650 }
0x11d4   : > { %v10653_v28 = vpop.eup %10652  ;;  %v2591_v62 = vsel %vm906_vm3, %v10651_v57, 0.0 }
0x11d5   : > { %2592 = vadd.xlane.f32.xlu1 %v2591_v62  ;;  %v2588_v1 = vsel %vm906_vm3, %v10653_v28, 0.0 }
0x11d6   : > { %2589 = vadd.xlane.f32.xlu0 %v2588_v1 }
0x11e6   : > { %10377 = vrot.lane.b32.xlu1 %v11109_v33, %s10909_s28 }
0x11ea   : > { %2685 = vrot.lane.b32.xlu1 %v11305_v48, %s10911_s29 }
0x11ec   : > { %10372 = vrot.lane.b32.xlu0 %v11109_v33, %s10908_s27 }
0x11f0   : > { %2687 = vrot.lane.b32.xlu0 %v11313_v49, %s10911_s29 }
0x1262   : > { %v2593_v2 = vpop.xlane.xlu1 %2592 }
0x1263   : > { %10654 = vrcp.f32 %v2593_v2  ;;  %v2590_v18 = vpop.xlane.xlu0 %2589 }
0x1264   : > { %10656 = vrcp.f32 %v2590_v18 }
0x1266   : > { %v10378_v3 = vpop.permute.xlu1 %10377 }
0x1267   : > { %v10373_v4 = vpop.permute.xlu0 %10372  ;;  %v10380_v5 = vunpack.i.h.bf16 %v10378_v3  ;;  %v10379_v6 = vunpack.i.l.bf16 %v10378_v3 }
0x1268   : > { %v10375_v9 = vunpack.i.h.bf16 %v10373_v4  ;;  %v10374_v10 = vunpack.i.l.bf16 %v10373_v4 }
0x1269   : > { %v9982_v13 = vpack.c.bf16 %v10380_v5, %v10379_v6 }
0x126a   : > { %v9978_v11 = vpack.c.bf16 %v10375_v9, %v10374_v10  ;;  %v2686_v35 = vpop.permute.xlu1 %2685 }
0x126b   : > { %v2688_v36 = vpop.permute.xlu0 %2687 }
0x126c   : > { %9979 = vmatprep.subr.bf16.mxu0 %v9978_v11 }
0x126d   : > { %v10655_v14 = vpop.eup %10654  ;;  %9981 = vmatpush3.bf16.msra.mxu0 %v9978_v11 }
0x126e   : > { %v10657_v24 = vpop.eup %10656  ;;  %9984 = vmatprep.subr.msk.bf16.mxu0 %vm11083_vm2, %v9982_v13  ;;  %v2597_v27 = vmul.f32 %v10655_v14, %v10651_v57 }
0x126f   : > { %v2596_v25 = vmul.f32 %v10657_v24, %v10653_v28 }
0x1271   : > { %9451 = vmatprep.mubr.msk.f32.mxu0 %vm906_vm3, %v2596_v25 }
0x1272   : > { %9452 = vmatmul.mubr.msk.f32.vlgmr.msra.gmra.mrb[18].mxu0 %vm906_vm3, %v2597_v27 }
0x1273   : > { %9458 = vmatprep.mubr.msk.f32.mxu0 %vm820_vm1, %v2686_v35 }
0x1276   : > { %9987 = vmatpush3.bf16.xpose.msk.msra.mxu0 %vm11083_vm2, %v9982_v13 }
0x127d   : > { %9459 = vmatmul.mubr.msk.f32.vlgmr.msra.gmra.mrb[20].mxu0 %vm820_vm1, %v2688_v36 }
0x1345   : > { %v11341_v12 = vpop.f32.mrb[18].mxu0 }
0x1346   : > { %v11343_v37 = vpop.f32.mrb[19].mxu0 }
0x1350   : > { %v9460_v38 = vpop.f32.mrb[20].mxu0 }
0x1351   : > { %v2767_v39 = vpop.f32.mrb[21].mxu0  ;;  %v2779_v40 = vsel %vm906_vm3, %v9460_v38, -inf }
0x1352   : > { %2780 = vmax.xlane.f32.xlu0 %v2779_v40  ;;  %v2776_v41 = vsel %vm906_vm3, %v2767_v39, -inf }
0x1353   : > { %2777 = vmax.xlane.f32.xlu1 %v2776_v41 }
0x13df   : > { %v2781_v42 = vpop.xlane.xlu0 %2780 }
0x13e0   : > { %v2783_v45 = vsub.f32 %v9460_v38, %v2781_v42  ;;  %v2778_v46 = vpop.xlane.xlu1 %2777 }
0x13e1   : > { %v2782_v19 = vsub.f32 %v2767_v39, %v2778_v46 }
0x13e2   : > { %v2786_v47 = vmul.f32 1.442695, %v2783_v45 }
0x13e3   : > { %v2784_v30 = vmul.f32 1.442695, %v2782_v19 }
0x13e4   : > { %10658 = vpow2.f32 %v2786_v47 }
0x13e5   : > { %10660 = vpow2.f32 %v2784_v30 }
0x13ee   : > { %v10659_v52 = vpop.eup %10658 }
0x13ef   : > { %v10661_v53 = vpop.eup %10660  ;;  %v2791_v54 = vsel %vm906_vm3, %v10659_v52, 0.0 }
0x13f0   : > { %2792 = vadd.xlane.f32.xlu1 %v2791_v54  ;;  %v2788_v55 = vsel %vm906_vm3, %v10661_v53, 0.0 }
0x13f1   : > { %2789 = vadd.xlane.f32.xlu0 %v2788_v55 }
0x1401   : > { %10387 = vrot.lane.b32.xlu1 %v11109_v33, %s12598_s4 }
0x1405   : > { %2885 = vrot.lane.b32.xlu1 %v11305_v48, %s10912_s0 }
0x1407   : > { %10382 = vrot.lane.b32.xlu0 %v11109_v33, %s10913_s21 }
0x140b   : > { %2887 = vrot.lane.b32.xlu0 %v11313_v49, %s10912_s0 }
0x147d   : > { %v2793_v56 = vpop.xlane.xlu1 %2792 }
0x147e   : > { %10662 = vrcp.f32 %v2793_v56  ;;  %v2790_v58 = vpop.xlane.xlu0 %2789 }
0x147f   : > { %10664 = vrcp.f32 %v2790_v58 }
0x1481   : > { %v10388_v29 = vpop.permute.xlu1 %10387 }
0x1482   : > { %v10383_v17 = vpop.permute.xlu0 %10382  ;;  %v10390_v59 = vunpack.i.h.bf16 %v10388_v29  ;;  %v10389_v57 = vunpack.i.l.bf16 %v10388_v29 }
0x1483   : > { %v10385_v28 = vunpack.i.h.bf16 %v10383_v17  ;;  %v10384_v62 = vunpack.i.l.bf16 %v10383_v17 }
0x1484   : > { %v9992_v2 = vpack.c.bf16 %v10390_v59, %v10389_v57 }
0x1485   : > { %v9988_v1 = vpack.c.bf16 %v10385_v28, %v10384_v62  ;;  %v2886_v6 = vpop.permute.xlu1 %2885 }
0x1486   : > { %v2888_v9 = vpop.permute.xlu0 %2887 }
0x1487   : > { %9989 = vmatprep.subr.bf16.mxu1 %v9988_v1 }
0x1488   : > { %v10663_v18 = vpop.eup %10662  ;;  %9991 = vmatpush3.bf16.msra.mxu1 %v9988_v1 }
0x1489   : > { %v10665_v3 = vpop.eup %10664  ;;  %9994 = vmatprep.subr.msk.bf16.mxu1 %vm11083_vm2, %v9992_v2  ;;  %v2797_v5 = vmul.f32 %v10663_v18, %v10659_v52 }
0x148a   : > { %v2796_v4 = vmul.f32 %v10665_v3, %v10661_v53 }
0x148c   : > { %9465 = vmatprep.mubr.msk.f32.mxu1 %vm906_vm3, %v2796_v4 }
0x148d   : > { %9466 = vmatmul.mubr.msk.f32.vlgmr.msra.gmra.mrb[24].mxu1 %vm906_vm3, %v2797_v5 }
0x148e   : > { %9472 = vmatprep.mubr.msk.f32.mxu1 %vm820_vm1, %v2886_v6 }
0x1491   : > { %9997 = vmatpush3.bf16.xpose.msk.msra.mxu1 %vm11083_vm2, %v9992_v2 }
0x1498   : > { %9473 = vmatmul.mubr.msk.f32.vlgmr.msra.gmra.mrb[26].mxu1 %vm820_vm1, %v2888_v9 }
0x1560   : > { %v11365_v10 = vpop.f32.mrb[24].mxu1 }
0x1561   : > { %v11367_v11 = vpop.f32.mrb[25].mxu1 }
0x156b   : > { %v9474_v13 = vpop.f32.mrb[26].mxu1 }
0x156c   : > { %v2967_v14 = vpop.f32.mrb[27].mxu1  ;;  %v2979_v24 = vsel %vm906_vm3, %v9474_v13, -inf }
0x156d   : > { %2980 = vmax.xlane.f32.xlu0 %v2979_v24  ;;  %v2976_v25 = vsel %vm906_vm3, %v2967_v14, -inf }
0x156e   : > { %2977 = vmax.xlane.f32.xlu1 %v2976_v25 }
0x15fa   : > { %v2981_v27 = vpop.xlane.xlu0 %2980 }
0x15fb   : > { %v2983_v35 = vsub.f32 %v9474_v13, %v2981_v27  ;;  %v2978_v36 = vpop.xlane.xlu1 %2977 }
0x15fc   : > { %v2982_v38 = vsub.f32 %v2967_v14, %v2978_v36 }
0x15fd   : > { %v2986_v39 = vmul.f32 1.442695, %v2983_v35 }
0x15fe   : > { %v2984_v40 = vmul.f32 1.442695, %v2982_v38 }
0x15ff   : > { %10666 = vpow2.f32 %v2986_v39 }
0x1600   : > { %10668 = vpow2.f32 %v2984_v40 }
0x1609   : > { %v10667_v41 = vpop.eup %10666 }
0x160a   : > { %v10669_v42 = vpop.eup %10668  ;;  %v2991_v45 = vsel %vm906_vm3, %v10667_v41, 0.0 }
0x160b   : > { %2992 = vadd.xlane.f32.xlu1 %v2991_v45  ;;  %v2988_v46 = vsel %vm906_vm3, %v10669_v42, 0.0 }
0x160c   : > { %2989 = vadd.xlane.f32.xlu0 %v2988_v46 }
0x161c   : > { %10397 = vrot.lane.b32.xlu1 %v11109_v33, %s12594_s22 }
0x1620   : > { %3085 = vrot.lane.b32.xlu1 %v11305_v48, %s12596_s25 }
0x1622   : > { %10392 = vrot.lane.b32.xlu0 %v11109_v33, %s10915_s24 }
0x1626   : > { %3087 = vrot.lane.b32.xlu0 %v11313_v49, %s12596_s25 }
0x1698   : > { %v2993_v19 = vpop.xlane.xlu1 %2992 }
0x1699   : > { %10670 = vrcp.f32 %v2993_v19  ;;  %v2990_v47 = vpop.xlane.xlu0 %2989 }
0x169a   : > { %10672 = vrcp.f32 %v2990_v47 }
0x169c   : > { %v10398_v30 = vpop.permute.xlu1 %10397 }
0x169d   : > { %v10393_v52 = vpop.permute.xlu0 %10392  ;;  %v10400_v53 = vunpack.i.h.bf16 %v10398_v30  ;;  %v10399_v54 = vunpack.i.l.bf16 %v10398_v30 }
0x169e   : > { %v10395_v55 = vunpack.i.h.bf16 %v10393_v52  ;;  %v10394_v56 = vunpack.i.l.bf16 %v10393_v52 }
0x169f   : > { %v10002_v29 = vpack.c.bf16 %v10400_v53, %v10399_v54 }
0x16a0   : > { %v9998_v58 = vpack.c.bf16 %v10395_v55, %v10394_v56  ;;  %v3086_v57 = vpop.permute.xlu1 %3085  ;;  %v11405_v55 = vmul.f32 0.35355338, %v11105_v32  ;;  %v11413_v56 = vmul.f32 0.35355338, %v11102_v31 }
0x16a1   : > { %v3088_v28 = vpop.permute.xlu0 %3087 }
0x16a2   : > { %9999 = vmatprep.subr.bf16.mxu0 %v9998_v58 }
0x16a3   : > { %v10671_v48 = vpop.eup %10670  ;;  %10001 = vmatpush3.bf16.msra.mxu0 %v9998_v58 }
0x16a4   : > { %v10673_v17 = vpop.eup %10672  ;;  %10004 = vmatprep.subr.msk.bf16.mxu0 %vm11083_vm2, %v10002_v29  ;;  %v2997_v59 = vmul.f32 %v10671_v48, %v10667_v41 }
0x16a5   : > { %v2996_v49 = vmul.f32 %v10673_v17, %v10669_v42 }
0x16a7   : > { %9479 = vmatprep.mubr.msk.f32.mxu0 %vm906_vm3, %v2996_v49 }
0x16a8   : > { %9480 = vmatmul.mubr.msk.f32.vlgmr.msra.gmra.mrb[22].mxu0 %vm906_vm3, %v2997_v59 }
0x16a9   : > { %9486 = vmatprep.mubr.msk.f32.mxu0 %vm820_vm1, %v3086_v57 }
0x16ac   : > { %10007 = vmatpush3.bf16.xpose.msk.msra.mxu0 %vm11083_vm2, %v10002_v29 }
0x16b3   : > { %9487 = vmatmul.mubr.msk.f32.vlgmr.msra.gmra.mrb[24].mxu0 %vm820_vm1, %v3088_v28 }
0x177b   : > { %v11389_v62 = vpop.f32.mrb[22].mxu0 }
0x177c   : > { %v11391_v1 = vpop.f32.mrb[23].mxu0 }
0x1786   : > { %v9488_v2 = vpop.f32.mrb[24].mxu0 }
0x1787   : > { %v3167_v18 = vpop.f32.mrb[25].mxu0  ;;  %v3179_v3 = vsel %vm906_vm3, %v9488_v2, -inf }
0x1788   : > { %3180 = vmax.xlane.f32.xlu0 %v3179_v3  ;;  %v3176_v4 = vsel %vm906_vm3, %v3167_v18, -inf }
0x1789   : > { %3177 = vmax.xlane.f32.xlu1 %v3176_v4 }
0x1815   : > { %v3181_v5 = vpop.xlane.xlu0 %3180 }
0x1816   : > { %v3183_v6 = vsub.f32 %v9488_v2, %v3181_v5  ;;  %v3178_v9 = vpop.xlane.xlu1 %3177 }
0x1817   : > { %v3182_v13 = vsub.f32 %v3167_v18, %v3178_v9 }
0x1818   : > { %v3186_v14 = vmul.f32 1.442695, %v3183_v6 }
0x1819   : > { %v3184_v24 = vmul.f32 1.442695, %v3182_v13 }
0x181a   : > { %10674 = vpow2.f32 %v3186_v14 }
0x181b   : > { %10676 = vpow2.f32 %v3184_v24 }
0x1824   : > { %v10675_v25 = vpop.eup %10674 }
0x1825   : > { %v10677_v27 = vpop.eup %10676  ;;  %v3191_v35 = vsel %vm906_vm3, %v10675_v25, 0.0 }
0x1826   : > { %3192 = vadd.xlane.f32.xlu1 %v3191_v35  ;;  %v3188_v36 = vsel %vm906_vm3, %v10677_v27, 0.0 }
0x1827   : > { %3189 = vadd.xlane.f32.xlu0 %v3188_v36 }
0x1837   : > { %10407 = vrot.lane.b32.xlu1 %v11113_v34, %s12600_s26  ;;  %s12617_s26 = sld [smem:[#allocation4_spill]] }
0x183d   : > { %10402 = vrot.lane.b32.xlu0 %v11109_v33, %s10917_s3 }
0x18b3   : > { %v3193_v38 = vpop.xlane.xlu1 %3192 }
0x18b4   : > { %10678 = vrcp.f32 %v3193_v38  ;;  %v3190_v39 = vpop.xlane.xlu0 %3189 }
0x18b5   : > { %10680 = vrcp.f32 %v3190_v39 }
0x18b7   : > { %v10408_v40 = vpop.permute.xlu1 %10407 }
0x18b8   : > { %v10403_v41 = vpop.permute.xlu0 %10402  ;;  %v10410_v42 = vunpack.i.h.bf16 %v10408_v40  ;;  %v10409_v45 = vunpack.i.l.bf16 %v10408_v40 }
0x18b9   : > { %v10405_v46 = vunpack.i.h.bf16 %v10403_v41  ;;  %v10404_v19 = vunpack.i.l.bf16 %v10403_v41 }
0x18ba   : > { %v10012_v30 = vpack.c.bf16 %v10410_v42, %v10409_v45 }
0x18bb   : > { %v10008_v47 = vpack.c.bf16 %v10405_v46, %v10404_v19 }
0x18bd   : > { %10009 = vmatprep.subr.bf16.mxu1 %v10008_v47 }
0x18be   : > { %v10679_v52 = vpop.eup %10678  ;;  %10011 = vmatpush3.bf16.msra.mxu1 %v10008_v47 }
0x18bf   : > { %v10681_v53 = vpop.eup %10680  ;;  %10014 = vmatprep.subr.msk.bf16.mxu1 %vm11083_vm2, %v10012_v30  ;;  %v3197_v54 = vmul.f32 %v10679_v52, %v10675_v25 }
0x18c0   : > { %v3196_v33 = vmul.f32 %v10681_v53, %v10677_v27 }
0x18c2   : > { %9493 = vmatprep.mubr.msk.f32.mxu1 %vm906_vm3, %v3196_v33 }
0x18c3   : > { %9494 = vmatmul.mubr.msk.f32.vlgmr.msra.gmra.mrb[28].mxu1 %vm906_vm3, %v3197_v54 }
0x18c4   : > { %9500 = vmatprep.mubr.msk.f32.mxu1 %vm820_vm1, %v11405_v55 }
0x18c7   : > { %10017 = vmatpush3.bf16.xpose.msk.msra.mxu1 %vm11083_vm2, %v10012_v30 }
0x18ce   : > { %9501 = vmatmul.mubr.msk.f32.vlgmr.msra.gmra.mrb[30].mxu1 %vm820_vm1, %v11413_v56 }
0x1996   : > { %v11417_v58 = vpop.f32.mrb[28].mxu1 }
0x1997   : > { %v11419_v29 = vpop.f32.mrb[29].mxu1 }
0x19a1   : > { %v9502_v32 = vpop.f32.mrb[30].mxu1 }
0x19a2   : > { %v3401_v48 = vpop.f32.mrb[31].mxu1  ;;  %v3413_v17 = vsel %vm906_vm3, %v9502_v32, -inf }
0x19a3   : > { %3414 = vmax.xlane.f32.xlu0 %v3413_v17  ;;  %v3410_v49 = vsel %vm906_vm3, %v3401_v48, -inf }
0x19a4   : > { %3411 = vmax.xlane.f32.xlu1 %v3410_v49 }
0x1a30   : > { %v3415_v59 = vpop.xlane.xlu0 %3414 }
0x1a31   : > { %v3417_v57 = vsub.f32 %v9502_v32, %v3415_v59  ;;  %v3412_v28 = vpop.xlane.xlu1 %3411 }
0x1a32   : > { %v3416_v31 = vsub.f32 %v3401_v48, %v3412_v28 }
0x1a33   : > { %v3420_v2 = vmul.f32 1.442695, %v3417_v57 }
0x1a34   : > { %v3418_v18 = vmul.f32 1.442695, %v3416_v31 }
0x1a35   : > { %10682 = vpow2.f32 %v3420_v2 }
0x1a36   : > { %10684 = vpow2.f32 %v3418_v18 }
0x1a3f   : > { %v10683_v3 = vpop.eup %10682 }
0x1a40   : > { %v10685_v4 = vpop.eup %10684  ;;  %v3425_v5 = vsel %vm906_vm3, %v10683_v3, 0.0 }
0x1a41   : > { %3426 = vadd.xlane.f32.xlu1 %v3425_v5  ;;  %v3422_v6 = vsel %vm906_vm3, %v10685_v4, 0.0 }
0x1a42   : > { %3423 = vadd.xlane.f32.xlu0 %v3422_v6 }
0x1a52   : > { %10417 = vrot.lane.b32.xlu1 %v11113_v34, %s10909_s28 }
0x1a56   : > { %3519 = vrot.lane.b32.xlu1 %v11405_v55, %s10911_s29 }
0x1a58   : > { %10412 = vrot.lane.b32.xlu0 %v11113_v34, %s10908_s27  ;;  %s10918_s27 = smov 8  }
0x1a5c   : > { %3521 = vrot.lane.b32.xlu0 %v11413_v56, %s10911_s29 }
0x1ace   : > { %v3427_v9 = vpop.xlane.xlu1 %3426 }
0x1acf   : > { %10686 = vrcp.f32 %v3427_v9  ;;  %v3424_v13 = vpop.xlane.xlu0 %3423 }
0x1ad0   : > { %10688 = vrcp.f32 %v3424_v13 }
0x1ad2   : > { %v10418_v14 = vpop.permute.xlu1 %10417 }
0x1ad3   : > { %v10413_v24 = vpop.permute.xlu0 %10412  ;;  %v10420_v25 = vunpack.i.h.bf16 %v10418_v14  ;;  %v10419_v27 = vunpack.i.l.bf16 %v10418_v14 }
0x1ad4   : > { %v10415_v35 = vunpack.i.h.bf16 %v10413_v24  ;;  %v10414_v36 = vunpack.i.l.bf16 %v10413_v24 }
0x1ad5   : > { %v10022_v39 = vpack.c.bf16 %v10420_v25, %v10419_v27 }
0x1ad6   : > { %v10018_v38 = vpack.c.bf16 %v10415_v35, %v10414_v36  ;;  %v3520_v46 = vpop.permute.xlu1 %3519 }
0x1ad7   : > { %v3522_v19 = vpop.permute.xlu0 %3521 }
0x1ad8   : > { %10019 = vmatprep.subr.bf16.mxu0 %v10018_v38 }
0x1ad9   : > { %v10687_v40 = vpop.eup %10686  ;;  %10021 = vmatpush3.bf16.msra.mxu0 %v10018_v38 }
0x1ada   : > { %v10689_v41 = vpop.eup %10688  ;;  %10024 = vmatprep.subr.msk.bf16.mxu0 %vm11083_vm2, %v10022_v39  ;;  %v3431_v45 = vmul.f32 %v10687_v40, %v10683_v3 }
0x1adb   : > { %v3430_v42 = vmul.f32 %v10689_v41, %v10685_v4 }
0x1add   : > { %9507 = vmatprep.mubr.msk.f32.mxu0 %vm906_vm3, %v3430_v42 }
0x1ade   : > { %9508 = vmatmul.mubr.msk.f32.vlgmr.msra.gmra.mrb[26].mxu0 %vm906_vm3, %v3431_v45 }
0x1adf   : > { %9514 = vmatprep.mubr.msk.f32.mxu0 %vm820_vm1, %v3520_v46 }
0x1ae2   : > { %10027 = vmatpush3.bf16.xpose.msk.msra.mxu0 %vm11083_vm2, %v10022_v39 }
0x1ae9   : > { %9515 = vmatmul.mubr.msk.f32.vlgmr.msra.gmra.mrb[28].mxu0 %vm820_vm1, %v3522_v19 }
0x1bb1   : > { %v11441_v47 = vpop.f32.mrb[26].mxu0 }
0x1bb2   : > { %v11443_v30 = vpop.f32.mrb[27].mxu0 }
0x1bbc   : > { %v9516_v52 = vpop.f32.mrb[28].mxu0 }
0x1bbd   : > { %v3601_v53 = vpop.f32.mrb[29].mxu0  ;;  %v3613_v33 = vsel %vm906_vm3, %v9516_v52, -inf }
0x1bbe   : > { %3614 = vmax.xlane.f32.xlu0 %v3613_v33  ;;  %v3610_v54 = vsel %vm906_vm3, %v3601_v53, -inf }
0x1bbf   : > { %3611 = vmax.xlane.f32.xlu1 %v3610_v54 }
0x1c4b   : > { %v3615_v32 = vpop.xlane.xlu0 %3614 }
0x1c4c   : > { %v3617_v48 = vsub.f32 %v9516_v52, %v3615_v32  ;;  %v3612_v17 = vpop.xlane.xlu1 %3611 }
0x1c4d   : > { %v3616_v49 = vsub.f32 %v3601_v53, %v3612_v17 }
0x1c4e   : > { %v3620_v59 = vmul.f32 1.442695, %v3617_v48 }
0x1c4f   : > { %v3618_v57 = vmul.f32 1.442695, %v3616_v49 }
0x1c50   : > { %10690 = vpow2.f32 %v3620_v59 }
0x1c51   : > { %10692 = vpow2.f32 %v3618_v57 }
0x1c5a   : > { %v10691_v28 = vpop.eup %10690 }
0x1c5b   : > { %v10693_v31 = vpop.eup %10692  ;;  %v3625_v2 = vsel %vm906_vm3, %v10691_v28, 0.0 }
0x1c5c   : > { %3626 = vadd.xlane.f32.xlu1 %v3625_v2  ;;  %v3622_v18 = vsel %vm906_vm3, %v10693_v31, 0.0 }
0x1c5d   : > { %3623 = vadd.xlane.f32.xlu0 %v3622_v18 }
0x1c6d   : > { %10427 = vrot.lane.b32.xlu1 %v11113_v34, %s12598_s4  ;;  %s11621_s4 = scalar_lea.vmem %s12617_s26, %s11046_s30  ;;  %s12620_s26 = smov 104  }
0x1c71   : > { %3719 = vrot.lane.b32.xlu1 %v11405_v55, %s10912_s0 }
0x1c73   : > { %10422 = vrot.lane.b32.xlu0 %v11113_v34, %s10913_s21  ;;  %s12604_s21 = smov 16  }
0x1c77   : > { %3721 = vrot.lane.b32.xlu0 %v11413_v56, %s10912_s0 }
0x1ce9   : > { %v3627_v3 = vpop.xlane.xlu1 %3626 }
0x1cea   : > { %10694 = vrcp.f32 %v3627_v3  ;;  %v3624_v4 = vpop.xlane.xlu0 %3623 }
0x1ceb   : > { %10696 = vrcp.f32 %v3624_v4 }
0x1ced   : > { %v10428_v5 = vpop.permute.xlu1 %10427 }
0x1cee   : > { %v10423_v6 = vpop.permute.xlu0 %10422  ;;  %v10430_v9 = vunpack.i.h.bf16 %v10428_v5  ;;  %v10429_v13 = vunpack.i.l.bf16 %v10428_v5 }
0x1cef   : > { %v10425_v14 = vunpack.i.h.bf16 %v10423_v6  ;;  %v10424_v24 = vunpack.i.l.bf16 %v10423_v6 }
0x1cf0   : > { %v10032_v27 = vpack.c.bf16 %v10430_v9, %v10429_v13 }
0x1cf1   : > { %v10028_v25 = vpack.c.bf16 %v10425_v14, %v10424_v24  ;;  %v3720_v40 = vpop.permute.xlu1 %3719 }
0x1cf2   : > { %v3722_v41 = vpop.permute.xlu0 %3721 }
0x1cf3   : > { %10029 = vmatprep.subr.bf16.mxu1 %v10028_v25 }
0x1cf4   : > { %v10695_v35 = vpop.eup %10694  ;;  %10031 = vmatpush3.bf16.msra.mxu1 %v10028_v25 }
0x1cf5   : > { %v10697_v36 = vpop.eup %10696  ;;  %10034 = vmatprep.subr.msk.bf16.mxu1 %vm11083_vm2, %v10032_v27  ;;  %v3631_v39 = vmul.f32 %v10695_v35, %v10691_v28 }
0x1cf6   : > { %v3630_v38 = vmul.f32 %v10697_v36, %v10693_v31 }
0x1cf8   : > { %9521 = vmatprep.mubr.msk.f32.mxu1 %vm906_vm3, %v3630_v38 }
0x1cf9   : > { %9522 = vmatmul.mubr.msk.f32.vlgmr.msra.gmra.mrb[32].mxu1 %vm906_vm3, %v3631_v39 }
0x1cfa   : > { %9528 = vmatprep.mubr.msk.f32.mxu1 %vm820_vm1, %v3720_v40 }
0x1cfd   : > { %10037 = vmatpush3.bf16.xpose.msk.msra.mxu1 %vm11083_vm2, %v10032_v27 }
0x1d04   : > { %9529 = vmatmul.mubr.msk.f32.vlgmr.msra.gmra.mrb[34].mxu1 %vm820_vm1, %v3722_v41 }
0x1dcc   : > { %v11465_v42 = vpop.f32.mrb[32].mxu1 }
0x1dcd   : > { %v11467_v45 = vpop.f32.mrb[33].mxu1 }
0x1dd7   : > { %v9530_v46 = vpop.f32.mrb[34].mxu1 }
0x1dd8   : > { %v3801_v19 = vpop.f32.mrb[35].mxu1  ;;  %v3813_v52 = vsel %vm906_vm3, %v9530_v46, -inf }
0x1dd9   : > { %3814 = vmax.xlane.f32.xlu0 %v3813_v52  ;;  %v3810_v53 = vsel %vm906_vm3, %v3801_v19, -inf }
0x1dda   : > { %3811 = vmax.xlane.f32.xlu1 %v3810_v53 }
0x1e66   : > { %v3815_v33 = vpop.xlane.xlu0 %3814 }
0x1e67   : > { %v3817_v54 = vsub.f32 %v9530_v46, %v3815_v33  ;;  %v3812_v32 = vpop.xlane.xlu1 %3811 }
0x1e68   : > { %v3816_v48 = vsub.f32 %v3801_v19, %v3812_v32 }
0x1e69   : > { %v3820_v17 = vmul.f32 1.442695, %v3817_v54 }
0x1e6a   : > { %v3818_v49 = vmul.f32 1.442695, %v3816_v48 }
0x1e6b   : > { %10698 = vpow2.f32 %v3820_v17 }
0x1e6c   : > { %10700 = vpow2.f32 %v3818_v49 }
0x1e75   : > { %v10699_v59 = vpop.eup %10698 }
0x1e76   : > { %v10701_v57 = vpop.eup %10700  ;;  %v3825_v28 = vsel %vm906_vm3, %v10699_v59, 0.0 }
0x1e77   : > { %3826 = vadd.xlane.f32.xlu1 %v3825_v28  ;;  %v3822_v31 = vsel %vm906_vm3, %v10701_v57, 0.0 }
0x1e78   : > { %3823 = vadd.xlane.f32.xlu0 %v3822_v31 }
0x1e88   : > { %10437 = vrot.lane.b32.xlu1 %v11113_v34, %s12594_s22 }
0x1e8c   : > { %3919 = vrot.lane.b32.xlu1 %v11405_v55, %s12596_s25 }
0x1e8e   : > { %10432 = vrot.lane.b32.xlu0 %v11113_v34, %s10915_s24  ;;  %s12602_s24 = smov 24  }
0x1e92   : > { %3921 = vrot.lane.b32.xlu0 %v11413_v56, %s12596_s25  ;;  %s12616_s25 = sld [smem:[#allocation7_spill]] }
0x1e98   : > { %v4160_v28 = vld [vmem:[%s12616_s25 + $0x8] sm:$0xff] }
0x1f04   : > { %v3827_v2 = vpop.xlane.xlu1 %3826 }
0x1f05   : > { %10702 = vrcp.f32 %v3827_v2  ;;  %v3824_v18 = vpop.xlane.xlu0 %3823 }
0x1f06   : > { %10704 = vrcp.f32 %v3824_v18 }
0x1f08   : > { %v10438_v3 = vpop.permute.xlu1 %10437 }
0x1f09   : > { %v10433_v4 = vpop.permute.xlu0 %10432  ;;  %v10440_v5 = vunpack.i.h.bf16 %v10438_v3  ;;  %v10439_v6 = vunpack.i.l.bf16 %v10438_v3 }
0x1f0a   : > { %v10435_v9 = vunpack.i.h.bf16 %v10433_v4  ;;  %v10434_v13 = vunpack.i.l.bf16 %v10433_v4 }
0x1f0b   : > { %v10042_v24 = vpack.c.bf16 %v10440_v5, %v10439_v6 }
0x1f0c   : > { %v10038_v14 = vpack.c.bf16 %v10435_v9, %v10434_v13  ;;  %v3920_v35 = vpop.permute.xlu1 %3919 }
0x1f0d   : > { %v3922_v36 = vpop.permute.xlu0 %3921 }
0x1f0e   : > { %10039 = vmatprep.subr.bf16.mxu0 %v10038_v14 }
0x1f0f   : > { %v10703_v55 = vpop.eup %10702  ;;  %10041 = vmatpush3.bf16.msra.mxu0 %v10038_v14 }
0x1f10   : > { %v10705_v25 = vpop.eup %10704  ;;  %10044 = vmatprep.subr.msk.bf16.mxu0 %vm11083_vm2, %v10042_v24  ;;  %v3831_v27 = vmul.f32 %v10703_v55, %v10699_v59 }
0x1f11   : > { %v3830_v56 = vmul.f32 %v10705_v25, %v10701_v57  ;;  %v4159_v57 = vld [vmem:[%s12616_s25] sm:$0xff] }
0x1f12   : > { %v10052_v31 = vpack.c.bf16 %v4160_v28, %v4159_v57 }
0x1f13   : > { %9535 = vmatprep.mubr.msk.f32.mxu0 %vm906_vm3, %v3830_v56 }
0x1f14   : > { %9536 = vmatmul.mubr.msk.f32.vlgmr.msra.gmra.mrb[30].mxu0 %vm906_vm3, %v3831_v27 }
0x1f15   : > { %9542 = vmatprep.mubr.msk.f32.mxu0 %vm820_vm1, %v3920_v35 }
0x1f18   : > { %10047 = vmatpush3.bf16.xpose.msk.msra.mxu0 %vm11083_vm2, %v10042_v24 }
0x1f1f   : > { %9543 = vmatmul.mubr.msk.f32.vlgmr.msra.gmra.mrb[32].mxu0 %vm820_vm1, %v3922_v36 }
0x1fe7   : > { %v11489_v38 = vpop.f32.mrb[30].mxu0 }
0x1fe8   : > { %v11491_v39 = vpop.f32.mrb[31].mxu0 }
0x1ff2   : > { %v9544_v40 = vpop.f32.mrb[32].mxu0 }
0x1ff3   : > { %v4001_v41 = vpop.f32.mrb[33].mxu0  ;;  %v4013_v46 = vsel %vm906_vm3, %v9544_v40, -inf }
0x1ff4   : > { %4014 = vmax.xlane.f32.xlu0 %v4013_v46  ;;  %v4010_v19 = vsel %vm906_vm3, %v4001_v41, -inf }
0x1ff5   : > { %4011 = vmax.xlane.f32.xlu1 %v4010_v19 }
0x2006   : > { %1618 = vrot.lane.b32.xlu1 %v11189_v21, %s10918_s27 }
0x200a   : > { %10442 = vrot.lane.b32.xlu0 %v11113_v34, %s10917_s3  ;;  %1620 = vrot.lane.b32.xlu1 %v11187_v20, %s10918_s27  ;;  %s12619_s3 = smov 80  }
0x200e   : > { %1626 = vrot.lane.b32.xlu0 %v11193_v23, %s12604_s21  ;;  %1628 = vrot.lane.b32.xlu1 %v11191_v22, %s12604_s21 }
0x2081   : > { %v4015_v52 = vpop.xlane.xlu0 %4014 }
0x2082   : > { %v4017_v53 = vsub.f32 %v9544_v40, %v4015_v52  ;;  %v4012_v33 = vpop.xlane.xlu1 %4011 }
0x2083   : > { %v4016_v54 = vsub.f32 %v4001_v41, %v4012_v33 }
0x2084   : > { %v4020_v32 = vmul.f32 1.442695, %v4017_v53  ;;  %v11542_v53 = vld [vmem:[%s12576_s5] ss:$0 sm:$0xff] }
0x2085   : > { %v4018_v48 = vmul.f32 1.442695, %v4016_v54  ;;  %v10443_v21 = vpop.permute.xlu0 %10442 }
0x2086   : > { %10706 = vpow2.f32 %v4020_v32  ;;  %v10445_v17 = vunpack.i.h.bf16 %v10443_v21  ;;  %v10444_v34 = vunpack.i.l.bf16 %v10443_v21  ;;  %v1619_v2 = vpop.permute.xlu1 %1618  ;;  %v10890_v21 = vld [vmem:[%s11052_s23 + $0x8] sm:$0xff] }
0x2087   : > { %10708 = vpow2.f32 %v4018_v48  ;;  %v1640_v6 = vsel %vm820_vm1, %v11149_v8, %v1619_v2  ;;  %v4162_v8 = vld [vmem:[%s12616_s25 + $0x18] sm:$0xff] }
0x2088   : > { %v10048_v49 = vpack.c.bf16 %v10445_v17, %v10444_v34  ;;  %v10891_v34 = vld [vmem:[%s11052_s23] sm:$0xff] }
0x2089   : > { %v1627_v4 = vpop.permute.xlu0 %1626 }
0x208a   : > { %10049 = vmatprep.subr.bf16.mxu1 %v10048_v49  ;;  %v1621_v18 = vpop.permute.xlu1 %1620  ;;  %v1642_v14 = vsel %vm906_vm3, %v1640_v6, %v1627_v4 }
0x208b   : > { %10051 = vmatpush3.bf16.msra.mxu1 %v10048_v49 }
0x208c   : > { %10053 = vmatprep.subr.bf16.mxu1 %v10052_v31 }
0x208e   : > { %v1629_v3 = vpop.permute.xlu1 %1628 }
0x2090   : > { %v10707_v20 = vpop.eup %10706 }
0x2091   : > { %v10709_v59 = vpop.eup %10708  ;;  %v4025_v23 = vsel %vm906_vm3, %v10707_v20, 0.0 }
0x2092   : > { %4026 = vadd.xlane.f32.xlu1 %v4025_v23  ;;  %v4022_v22 = vsel %vm906_vm3, %v10709_v59, 0.0 }
0x2093   : > { %4023 = vadd.xlane.f32.xlu0 %v4022_v22 }
0x20a3   : > { %1636 = vrot.lane.b32.xlu1 %v11217_v60, %s12602_s24 }
0x20a9   : > { %1634 = vrot.lane.b32.xlu0 %v11219_v61, %s12602_s24  ;;  %v1641_v61 = vsel %vm820_vm1, %v11147_v7, %v1621_v18  ;;  %v4161_v7 = vld [vmem:[%s12616_s25 + $0x10] sm:$0xff] }
0x20aa   : > { %v1643_v9 = vsel %vm906_vm3, %v1641_v61, %v1629_v3  ;;  %v10056_v40 = vpack.c.bf16 %v4162_v8, %v4161_v7 }
0x211f   : > { %v4027_v5 = vpop.xlane.xlu1 %4026 }
0x2120   : > { %10710 = vrcp.f32 %v4027_v5  ;;  %v4024_v60 = vpop.xlane.xlu0 %4023 }
0x2121   : > { %10712 = vrcp.f32 %v4024_v60 }
0x2123   : > { %v1637_v13 = vpop.permute.xlu1 %1636 }
0x2124   : > { %v1646_v24 = vsel %vm1644_vm4, %v1643_v9, %v1637_v13  ;;  %v1635_v55 = vpop.permute.xlu0 %1634  ;;  %v4442_v9 = vld [vmem:[%s12579_s8] sm:$0xff] }
0x2125   : > { %1648 = vst.msk [vmem:[#allocation2 + $0x8] sm:$0xff] %vm682_vm0, %v1646_v24  ;;  %v1645_v25 = vsel %vm1644_vm4, %v1642_v14, %v1635_v55 }
0x2126   : > { %1647 = vst.msk [vmem:[#allocation2] sm:$0xff] %vm682_vm0, %v1645_v25  ;;  %v4444_v25 = vld [vmem:[%s12579_s8 + $0x10] sm:$0xff] }
0x212a   : > { %v10711_v56 = vpop.eup %10710 }
0x212b   : > { %v10713_v27 = vpop.eup %10712  ;;  %v4031_v36 = vmul.f32 %v10711_v56, %v10707_v20  ;;  %v4445_v56 = vld [vmem:[%s12579_s8 + $0x18] sm:$0xff] }
0x212c   : > { %v4030_v35 = vmul.f32 %v10713_v27, %v10709_v59  ;;  %v4152_v46 = vld [vmem:[#allocation2 + $0x8] sm:$0xff] }
0x212d   : > { %v4151_v41 = vld [vmem:[#allocation2] sm:$0xff] }
0x212e   : > { %9549 = vmatprep.mubr.msk.f32.mxu1 %vm906_vm3, %v4030_v35 }
0x212f   : > { %9550 = vmatmul.mubr.msk.f32.vlgmr.msra.gmra.mrb[36].mxu1 %vm906_vm3, %v4031_v36 }
0x2130   : > { %10055 = vmatpush3.bf16.msra.mxu1 %v10052_v31  ;;  %9560 = vmatprep.mubr.msk.f32.mxu1 %vm682_vm0, %v4151_v41 }
0x2131   : > { %10057 = vmatprep.subr.bf16.mxu1 %v10056_v40 }
0x2134   : > { %10059 = vmatpush3.bf16.msra.mxu1 %v10056_v40 }
0x2137   : > { %9561 = vmatmul.mubr.msk.f32.vlgmr.msra.gmra.mrb[38].mxu1 %vm682_vm0, %v4152_v46 }
0x2202   : > { %v9551_v19 = vpop.f32.mrb[36].mxu1 }
0x2203   : > { %v11537_v52 = vpop.f32.mrb[37].mxu1 }
0x220a   : > { %v9562_v33 = vpop.f32.mrb[38].mxu1 }
0x220b   : > { %v4266_v54 = vadd.f32 %v9562_v33, %v11542_v53  ;;  %v4260_v32 = vpop.f32.mrb[39].mxu1 }
0x220c   : > { %v4261_v48 = vadd.f32 %v11542_v53, %v4260_v32 }
0x220d   : > { %v4300_v17 = vadd.f32 %v10890_v21, %v4266_v54 }
0x220e   : > { %v4299_v49 = vadd.f32 %v10891_v34, %v4261_v48  ;;  %v11648_v48 = vld [vmem:[%s12578_s7] ss:$0 sm:$0xff] }
0x220f   : > { %v4312_v20 = vsel %vm682_vm0, %v4300_v17, 0.0 }
0x2210   : > { %4313 = vadd.xlane.f32.xlu1 %v4312_v20  ;;  %v4309_v59 = vsel %vm682_vm0, %v4299_v49, 0.0 }
0x2211   : > { %4310 = vadd.xlane.f32.xlu0 %v4309_v59 }
0x2221   : > { %2453 = vrot.lane.b32.xlu1 %v11267_v16, %s10918_s27 }
0x2225   : > { %2461 = vrot.lane.b32.xlu1 %v11291_v0, %s12604_s21 }
0x2229   : > { %2463 = vrot.lane.b32.xlu1 %v11289_v63, %s12604_s21 }
0x222d   : > { %2471 = vrot.lane.b32.xlu1 %v11317_v50, %s12602_s24 }
0x2231   : > { %3289 = vrot.lane.b32.xlu1 %v11365_v10, %s10918_s27 }
0x2235   : > { %3297 = vrot.lane.b32.xlu1 %v11389_v62, %s12604_s21 }
0x2239   : > { %3305 = vrot.lane.b32.xlu1 %v11417_v58, %s12602_s24 }
0x223d   : > { %4123 = vrot.lane.b32.xlu1 %v11465_v42, %s10918_s27 }
0x2241   : > { %4131 = vrot.lane.b32.xlu1 %v11489_v38, %s12604_s21 }
0x2245   : > { %4139 = vrot.lane.b32.xlu1 %v9551_v19, %s12602_s24 }
0x229d   : > { %v4314_v16 = vpop.xlane.xlu1 %4313 }
0x229e   : > { %v4335_v63 = vmul.f32 0.03125, %v4314_v16  ;;  %v4311_v0 = vpop.xlane.xlu0 %4310 }
0x229f   : > { %v4334_v50 = vmul.f32 0.03125, %v4311_v0 }
0x22a0   : > { %v11569_v23 = vsub.f32 %v4300_v17, %v4335_v63 }
0x22a1   : > { %v11571_v10 = vsub.f32 %v4299_v49, %v4334_v50  ;;  %v2454_v62 = vpop.permute.xlu1 %2453 }
0x22a2   : > { %v4351_v38 = vmul.f32 %v11569_v23, %v11569_v23  ;;  %v2475_v41 = vsel %vm820_vm1, %v11243_v44, %v2454_v62 }
0x22a3   : > { %v4350_v58 = vmul.f32 %v11571_v10, %v11571_v10 }
0x22a4   : > { %v4361_v28 = vsel %vm682_vm0, %v4351_v38, 0.0 }
0x22a5   : > { %v2462_v22 = vpop.permute.xlu1 %2461  ;;  %v4358_v42 = vsel %vm682_vm0, %v4350_v58, 0.0 }
0x22a6   : > { %4359 = vadd.xlane.f32.xlu0 %v4358_v42  ;;  %v2477_v19 = vsel %vm906_vm3, %v2475_v41, %v2462_v22 }
0x22a9   : > { %v2464_v57 = vpop.permute.xlu1 %2463 }
0x22aa   : > { %4362 = vadd.xlane.f32.xlu0 %v4361_v28 }
0x22ad   : > { %v2472_v31 = vpop.permute.xlu1 %2471 }
0x22b1   : > { %v3290_v2 = vpop.permute.xlu1 %3289 }
0x22b2   : > { %v3310_v3 = vsel %vm820_vm1, %v11341_v12, %v3290_v2  ;;  %v4443_v12 = vld [vmem:[%s12579_s8 + $0x8] sm:$0xff] }
0x22b3   : > { %v10060_v13 = vpack.c.bf16 %v4443_v12, %v4442_v9  ;;  %v11688_v9 = vld [vmem:[%s12580_s9] ss:$0 sm:$0xff] }
0x22b5   : > { %v3298_v18 = vpop.permute.xlu1 %3297  ;;  %10061 = vmatprep.subr.bf16.mxu0 %v10060_v13 }
0x22b6   : > { %v3312_v4 = vsel %vm906_vm3, %v3310_v3, %v3298_v18  ;;  %10063 = vmatpush3.bf16.msra.mxu0 %v10060_v13 }
0x22b9   : > { %v3306_v5 = vpop.permute.xlu1 %3305 }
0x22ba   : > { %v3314_v60 = vsel %vm1644_vm4, %v3312_v4, %v3306_v5 }
0x22bb   : > { %3316 = vst.msk [vmem:[#allocation2 + $0x28] sm:$0xff] %vm682_vm0, %v3314_v60 }
0x22bd   : > { %v4124_v61 = vpop.permute.xlu1 %4123 }
0x22be   : > { %v4144_v14 = vsel %vm820_vm1, %v11441_v47, %v4124_v61  ;;  %v10064_v47 = vpack.c.bf16 %v4445_v56, %v4444_v25 }
0x22c0   : > { %2455 = vrot.lane.b32.xlu0 %v11265_v15, %s10918_s27  ;;  %10065 = vmatprep.subr.bf16.mxu0 %v10064_v47 }
0x22c1   : > { %v4132_v6 = vpop.permute.xlu1 %4131  ;;  %10067 = vmatpush3.bf16.msra.mxu0 %v10064_v47 }
0x22c2   : > { %v4146_v24 = vsel %vm906_vm3, %v4144_v14, %v4132_v6 }
0x22c4   : > { %2469 = vrot.lane.b32.xlu0 %v11319_v51, %s12602_s24  ;;  %v663_v51 = vld [vmem:[%s11621_s4] sm:$0xff] }
0x22c5   : > { %v4140_v55 = vpop.permute.xlu1 %4139 }
0x22c6   : > { %v4148_v15 = vsel %vm1644_vm4, %v4146_v24, %v4140_v55 }
0x22c7   : > { %4150 = vst.msk [vmem:[#allocation2 + $0x38] sm:$0xff] %vm682_vm0, %v4148_v15 }
0x22c8   : > { %3287 = vrot.lane.b32.xlu0 %v11367_v11, %s10918_s27  ;;  %v664_v11 = vld [vmem:[%s11621_s4 + $0x8] sm:$0xff] }
0x22c9   : > { %v10068_v3 = vpack.c.bf16 %v664_v11, %v663_v51 }
0x22cb   : > { %10070 = vmatprep.subr.msk.bf16.mxu1 %vm11083_vm2, %v10068_v3 }
0x22cc   : > { %3295 = vrot.lane.b32.xlu0 %v11391_v1, %s12604_s21  ;;  %v11625_v1 = vpack.i.bf16 %v664_v11, %v663_v51  ;;  %10073 = vmatpush3.bf16.xpose.msk.msra.mxu1 %vm11083_vm2, %v10068_v3 }
0x22ce   : > { %v4158_v18 = vld [vmem:[#allocation2 + $0x38] sm:$0xff] }
0x22d0   : > { %3303 = vrot.lane.b32.xlu0 %v11419_v29, %s12602_s24 }
0x22d4   : > { %4121 = vrot.lane.b32.xlu0 %v11467_v45, %s10918_s27 }
0x22d8   : > { %4129 = vrot.lane.b32.xlu0 %v11491_v39, %s12604_s21 }
0x22dc   : > { %4137 = vrot.lane.b32.xlu0 %v11537_v52, %s12602_s24  ;;  %s12621_s24 = smov 72  }
0x22e0   : > { %10447 = vrot.lane.b32.xlu0 %v11625_v1, %s10911_s29 }
0x2333   : > { %v4360_v29 = vpop.xlane.xlu0 %4359 }
0x2334   : > { %v4382_v45 = vmul.f32 0.03125, %v4360_v29  ;;  %v10892_v29 = vld [vmem:[%s11052_s23 + $0x18] sm:$0xff] }
0x2336   : > { %v4390_v39 = vadd.f32 1e-05, %v4382_v45 }
0x2337   : > { %v4363_v7 = vpop.xlane.xlu0 %4362 }
0x2338   : > { %10714 = vrsqrt.f32 %v4390_v39  ;;  %v4383_v8 = vmul.f32 0.03125, %v4363_v7 }
0x233a   : > { %v4391_v27 = vadd.f32 1e-05, %v4383_v8  ;;  %v10893_v8 = vld [vmem:[%s11052_s23 + $0x20] sm:$0xff] }
0x233b   : > { %v2456_v35 = vpop.permute.xlu0 %2455 }
0x233c   : > { %10716 = vrsqrt.f32 %v4391_v27  ;;  %v2476_v36 = vsel %vm820_vm1, %v11241_v43, %v2456_v35  ;;  %v11642_v43 = vld [vmem:[%s12577_s6] ss:$0 sm:$0xff] }
0x233d   : > { %v2478_v40 = vsel %vm906_vm3, %v2476_v36, %v2464_v57 }
0x233e   : > { %v2480_v46 = vsel %vm1644_vm4, %v2478_v40, %v2472_v31  ;;  %v10894_v40 = vld [vmem:[%s11052_s23 + $0x10] sm:$0xff] }
0x233f   : > { %2482 = vst.msk [vmem:[#allocation2 + $0x18] sm:$0xff] %vm682_vm0, %v2480_v46  ;;  %v2470_v52 = vpop.permute.xlu0 %2469 }
0x2340   : > { %v2479_v33 = vsel %vm1644_vm4, %v2477_v19, %v2470_v52  ;;  %v10895_v19 = vld [vmem:[%s11052_s23 + $0x30] sm:$0xff] }
0x2341   : > { %2481 = vst.msk [vmem:[#allocation2 + $0x10] sm:$0xff] %vm682_vm0, %v2479_v33 }
0x2342   : > { %v10715_v54 = vpop.eup %10714 }
0x2343   : > { %v3288_v32 = vpop.permute.xlu0 %3287  ;;  %v4406_v44 = vmul.f32 %v10715_v54, %v11571_v10  ;;  %v10896_v54 = vld [vmem:[%s11052_s23 + $0x28] sm:$0xff] }
0x2344   : > { %v3309_v0 = vsel %vm820_vm1, %v11343_v37, %v3288_v32  ;;  %v4156_v37 = vld [vmem:[#allocation2 + $0x28] sm:$0xff] }
0x2345   : > { %v4420_v21 = vmul.f32 %v11642_v43, %v4406_v44 }
0x2346   : > { %v10717_v17 = vpop.eup %10716  ;;  %v4154_v16 = vld [vmem:[#allocation2 + $0x18] sm:$0xff] }
0x2347   : > { %v4407_v34 = vmul.f32 %v10717_v17, %v11569_v23  ;;  %v3296_v49 = vpop.permute.xlu0 %3295  ;;  %v11653_v20 = vadd.f32 %v11648_v48, %v4420_v21 }
0x2348   : > { %v4153_v59 = vld [vmem:[#allocation2 + $0x10] sm:$0xff]  ;;  %v3311_v50 = vsel %vm906_vm3, %v3309_v0, %v3296_v49 }
0x2349   : > { %9563 = vmatprep.mubr.msk.f32.mxu1 %vm682_vm0, %v4153_v59  ;;  %9580 = vmatprep.mubr.msk.f32.mxu0 %vm682_vm0, %v11653_v20  ;;  %v4421_v63 = vmul.f32 %v11642_v43, %v4407_v34  ;;  %v10897_v34 = vld [vmem:[%s11052_s23 + $0x38] sm:$0xff]  ;;  %s12618_s23 = smov 96  }
0x234a   : > { %9564 = vmatmul.mubr.msk.f32.gmra.mrb[40].mxu1 %vm682_vm0, %v4154_v16 }
0x234b   : > { %v3304_v23 = vpop.permute.xlu0 %3303  ;;  %v11664_v10 = vadd.f32 %v11648_v48, %v4421_v63 }
0x234c   : > { %v3313_v62 = vsel %vm1644_vm4, %v3311_v50, %v3304_v23 }
0x234d   : > { %3315 = vst.msk [vmem:[#allocation2 + $0x20] sm:$0xff] %vm682_vm0, %v3313_v62  ;;  %9581 = vmatmul.mubr.msk.f32.vlgmr.msra.gmra.mrb[34].mxu0 %vm682_vm0, %v11664_v10 }
0x234f   : > { %v4122_v58 = vpop.permute.xlu0 %4121 }
0x2350   : > { %v4143_v38 = vsel %vm820_vm1, %v11443_v30, %v4122_v58 }
0x2353   : > { %v4130_v22 = vpop.permute.xlu0 %4129 }
0x2354   : > { %v4155_v42 = vld [vmem:[#allocation2 + $0x20] sm:$0xff]  ;;  %v4145_v57 = vsel %vm906_vm3, %v4143_v38, %v4130_v22 }
0x2355   : > { %9566 = vmatprep.mubr.msk.f32.mxu1 %vm682_vm0, %v4155_v42 }
0x2356   : > { %9567 = vmatmul.mubr.msk.f32.gmra.mrb[42].mxu1 %vm682_vm0, %v4156_v37 }
0x2357   : > { %v4138_v28 = vpop.permute.xlu0 %4137 }
0x2358   : > { %v4147_v31 = vsel %vm1644_vm4, %v4145_v57, %v4138_v28 }
0x2359   : > { %4149 = vst.msk [vmem:[#allocation2 + $0x30] sm:$0xff] %vm682_vm0, %v4147_v31 }
0x235b   : > { %v10448_v30 = vpop.permute.xlu0 %10447 }
0x235c   : > { %v10450_v4 = vunpack.i.h.bf16 %v10448_v30  ;;  %v10449_v5 = vunpack.i.l.bf16 %v10448_v30 }
0x235e   : > { %v10078_v60 = vpack.c.bf16 %v10450_v4, %v10449_v5 }
0x2360   : > { %v4157_v2 = vld [vmem:[#allocation2 + $0x30] sm:$0xff]  ;;  %10080 = vmatprep.subr.msk.bf16.mxu1 %vm11083_vm2, %v10078_v60 }
0x2361   : > { %9569 = vmatprep.mubr.msk.f32.mxu1 %vm682_vm0, %v4157_v2 }
0x2362   : > { %9570 = vmatmul.mubr.msk.f32.gmra.mrb[44].mxu1 %vm682_vm0, %v4158_v18 }
0x241d   : > { %v9565_v61 = vpop.f32.mrb[40].mxu1 }
0x241e   : > { %v4270_v6 = vpop.f32.mrb[41].mxu1  ;;  %v4276_v11 = vadd.f32 %v9565_v61, %v11542_v53 }
0x241f   : > { %v4271_v7 = vadd.f32 %v11542_v53, %v4270_v6 }
0x2420   : > { %v9582_v12 = vpop.f32.mrb[34].mxu0  ;;  %v4302_v45 = vadd.f32 %v10892_v29, %v4276_v11 }
0x2421   : > { %v4549_v13 = vadd.f32 %v9582_v12, %v11688_v9  ;;  %v4543_v14 = vpop.f32.mrb[35].mxu0  ;;  %v4301_v41 = vadd.f32 %v10894_v40, %v4271_v7 }
0x2422   : > { %v4544_v24 = vadd.f32 %v11688_v9, %v4543_v14  ;;  %v4318_v36 = vsel %vm682_vm0, %v4302_v45, 0.0 }
0x2423   : > { %v11692_v55 = vmul.f32 0.35355338, %v4549_v13  ;;  %v4315_v21 = vsel %vm682_vm0, %v4301_v41, 0.0 }
0x2424   : > { %v11694_v15 = vmul.f32 0.35355338, %v4544_v24 }
0x2425   : > { %4782 = vrot.lane.b32.xlu0 %v11692_v55, %s10911_s29 }
0x2426   : > { %4780 = vrot.lane.b32.xlu1 %v11694_v15, %s10911_s29  ;;  %9596 = vmatprep.mubr.msk.f32.mxu1 %vm820_vm1, %v11694_v15 }
0x2427   : > { %9597 = vmatmul.mubr.msk.f32.vlgmr.msra.gmra.mrb[46].mxu1 %vm820_vm1, %v11692_v55 }
0x2428   : > { %10083 = vmatpush3.bf16.xpose.msk.msra.mxu1 %vm11083_vm2, %v10078_v60 }
0x2429   : > { %v9568_v25 = vpop.f32.mrb[42].mxu1 }
0x242a   : > { %v4280_v56 = vpop.f32.mrb[43].mxu1  ;;  %v4286_v46 = vadd.f32 %v9568_v25, %v11542_v53 }
0x242b   : > { %v4281_v39 = vadd.f32 %v11542_v53, %v4280_v56 }
0x242c   : > { %v4304_v32 = vadd.f32 %v10896_v54, %v4286_v46 }
0x242d   : > { %v4303_v27 = vadd.f32 %v10893_v8, %v4281_v39 }
0x242e   : > { %v4324_v59 = vsel %vm682_vm0, %v4304_v32, 0.0 }
0x242f   : > { %v4321_v33 = vsel %vm682_vm0, %v4303_v27, 0.0 }
0x2435   : > { %v9571_v47 = vpop.f32.mrb[44].mxu1 }
0x2436   : > { %v4290_v51 = vpop.f32.mrb[45].mxu1  ;;  %v4296_v44 = vadd.f32 %v9571_v47, %v11542_v53 }
0x2437   : > { %v4291_v35 = vadd.f32 %v11542_v53, %v4290_v51 }
0x2438   : > { %v4306_v49 = vadd.f32 %v10897_v34, %v4296_v44 }
0x2439   : > { %v4305_v52 = vadd.f32 %v10895_v19, %v4291_v35 }
0x243a   : > { %v4330_v16 = vsel %vm682_vm0, %v4306_v49, 0.0 }
0x243b   : > { %v4327_v17 = vsel %vm682_vm0, %v4305_v52, 0.0 }
0x2444   : > { %4319 = vadd.xlane.f32.xlu0 %v4318_v36 }
0x2448   : > { %4322 = vadd.xlane.f32.xlu0 %v4321_v33 }
0x244a   : > { %4316 = vadd.xlane.f32.xlu1 %v4315_v21 }
0x244c   : > { %4328 = vadd.xlane.f32.xlu0 %v4327_v17 }
0x244e   : > { %4325 = vadd.xlane.f32.xlu1 %v4324_v59 }
0x2452   : > { %4331 = vadd.xlane.f32.xlu1 %v4330_v16 }
0x2497   : > { %v4783_v0 = vpop.permute.xlu0 %4782 }
0x2498   : > { %v4781_v63 = vpop.permute.xlu1 %4780 }
0x2499   : > { %9610 = vmatprep.mubr.msk.f32.mxu1 %vm820_vm1, %v4781_v63 }
0x249a   : > { %9611 = vmatmul.mubr.msk.f32.vlgmr.msra.gmra.mrb[48].mxu1 %vm820_vm1, %v4783_v0 }
0x24d1   : > { %v4320_v22 = vpop.xlane.xlu0 %4319 }
0x24d2   : > { %v4337_v37 = vmul.f32 0.03125, %v4320_v22 }
0x24d4   : > { %v11728_v28 = vsub.f32 %v4302_v45, %v4337_v37 }
0x24d5   : > { %v4323_v38 = vpop.xlane.xlu0 %4322 }
0x24d6   : > { %v4338_v2 = vmul.f32 0.03125, %v4323_v38  ;;  %v4353_v12 = vmul.f32 %v11728_v28, %v11728_v28 }
0x24d7   : > { %v4317_v58 = vpop.xlane.xlu1 %4316 }
0x24d8   : > { %v4336_v57 = vmul.f32 0.03125, %v4317_v58  ;;  %v11737_v13 = vsub.f32 %v4303_v27, %v4338_v2  ;;  %v4367_v47 = vsel %vm682_vm0, %v4353_v12, 0.0 }
0x24d9   : > { %v4329_v30 = vpop.xlane.xlu0 %4328 }
0x24da   : > { %v11730_v18 = vsub.f32 %v4301_v41, %v4336_v57  ;;  %v4340_v14 = vmul.f32 0.03125, %v4329_v30  ;;  %v4354_v45 = vmul.f32 %v11737_v13, %v11737_v13 }
0x24db   : > { %v4326_v42 = vpop.xlane.xlu1 %4325 }
0x24dc   : > { %v4339_v31 = vmul.f32 0.03125, %v4326_v42  ;;  %v4352_v25 = vmul.f32 %v11730_v18, %v11730_v18  ;;  %v11747_v11 = vsub.f32 %v4305_v52, %v4340_v14  ;;  %v4370_v8 = vsel %vm682_vm0, %v4354_v45, 0.0 }
0x24de   : > { %v11732_v5 = vsub.f32 %v4304_v32, %v4339_v31  ;;  %v4364_v29 = vsel %vm682_vm0, %v4352_v25, 0.0  ;;  %v4356_v27 = vmul.f32 %v11747_v11, %v11747_v11 }
0x24df   : > { %v4332_v3 = vpop.xlane.xlu1 %4331 }
0x24e0   : > { %v4341_v60 = vmul.f32 0.03125, %v4332_v3  ;;  %v4355_v51 = vmul.f32 %v11732_v5, %v11732_v5  ;;  %v4376_v36 = vsel %vm682_vm0, %v4356_v27, 0.0 }
0x24e2   : > { %v11742_v56 = vsub.f32 %v4306_v49, %v4341_v60  ;;  %v4373_v39 = vsel %vm682_vm0, %v4355_v51, 0.0 }
0x24e4   : > { %v4357_v7 = vmul.f32 %v11742_v56, %v11742_v56 }
0x24e6   : > { %v4379_v35 = vsel %vm682_vm0, %v4357_v7, 0.0 }
0x24fa   : > { %v9598_v53 = vpop.f32.mrb[46].mxu1 }
0x24fb   : > { %v4662_v50 = vpop.f32.mrb[47].mxu1  ;;  %v4674_v23 = vsel %vm906_vm3, %v9598_v53, -inf }
0x24fc   : > { %4675 = vmax.xlane.f32.xlu1 %v4674_v23  ;;  %v4671_v62 = vsel %vm906_vm3, %v4662_v50, -inf }
0x24fd   : > { %4672 = vmax.xlane.f32.xlu0 %v4671_v62 }
0x256d   : > { %v9612_v4 = vpop.f32.mrb[48].mxu1 }
0x256e   : > { %v4862_v61 = vpop.f32.mrb[49].mxu1  ;;  %v4874_v6 = vsel %vm906_vm3, %v9612_v4, -inf }
0x256f   : > { %4875 = vmax.xlane.f32.xlu1 %v4874_v6  ;;  %v4871_v24 = vsel %vm906_vm3, %v4862_v61, -inf }
0x2570   : > { %4872 = vmax.xlane.f32.xlu0 %v4871_v24 }
0x2573   : > { %4368 = vadd.xlane.f32.xlu1 %v4367_v47 }
0x2574   : > { %4365 = vadd.xlane.f32.xlu0 %v4364_v29 }
0x2577   : > { %4374 = vadd.xlane.f32.xlu1 %v4373_v39 }
0x2578   : > { %4371 = vadd.xlane.f32.xlu0 %v4370_v8 }
0x257b   : > { %4380 = vadd.xlane.f32.xlu1 %v4379_v35 }
0x257c   : > { %4377 = vadd.xlane.f32.xlu0 %v4376_v36 }
0x2589   : > { %v4676_v40 = vpop.xlane.xlu1 %4675 }
0x258a   : > { %v4678_v41 = vsub.f32 %v9598_v53, %v4676_v40  ;;  %v4673_v46 = vpop.xlane.xlu0 %4672 }
0x258b   : > { %v4677_v19 = vsub.f32 %v4662_v50, %v4673_v46 }
0x258c   : > { %v4681_v52 = vmul.f32 1.442695, %v4678_v41 }
0x258d   : > { %v4679_v33 = vmul.f32 1.442695, %v4677_v19 }
0x258e   : > { %10718 = vpow2.f32 %v4681_v52 }
0x258f   : > { %10720 = vpow2.f32 %v4679_v33 }
0x2598   : > { %v11760_v54 = vpop.eup %10718 }
0x2599   : > { %v11762_v32 = vpop.eup %10720  ;;  %v4686_v44 = vsel %vm906_vm3, %v11760_v54, 0.0 }
0x259a   : > { %4687 = vadd.xlane.f32.xlu1 %v4686_v44  ;;  %v4683_v21 = vsel %vm906_vm3, %v11762_v32, 0.0 }
0x259b   : > { %4684 = vadd.xlane.f32.xlu0 %v4683_v21 }
0x25fc   : > { %v4876_v17 = vpop.xlane.xlu1 %4875 }
0x25fd   : > { %v4878_v34 = vsub.f32 %v9612_v4, %v4876_v17  ;;  %v4873_v49 = vpop.xlane.xlu0 %4872 }
0x25fe   : > { %v4877_v59 = vsub.f32 %v4862_v61, %v4873_v49 }
0x25ff   : > { %v4881_v16 = vmul.f32 1.442695, %v4878_v34 }
0x2600   : > { %v4879_v63 = vmul.f32 1.442695, %v4877_v59  ;;  %v4369_v0 = vpop.xlane.xlu1 %4368 }
0x2601   : > { %10722 = vpow2.f32 %v4881_v16  ;;  %v4385_v53 = vmul.f32 0.03125, %v4369_v0  ;;  %v4366_v50 = vpop.xlane.xlu0 %4365 }
0x2602   : > { %10724 = vpow2.f32 %v4879_v63  ;;  %v4384_v23 = vmul.f32 0.03125, %v4366_v50 }
0x2603   : > { %v4393_v62 = vadd.f32 1e-05, %v4385_v53 }
0x2604   : > { %v4392_v58 = vadd.f32 1e-05, %v4384_v23  ;;  %v4375_v22 = vpop.xlane.xlu1 %4374 }
0x2605   : > { %10726 = vrsqrt.f32 %v4393_v62  ;;  %v4387_v42 = vmul.f32 0.03125, %v4375_v22  ;;  %v4372_v37 = vpop.xlane.xlu0 %4371 }
0x2606   : > { %10728 = vrsqrt.f32 %v4392_v58  ;;  %v4386_v38 = vmul.f32 0.03125, %v4372_v37 }
0x2607   : > { %v4395_v57 = vadd.f32 1e-05, %v4387_v42 }
0x2608   : > { %v4394_v31 = vadd.f32 1e-05, %v4386_v38  ;;  %v4381_v2 = vpop.xlane.xlu1 %4380 }
0x2609   : > { %10730 = vrsqrt.f32 %v4395_v57  ;;  %v4389_v3 = vmul.f32 0.03125, %v4381_v2  ;;  %v4378_v30 = vpop.xlane.xlu0 %4377 }
0x260a   : > { %10732 = vrsqrt.f32 %v4394_v31  ;;  %v4388_v4 = vmul.f32 0.03125, %v4378_v30 }
0x260b   : > { %v11768_v60 = vpop.eup %10722  ;;  %v4397_v61 = vadd.f32 1e-05, %v4389_v3 }
0x260c   : > { %v11770_v6 = vpop.eup %10724  ;;  %v4396_v12 = vadd.f32 1e-05, %v4388_v4  ;;  %v4886_v14 = vsel %vm906_vm3, %v11768_v60, 0.0 }
0x260d   : > { %10734 = vrsqrt.f32 %v4397_v61  ;;  %4887 = vadd.xlane.f32.xlu1 %v4886_v14  ;;  %v4883_v24 = vsel %vm906_vm3, %v11770_v6, 0.0 }
0x260e   : > { %10736 = vrsqrt.f32 %v4396_v12  ;;  %4884 = vadd.xlane.f32.xlu0 %v4883_v24 }
0x260f   : > { %v10727_v25 = vpop.eup %10726 }
0x2610   : > { %v10729_v47 = vpop.eup %10728  ;;  %v4409_v51 = vmul.f32 %v10727_v25, %v11728_v28 }
0x2611   : > { %v4408_v29 = vmul.f32 %v10729_v47, %v11730_v18 }
0x2612   : > { %v4423_v45 = vmul.f32 %v11642_v43, %v4409_v51 }
0x2613   : > { %v10731_v39 = vpop.eup %10730  ;;  %v4422_v7 = vmul.f32 %v11642_v43, %v4408_v29 }
0x2614   : > { %v10733_v8 = vpop.eup %10732  ;;  %v4411_v27 = vmul.f32 %v10731_v39, %v11732_v5  ;;  %v11786_v40 = vadd.f32 %v11648_v48, %v4423_v45 }
0x2615   : > { %v11782_v35 = vadd.f32 %v11648_v48, %v4422_v7  ;;  %v4410_v36 = vmul.f32 %v10733_v8, %v11737_v13 }
0x2616   : > { %v4425_v28 = vmul.f32 %v11642_v43, %v4411_v27 }
0x2617   : > { %v10735_v41 = vpop.eup %10734  ;;  %9583 = vmatprep.mubr.msk.f32.mxu0 %vm682_vm0, %v11782_v35  ;;  %v4424_v18 = vmul.f32 %v11642_v43, %v4410_v36 }
0x2618   : > { %v10737_v46 = vpop.eup %10736  ;;  %9584 = vmatmul.mubr.msk.f32.gmra.mrb[36].mxu0 %vm682_vm0, %v11786_v40  ;;  %v4413_v5 = vmul.f32 %v10735_v41, %v11742_v56  ;;  %v11800_v52 = vadd.f32 %v11648_v48, %v4425_v28 }
0x2619   : > { %v11796_v19 = vadd.f32 %v11648_v48, %v4424_v18  ;;  %v4412_v13 = vmul.f32 %v10737_v46, %v11747_v11 }
0x261a   : > { %v4427_v33 = vmul.f32 %v11642_v43, %v4413_v5 }
0x261b   : > { %9586 = vmatprep.mubr.msk.f32.mxu0 %vm682_vm0, %v11796_v19  ;;  %v4426_v44 = vmul.f32 %v11642_v43, %v4412_v13 }
0x261c   : > { %9587 = vmatmul.mubr.msk.f32.gmra.mrb[38].mxu0 %vm682_vm0, %v11800_v52  ;;  %v11814_v11 = vadd.f32 %v11648_v48, %v4427_v33 }
0x261d   : > { %v11809_v56 = vadd.f32 %v11648_v48, %v4426_v44 }
0x261e   : > { %10457 = vrot.lane.b32.xlu1 %v11625_v1, %s10909_s28 }
0x261f   : > { %9589 = vmatprep.mubr.msk.f32.mxu0 %vm682_vm0, %v11809_v56 }
0x2620   : > { %9590 = vmatmul.mubr.msk.f32.gmra.mrb[40].mxu0 %vm682_vm0, %v11814_v11 }
0x2622   : > { %10462 = vrot.lane.b32.xlu1 %v11625_v1, %s10912_s0 }
0x2624   : > { %10452 = vrot.lane.b32.xlu0 %v11625_v1, %s12618_s23 }
0x2626   : > { %4982 = vrot.lane.b32.xlu1 %v11692_v55, %s10912_s0 }
0x2627   : > { %v4688_v17 = vpop.xlane.xlu1 %4687 }
0x2628   : > { %4980 = vrot.lane.b32.xlu0 %v11694_v15, %s10912_s0  ;;  %v4685_v43 = vpop.xlane.xlu0 %4684 }
0x2629   : > { %10738 = vrcp.f32 %v4685_v43 }
0x262a   : > { %10740 = vrcp.f32 %v4688_v17 }
0x2633   : > { %v10739_v48 = vpop.eup %10738 }
0x2634   : > { %v4691_v21 = vmul.f32 %v10739_v48, %v11762_v32  ;;  %v10741_v22 = vpop.eup %10740 }
0x2635   : > { %v4692_v38 = vmul.f32 %v10741_v22, %v11760_v54 }
0x2636   : > { %9603 = vmatprep.mubr.msk.f32.mxu0 %vm906_vm3, %v4691_v21 }
0x269a   : > { %v4888_v34 = vpop.xlane.xlu1 %4887 }
0x269b   : > { %v4885_v49 = vpop.xlane.xlu0 %4884 }
0x269c   : > { %10742 = vrcp.f32 %v4885_v49 }
0x269d   : > { %10744 = vrcp.f32 %v4888_v34 }
0x269e   : > { %v10458_v59 = vpop.permute.xlu1 %10457 }
0x269f   : > { %v10460_v16 = vunpack.i.h.bf16 %v10458_v59  ;;  %v10459_v63 = vunpack.i.l.bf16 %v10458_v59  ;;  %v10453_v0 = vpop.permute.xlu0 %10452 }
0x26a0   : > { %v10455_v53 = vunpack.i.h.bf16 %v10453_v0  ;;  %v10454_v50 = vunpack.i.l.bf16 %v10453_v0 }
0x26a1   : > { %v10084_v58 = vpack.c.bf16 %v10460_v16, %v10459_v63 }
0x26a2   : > { %v10463_v23 = vpop.permute.xlu1 %10462  ;;  %v10074_v62 = vpack.c.bf16 %v10455_v53, %v10454_v50 }
0x26a3   : > { %v10465_v42 = vunpack.i.h.bf16 %v10463_v23  ;;  %v10464_v32 = vunpack.i.l.bf16 %v10463_v23  ;;  %v4981_v30 = vpop.permute.xlu0 %4980 }
0x26a4   : > { %10075 = vmatprep.subr.bf16.mxu0 %v10074_v62 }
0x26a5   : > { %10077 = vmatpush3.bf16.msra.mxu0 %v10074_v62  ;;  %v10088_v57 = vpack.c.bf16 %v10465_v42, %v10464_v32 }
0x26a6   : > { %v10743_v37 = vpop.eup %10742  ;;  %10085 = vmatprep.subr.bf16.mxu0 %v10084_v58  ;;  %v4983_v54 = vpop.permute.xlu1 %4982 }
0x26a7   : > { %v10745_v31 = vpop.eup %10744  ;;  %v4891_v2 = vmul.f32 %v10743_v37, %v11770_v6 }
0x26a8   : > { %9604 = vmatmul.mubr.msk.f32.vlgmr.msra.gmra.mrb[42].mxu0 %vm906_vm3, %v4692_v38  ;;  %v4892_v3 = vmul.f32 %v10745_v31, %v11768_v60  ;;  %v665_v38 = vld [vmem:[%s11621_s4 + $0x10] sm:$0xff] }
0x26a9   : > { %10087 = vmatpush3.bf16.msra.mxu0 %v10084_v58  ;;  %9617 = vmatprep.mubr.msk.f32.mxu0 %vm906_vm3, %v4891_v2 }
0x26aa   : > { %10090 = vmatprep.subr.msk.bf16.mxu0 %vm11083_vm2, %v10088_v57 }
0x26ac   : > { %9618 = vmatmul.mubr.msk.f32.vlgmr.msra.gmra.mrb[44].mxu0 %vm906_vm3, %v4892_v3 }
0x26ad   : > { %9624 = vmatprep.mubr.msk.f32.mxu0 %vm820_vm1, %v4981_v30 }
0x26b2   : > { %10093 = vmatpush3.bf16.xpose.msk.msra.mxu0 %vm11083_vm2, %v10088_v57  ;;  %v666_v57 = vld [vmem:[%s11621_s4 + $0x18] sm:$0xff] }
0x26b3   : > { %v11892_v31 = vpack.i.bf16 %v666_v57, %v665_v38 }
0x26b9   : > { %9625 = vmatmul.mubr.msk.f32.vlgmr.msra.gmra.mrb[46].mxu0 %vm820_vm1, %v4983_v54 }
0x26eb   : > { %v11842_v4 = vpop.f32.mrb[36].mxu0 }
0x26ec   : > { %v11844_v61 = vpop.f32.mrb[37].mxu0  ;;  %v4559_v3 = vadd.f32 %v11842_v4, %v11688_v9 }
0x26ed   : > { %v4554_v2 = vadd.f32 %v11688_v9, %v11844_v61 }
0x26ee   : > { %v11904_v54 = vmul.f32 0.35355338, %v4559_v3 }
0x26ef   : > { %v11846_v6 = vpop.f32.mrb[38].mxu0  ;;  %v11900_v30 = vmul.f32 0.35355338, %v4554_v2 }
0x26f0   : > { %v11848_v60 = vpop.f32.mrb[39].mxu0 }
0x26f3   : > { %v11850_v12 = vpop.f32.mrb[40].mxu0 }
0x26f4   : > { %v11852_v14 = vpop.f32.mrb[41].mxu0 }
0x277b   : > { %v11854_v24 = vpop.f32.mrb[42].mxu0 }
0x277c   : > { %v11856_v25 = vpop.f32.mrb[43].mxu0 }
0x277f   : > { %v11858_v47 = vpop.f32.mrb[44].mxu0 }
0x2780   : > { %v11860_v51 = vpop.f32.mrb[45].mxu0 }
0x278c   : > { %v9626_v29 = vpop.f32.mrb[46].mxu0 }
0x278d   : > { %v5062_v45 = vpop.f32.mrb[47].mxu0  ;;  %v5074_v39 = vsel %vm906_vm3, %v9626_v29, -inf }
0x278e   : > { %5075 = vmax.xlane.f32.xlu1 %v5074_v39  ;;  %v5071_v7 = vsel %vm906_vm3, %v5062_v45, -inf }
0x278f   : > { %5072 = vmax.xlane.f32.xlu0 %v5071_v7 }
0x279f   : > { %10467 = vrot.lane.b32.xlu1 %v11625_v1, %s12619_s3 }
0x27a3   : > { %5180 = vrot.lane.b32.xlu1 %v11694_v15, %s12620_s26 }
0x27a7   : > { %5182 = vrot.lane.b32.xlu1 %v11692_v55, %s12620_s26 }
0x281b   : > { %v5076_v8 = vpop.xlane.xlu1 %5075 }
0x281c   : > { %v5078_v27 = vsub.f32 %v9626_v29, %v5076_v8  ;;  %v5073_v36 = vpop.xlane.xlu0 %5072 }
0x281d   : > { %v5077_v28 = vsub.f32 %v5062_v45, %v5073_v36 }
0x281e   : > { %v5081_v41 = vmul.f32 1.442695, %v5078_v27 }
0x281f   : > { %v5079_v18 = vmul.f32 1.442695, %v5077_v28  ;;  %v10468_v15 = vpop.permute.xlu1 %10467 }
0x2820   : > { %10746 = vpow2.f32 %v5081_v41  ;;  %v10470_v44 = vunpack.i.h.bf16 %v10468_v15  ;;  %v10469_v43 = vunpack.i.l.bf16 %v10468_v15 }
0x2821   : > { %10748 = vpow2.f32 %v5079_v18 }
0x2822   : > { %v10094_v55 = vpack.c.bf16 %v10470_v44, %v10469_v43 }
0x2823   : > { %v5181_v50 = vpop.permute.xlu1 %5180 }
0x2824   : > { %10095 = vmatprep.subr.bf16.mxu1 %v10094_v55 }
0x2825   : > { %10097 = vmatpush3.bf16.msra.mxu1 %v10094_v55 }
0x2827   : > { %v5183_v23 = vpop.permute.xlu1 %5182 }
0x282a   : > { %v10747_v46 = vpop.eup %10746 }
0x282b   : > { %v5086_v5 = vsel %vm906_vm3, %v10747_v46, 0.0  ;;  %v10749_v13 = vpop.eup %10748 }
0x282c   : > { %5087 = vadd.xlane.f32.xlu0 %v5086_v5  ;;  %v5083_v33 = vsel %vm906_vm3, %v10749_v13, 0.0 }
0x2830   : > { %5084 = vadd.xlane.f32.xlu0 %v5083_v33 }
0x2846   : > { %10472 = vrot.lane.b32.xlu0 %v11625_v1, %s12620_s26 }
0x28b9   : > { %v5088_v48 = vpop.xlane.xlu0 %5087 }
0x28ba   : > { %10750 = vrcp.f32 %v5088_v48 }
0x28bd   : > { %v5085_v21 = vpop.xlane.xlu0 %5084 }
0x28be   : > { %10752 = vrcp.f32 %v5085_v21 }
0x28c1   : > { %v10473_v17 = vpop.permute.xlu0 %10472 }
0x28c2   : > { %v10475_v34 = vunpack.i.h.bf16 %v10473_v17  ;;  %v10474_v49 = vunpack.i.l.bf16 %v10473_v17 }
0x28c4   : > { %v10098_v59 = vpack.c.bf16 %v10475_v34, %v10474_v49  ;;  %v10751_v16 = vpop.eup %10750 }
0x28c5   : > { %v5092_v53 = vmul.f32 %v10751_v16, %v10747_v46  ;;  %v10108_v46 = vpack.c.bf16 %v666_v57, %v665_v38 }
0x28c6   : > { %10100 = vmatprep.subr.msk.bf16.mxu1 %vm11083_vm2, %v10098_v59 }
0x28c8   : > { %v10753_v63 = vpop.eup %10752 }
0x28c9   : > { %v5091_v0 = vmul.f32 %v10753_v63, %v10749_v13 }
0x28cb   : > { %9631 = vmatprep.mubr.msk.f32.mxu1 %vm906_vm3, %v5091_v0 }
0x28cc   : > { %9632 = vmatmul.mubr.msk.f32.vlgmr.msra.gmra.mrb[50].mxu1 %vm906_vm3, %v5092_v53 }
0x28cd   : > { %10103 = vmatpush3.bf16.xpose.msk.msra.mxu1 %vm11083_vm2, %v10098_v59  ;;  %9638 = vmatprep.mubr.msk.f32.mxu1 %vm820_vm1, %v5181_v50 }
0x28d4   : > { %9639 = vmatmul.mubr.msk.f32.vlgmr.msra.gmra.mrb[52].mxu1 %vm820_vm1, %v5183_v23 }
0x299f   : > { %v11882_v62 = vpop.f32.mrb[50].mxu1 }
0x29a0   : > { %v11884_v58 = vpop.f32.mrb[51].mxu1 }
0x29a7   : > { %v9640_v22 = vpop.f32.mrb[52].mxu1 }
0x29a8   : > { %v5262_v42 = vpop.f32.mrb[53].mxu1  ;;  %v5274_v32 = vsel %vm906_vm3, %v9640_v22, -inf }
0x29a9   : > { %5275 = vmax.xlane.f32.xlu1 %v5274_v32  ;;  %v5271_v37 = vsel %vm906_vm3, %v5262_v42, -inf }
0x29aa   : > { %5272 = vmax.xlane.f32.xlu0 %v5271_v37 }
0x29ba   : > { %10477 = vrot.lane.b32.xlu1 %v11625_v1, %s12621_s24 }
0x29be   : > { %10482 = vrot.lane.b32.xlu1 %v11892_v31, %s12618_s23 }
0x29c2   : > { %5610 = vrot.lane.b32.xlu1 %v11900_v30, %s10911_s29 }
0x29c6   : > { %5612 = vrot.lane.b32.xlu1 %v11904_v54, %s10911_s29 }
0x2a36   : > { %v5276_v1 = vpop.xlane.xlu1 %5275 }
0x2a37   : > { %v5278_v29 = vsub.f32 %v9640_v22, %v5276_v1  ;;  %v5273_v45 = vpop.xlane.xlu0 %5272 }
0x2a38   : > { %v5277_v61 = vsub.f32 %v5262_v42, %v5273_v45 }
0x2a39   : > { %v5281_v39 = vmul.f32 1.442695, %v5278_v29 }
0x2a3a   : > { %v5279_v7 = vmul.f32 1.442695, %v5277_v61  ;;  %v10478_v36 = vpop.permute.xlu1 %10477 }
0x2a3b   : > { %v10480_v28 = vunpack.i.h.bf16 %v10478_v36  ;;  %v10479_v41 = vunpack.i.l.bf16 %v10478_v36 }
0x2a3c   : > { %10754 = vpow2.f32 %v5279_v7 }
0x2a3d   : > { %10756 = vpow2.f32 %v5281_v39  ;;  %v10104_v18 = vpack.c.bf16 %v10480_v28, %v10479_v41 }
0x2a3e   : > { %v10483_v37 = vpop.permute.xlu1 %10482 }
0x2a3f   : > { %10105 = vmatprep.subr.bf16.mxu0 %v10104_v18  ;;  %v10485_v38 = vunpack.i.h.bf16 %v10483_v37  ;;  %v10484_v57 = vunpack.i.l.bf16 %v10483_v37 }
0x2a40   : > { %10107 = vmatpush3.bf16.msra.mxu0 %v10104_v18 }
0x2a41   : > { %10110 = vmatprep.subr.msk.bf16.mxu0 %vm11083_vm2, %v10108_v46  ;;  %v10114_v2 = vpack.c.bf16 %v10485_v38, %v10484_v57 }
0x2a43   : > { %10115 = vmatprep.subr.bf16.mxu1 %v10114_v2 }
0x2a44   : > { %10117 = vmatpush3.bf16.msra.mxu1 %v10114_v2 }
0x2a46   : > { %v10755_v8 = vpop.eup %10754 }
0x2a47   : > { %v5283_v9 = vsel %vm906_vm3, %v10755_v8, 0.0  ;;  %v10757_v4 = vpop.eup %10756 }
0x2a48   : > { %5284 = vadd.xlane.f32.xlu0 %v5283_v9  ;;  %v5286_v27 = vsel %vm906_vm3, %v10757_v4, 0.0 }
0x2a4c   : > { %5287 = vadd.xlane.f32.xlu0 %v5286_v27  ;;  %v5611_v27 = vpop.permute.xlu1 %5610 }
0x2a50   : > { %v5613_v36 = vpop.permute.xlu1 %5612 }
0x2ad5   : > { %v5285_v5 = vpop.xlane.xlu0 %5284 }
0x2ad6   : > { %10758 = vrcp.f32 %v5285_v5 }
0x2ad9   : > { %v5288_v13 = vpop.xlane.xlu0 %5287 }
0x2ada   : > { %10760 = vrcp.f32 %v5288_v13 }
0x2ae0   : > { %v10759_v33 = vpop.eup %10758 }
0x2ae1   : > { %v5291_v15 = vmul.f32 %v10759_v33, %v10755_v8 }
0x2ae3   : > { %9645 = vmatprep.mubr.msk.f32.mxu0 %vm906_vm3, %v5291_v15 }
0x2ae4   : > { %v10761_v44 = vpop.eup %10760 }
0x2ae5   : > { %v5292_v43 = vmul.f32 %v10761_v44, %v10757_v4 }
0x2ae7   : > { %9646 = vmatmul.mubr.msk.f32.vlgmr.msra.gmra.mrb[48].mxu0 %vm906_vm3, %v5292_v43 }
0x2ae8   : > { %10113 = vmatpush3.bf16.xpose.msk.msra.mxu0 %vm11083_vm2, %v10108_v46  ;;  %9652 = vmatprep.mubr.msk.f32.mxu0 %vm820_vm1, %v11900_v30 }
0x2aef   : > { %9653 = vmatmul.mubr.msk.f32.vlgmr.msra.gmra.mrb[50].mxu0 %vm820_vm1, %v11904_v54 }
0x2bba   : > { %v11920_v55 = vpop.f32.mrb[48].mxu0 }
0x2bbb   : > { %v11922_v48 = vpop.f32.mrb[49].mxu0 }
0x2bc2   : > { %v9654_v21 = vpop.f32.mrb[50].mxu0 }
0x2bc3   : > { %v5492_v17 = vpop.f32.mrb[51].mxu0  ;;  %v5504_v49 = vsel %vm906_vm3, %v9654_v21, -inf }
0x2bc4   : > { %v5501_v34 = vsel %vm906_vm3, %v5492_v17, -inf }
0x2bc5   : > { %5502 = vmax.xlane.f32.xlu0 %v5501_v34 }
0x2bc9   : > { %5505 = vmax.xlane.f32.xlu0 %v5504_v49 }
0x2c52   : > { %v5503_v59 = vpop.xlane.xlu0 %5502 }
0x2c53   : > { %v5507_v16 = vsub.f32 %v5492_v17, %v5503_v59 }
0x2c55   : > { %v5509_v53 = vmul.f32 1.442695, %v5507_v16 }
0x2c56   : > { %v5506_v63 = vpop.xlane.xlu0 %5505 }
0x2c57   : > { %v5508_v0 = vsub.f32 %v9654_v21, %v5506_v63 }
0x2c59   : > { %v5511_v50 = vmul.f32 1.442695, %v5508_v0 }
0x2c5b   : > { %10762 = vpow2.f32 %v5511_v50 }
0x2c5c   : > { %10764 = vpow2.f32 %v5509_v53 }
0x2c65   : > { %v10763_v23 = vpop.eup %10762 }
0x2c66   : > { %v5516_v22 = vsel %vm906_vm3, %v10763_v23, 0.0  ;;  %v10765_v42 = vpop.eup %10764 }
0x2c67   : > { %5517 = vadd.xlane.f32.xlu0 %v5516_v22  ;;  %v5513_v32 = vsel %vm906_vm3, %v10765_v42, 0.0 }
0x2c6b   : > { %5514 = vadd.xlane.f32.xlu0 %v5513_v32 }
0x2c81   : > { %10487 = vrot.lane.b32.xlu0 %v11892_v31, %s10911_s29 }
0x2cf4   : > { %v5518_v3 = vpop.xlane.xlu0 %5517 }
0x2cf5   : > { %10766 = vrcp.f32 %v5518_v3 }
0x2cf8   : > { %v5515_v1 = vpop.xlane.xlu0 %5514 }
0x2cf9   : > { %10768 = vrcp.f32 %v5515_v1 }
0x2cfc   : > { %v10488_v29 = vpop.permute.xlu0 %10487 }
0x2cfd   : > { %v10490_v45 = vunpack.i.h.bf16 %v10488_v29  ;;  %v10489_v61 = vunpack.i.l.bf16 %v10488_v29 }
0x2cff   : > { %v10118_v39 = vpack.c.bf16 %v10490_v45, %v10489_v61  ;;  %v10767_v7 = vpop.eup %10766 }
0x2d00   : > { %v5522_v4 = vmul.f32 %v10767_v7, %v10763_v23 }
0x2d01   : > { %10120 = vmatprep.subr.msk.bf16.mxu1 %vm11083_vm2, %v10118_v39 }
0x2d03   : > { %v10769_v8 = vpop.eup %10768 }
0x2d04   : > { %v5521_v9 = vmul.f32 %v10769_v8, %v10765_v42 }
0x2d06   : > { %9659 = vmatprep.mubr.msk.f32.mxu1 %vm906_vm3, %v5521_v9 }
0x2d07   : > { %9660 = vmatmul.mubr.msk.f32.vlgmr.msra.gmra.mrb[54].mxu1 %vm906_vm3, %v5522_v4 }
0x2d08   : > { %10123 = vmatpush3.bf16.xpose.msk.msra.mxu1 %vm11083_vm2, %v10118_v39  ;;  %9666 = vmatprep.mubr.msk.f32.mxu1 %vm820_vm1, %v5611_v27 }
0x2d0f   : > { %9667 = vmatmul.mubr.msk.f32.vlgmr.msra.gmra.mrb[56].mxu1 %vm820_vm1, %v5613_v36 }
0x2dda   : > { %v11938_v28 = vpop.f32.mrb[54].mxu1 }
0x2ddb   : > { %v11940_v41 = vpop.f32.mrb[55].mxu1 }
0x2de2   : > { %v9668_v18 = vpop.f32.mrb[56].mxu1 }
0x2de3   : > { %v5692_v46 = vpop.f32.mrb[57].mxu1  ;;  %v5704_v5 = vsel %vm906_vm3, %v9668_v18, -inf }
0x2de4   : > { %5705 = vmax.xlane.f32.xlu0 %v5704_v5  ;;  %v5701_v13 = vsel %vm906_vm3, %v5692_v46, -inf }
0x2de5   : > { %5702 = vmax.xlane.f32.xlu1 %v5701_v13 }
0x2df6   : > { %10497 = vrot.lane.b32.xlu1 %v11892_v31, %s10912_s0 }
0x2dfa   : > { %10492 = vrot.lane.b32.xlu0 %v11892_v31, %s10909_s28 }
0x2dfe   : > { %5812 = vrot.lane.b32.xlu0 %v11904_v54, %s10912_s0 }
0x2e71   : > { %v5706_v33 = vpop.xlane.xlu0 %5705 }
0x2e72   : > { %v5708_v15 = vsub.f32 %v9668_v18, %v5706_v33  ;;  %v5703_v44 = vpop.xlane.xlu1 %5702 }
0x2e73   : > { %v5707_v43 = vsub.f32 %v5692_v46, %v5703_v44 }
0x2e74   : > { %v5711_v21 = vmul.f32 1.442695, %v5708_v15 }
0x2e75   : > { %v5709_v17 = vmul.f32 1.442695, %v5707_v43  ;;  %v10493_v34 = vpop.permute.xlu0 %10492 }
0x2e76   : > { %10770 = vpow2.f32 %v5711_v21  ;;  %v10495_v49 = vunpack.i.h.bf16 %v10493_v34  ;;  %v10494_v59 = vunpack.i.l.bf16 %v10493_v34  ;;  %v10498_v16 = vpop.permute.xlu1 %10497 }
0x2e77   : > { %v10500_v63 = vunpack.i.h.bf16 %v10498_v16  ;;  %v10499_v0 = vunpack.i.l.bf16 %v10498_v16  ;;  %10772 = vpow2.f32 %v5709_v17 }
0x2e78   : > { %v10124_v53 = vpack.c.bf16 %v10495_v49, %v10494_v59 }
0x2e79   : > { %v10128_v50 = vpack.c.bf16 %v10500_v63, %v10499_v0  ;;  %v5813_v45 = vpop.permute.xlu0 %5812 }
0x2e7a   : > { %10125 = vmatprep.subr.bf16.mxu0 %v10124_v53 }
0x2e7b   : > { %10127 = vmatpush3.bf16.msra.mxu0 %v10124_v53 }
0x2e7c   : > { %10130 = vmatprep.subr.msk.bf16.mxu0 %vm11083_vm2, %v10128_v50 }
0x2e80   : > { %v10771_v23 = vpop.eup %10770 }
0x2e81   : > { %v5716_v22 = vsel %vm906_vm3, %v10771_v23, 0.0  ;;  %v10773_v42 = vpop.eup %10772 }
0x2e82   : > { %5717 = vadd.xlane.f32.xlu1 %v5716_v22  ;;  %v5713_v32 = vsel %vm906_vm3, %v10773_v42, 0.0 }
0x2e86   : > { %5714 = vadd.xlane.f32.xlu1 %v5713_v32 }
0x2e97   : > { %5810 = vrot.lane.b32.xlu1 %v11900_v30, %s10912_s0 }
0x2f0f   : > { %v5718_v37 = vpop.xlane.xlu1 %5717 }
0x2f10   : > { %10774 = vrcp.f32 %v5718_v37 }
0x2f13   : > { %v5715_v38 = vpop.xlane.xlu1 %5714 }
0x2f14   : > { %10776 = vrcp.f32 %v5715_v38 }
0x2f17   : > { %v5811_v29 = vpop.permute.xlu1 %5810 }
0x2f1a   : > { %v10775_v57 = vpop.eup %10774 }
0x2f1b   : > { %v5722_v1 = vmul.f32 %v10775_v57, %v10771_v23 }
0x2f1e   : > { %v10777_v2 = vpop.eup %10776 }
0x2f1f   : > { %v5721_v3 = vmul.f32 %v10777_v2, %v10773_v42 }
0x2f21   : > { %9673 = vmatprep.mubr.msk.f32.mxu0 %vm906_vm3, %v5721_v3 }
0x2f22   : > { %9674 = vmatmul.mubr.msk.f32.vlgmr.msra.gmra.mrb[52].mxu0 %vm906_vm3, %v5722_v1 }
0x2f23   : > { %10133 = vmatpush3.bf16.xpose.msk.msra.mxu0 %vm11083_vm2, %v10128_v50  ;;  %9680 = vmatprep.mubr.msk.f32.mxu0 %vm820_vm1, %v5811_v29 }
0x2f2a   : > { %9681 = vmatmul.mubr.msk.f32.vlgmr.msra.gmra.mrb[54].mxu0 %vm820_vm1, %v5813_v45 }
0x2ff5   : > { %v11962_v61 = vpop.f32.mrb[52].mxu0 }
0x2ff6   : > { %v11964_v39 = vpop.f32.mrb[53].mxu0 }
0x2ffd   : > { %v9682_v7 = vpop.f32.mrb[54].mxu0 }
0x2ffe   : > { %v5892_v8 = vpop.f32.mrb[55].mxu0  ;;  %v5904_v9 = vsel %vm906_vm3, %v9682_v7, -inf }
0x2fff   : > { %5905 = vmax.xlane.f32.xlu0 %v5904_v9  ;;  %v5901_v4 = vsel %vm906_vm3, %v5892_v8, -inf }
0x3000   : > { %5902 = vmax.xlane.f32.xlu1 %v5901_v4 }
0x308c   : > { %v5906_v27 = vpop.xlane.xlu0 %5905 }
0x308d   : > { %v5908_v36 = vsub.f32 %v9682_v7, %v5906_v27  ;;  %v5903_v18 = vpop.xlane.xlu1 %5902 }
0x308e   : > { %v5907_v46 = vsub.f32 %v5892_v8, %v5903_v18 }
0x308f   : > { %v5911_v5 = vmul.f32 1.442695, %v5908_v36 }
0x3090   : > { %v5909_v13 = vmul.f32 1.442695, %v5907_v46 }
0x3091   : > { %10778 = vpow2.f32 %v5911_v5  ;;  %v667_v5 = vld [vmem:[%s11621_s4 + $0x20] sm:$0xff] }
0x3092   : > { %10780 = vpow2.f32 %v5909_v13  ;;  %v668_v13 = vld [vmem:[%s11621_s4 + $0x28] sm:$0xff] }
0x309b   : > { %v10779_v33 = vpop.eup %10778 }
0x309c   : > { %v10781_v15 = vpop.eup %10780  ;;  %v5916_v44 = vsel %vm906_vm3, %v10779_v33, 0.0 }
0x309d   : > { %5917 = vadd.xlane.f32.xlu1 %v5916_v44  ;;  %v5913_v43 = vsel %vm906_vm3, %v10781_v15, 0.0 }
0x309e   : > { %5914 = vadd.xlane.f32.xlu0 %v5913_v43 }
0x30ae   : > { %10507 = vrot.lane.b32.xlu1 %v11892_v31, %s12620_s26 }
0x30b2   : > { %6010 = vrot.lane.b32.xlu1 %v11900_v30, %s12620_s26 }
0x30b4   : > { %10502 = vrot.lane.b32.xlu0 %v11892_v31, %s12619_s3 }
0x30b8   : > { %6012 = vrot.lane.b32.xlu0 %v11904_v54, %s12620_s26 }
0x312a   : > { %v5918_v21 = vpop.xlane.xlu1 %5917 }
0x312b   : > { %10782 = vrcp.f32 %v5918_v21  ;;  %v5915_v17 = vpop.xlane.xlu0 %5914 }
0x312c   : > { %10784 = vrcp.f32 %v5915_v17 }
0x312e   : > { %v10508_v34 = vpop.permute.xlu1 %10507 }
0x312f   : > { %v10510_v49 = vunpack.i.h.bf16 %v10508_v34  ;;  %v10509_v59 = vunpack.i.l.bf16 %v10508_v34  ;;  %v10503_v16 = vpop.permute.xlu0 %10502 }
0x3130   : > { %v10505_v63 = vunpack.i.h.bf16 %v10503_v16  ;;  %v10504_v0 = vunpack.i.l.bf16 %v10503_v16 }
0x3131   : > { %v10138_v53 = vpack.c.bf16 %v10510_v49, %v10509_v59 }
0x3132   : > { %v10134_v50 = vpack.c.bf16 %v10505_v63, %v10504_v0  ;;  %v6011_v42 = vpop.permute.xlu1 %6010  ;;  %v10148_v63 = vpack.c.bf16 %v668_v13, %v667_v5 }
0x3133   : > { %v6013_v32 = vpop.permute.xlu0 %6012 }
0x3134   : > { %10135 = vmatprep.subr.bf16.mxu1 %v10134_v50 }
0x3135   : > { %v10783_v30 = vpop.eup %10782  ;;  %10137 = vmatpush3.bf16.msra.mxu1 %v10134_v50 }
0x3136   : > { %v10785_v23 = vpop.eup %10784  ;;  %10140 = vmatprep.subr.msk.bf16.mxu1 %vm11083_vm2, %v10138_v53  ;;  %v5922_v22 = vmul.f32 %v10783_v30, %v10779_v33  ;;  %v11998_v33 = vpack.i.bf16 %v668_v13, %v667_v5 }
0x3137   : > { %v5921_v54 = vmul.f32 %v10785_v23, %v10781_v15  ;;  %v12003_v15 = vld [vmem:[%s12580_s9] ss:$0 sm:$0xff] }
0x3138   : > { %v4564_v44 = vadd.f32 %v12003_v15, %v11848_v60  ;;  %v4569_v43 = vadd.f32 %v12003_v15, %v11846_v6 }
0x3139   : > { %9687 = vmatprep.mubr.msk.f32.mxu1 %vm906_vm3, %v5921_v54 }
0x313a   : > { %9688 = vmatmul.mubr.msk.f32.vlgmr.msra.gmra.mrb[58].mxu1 %vm906_vm3, %v5922_v22  ;;  %v12011_v21 = vmul.f32 0.35355338, %v4564_v44 }
0x313b   : > { %9694 = vmatprep.mubr.msk.f32.mxu1 %vm820_vm1, %v6011_v42 }
0x313e   : > { %10143 = vmatpush3.bf16.xpose.msk.msra.mxu1 %vm11083_vm2, %v10138_v53 }
0x3145   : > { %9695 = vmatmul.mubr.msk.f32.vlgmr.msra.gmra.mrb[60].mxu1 %vm820_vm1, %v6013_v32 }
0x320d   : > { %v11986_v37 = vpop.f32.mrb[58].mxu1 }
0x320e   : > { %v11988_v38 = vpop.f32.mrb[59].mxu1 }
0x3218   : > { %v9696_v57 = vpop.f32.mrb[60].mxu1 }
0x3219   : > { %v6092_v2 = vpop.f32.mrb[61].mxu1  ;;  %v6104_v3 = vsel %vm906_vm3, %v9696_v57, -inf }
0x321a   : > { %6105 = vmax.xlane.f32.xlu0 %v6104_v3  ;;  %v6101_v1 = vsel %vm906_vm3, %v6092_v2, -inf }
0x321b   : > { %6102 = vmax.xlane.f32.xlu1 %v6101_v1 }
0x32a7   : > { %v6106_v29 = vpop.xlane.xlu0 %6105 }
0x32a8   : > { %v6108_v45 = vsub.f32 %v9696_v57, %v6106_v29  ;;  %v6103_v7 = vpop.xlane.xlu1 %6102 }
0x32a9   : > { %v6107_v8 = vsub.f32 %v6092_v2, %v6103_v7 }
0x32aa   : > { %v6111_v9 = vmul.f32 1.442695, %v6108_v45 }
0x32ab   : > { %v6109_v4 = vmul.f32 1.442695, %v6107_v8 }
0x32ac   : > { %10786 = vpow2.f32 %v6111_v9 }
0x32ad   : > { %10788 = vpow2.f32 %v6109_v4 }
0x32b6   : > { %v10787_v27 = vpop.eup %10786 }
0x32b7   : > { %v10789_v36 = vpop.eup %10788  ;;  %v6116_v18 = vsel %vm906_vm3, %v10787_v27, 0.0 }
0x32b8   : > { %6117 = vadd.xlane.f32.xlu1 %v6116_v18  ;;  %v6113_v46 = vsel %vm906_vm3, %v10789_v36, 0.0 }
0x32b9   : > { %6114 = vadd.xlane.f32.xlu0 %v6113_v46 }
0x32cf   : > { %10512 = vrot.lane.b32.xlu0 %v11892_v31, %s12621_s24  ;;  %v12015_v31 = vmul.f32 0.35355338, %v4569_v43 }
0x32d3   : > { %10522 = vrot.lane.b32.xlu0 %v11998_v33, %s10911_s29 }
0x32d7   : > { %6440 = vrot.lane.b32.xlu0 %v12011_v21, %s10911_s29 }
0x32db   : > { %6442 = vrot.lane.b32.xlu0 %v12015_v31, %s10911_s29 }
0x3345   : > { %v6118_v17 = vpop.xlane.xlu1 %6117 }
0x3346   : > { %10790 = vrcp.f32 %v6118_v17  ;;  %v6115_v34 = vpop.xlane.xlu0 %6114 }
0x3347   : > { %10792 = vrcp.f32 %v6115_v34 }
0x334a   : > { %v10513_v60 = vpop.permute.xlu0 %10512 }
0x334b   : > { %v10515_v49 = vunpack.i.h.bf16 %v10513_v60  ;;  %v10514_v59 = vunpack.i.l.bf16 %v10513_v60 }
0x334d   : > { %v10144_v16 = vpack.c.bf16 %v10515_v49, %v10514_v59 }
0x334e   : > { %v10523_v18 = vpop.permute.xlu0 %10522 }
0x334f   : > { %10145 = vmatprep.subr.bf16.mxu0 %v10144_v16  ;;  %v10525_v46 = vunpack.i.h.bf16 %v10523_v18  ;;  %v10524_v5 = vunpack.i.l.bf16 %v10523_v18 }
0x3350   : > { %v10791_v6 = vpop.eup %10790  ;;  %10147 = vmatpush3.bf16.msra.mxu0 %v10144_v16 }
0x3351   : > { %v10793_v0 = vpop.eup %10792  ;;  %10150 = vmatprep.subr.msk.bf16.mxu0 %vm11083_vm2, %v10148_v63  ;;  %v6122_v50 = vmul.f32 %v10791_v6, %v10787_v27  ;;  %v10158_v17 = vpack.c.bf16 %v10525_v46, %v10524_v5 }
0x3352   : > { %v6121_v53 = vmul.f32 %v10793_v0, %v10789_v36 }
0x3354   : > { %9701 = vmatprep.mubr.msk.f32.mxu0 %vm906_vm3, %v6121_v53 }
0x3355   : > { %9702 = vmatmul.mubr.msk.f32.vlgmr.msra.gmra.mrb[56].mxu0 %vm906_vm3, %v6122_v50 }
0x3356   : > { %9708 = vmatprep.mubr.msk.f32.mxu0 %vm820_vm1, %v12011_v21 }
0x3359   : > { %10153 = vmatpush3.bf16.xpose.msk.msra.mxu0 %vm11083_vm2, %v10148_v63  ;;  %v6441_v63 = vpop.permute.xlu0 %6440 }
0x335d   : > { %v6443_v6 = vpop.permute.xlu0 %6442 }
0x3360   : > { %9709 = vmatmul.mubr.msk.f32.vlgmr.msra.gmra.mrb[58].mxu0 %vm820_vm1, %v12015_v31 }
0x3428   : > { %v12029_v30 = vpop.f32.mrb[56].mxu0 }
0x3429   : > { %v12031_v23 = vpop.f32.mrb[57].mxu0 }
0x3433   : > { %v9710_v54 = vpop.f32.mrb[58].mxu0 }
0x3434   : > { %v6322_v22 = vpop.f32.mrb[59].mxu0  ;;  %v6334_v32 = vsel %vm906_vm3, %v9710_v54, -inf }
0x3435   : > { %v6331_v42 = vsel %vm906_vm3, %v6322_v22, -inf }
0x3436   : > { %6332 = vmax.xlane.f32.xlu1 %v6331_v42 }
0x343a   : > { %6335 = vmax.xlane.f32.xlu1 %v6334_v32 }
0x34c3   : > { %v6333_v57 = vpop.xlane.xlu1 %6332 }
0x34c4   : > { %v6337_v2 = vsub.f32 %v6322_v22, %v6333_v57 }
0x34c6   : > { %v6339_v29 = vmul.f32 1.442695, %v6337_v2 }
0x34c7   : > { %v6336_v3 = vpop.xlane.xlu1 %6335 }
0x34c8   : > { %v6338_v1 = vsub.f32 %v9710_v54, %v6336_v3 }
0x34ca   : > { %v6341_v45 = vmul.f32 1.442695, %v6338_v1 }
0x34cc   : > { %10794 = vpow2.f32 %v6341_v45 }
0x34cd   : > { %10796 = vpow2.f32 %v6339_v29 }
0x34d6   : > { %v10795_v7 = vpop.eup %10794 }
0x34d7   : > { %v6346_v8 = vsel %vm906_vm3, %v10795_v7, 0.0  ;;  %v10797_v9 = vpop.eup %10796 }
0x34d8   : > { %6347 = vadd.xlane.f32.xlu1 %v6346_v8  ;;  %v6343_v4 = vsel %vm906_vm3, %v10797_v9, 0.0 }
0x34dc   : > { %6344 = vadd.xlane.f32.xlu1 %v6343_v4 }
0x34ed   : > { %10517 = vrot.lane.b32.xlu1 %v11998_v33, %s12618_s23 }
0x3565   : > { %v6348_v27 = vpop.xlane.xlu1 %6347 }
0x3566   : > { %10798 = vrcp.f32 %v6348_v27 }
0x3569   : > { %v6345_v36 = vpop.xlane.xlu1 %6344 }
0x356a   : > { %10800 = vrcp.f32 %v6345_v36 }
0x356d   : > { %v10518_v13 = vpop.permute.xlu1 %10517 }
0x356e   : > { %v10520_v44 = vunpack.i.h.bf16 %v10518_v13  ;;  %v10519_v43 = vunpack.i.l.bf16 %v10518_v13 }
0x3570   : > { %v10154_v34 = vpack.c.bf16 %v10520_v44, %v10519_v43  ;;  %v10799_v60 = vpop.eup %10798 }
0x3571   : > { %v6352_v16 = vmul.f32 %v10799_v60, %v10795_v7 }
0x3572   : > { %10155 = vmatprep.subr.bf16.mxu1 %v10154_v34 }
0x3573   : > { %10157 = vmatpush3.bf16.msra.mxu1 %v10154_v34 }
0x3574   : > { %v10801_v49 = vpop.eup %10800  ;;  %10160 = vmatprep.subr.msk.bf16.mxu1 %vm11083_vm2, %v10158_v17 }
0x3575   : > { %v6351_v59 = vmul.f32 %v10801_v49, %v10797_v9 }
0x3577   : > { %9715 = vmatprep.mubr.msk.f32.mxu1 %vm906_vm3, %v6351_v59 }
0x3578   : > { %9716 = vmatmul.mubr.msk.f32.vlgmr.msra.gmra.mrb[62].mxu1 %vm906_vm3, %v6352_v16 }
0x3579   : > { %9722 = vmatprep.mubr.msk.f32.mxu1 %vm820_vm1, %v6441_v63 }
0x357c   : > { %10163 = vmatpush3.bf16.xpose.msk.msra.mxu1 %vm11083_vm2, %v10158_v17 }
0x3583   : > { %9723 = vmatmul.mubr.msk.f32.vlgmr.msra.gmra.mrb[64].mxu1 %vm820_vm1, %v6443_v6 }
0x364b   : > { %v12047_v0 = vpop.f32.mrb[62].mxu1 }
0x364c   : > { %v12049_v53 = vpop.f32.mrb[63].mxu1 }
0x3656   : > { %v9724_v50 = vpop.f32.mrb[64].mxu1 }
0x3657   : > { %v6522_v54 = vpop.f32.mrb[65].mxu1  ;;  %v6534_v22 = vsel %vm906_vm3, %v9724_v50, -inf }
0x3658   : > { %6535 = vmax.xlane.f32.xlu1 %v6534_v22  ;;  %v6531_v42 = vsel %vm906_vm3, %v6522_v54, -inf }
0x3659   : > { %6532 = vmax.xlane.f32.xlu0 %v6531_v42 }
0x3669   : > { %10527 = vrot.lane.b32.xlu1 %v11998_v33, %s10909_s28 }
0x366d   : > { %6640 = vrot.lane.b32.xlu1 %v12011_v21, %s10912_s0 }
0x3671   : > { %6642 = vrot.lane.b32.xlu1 %v12015_v31, %s10912_s0 }
0x36e5   : > { %v6536_v32 = vpop.xlane.xlu1 %6535 }
0x36e6   : > { %v6538_v57 = vsub.f32 %v9724_v50, %v6536_v32  ;;  %v6533_v2 = vpop.xlane.xlu0 %6532 }
0x36e7   : > { %v6537_v3 = vsub.f32 %v6522_v54, %v6533_v2 }
0x36e8   : > { %v6541_v1 = vmul.f32 1.442695, %v6538_v57 }
0x36e9   : > { %v6539_v29 = vmul.f32 1.442695, %v6537_v3  ;;  %v10528_v4 = vpop.permute.xlu1 %10527 }
0x36ea   : > { %10802 = vpow2.f32 %v6541_v1  ;;  %v10530_v27 = vunpack.i.h.bf16 %v10528_v4  ;;  %v10529_v36 = vunpack.i.l.bf16 %v10528_v4 }
0x36eb   : > { %10804 = vpow2.f32 %v6539_v29 }
0x36ec   : > { %v10164_v18 = vpack.c.bf16 %v10530_v27, %v10529_v36 }
0x36ed   : > { %v6641_v16 = vpop.permute.xlu1 %6640 }
0x36ee   : > { %10165 = vmatprep.subr.bf16.mxu0 %v10164_v18 }
0x36ef   : > { %10167 = vmatpush3.bf16.msra.mxu0 %v10164_v18 }
0x36f1   : > { %v6643_v63 = vpop.permute.xlu1 %6642 }
0x36f4   : > { %v10803_v45 = vpop.eup %10802 }
0x36f5   : > { %v6546_v7 = vsel %vm906_vm3, %v10803_v45, 0.0  ;;  %v10805_v8 = vpop.eup %10804 }
0x36f6   : > { %6547 = vadd.xlane.f32.xlu0 %v6546_v7  ;;  %v6543_v9 = vsel %vm906_vm3, %v10805_v8, 0.0 }
0x36fa   : > { %6544 = vadd.xlane.f32.xlu0 %v6543_v9 }
0x3710   : > { %10532 = vrot.lane.b32.xlu0 %v11998_v33, %s10912_s0 }
0x3783   : > { %v6548_v46 = vpop.xlane.xlu0 %6547 }
0x3784   : > { %10806 = vrcp.f32 %v6548_v46 }
0x3787   : > { %v6545_v5 = vpop.xlane.xlu0 %6544 }
0x3788   : > { %10808 = vrcp.f32 %v6545_v5 }
0x378b   : > { %v10533_v13 = vpop.permute.xlu0 %10532 }
0x378c   : > { %v10535_v44 = vunpack.i.h.bf16 %v10533_v13  ;;  %v10534_v43 = vunpack.i.l.bf16 %v10533_v13 }
0x378e   : > { %v10168_v17 = vpack.c.bf16 %v10535_v44, %v10534_v43  ;;  %v10807_v34 = vpop.eup %10806 }
0x378f   : > { %v6552_v59 = vmul.f32 %v10807_v34, %v10803_v45 }
0x3790   : > { %10170 = vmatprep.subr.msk.bf16.mxu0 %vm11083_vm2, %v10168_v17 }
0x3792   : > { %v10809_v60 = vpop.eup %10808 }
0x3793   : > { %v6551_v49 = vmul.f32 %v10809_v60, %v10805_v8 }
0x3795   : > { %9729 = vmatprep.mubr.msk.f32.mxu0 %vm906_vm3, %v6551_v49 }
0x3796   : > { %9730 = vmatmul.mubr.msk.f32.vlgmr.msra.gmra.mrb[60].mxu0 %vm906_vm3, %v6552_v59 }
0x3797   : > { %10173 = vmatpush3.bf16.xpose.msk.msra.mxu0 %vm11083_vm2, %v10168_v17  ;;  %9736 = vmatprep.mubr.msk.f32.mxu0 %vm820_vm1, %v6641_v16 }
0x379e   : > { %9737 = vmatmul.mubr.msk.f32.vlgmr.msra.gmra.mrb[62].mxu0 %vm820_vm1, %v6643_v63 }
0x3869   : > { %v12071_v6 = vpop.f32.mrb[60].mxu0 }
0x386a   : > { %v12073_v50 = vpop.f32.mrb[61].mxu0 }
0x3871   : > { %v9738_v54 = vpop.f32.mrb[62].mxu0 }
0x3872   : > { %v6722_v22 = vpop.f32.mrb[63].mxu0  ;;  %v6734_v42 = vsel %vm906_vm3, %v9738_v54, -inf }
0x3873   : > { %6735 = vmax.xlane.f32.xlu1 %v6734_v42  ;;  %v6731_v32 = vsel %vm906_vm3, %v6722_v22, -inf }
0x3874   : > { %6732 = vmax.xlane.f32.xlu0 %v6731_v32 }
0x3884   : > { %10537 = vrot.lane.b32.xlu1 %v11998_v33, %s12619_s3 }
0x3888   : > { %6840 = vrot.lane.b32.xlu1 %v12011_v21, %s12620_s26 }
0x388c   : > { %6842 = vrot.lane.b32.xlu1 %v12015_v31, %s12620_s26 }
0x3900   : > { %v6736_v57 = vpop.xlane.xlu1 %6735 }
0x3901   : > { %v6738_v2 = vsub.f32 %v9738_v54, %v6736_v57  ;;  %v6733_v3 = vpop.xlane.xlu0 %6732 }
0x3902   : > { %v6737_v1 = vsub.f32 %v6722_v22, %v6733_v3  ;;  %v670_v3 = vld [vmem:[%s11621_s4 + $0x38] sm:$0xff] }
0x3903   : > { %v6741_v29 = vmul.f32 1.442695, %v6738_v2  ;;  %v669_v2 = vld [vmem:[%s11621_s4 + $0x30] sm:$0xff] }
0x3904   : > { %v6739_v45 = vmul.f32 1.442695, %v6737_v1  ;;  %v10538_v7 = vpop.permute.xlu1 %10537  ;;  %v12105_v1 = vpack.i.bf16 %v670_v3, %v669_v2 }
0x3905   : > { %10810 = vpow2.f32 %v6741_v29  ;;  %v10540_v8 = vunpack.i.h.bf16 %v10538_v7  ;;  %v10539_v9 = vunpack.i.l.bf16 %v10538_v7  ;;  %v4574_v29 = vadd.f32 %v12003_v15, %v11852_v14 }
0x3906   : > { %10812 = vpow2.f32 %v6739_v45  ;;  %v4579_v45 = vadd.f32 %v12003_v15, %v11850_v12 }
0x3907   : > { %v10174_v4 = vpack.c.bf16 %v10540_v8, %v10539_v9  ;;  %v12113_v7 = vmul.f32 0.35355338, %v4574_v29 }
0x3908   : > { %v6841_v59 = vpop.permute.xlu1 %6840  ;;  %v12117_v8 = vmul.f32 0.35355338, %v4579_v45 }
0x3909   : > { %10175 = vmatprep.subr.bf16.mxu1 %v10174_v4 }
0x390a   : > { %10177 = vmatpush3.bf16.msra.mxu1 %v10174_v4 }
0x390c   : > { %v6843_v16 = vpop.permute.xlu1 %6842 }
0x390f   : > { %v10811_v27 = vpop.eup %10810 }
0x3910   : > { %v6746_v21 = vsel %vm906_vm3, %v10811_v27, 0.0  ;;  %v10813_v36 = vpop.eup %10812 }
0x3911   : > { %6747 = vadd.xlane.f32.xlu0 %v6746_v21  ;;  %v6743_v31 = vsel %vm906_vm3, %v10813_v36, 0.0 }
0x3915   : > { %6744 = vadd.xlane.f32.xlu0 %v6743_v31 }
0x392b   : > { %10542 = vrot.lane.b32.xlu0 %v11998_v33, %s12620_s26 }
0x399e   : > { %v6748_v18 = vpop.xlane.xlu0 %6747 }
0x399f   : > { %10814 = vrcp.f32 %v6748_v18 }
0x39a2   : > { %v6745_v46 = vpop.xlane.xlu0 %6744 }
0x39a3   : > { %10816 = vrcp.f32 %v6745_v46 }
0x39a6   : > { %v10543_v5 = vpop.permute.xlu0 %10542 }
0x39a7   : > { %v10545_v13 = vunpack.i.h.bf16 %v10543_v5  ;;  %v10544_v44 = vunpack.i.l.bf16 %v10543_v5 }
0x39a9   : > { %v10178_v43 = vpack.c.bf16 %v10545_v13, %v10544_v44  ;;  %v10815_v17 = vpop.eup %10814 }
0x39aa   : > { %v6752_v49 = vmul.f32 %v10815_v17, %v10811_v27 }
0x39ab   : > { %10180 = vmatprep.subr.msk.bf16.mxu1 %vm11083_vm2, %v10178_v43 }
0x39ad   : > { %v10817_v34 = vpop.eup %10816 }
0x39ae   : > { %v6751_v60 = vmul.f32 %v10817_v34, %v10813_v36 }
0x39b0   : > { %9743 = vmatprep.mubr.msk.f32.mxu1 %vm906_vm3, %v6751_v60  ;;  %v10188_v60 = vpack.c.bf16 %v670_v3, %v669_v2 }
0x39b1   : > { %9744 = vmatmul.mubr.msk.f32.vlgmr.msra.gmra.mrb[66].mxu1 %vm906_vm3, %v6752_v49 }
0x39b2   : > { %10183 = vmatpush3.bf16.xpose.msk.msra.mxu1 %vm11083_vm2, %v10178_v43  ;;  %9750 = vmatprep.mubr.msk.f32.mxu1 %vm820_vm1, %v6841_v59 }
0x39b9   : > { %9751 = vmatmul.mubr.msk.f32.vlgmr.msra.gmra.mrb[68].mxu1 %vm820_vm1, %v6843_v16 }
0x3a84   : > { %v12095_v63 = vpop.f32.mrb[66].mxu1 }
0x3a85   : > { %v12097_v54 = vpop.f32.mrb[67].mxu1 }
0x3a8c   : > { %v9752_v22 = vpop.f32.mrb[68].mxu1 }
0x3a8d   : > { %v6922_v42 = vpop.f32.mrb[69].mxu1  ;;  %v6934_v32 = vsel %vm906_vm3, %v9752_v22, -inf }
0x3a8e   : > { %6935 = vmax.xlane.f32.xlu1 %v6934_v32  ;;  %v6931_v57 = vsel %vm906_vm3, %v6922_v42, -inf }
0x3a8f   : > { %6932 = vmax.xlane.f32.xlu0 %v6931_v57 }
0x3a9f   : > { %10547 = vrot.lane.b32.xlu1 %v11998_v33, %s12621_s24 }
0x3aa3   : > { %10552 = vrot.lane.b32.xlu1 %v12105_v1, %s12618_s23 }
0x3aa7   : > { %7270 = vrot.lane.b32.xlu1 %v12113_v7, %s10911_s29 }
0x3aab   : > { %7272 = vrot.lane.b32.xlu1 %v12117_v8, %s10911_s29 }
0x3b1b   : > { %v6936_v33 = vpop.xlane.xlu1 %6935 }
0x3b1c   : > { %v6938_v9 = vsub.f32 %v9752_v22, %v6936_v33  ;;  %v6933_v4 = vpop.xlane.xlu0 %6932 }
0x3b1d   : > { %v6937_v14 = vsub.f32 %v6922_v42, %v6933_v4 }
0x3b1e   : > { %v6941_v27 = vmul.f32 1.442695, %v6938_v9 }
0x3b1f   : > { %v6939_v21 = vmul.f32 1.442695, %v6937_v14  ;;  %v10548_v36 = vpop.permute.xlu1 %10547 }
0x3b20   : > { %v10550_v31 = vunpack.i.h.bf16 %v10548_v36  ;;  %v10549_v18 = vunpack.i.l.bf16 %v10548_v36 }
0x3b21   : > { %10818 = vpow2.f32 %v6939_v21 }
0x3b22   : > { %v10184_v12 = vpack.c.bf16 %v10550_v31, %v10549_v18  ;;  %10820 = vpow2.f32 %v6941_v27 }
0x3b23   : > { %v10553_v15 = vpop.permute.xlu1 %10552 }
0x3b24   : > { %v10555_v46 = vunpack.i.h.bf16 %v10553_v15  ;;  %v10554_v5 = vunpack.i.l.bf16 %v10553_v15  ;;  %10185 = vmatprep.subr.bf16.mxu0 %v10184_v12 }
0x3b25   : > { %10187 = vmatpush3.bf16.msra.mxu0 %v10184_v12 }
0x3b26   : > { %v10194_v13 = vpack.c.bf16 %v10555_v46, %v10554_v5  ;;  %10190 = vmatprep.subr.msk.bf16.mxu0 %vm11083_vm2, %v10188_v60 }
0x3b28   : > { %10195 = vmatprep.subr.bf16.mxu1 %v10194_v13 }
0x3b29   : > { %10197 = vmatpush3.bf16.msra.mxu1 %v10194_v13 }
0x3b2b   : > { %v10819_v44 = vpop.eup %10818 }
0x3b2c   : > { %v6943_v43 = vsel %vm906_vm3, %v10819_v44, 0.0  ;;  %v10821_v17 = vpop.eup %10820 }
0x3b2d   : > { %6944 = vadd.xlane.f32.xlu0 %v6943_v43  ;;  %v6946_v34 = vsel %vm906_vm3, %v10821_v17, 0.0 }
0x3b31   : > { %6947 = vadd.xlane.f32.xlu0 %v6946_v34 }
0x3bba   : > { %v6945_v49 = vpop.xlane.xlu0 %6944 }
0x3bbb   : > { %10822 = vrcp.f32 %v6945_v49 }
0x3bbe   : > { %v6948_v59 = vpop.xlane.xlu0 %6947 }
0x3bbf   : > { %10824 = vrcp.f32 %v6948_v59 }
0x3bc5   : > { %v10823_v16 = vpop.eup %10822 }
0x3bc6   : > { %v6951_v22 = vmul.f32 %v10823_v16, %v10819_v44  ;;  %v7271_v16 = vpop.permute.xlu1 %7270 }
0x3bc8   : > { %9757 = vmatprep.mubr.msk.f32.mxu0 %vm906_vm3, %v6951_v22 }
0x3bc9   : > { %v10825_v42 = vpop.eup %10824 }
0x3bca   : > { %v6952_v32 = vmul.f32 %v10825_v42, %v10821_v17  ;;  %v7273_v22 = vpop.permute.xlu1 %7272 }
0x3bcc   : > { %9758 = vmatmul.mubr.msk.f32.vlgmr.msra.gmra.mrb[64].mxu0 %vm906_vm3, %v6952_v32 }
0x3bcd   : > { %10193 = vmatpush3.bf16.xpose.msk.msra.mxu0 %vm11083_vm2, %v10188_v60  ;;  %9764 = vmatprep.mubr.msk.f32.mxu0 %vm820_vm1, %v12113_v7 }
0x3bd4   : > { %9765 = vmatmul.mubr.msk.f32.vlgmr.msra.gmra.mrb[66].mxu0 %vm820_vm1, %v12117_v8 }
0x3c9f   : > { %v12133_v57 = vpop.f32.mrb[64].mxu0 }
0x3ca0   : > { %v12135_v2 = vpop.f32.mrb[65].mxu0 }
0x3ca7   : > { %v9766_v3 = vpop.f32.mrb[66].mxu0 }
0x3ca8   : > { %v7152_v29 = vpop.f32.mrb[67].mxu0  ;;  %v7164_v33 = vsel %vm906_vm3, %v9766_v3, -inf }
0x3ca9   : > { %v7161_v45 = vsel %vm906_vm3, %v7152_v29, -inf }
0x3caa   : > { %7162 = vmax.xlane.f32.xlu0 %v7161_v45 }
0x3cae   : > { %7165 = vmax.xlane.f32.xlu0 %v7164_v33 }
0x3d37   : > { %v7163_v9 = vpop.xlane.xlu0 %7162 }
0x3d38   : > { %v7167_v4 = vsub.f32 %v7152_v29, %v7163_v9 }
0x3d3a   : > { %v7169_v21 = vmul.f32 1.442695, %v7167_v4 }
0x3d3b   : > { %v7166_v14 = vpop.xlane.xlu0 %7165 }
0x3d3c   : > { %v7168_v27 = vsub.f32 %v9766_v3, %v7166_v14 }
0x3d3e   : > { %v7171_v36 = vmul.f32 1.442695, %v7168_v27 }
0x3d40   : > { %10826 = vpow2.f32 %v7171_v36 }
0x3d41   : > { %10828 = vpow2.f32 %v7169_v21 }
0x3d4a   : > { %v10827_v31 = vpop.eup %10826 }
0x3d4b   : > { %v7176_v18 = vsel %vm906_vm3, %v10827_v31, 0.0  ;;  %v10829_v12 = vpop.eup %10828 }
0x3d4c   : > { %7177 = vadd.xlane.f32.xlu0 %v7176_v18  ;;  %v7173_v15 = vsel %vm906_vm3, %v10829_v12, 0.0 }
0x3d50   : > { %7174 = vadd.xlane.f32.xlu0 %v7173_v15 }
0x3d66   : > { %10557 = vrot.lane.b32.xlu0 %v12105_v1, %s10911_s29  ;;  %s12623_s29 = smov 24  }
0x3dd9   : > { %v7178_v46 = vpop.xlane.xlu0 %7177 }
0x3dda   : > { %10830 = vrcp.f32 %v7178_v46 }
0x3ddd   : > { %v7175_v5 = vpop.xlane.xlu0 %7174 }
0x3dde   : > { %10832 = vrcp.f32 %v7175_v5 }
0x3de1   : > { %v10558_v13 = vpop.permute.xlu0 %10557 }
0x3de2   : > { %v10560_v44 = vunpack.i.h.bf16 %v10558_v13  ;;  %v10559_v43 = vunpack.i.l.bf16 %v10558_v13 }
0x3de4   : > { %v10198_v17 = vpack.c.bf16 %v10560_v44, %v10559_v43  ;;  %v10831_v34 = vpop.eup %10830 }
0x3de5   : > { %v7182_v59 = vmul.f32 %v10831_v34, %v10827_v31 }
0x3de6   : > { %10200 = vmatprep.subr.msk.bf16.mxu1 %vm11083_vm2, %v10198_v17 }
0x3de8   : > { %v10833_v60 = vpop.eup %10832 }
0x3de9   : > { %v7181_v49 = vmul.f32 %v10833_v60, %v10829_v12 }
0x3deb   : > { %9771 = vmatprep.mubr.msk.f32.mxu1 %vm906_vm3, %v7181_v49 }
0x3dec   : > { %9772 = vmatmul.mubr.msk.f32.vlgmr.msra.gmra.mrb[70].mxu1 %vm906_vm3, %v7182_v59 }
0x3ded   : > { %10203 = vmatpush3.bf16.xpose.msk.msra.mxu1 %vm11083_vm2, %v10198_v17  ;;  %9778 = vmatprep.mubr.msk.f32.mxu1 %vm820_vm1, %v7271_v16 }
0x3df4   : > { %9779 = vmatmul.mubr.msk.f32.vlgmr.msra.gmra.mrb[72].mxu1 %vm820_vm1, %v7273_v22 }
0x3ebf   : > { %v12151_v42 = vpop.f32.mrb[70].mxu1 }
0x3ec0   : > { %v12153_v32 = vpop.f32.mrb[71].mxu1 }
0x3ec7   : > { %v9780_v3 = vpop.f32.mrb[72].mxu1 }
0x3ec8   : > { %v7352_v29 = vpop.f32.mrb[73].mxu1  ;;  %v7364_v45 = vsel %vm906_vm3, %v9780_v3, -inf }
0x3ec9   : > { %7365 = vmax.xlane.f32.xlu0 %v7364_v45  ;;  %v7361_v33 = vsel %vm906_vm3, %v7352_v29, -inf }
0x3eca   : > { %7362 = vmax.xlane.f32.xlu1 %v7361_v33 }
0x3edb   : > { %10567 = vrot.lane.b32.xlu1 %v12105_v1, %s10912_s0 }
0x3edf   : > { %10562 = vrot.lane.b32.xlu0 %v12105_v1, %s10909_s28  ;;  %s12622_s28 = smov 16  }
0x3ee3   : > { %7472 = vrot.lane.b32.xlu0 %v12117_v8, %s10912_s0 }
0x3f56   : > { %v7366_v9 = vpop.xlane.xlu0 %7365 }
0x3f57   : > { %v7368_v4 = vsub.f32 %v9780_v3, %v7366_v9  ;;  %v7363_v14 = vpop.xlane.xlu1 %7362 }
0x3f58   : > { %v7367_v27 = vsub.f32 %v7352_v29, %v7363_v14 }
0x3f59   : > { %v7371_v21 = vmul.f32 1.442695, %v7368_v4 }
0x3f5a   : > { %v7369_v36 = vmul.f32 1.442695, %v7367_v27  ;;  %v10563_v31 = vpop.permute.xlu0 %10562 }
0x3f5b   : > { %10834 = vpow2.f32 %v7371_v21  ;;  %v10565_v18 = vunpack.i.h.bf16 %v10563_v31  ;;  %v10564_v12 = vunpack.i.l.bf16 %v10563_v31  ;;  %v10568_v15 = vpop.permute.xlu1 %10567 }
0x3f5c   : > { %v10570_v46 = vunpack.i.h.bf16 %v10568_v15  ;;  %v10569_v5 = vunpack.i.l.bf16 %v10568_v15  ;;  %10836 = vpow2.f32 %v7369_v36 }
0x3f5d   : > { %v10204_v13 = vpack.c.bf16 %v10565_v18, %v10564_v12 }
0x3f5e   : > { %v10208_v44 = vpack.c.bf16 %v10570_v46, %v10569_v5  ;;  %v7473_v33 = vpop.permute.xlu0 %7472 }
0x3f5f   : > { %10205 = vmatprep.subr.bf16.mxu0 %v10204_v13 }
0x3f60   : > { %10207 = vmatpush3.bf16.msra.mxu0 %v10204_v13 }
0x3f61   : > { %10210 = vmatprep.subr.msk.bf16.mxu0 %vm11083_vm2, %v10208_v44 }
0x3f65   : > { %v10835_v43 = vpop.eup %10834 }
0x3f66   : > { %v7376_v17 = vsel %vm906_vm3, %v10835_v43, 0.0  ;;  %v10837_v34 = vpop.eup %10836 }
0x3f67   : > { %7377 = vadd.xlane.f32.xlu1 %v7376_v17  ;;  %v7373_v60 = vsel %vm906_vm3, %v10837_v34, 0.0 }
0x3f6b   : > { %7374 = vadd.xlane.f32.xlu1 %v7373_v60 }
0x3f7c   : > { %7470 = vrot.lane.b32.xlu1 %v12113_v7, %s10912_s0 }
0x3ff4   : > { %v7378_v49 = vpop.xlane.xlu1 %7377 }
0x3ff5   : > { %10838 = vrcp.f32 %v7378_v49 }
0x3ff8   : > { %v7375_v59 = vpop.xlane.xlu1 %7374 }
0x3ff9   : > { %10840 = vrcp.f32 %v7375_v59 }
0x3ffc   : > { %v7471_v45 = vpop.permute.xlu1 %7470 }
0x3fff   : > { %v10839_v16 = vpop.eup %10838 }
0x4000   : > { %v7382_v29 = vmul.f32 %v10839_v16, %v10835_v43 }
0x4003   : > { %v10841_v22 = vpop.eup %10840 }
0x4004   : > { %v7381_v3 = vmul.f32 %v10841_v22, %v10837_v34 }
0x4006   : > { %9785 = vmatprep.mubr.msk.f32.mxu0 %vm906_vm3, %v7381_v3 }
0x4007   : > { %9786 = vmatmul.mubr.msk.f32.vlgmr.msra.gmra.mrb[68].mxu0 %vm906_vm3, %v7382_v29 }
0x4008   : > { %10213 = vmatpush3.bf16.xpose.msk.msra.mxu0 %vm11083_vm2, %v10208_v44  ;;  %9792 = vmatprep.mubr.msk.f32.mxu0 %vm820_vm1, %v7471_v45 }
0x400f   : > { %9793 = vmatmul.mubr.msk.f32.vlgmr.msra.gmra.mrb[70].mxu0 %vm820_vm1, %v7473_v33 }
0x40da   : > { %v12175_v9 = vpop.f32.mrb[68].mxu0 }
0x40db   : > { %v12177_v4 = vpop.f32.mrb[69].mxu0 }
0x40e2   : > { %v9794_v14 = vpop.f32.mrb[70].mxu0 }
0x40e3   : > { %v7552_v27 = vpop.f32.mrb[71].mxu0  ;;  %v7564_v21 = vsel %vm906_vm3, %v9794_v14, -inf }
0x40e4   : > { %7565 = vmax.xlane.f32.xlu0 %v7564_v21  ;;  %v7561_v36 = vsel %vm906_vm3, %v7552_v27, -inf }
0x40e5   : > { %7562 = vmax.xlane.f32.xlu1 %v7561_v36 }
0x4171   : > { %v7566_v31 = vpop.xlane.xlu0 %7565 }
0x4172   : > { %v7568_v18 = vsub.f32 %v9794_v14, %v7566_v31  ;;  %v7563_v12 = vpop.xlane.xlu1 %7562 }
0x4173   : > { %v7567_v15 = vsub.f32 %v7552_v27, %v7563_v12 }
0x4174   : > { %v7571_v46 = vmul.f32 1.442695, %v7568_v18 }
0x4175   : > { %v7569_v5 = vmul.f32 1.442695, %v7567_v15 }
0x4176   : > { %10842 = vpow2.f32 %v7571_v46 }
0x4177   : > { %10844 = vpow2.f32 %v7569_v5 }
0x4180   : > { %v10843_v13 = vpop.eup %10842 }
0x4181   : > { %v10845_v44 = vpop.eup %10844  ;;  %v7576_v43 = vsel %vm906_vm3, %v10843_v13, 0.0 }
0x4182   : > { %7577 = vadd.xlane.f32.xlu1 %v7576_v43  ;;  %v7573_v17 = vsel %vm906_vm3, %v10845_v44, 0.0 }
0x4183   : > { %7574 = vadd.xlane.f32.xlu0 %v7573_v17 }
0x4193   : > { %10577 = vrot.lane.b32.xlu1 %v12105_v1, %s12620_s26 }
0x4197   : > { %7670 = vrot.lane.b32.xlu1 %v12113_v7, %s12620_s26 }
0x4199   : > { %10572 = vrot.lane.b32.xlu0 %v12105_v1, %s12619_s3 }
0x419d   : > { %7672 = vrot.lane.b32.xlu0 %v12117_v8, %s12620_s26 }
0x420f   : > { %v7578_v34 = vpop.xlane.xlu1 %7577 }
0x4210   : > { %10846 = vrcp.f32 %v7578_v34  ;;  %v7575_v60 = vpop.xlane.xlu0 %7574 }
0x4211   : > { %10848 = vrcp.f32 %v7575_v60 }
0x4213   : > { %v10578_v49 = vpop.permute.xlu1 %10577 }
0x4214   : > { %v10580_v59 = vunpack.i.h.bf16 %v10578_v49  ;;  %v10579_v16 = vunpack.i.l.bf16 %v10578_v49  ;;  %v10573_v22 = vpop.permute.xlu0 %10572 }
0x4215   : > { %v10575_v3 = vunpack.i.h.bf16 %v10573_v22  ;;  %v10574_v29 = vunpack.i.l.bf16 %v10573_v22 }
0x4216   : > { %v10218_v45 = vpack.c.bf16 %v10580_v59, %v10579_v16 }
0x4217   : > { %v10214_v33 = vpack.c.bf16 %v10575_v3, %v10574_v29  ;;  %v7671_v21 = vpop.permute.xlu1 %7670 }
0x4218   : > { %v7673_v36 = vpop.permute.xlu0 %7672 }
0x4219   : > { %10215 = vmatprep.subr.bf16.mxu1 %v10214_v33 }
0x421a   : > { %v10847_v7 = vpop.eup %10846  ;;  %10217 = vmatpush3.bf16.msra.mxu1 %v10214_v33 }
0x421b   : > { %v10849_v14 = vpop.eup %10848  ;;  %10220 = vmatprep.subr.msk.bf16.mxu1 %vm11083_vm2, %v10218_v45  ;;  %v7582_v27 = vmul.f32 %v10847_v7, %v10843_v13 }
0x421c   : > { %v7581_v8 = vmul.f32 %v10849_v14, %v10845_v44 }
0x421e   : > { %9799 = vmatprep.mubr.msk.f32.mxu1 %vm906_vm3, %v7581_v8 }
0x421f   : > { %9800 = vmatmul.mubr.msk.f32.vlgmr.msra.gmra.mrb[74].mxu1 %vm906_vm3, %v7582_v27 }
0x4220   : > { %9806 = vmatprep.mubr.msk.f32.mxu1 %vm820_vm1, %v7671_v21 }
0x4223   : > { %10223 = vmatpush3.bf16.xpose.msk.msra.mxu1 %vm11083_vm2, %v10218_v45 }
0x422a   : > { %9807 = vmatmul.mubr.msk.f32.vlgmr.msra.gmra.mrb[76].mxu1 %vm820_vm1, %v7673_v36 }
0x42f2   : > { %v9801_v31 = vpop.f32.mrb[74].mxu1 }
0x42f3   : > { %v7661_v18 = vpop.f32.mrb[75].mxu1 }
0x42fd   : > { %v9808_v12 = vpop.f32.mrb[76].mxu1 }
0x42fe   : > { %v7752_v15 = vpop.f32.mrb[77].mxu1  ;;  %v7764_v46 = vsel %vm906_vm3, %v9808_v12, -inf }
0x42ff   : > { %7765 = vmax.xlane.f32.xlu0 %v7764_v46  ;;  %v7761_v5 = vsel %vm906_vm3, %v7752_v15, -inf }
0x4300   : > { %7762 = vmax.xlane.f32.xlu1 %v7761_v5 }
0x438c   : > { %v7766_v13 = vpop.xlane.xlu0 %7765 }
0x438d   : > { %v7768_v44 = vsub.f32 %v9808_v12, %v7766_v13  ;;  %v7763_v43 = vpop.xlane.xlu1 %7762 }
0x438e   : > { %v7767_v17 = vsub.f32 %v7752_v15, %v7763_v43 }
0x438f   : > { %v7771_v34 = vmul.f32 1.442695, %v7768_v44 }
0x4390   : > { %v7769_v26 = vmul.f32 1.442695, %v7767_v17 }
0x4391   : > { %10850 = vpow2.f32 %v7771_v34 }
0x4392   : > { %10852 = vpow2.f32 %v7769_v26 }
0x439b   : > { %v10851_v60 = vpop.eup %10850 }
0x439c   : > { %v10853_v49 = vpop.eup %10852  ;;  %v7776_v59 = vsel %vm906_vm3, %v10851_v60, 0.0 }
0x439d   : > { %7777 = vadd.xlane.f32.xlu1 %v7776_v59  ;;  %v7773_v16 = vsel %vm906_vm3, %v10853_v49, 0.0 }
0x439e   : > { %7774 = vadd.xlane.f32.xlu0 %v7773_v16 }
0x43ae   : > { %5382 = vrot.lane.b32.xlu1 %v11860_v51, %s10918_s27 }
0x43b2   : > { %5384 = vrot.lane.b32.xlu1 %v11858_v47, %s10918_s27 }
0x43b4   : > { %10582 = vrot.lane.b32.xlu0 %v12105_v1, %s12621_s24 }
0x43b6   : > { %5392 = vrot.lane.b32.xlu1 %v11882_v62, %s12622_s28 }
0x43b8   : > { %5390 = vrot.lane.b32.xlu0 %v11884_v58, %s12622_s28 }
0x43ba   : > { %5400 = vrot.lane.b32.xlu1 %v11920_v55, %s12623_s29  ;;  %v7910_v55 = vld [vmem:[%s12581_s10] sm:$0xff] }
0x43bc   : > { %5398 = vrot.lane.b32.xlu0 %v11922_v48, %s12623_s29  ;;  %v7911_v48 = vld [vmem:[%s12581_s10 + $0x8] sm:$0xff] }
0x43be   : > { %6214 = vrot.lane.b32.xlu1 %v11962_v61, %s10918_s27 }
0x43c0   : > { %6212 = vrot.lane.b32.xlu0 %v11964_v39, %s10918_s27 }
0x43c2   : > { %6222 = vrot.lane.b32.xlu1 %v11986_v37, %s12622_s28 }
0x43c4   : > { %6220 = vrot.lane.b32.xlu0 %v11988_v38, %s12622_s28 }
0x43c6   : > { %6230 = vrot.lane.b32.xlu1 %v12029_v30, %s12623_s29  ;;  %v10228_v30 = vpack.c.bf16 %v7911_v48, %v7910_v55 }
0x43c8   : > { %6228 = vrot.lane.b32.xlu0 %v12031_v23, %s12623_s29 }
0x43ca   : > { %7044 = vrot.lane.b32.xlu1 %v12071_v6, %s10918_s27 }
0x43cc   : > { %7042 = vrot.lane.b32.xlu0 %v12073_v50, %s10918_s27  ;;  %v7912_v50 = vld [vmem:[%s12581_s10 + $0x10] sm:$0xff] }
0x43ce   : > { %7052 = vrot.lane.b32.xlu1 %v12095_v63, %s12622_s28  ;;  %v7913_v63 = vld [vmem:[%s12581_s10 + $0x18] sm:$0xff] }
0x43cf   : > { %v10232_v29 = vpack.c.bf16 %v7913_v63, %v7912_v50 }
0x43d0   : > { %7050 = vrot.lane.b32.xlu0 %v12097_v54, %s12622_s28 }
0x43d2   : > { %7060 = vrot.lane.b32.xlu1 %v12133_v57, %s12623_s29 }
0x43d4   : > { %7058 = vrot.lane.b32.xlu0 %v12135_v2, %s12623_s29 }
0x43d6   : > { %7874 = vrot.lane.b32.xlu1 %v12175_v9, %s10918_s27 }
0x43d8   : > { %7872 = vrot.lane.b32.xlu0 %v12177_v4, %s10918_s27  ;;  %s12544_s27 = scalar_lea.vmem %s12591_s20, %s11046_s30 }
0x43da   : > { %7882 = vrot.lane.b32.xlu1 %v9801_v31, %s12622_s28 }
0x43dc   : > { %7880 = vrot.lane.b32.xlu0 %v7661_v18, %s12622_s28 }
0x442a   : > { %v7778_v47 = vpop.xlane.xlu1 %7777 }
0x442b   : > { %10854 = vrcp.f32 %v7778_v47  ;;  %v7775_v51 = vpop.xlane.xlu0 %7774 }
0x442c   : > { %10856 = vrcp.f32 %v7775_v51 }
0x442e   : > { %v5383_v62 = vpop.permute.xlu1 %5382 }
0x442f   : > { %v10583_v58 = vpop.permute.xlu0 %10582  ;;  %v5404_v1 = vsel %vm820_vm1, %v11856_v25, %v5383_v62 }
0x4430   : > { %v10585_v61 = vunpack.i.h.bf16 %v10583_v58  ;;  %v10584_v39 = vunpack.i.l.bf16 %v10583_v58 }
0x4432   : > { %v10224_v37 = vpack.c.bf16 %v10585_v61, %v10584_v39  ;;  %v5385_v38 = vpop.permute.xlu1 %5384 }
0x4433   : > { %v5391_v23 = vpop.permute.xlu0 %5390  ;;  %v5405_v45 = vsel %vm820_vm1, %v11854_v24, %v5385_v38 }
0x4434   : > { %10225 = vmatprep.subr.bf16.mxu0 %v10224_v37  ;;  %v5406_v2 = vsel %vm906_vm3, %v5404_v1, %v5391_v23 }
0x4435   : > { %v10855_v6 = vpop.eup %10854  ;;  %10227 = vmatpush3.bf16.msra.mxu0 %v10224_v37  ;;  %v8943_v37 = vld [vmem:[%s12582_s11] ss:$0 sm:$0xff] }
0x4436   : > { %v10857_v54 = vpop.eup %10856  ;;  %v5393_v57 = vpop.permute.xlu1 %5392  ;;  %10229 = vmatprep.subr.bf16.mxu0 %v10228_v30  ;;  %v7782_v22 = vmul.f32 %v10855_v6, %v10851_v60 }
0x4437   : > { %v5399_v9 = vpop.permute.xlu0 %5398  ;;  %v7781_v4 = vmul.f32 %v10857_v54, %v10853_v49  ;;  %v5407_v33 = vsel %vm906_vm3, %v5405_v45, %v5393_v57 }
0x4438   : > { %v5408_v3 = vsel %vm1644_vm4, %v5406_v2, %v5399_v9 }
0x4439   : > { %5410 = vst.msk [vmem:[#allocation2] sm:$0xff] %vm682_vm0, %v5408_v3  ;;  %9813 = vmatprep.mubr.msk.f32.mxu0 %vm906_vm3, %v7781_v4 }
0x443a   : > { %9814 = vmatmul.mubr.msk.f32.vlgmr.msra.gmra.mrb[72].mxu0 %vm906_vm3, %v7782_v22  ;;  %v5401_v25 = vpop.permute.xlu1 %5400 }
0x443b   : > { %v5409_v7 = vsel %vm1644_vm4, %v5407_v33, %v5401_v25  ;;  %v6213_v14 = vpop.permute.xlu0 %6212  ;;  %10231 = vmatpush3.bf16.msra.mxu0 %v10228_v30 }
0x443c   : > { %5411 = vst.msk [vmem:[#allocation2 + $0x8] sm:$0xff] %vm682_vm0, %v5409_v7  ;;  %10233 = vmatprep.subr.bf16.mxu0 %v10232_v29  ;;  %v6234_v21 = vsel %vm820_vm1, %v11940_v41, %v6213_v14 }
0x443e   : > { %v6215_v8 = vpop.permute.xlu1 %6214 }
0x443f   : > { %v6221_v27 = vpop.permute.xlu0 %6220  ;;  %10235 = vmatpush3.bf16.msra.mxu0 %v10232_v29  ;;  %v6235_v46 = vsel %vm820_vm1, %v11938_v28, %v6215_v8 }
0x4440   : > { %v7902_v24 = vld [vmem:[#allocation2] sm:$0xff]  ;;  %v6236_v31 = vsel %vm906_vm3, %v6234_v21, %v6221_v27 }
0x4441   : > { %9824 = vmatprep.mubr.msk.f32.mxu0 %vm682_vm0, %v7902_v24 }
0x4442   : > { %v6223_v36 = vpop.permute.xlu1 %6222 }
0x4443   : > { %v6229_v18 = vpop.permute.xlu0 %6228  ;;  %v7903_v12 = vld [vmem:[#allocation2 + $0x8] sm:$0xff]  ;;  %v6237_v5 = vsel %vm906_vm3, %v6235_v46, %v6223_v36 }
0x4444   : > { %v6238_v15 = vsel %vm1644_vm4, %v6236_v31, %v6229_v18  ;;  %9825 = vmatmul.mubr.msk.f32.vlgmr.msra.gmra.mrb[74].mxu0 %vm682_vm0, %v7903_v12 }
0x4445   : > { %6240 = vst.msk [vmem:[#allocation2 + $0x10] sm:$0xff] %vm682_vm0, %v6238_v15 }
0x4446   : > { %v6231_v13 = vpop.permute.xlu1 %6230 }
0x4447   : > { %v6239_v44 = vsel %vm1644_vm4, %v6237_v5, %v6231_v13  ;;  %v7043_v41 = vpop.permute.xlu0 %7042 }
0x4448   : > { %6241 = vst.msk [vmem:[#allocation2 + $0x18] sm:$0xff] %vm682_vm0, %v6239_v44  ;;  %v7064_v26 = vsel %vm820_vm1, %v12049_v53, %v7043_v41 }
0x444a   : > { %v7045_v43 = vpop.permute.xlu1 %7044 }
0x444b   : > { %v7051_v17 = vpop.permute.xlu0 %7050  ;;  %v7065_v47 = vsel %vm820_vm1, %v12047_v0, %v7045_v43 }
0x444c   : > { %v7904_v34 = vld [vmem:[#allocation2 + $0x10] sm:$0xff]  ;;  %v7066_v28 = vsel %vm906_vm3, %v7064_v26, %v7051_v17 }
0x444d   : > { %9827 = vmatprep.mubr.msk.f32.mxu0 %vm682_vm0, %v7904_v34 }
0x444e   : > { %v7053_v60 = vpop.permute.xlu1 %7052 }
0x444f   : > { %v7059_v49 = vpop.permute.xlu0 %7058  ;;  %v7905_v59 = vld [vmem:[#allocation2 + $0x18] sm:$0xff]  ;;  %v7067_v51 = vsel %vm906_vm3, %v7065_v47, %v7053_v60 }
0x4450   : > { %v7068_v16 = vsel %vm1644_vm4, %v7066_v28, %v7059_v49  ;;  %9828 = vmatmul.mubr.msk.f32.gmra.mrb[76].mxu0 %vm682_vm0, %v7905_v59 }
0x4451   : > { %7070 = vst.msk [vmem:[#allocation2 + $0x20] sm:$0xff] %vm682_vm0, %v7068_v16 }
0x4452   : > { %v7061_v62 = vpop.permute.xlu1 %7060 }
0x4453   : > { %v7069_v58 = vsel %vm1644_vm4, %v7067_v51, %v7061_v62  ;;  %v7873_v14 = vpop.permute.xlu0 %7872 }
0x4454   : > { %7071 = vst.msk [vmem:[#allocation2 + $0x28] sm:$0xff] %vm682_vm0, %v7069_v58 }
0x4457   : > { %v7881_v27 = vpop.permute.xlu0 %7880 }
0x4458   : > { %v7906_v53 = vld [vmem:[#allocation2 + $0x20] sm:$0xff] }
0x4459   : > { %9830 = vmatprep.mubr.msk.f32.mxu0 %vm682_vm0, %v7906_v53 }
0x445b   : > { %v7907_v55 = vld [vmem:[#allocation2 + $0x28] sm:$0xff] }
0x445c   : > { %9831 = vmatmul.mubr.msk.f32.gmra.mrb[78].mxu0 %vm682_vm0, %v7907_v55 }
0x450d   : > { %v9815_v48 = vpop.f32.mrb[72].mxu0 }
0x450e   : > { %7890 = vrot.lane.b32.xlu1 %v9815_v48, %s12623_s29  ;;  %v7861_v61 = vpop.f32.mrb[73].mxu0 }
0x450f   : > { %7888 = vrot.lane.b32.xlu0 %v7861_v61, %s12623_s29 }
0x4517   : > { %v9826_v0 = vpop.f32.mrb[74].mxu0 }
0x4518   : > { %v8011_v39 = vpop.f32.mrb[75].mxu0  ;;  %v8017_v6 = vadd.f32 %v9826_v0, %v8943_v37 }
0x4519   : > { %v8012_v23 = vadd.f32 %v8943_v37, %v8011_v39 }
0x451a   : > { %v8051_v54 = vadd.f32 %v8017_v6, %v11664_v10 }
0x451b   : > { %v8050_v50 = vadd.f32 %v8012_v23, %v11653_v20 }
0x451c   : > { %v8063_v22 = vsel %vm682_vm0, %v8051_v54, 0.0 }
0x451d   : > { %v8060_v2 = vsel %vm682_vm0, %v8050_v50, 0.0 }
0x4523   : > { %v9829_v38 = vpop.f32.mrb[76].mxu0 }
0x4524   : > { %v8021_v30 = vpop.f32.mrb[77].mxu0  ;;  %v8027_v1 = vadd.f32 %v9829_v38, %v8943_v37 }
0x4525   : > { %v8022_v63 = vadd.f32 %v8943_v37, %v8021_v30 }
0x4526   : > { %v8053_v3 = vadd.f32 %v8027_v1, %v11786_v40  ;;  %v7875_v40 = vpop.permute.xlu1 %7874 }
0x4527   : > { %v8052_v57 = vadd.f32 %v8022_v63, %v11782_v35  ;;  %v7895_v24 = vsel %vm820_vm1, %v12151_v42, %v7875_v40 }
0x4528   : > { %v8069_v35 = vsel %vm682_vm0, %v8053_v3, 0.0 }
0x4529   : > { %v8066_v33 = vsel %vm682_vm0, %v8052_v57, 0.0 }
0x452a   : > { %v7883_v8 = vpop.permute.xlu1 %7882 }
0x452e   : > { %8061 = vadd.xlane.f32.xlu0 %v8060_v2 }
0x452f   : > { %v9832_v9 = vpop.f32.mrb[78].mxu0 }
0x4530   : > { %v8031_v4 = vpop.f32.mrb[79].mxu0  ;;  %v8037_v29 = vadd.f32 %v9832_v9, %v8943_v37  ;;  %v8192_v9 = vld [vmem:[%s12585_s14] sm:$0xff] }
0x4531   : > { %v8032_v45 = vadd.f32 %v8943_v37, %v8031_v4  ;;  %v8193_v4 = vld [vmem:[%s12585_s14 + $0x8] sm:$0xff] }
0x4532   : > { %8064 = vadd.xlane.f32.xlu1 %v8063_v22  ;;  %8067 = vadd.xlane.f32.xlu0 %v8066_v33  ;;  %v8055_v10 = vadd.f32 %v8037_v29, %v11800_v52  ;;  %v7897_v52 = vsel %vm906_vm3, %v7895_v24, %v7883_v8  ;;  %v10236_v22 = vpack.c.bf16 %v8193_v4, %v8192_v9  ;;  %v8195_v29 = vld [vmem:[%s12585_s14 + $0x18] sm:$0xff] }
0x4533   : > { %v8054_v20 = vadd.f32 %v8032_v45, %v11796_v19  ;;  %v7894_v19 = vsel %vm820_vm1, %v12153_v32, %v7873_v14  ;;  %v8343_v9 = vld [vmem:[%s12587_s16 + $0x18] sm:$0xff] }
0x4534   : > { %v8075_v7 = vsel %vm682_vm0, %v8055_v10, 0.0  ;;  %v7896_v36 = vsel %vm906_vm3, %v7894_v19, %v7881_v27  ;;  %10237 = vmatprep.subr.bf16.mxu1 %v10236_v22 }
0x4535   : > { %v8072_v25 = vsel %vm682_vm0, %v8054_v20, 0.0  ;;  %10239 = vmatpush3.bf16.msra.mxu1 %v10236_v22  ;;  %v8344_v22 = vld [vmem:[%s12587_s16 + $0x20] sm:$0xff] }
0x4536   : > { %8070 = vadd.xlane.f32.xlu0 %v8069_v35  ;;  %8073 = vadd.xlane.f32.xlu1 %v8072_v25 }
0x453a   : > { %8076 = vadd.xlane.f32.xlu0 %v8075_v7 }
0x4580   : > { %v7891_v21 = vpop.permute.xlu1 %7890 }
0x4581   : > { %v7899_v31 = vsel %vm1644_vm4, %v7897_v52, %v7891_v21  ;;  %v7889_v18 = vpop.permute.xlu0 %7888 }
0x4582   : > { %7901 = vst.msk [vmem:[#allocation2 + $0x38] sm:$0xff] %vm682_vm0, %v7899_v31  ;;  %v7898_v12 = vsel %vm1644_vm4, %v7896_v36, %v7889_v18 }
0x4583   : > { %7900 = vst.msk [vmem:[#allocation2 + $0x30] sm:$0xff] %vm682_vm0, %v7898_v12 }
0x4589   : > { %v7909_v42 = vld [vmem:[#allocation2 + $0x38] sm:$0xff] }
0x458a   : > { %v7908_v15 = vld [vmem:[#allocation2 + $0x30] sm:$0xff] }
0x458b   : > { %9833 = vmatprep.mubr.msk.f32.mxu0 %vm682_vm0, %v7908_v15 }
0x458c   : > { %9834 = vmatmul.mubr.msk.f32.gmra.mrb[80].mxu0 %vm682_vm0, %v7909_v42 }
0x45bb   : > { %v8062_v32 = vpop.xlane.xlu0 %8061 }
0x45bc   : > { %v8084_v41 = vmul.f32 0.03125, %v8062_v32 }
0x45be   : > { %v12328_v28 = vsub.f32 %v8050_v50, %v8084_v41 }
0x45bf   : > { %v8068_v46 = vpop.xlane.xlu0 %8067  ;;  %v8065_v5 = vpop.xlane.xlu1 %8064 }
0x45c0   : > { %v8085_v44 = vmul.f32 0.03125, %v8065_v5  ;;  %v8086_v49 = vmul.f32 0.03125, %v8068_v46 }
0x45c2   : > { %v12326_v17 = vsub.f32 %v8051_v54, %v8085_v44  ;;  %v12337_v61 = vsub.f32 %v8052_v57, %v8086_v49 }
0x45c3   : > { %v8071_v13 = vpop.xlane.xlu0 %8070  ;;  %v8074_v47 = vpop.xlane.xlu1 %8073 }
0x45c4   : > { %v8087_v34 = vmul.f32 0.03125, %v8071_v13  ;;  %v8101_v48 = vmul.f32 %v12326_v17, %v12326_v17  ;;  %v8088_v0 = vmul.f32 0.03125, %v8074_v47  ;;  %v8102_v6 = vmul.f32 %v12337_v61, %v12337_v61  ;;  %v8953_v47 = vld [vmem:[%s12584_s13] ss:$0 sm:$0xff] }
0x45c6   : > { %v12332_v58 = vsub.f32 %v8053_v3, %v8087_v34  ;;  %v12347_v30 = vsub.f32 %v8054_v20, %v8088_v0  ;;  %v8114_v54 = vsel %vm682_vm0, %v8102_v6, 0.0  ;;  %v8194_v3 = vld [vmem:[%s12585_s14 + $0x10] sm:$0xff] }
0x45c7   : > { %v8077_v59 = vpop.xlane.xlu0 %8076  ;;  %v10240_v45 = vpack.c.bf16 %v8195_v29, %v8194_v3  ;;  %v8345_v3 = vld [vmem:[%s12587_s16 + $0x28] sm:$0xff] }
0x45c8   : > { %v8089_v53 = vmul.f32 0.03125, %v8077_v59  ;;  %v8103_v38 = vmul.f32 %v12332_v58, %v12332_v58  ;;  %v8104_v1 = vmul.f32 %v12347_v30, %v12347_v30  ;;  %v10252_v29 = vpack.c.bf16 %v8345_v3, %v8344_v22 }
0x45c9   : > { %10241 = vmatprep.subr.bf16.mxu1 %v10240_v45 }
0x45ca   : > { %v8117_v50 = vsel %vm682_vm0, %v8103_v38, 0.0  ;;  %v8120_v2 = vsel %vm682_vm0, %v8104_v1, 0.0  ;;  %10243 = vmatpush3.bf16.msra.mxu1 %v10240_v45  ;;  %v8346_v45 = vld [vmem:[%s12587_s16 + $0x30] sm:$0xff] }
0x465f   : > { %v9835_v43 = vpop.f32.mrb[80].mxu0 }
0x4660   : > { %v8047_v26 = vadd.f32 %v9835_v43, %v8943_v37  ;;  %v8041_v60 = vpop.f32.mrb[81].mxu0 }
0x4661   : > { %v8042_v16 = vadd.f32 %v8943_v37, %v8041_v60  ;;  %v8100_v37 = vmul.f32 %v12328_v28, %v12328_v28  ;;  %v12385_v60 = vld [vmem:[%s12583_s12] ss:$0 sm:$0xff] }
0x4662   : > { %v8057_v51 = vadd.f32 %v8047_v26, %v11814_v11  ;;  %v12342_v11 = vsub.f32 %v8055_v10, %v8089_v53 }
0x4663   : > { %v8056_v62 = vadd.f32 %v8042_v16, %v11809_v56  ;;  %v8111_v56 = vsel %vm682_vm0, %v8101_v48, 0.0  ;;  %v8108_v23 = vsel %vm682_vm0, %v8100_v37, 0.0 }
0x4664   : > { %v8081_v55 = vsel %vm682_vm0, %v8057_v51, 0.0  ;;  %v8105_v63 = vmul.f32 %v12342_v11, %v12342_v11 }
0x4665   : > { %8082 = vadd.xlane.f32.xlu0 %v8081_v55  ;;  %v8078_v39 = vsel %vm682_vm0, %v8056_v62, 0.0 }
0x4666   : > { %8079 = vadd.xlane.f32.xlu1 %v8078_v39  ;;  %v8123_v57 = vsel %vm682_vm0, %v8105_v63, 0.0 }
0x4669   : > { %8112 = vadd.xlane.f32.xlu0 %v8111_v56 }
0x466a   : > { %8109 = vadd.xlane.f32.xlu1 %v8108_v23 }
0x466d   : > { %8118 = vadd.xlane.f32.xlu0 %v8117_v50 }
0x466e   : > { %8115 = vadd.xlane.f32.xlu1 %v8114_v54 }
0x4671   : > { %8124 = vadd.xlane.f32.xlu0 %v8123_v57  ;;  %v8342_v57 = vld [vmem:[%s12587_s16 + $0x10] sm:$0xff] }
0x4672   : > { %8121 = vadd.xlane.f32.xlu1 %v8120_v2  ;;  %v10248_v4 = vpack.c.bf16 %v8343_v9, %v8342_v57 }
0x46f2   : > { %v8083_v33 = vpop.xlane.xlu0 %8082 }
0x46f3   : > { %v8091_v20 = vmul.f32 0.03125, %v8083_v33  ;;  %v8080_v10 = vpop.xlane.xlu1 %8079  ;;  %v8347_v33 = vld [vmem:[%s12587_s16 + $0x38] sm:$0xff] }
0x46f4   : > { %v8090_v35 = vmul.f32 0.03125, %v8080_v10 }
0x46f5   : > { %v12372_v25 = vsub.f32 %v8057_v51, %v8091_v20  ;;  %v10256_v20 = vpack.c.bf16 %v8347_v33, %v8346_v45 }
0x46f6   : > { %v12374_v7 = vsub.f32 %v8056_v62, %v8090_v35  ;;  %v8113_v40 = vpop.xlane.xlu0 %8112 }
0x46f7   : > { %v8133_v14 = vmul.f32 0.03125, %v8113_v40  ;;  %v8110_v8 = vpop.xlane.xlu1 %8109  ;;  %v8107_v27 = vmul.f32 %v12372_v25, %v12372_v25 }
0x46f8   : > { %v8132_v24 = vmul.f32 0.03125, %v8110_v8  ;;  %v8106_v19 = vmul.f32 %v12374_v7, %v12374_v7 }
0x46f9   : > { %v8141_v52 = vadd.f32 1e-05, %v8133_v14  ;;  %v8129_v21 = vsel %vm682_vm0, %v8107_v27, 0.0 }
0x46fa   : > { %v8140_v36 = vadd.f32 1e-05, %v8132_v24  ;;  %8130 = vadd.xlane.f32.xlu0 %v8129_v21  ;;  %v8119_v31 = vpop.xlane.xlu0 %8118  ;;  %v8126_v18 = vsel %vm682_vm0, %v8106_v19, 0.0 }
0x46fb   : > { %10858 = vrsqrt.f32 %v8141_v52  ;;  %v8135_v12 = vmul.f32 0.03125, %v8119_v31  ;;  %8127 = vadd.xlane.f32.xlu1 %v8126_v18  ;;  %v8116_v15 = vpop.xlane.xlu1 %8115 }
0x46fc   : > { %10860 = vrsqrt.f32 %v8140_v36  ;;  %v8134_v42 = vmul.f32 0.03125, %v8116_v15 }
0x46fd   : > { %v8143_v32 = vadd.f32 1e-05, %v8135_v12 }
0x46fe   : > { %v8142_v46 = vadd.f32 1e-05, %v8134_v42  ;;  %v8125_v5 = vpop.xlane.xlu0 %8124 }
0x46ff   : > { %10862 = vrsqrt.f32 %v8143_v32  ;;  %v8137_v13 = vmul.f32 0.03125, %v8125_v5  ;;  %v8122_v44 = vpop.xlane.xlu1 %8121 }
0x4700   : > { %10864 = vrsqrt.f32 %v8142_v46  ;;  %v8136_v41 = vmul.f32 0.03125, %v8122_v44 }
0x4701   : > { %v8145_v43 = vadd.f32 1e-05, %v8137_v13 }
0x4702   : > { %v8144_v34 = vadd.f32 1e-05, %v8136_v41 }
0x4703   : > { %10866 = vrsqrt.f32 %v8145_v43 }
0x4704   : > { %10868 = vrsqrt.f32 %v8144_v34 }
0x4705   : > { %v10859_v26 = vpop.eup %10858 }
0x4706   : > { %v10861_v49 = vpop.eup %10860  ;;  %v8157_v59 = vmul.f32 %v10859_v26, %v12326_v17 }
0x4707   : > { %v8156_v16 = vmul.f32 %v10861_v49, %v12328_v28 }
0x4708   : > { %v8171_v51 = vmul.f32 %v12385_v60, %v8157_v59 }
0x4709   : > { %v10863_v62 = vpop.eup %10862  ;;  %v8170_v53 = vmul.f32 %v12385_v60, %v8156_v16 }
0x470a   : > { %v10865_v55 = vpop.eup %10864  ;;  %v8159_v48 = vmul.f32 %v10863_v62, %v12332_v58  ;;  %v12398_v37 = vadd.f32 %v8953_v47, %v8171_v51 }
0x470b   : > { %v12395_v0 = vadd.f32 %v8953_v47, %v8170_v53  ;;  %v8158_v39 = vmul.f32 %v10865_v55, %v12337_v61 }
0x470c   : > { %v8173_v17 = vmul.f32 %v12385_v60, %v8159_v48 }
0x470d   : > { %v10867_v28 = vpop.eup %10866  ;;  %9844 = vmatprep.mubr.msk.f32.mxu1 %vm682_vm0, %v12395_v0  ;;  %v8172_v56 = vmul.f32 %v12385_v60, %v8158_v39 }
0x470e   : > { %v10869_v38 = vpop.eup %10868  ;;  %9845 = vmatmul.mubr.msk.f32.vlgmr.msra.gmra.mrb[78].mxu1 %vm682_vm0, %v12398_v37  ;;  %v8161_v58 = vmul.f32 %v10867_v28, %v12342_v11  ;;  %v12410_v6 = vadd.f32 %v8953_v47, %v8173_v17  ;;  %v8340_v11 = vld [vmem:[%s12587_s16] sm:$0xff] }
0x470f   : > { %v12407_v23 = vadd.f32 %v8953_v47, %v8172_v56  ;;  %v8160_v61 = vmul.f32 %v10869_v38, %v12347_v30  ;;  %v8341_v30 = vld [vmem:[%s12587_s16 + $0x8] sm:$0xff]  ;;  %v8971_v56 = vld [vmem:[%s12588_s17] ss:$0 sm:$0xff] }
0x4710   : > { %v8175_v50 = vmul.f32 %v12385_v60, %v8161_v58  ;;  %v10244_v2 = vpack.c.bf16 %v8341_v30, %v8340_v11 }
0x4711   : > { %9847 = vmatprep.mubr.msk.f32.mxu1 %vm682_vm0, %v12407_v23  ;;  %v8174_v63 = vmul.f32 %v12385_v60, %v8160_v61 }
0x4712   : > { %9848 = vmatmul.mubr.msk.f32.gmra.mrb[80].mxu1 %vm682_vm0, %v12410_v6  ;;  %v12420_v1 = vadd.f32 %v8953_v47, %v8175_v50  ;;  %10245 = vmatprep.subr.bf16.mxu0 %v10244_v2 }
0x4713   : > { %v12418_v54 = vadd.f32 %v8953_v47, %v8174_v63  ;;  %10247 = vmatpush3.bf16.msra.mxu0 %v10244_v2 }
0x4714   : > { %10249 = vmatprep.subr.bf16.mxu0 %v10248_v4 }
0x4715   : > { %9850 = vmatprep.mubr.msk.f32.mxu1 %vm682_vm0, %v12418_v54 }
0x4716   : > { %9851 = vmatmul.mubr.msk.f32.gmra.mrb[82].mxu1 %vm682_vm0, %v12420_v1 }
0x4717   : > { %10251 = vmatpush3.bf16.msra.mxu0 %v10248_v4 }
0x4718   : > { %10253 = vmatprep.subr.bf16.mxu0 %v10252_v29 }
0x471b   : > { %10255 = vmatpush3.bf16.msra.mxu0 %v10252_v29 }
0x471c   : > { %10257 = vmatprep.subr.bf16.mxu0 %v10256_v20 }
0x471f   : > { %10259 = vmatpush3.bf16.msra.mxu0 %v10256_v20 }
0x4787   : > { %v8131_v10 = vpop.xlane.xlu0 %8130 }
0x4788   : > { %v8139_v35 = vmul.f32 0.03125, %v8131_v10  ;;  %v8128_v40 = vpop.xlane.xlu1 %8127 }
0x4789   : > { %v8138_v14 = vmul.f32 0.03125, %v8128_v40 }
0x478a   : > { %v8147_v8 = vadd.f32 1e-05, %v8139_v35 }
0x478b   : > { %v8146_v27 = vadd.f32 1e-05, %v8138_v14 }
0x478c   : > { %10870 = vrsqrt.f32 %v8147_v8 }
0x478d   : > { %10872 = vrsqrt.f32 %v8146_v27 }
0x4796   : > { %v10871_v24 = vpop.eup %10870 }
0x4797   : > { %v10873_v19 = vpop.eup %10872  ;;  %v8163_v52 = vmul.f32 %v10871_v24, %v12372_v25  ;;  %v8954_v25 = vld [vmem:[%s12586_s15] ss:$0 sm:$0xff] }
0x4798   : > { %v8162_v21 = vmul.f32 %v10873_v19, %v12374_v7 }
0x4799   : > { %v8177_v36 = vmul.f32 %v12385_v60, %v8163_v52 }
0x479a   : > { %v8176_v31 = vmul.f32 %v12385_v60, %v8162_v21 }
0x479b   : > { %v12456_v12 = vadd.f32 %v8953_v47, %v8177_v36 }
0x479c   : > { %v12454_v18 = vadd.f32 %v8953_v47, %v8176_v31 }
0x479e   : > { %9853 = vmatprep.mubr.msk.f32.mxu1 %vm682_vm0, %v12454_v18 }
0x479f   : > { %9854 = vmatmul.mubr.msk.f32.gmra.mrb[84].mxu1 %vm682_vm0, %v12456_v12 }
0x47e1   : > { %v9846_v15 = vpop.f32.mrb[78].mxu1 }
0x47e2   : > { %v8299_v7 = vadd.f32 %v9846_v15, %v8954_v25  ;;  %v8293_v42 = vpop.f32.mrb[79].mxu1 }
0x47e3   : > { %v8294_v32 = vadd.f32 %v8954_v25, %v8293_v42 }
0x47e4   : > { %v8333_v13 = vmax.f32 %v8299_v7, 0.0 }
0x47e5   : > { %v8332_v46 = vmax.f32 %v8294_v32, 0.0  ;;  %v9849_v5 = vpop.f32.mrb[80].mxu1 }
0x47e6   : > { %v8309_v44 = vadd.f32 %v9849_v5, %v8954_v25  ;;  %v8303_v41 = vpop.f32.mrb[81].mxu1 }
0x47e7   : > { %v8304_v43 = vadd.f32 %v8954_v25, %v8303_v41  ;;  %9872 = vmatprep.mubr.msk.f32.mxu0 %vm8348_vm5, %v8332_v46 }
0x47e8   : > { %9873 = vmatmul.mubr.msk.f32.vlgmr.msra.gmra.mrb[82].mxu0 %vm8348_vm5, %v8333_v13  ;;  %v8335_v60 = vmax.f32 %v8309_v44, 0.0 }
0x47e9   : > { %v8334_v34 = vmax.f32 %v8304_v43, 0.0  ;;  %v9852_v26 = vpop.f32.mrb[82].mxu1 }
0x47ea   : > { %v8319_v49 = vadd.f32 %v9852_v26, %v8954_v25  ;;  %v8313_v59 = vpop.f32.mrb[83].mxu1 }
0x47eb   : > { %v8314_v16 = vadd.f32 %v8954_v25, %v8313_v59  ;;  %9875 = vmatprep.mubr.msk.f32.mxu0 %vm8348_vm5, %v8334_v34 }
0x47ec   : > { %9876 = vmatmul.mubr.msk.f32.gmra.mrb[84].mxu0 %vm8348_vm5, %v8335_v60  ;;  %v8337_v51 = vmax.f32 %v8319_v49, 0.0 }
0x47ed   : > { %v8336_v47 = vmax.f32 %v8314_v16, 0.0 }
0x47ef   : > { %9878 = vmatprep.mubr.msk.f32.mxu0 %vm8348_vm5, %v8336_v47 }
0x47f0   : > { %9879 = vmatmul.mubr.msk.f32.gmra.mrb[86].mxu0 %vm8348_vm5, %v8337_v51 }
0x4872   : > { %v9855_v62 = vpop.f32.mrb[84].mxu1 }
0x4873   : > { %v8329_v53 = vadd.f32 %v9855_v62, %v8954_v25  ;;  %v8323_v55 = vpop.f32.mrb[85].mxu1 }
0x4874   : > { %v8324_v48 = vadd.f32 %v8954_v25, %v8323_v55 }
0x4875   : > { %v8339_v17 = vmax.f32 %v8329_v53, 0.0 }
0x4876   : > { %v8338_v39 = vmax.f32 %v8324_v48, 0.0 }
0x4878   : > { %9881 = vmatprep.mubr.msk.f32.mxu0 %vm8348_vm5, %v8338_v39 }
0x4879   : > { %9882 = vmatmul.mubr.msk.f32.gmra.mrb[88].mxu0 %vm8348_vm5, %v8339_v17 }
0x48bb   : > { %v9874_v28 = vpop.f32.mrb[82].mxu0 }
0x48bc   : > { %v8479_v38 = vadd.f32 %v9874_v28, %v12398_v37  ;;  %v8439_v58 = vpop.f32.mrb[83].mxu0 }
0x48bd   : > { %v8478_v61 = vadd.f32 %v8439_v58, %v12395_v0 }
0x48be   : > { %v8494_v50 = vadd.f32 %v8971_v56, %v8479_v38 }
0x48bf   : > { %v8493_v63 = vadd.f32 %v8971_v56, %v8478_v61  ;;  %v9877_v11 = vpop.f32.mrb[84].mxu0 }
0x48c0   : > { %v8481_v30 = vadd.f32 %v9877_v11, %v12410_v6  ;;  %v8449_v57 = vpop.f32.mrb[85].mxu0  ;;  %v8506_v2 = vsel %vm682_vm0, %v8494_v50, 0.0 }
0x48c1   : > { %v8480_v9 = vadd.f32 %v8449_v57, %v12407_v23  ;;  %8507 = vadd.xlane.f32.xlu0 %v8506_v2  ;;  %v8503_v4 = vsel %vm682_vm0, %v8493_v63, 0.0 }
0x48c2   : > { %v8496_v22 = vadd.f32 %v8971_v56, %v8481_v30  ;;  %8504 = vadd.xlane.f32.xlu1 %v8503_v4 }
0x48c3   : > { %v8495_v3 = vadd.f32 %v8971_v56, %v8480_v9  ;;  %v9880_v37 = vpop.f32.mrb[86].mxu0 }
0x48c4   : > { %v8483_v29 = vadd.f32 %v9880_v37, %v12420_v1  ;;  %v8459_v0 = vpop.f32.mrb[87].mxu0  ;;  %v8512_v45 = vsel %vm682_vm0, %v8496_v22, 0.0 }
0x48c5   : > { %v8482_v33 = vadd.f32 %v8459_v0, %v12418_v54  ;;  %8513 = vadd.xlane.f32.xlu0 %v8512_v45  ;;  %v8509_v6 = vsel %vm682_vm0, %v8495_v3, 0.0 }
0x48c6   : > { %v8498_v20 = vadd.f32 %v8971_v56, %v8483_v29  ;;  %8510 = vadd.xlane.f32.xlu1 %v8509_v6 }
0x48c7   : > { %v8497_v23 = vadd.f32 %v8971_v56, %v8482_v33 }
0x48c8   : > { %v8518_v10 = vsel %vm682_vm0, %v8498_v20, 0.0 }
0x48c9   : > { %8519 = vadd.xlane.f32.xlu0 %v8518_v10  ;;  %v8515_v35 = vsel %vm682_vm0, %v8497_v23, 0.0 }
0x48ca   : > { %8516 = vadd.xlane.f32.xlu1 %v8515_v35 }
0x494c   : > { %v9883_v40 = vpop.f32.mrb[88].mxu0 }
0x494d   : > { %v8485_v1 = vadd.f32 %v9883_v40, %v12456_v12  ;;  %v8469_v14 = vpop.f32.mrb[89].mxu0 }
0x494e   : > { %v8484_v8 = vadd.f32 %v8469_v14, %v12454_v18  ;;  %v8508_v27 = vpop.xlane.xlu0 %8507 }
0x494f   : > { %v8500_v54 = vadd.f32 %v8971_v56, %v8485_v1  ;;  %v8528_v24 = vmul.f32 0.03125, %v8508_v27  ;;  %v8505_v19 = vpop.xlane.xlu1 %8504 }
0x4950   : > { %v8499_v52 = vadd.f32 %v8971_v56, %v8484_v8  ;;  %v8527_v21 = vmul.f32 0.03125, %v8505_v19  ;;  %v8972_v8 = vld [vmem:[%s12589_s18] ss:$0 sm:$0xff] }
0x4951   : > { %v12490_v36 = vsub.f32 %v8494_v50, %v8528_v24  ;;  %v8524_v31 = vsel %vm682_vm0, %v8500_v54, 0.0  ;;  %v8973_v24 = vld [vmem:[%s12590_s19] ss:$0 sm:$0xff] }
0x4952   : > { %v12493_v25 = vsub.f32 %v8493_v63, %v8527_v21  ;;  %v8514_v15 = vpop.xlane.xlu0 %8513  ;;  %8525 = vadd.xlane.f32.xlu0 %v8524_v31  ;;  %v8521_v7 = vsel %vm682_vm0, %v8499_v52, 0.0 }
0x4953   : > { %v8530_v12 = vmul.f32 0.03125, %v8514_v15  ;;  %8522 = vadd.xlane.f32.xlu1 %v8521_v7  ;;  %v8511_v42 = vpop.xlane.xlu1 %8510  ;;  %v8544_v18 = vmul.f32 %v12490_v36, %v12490_v36 }
0x4954   : > { %v8529_v32 = vmul.f32 0.03125, %v8511_v42  ;;  %v8543_v46 = vmul.f32 %v12493_v25, %v12493_v25 }
0x4955   : > { %v12500_v5 = vsub.f32 %v8496_v22, %v8530_v12  ;;  %v8554_v13 = vsel %vm682_vm0, %v8544_v18, 0.0 }
0x4956   : > { %v12503_v44 = vsub.f32 %v8495_v3, %v8529_v32  ;;  %v8520_v41 = vpop.xlane.xlu0 %8519  ;;  %8555 = vadd.xlane.f32.xlu0 %v8554_v13  ;;  %v8551_v43 = vsel %vm682_vm0, %v8543_v46, 0.0 }
0x4957   : > { %v8532_v34 = vmul.f32 0.03125, %v8520_v41  ;;  %8552 = vadd.xlane.f32.xlu1 %v8551_v43  ;;  %v8517_v26 = vpop.xlane.xlu1 %8516  ;;  %v8546_v60 = vmul.f32 %v12500_v5, %v12500_v5 }
0x4958   : > { %v8531_v49 = vmul.f32 0.03125, %v8517_v26  ;;  %v8545_v59 = vmul.f32 %v12503_v44, %v12503_v44 }
0x4959   : > { %v12510_v16 = vsub.f32 %v8498_v20, %v8532_v34  ;;  %v8560_v47 = vsel %vm682_vm0, %v8546_v60, 0.0 }
0x495a   : > { %v12513_v51 = vsub.f32 %v8497_v23, %v8531_v49  ;;  %8561 = vadd.xlane.f32.xlu0 %v8560_v47  ;;  %v8557_v62 = vsel %vm682_vm0, %v8545_v59, 0.0 }
0x495b   : > { %8558 = vadd.xlane.f32.xlu1 %v8557_v62  ;;  %v8548_v53 = vmul.f32 %v12510_v16, %v12510_v16 }
0x495c   : > { %v8547_v55 = vmul.f32 %v12513_v51, %v12513_v51 }
0x495d   : > { %v8566_v48 = vsel %vm682_vm0, %v8548_v53, 0.0 }
0x495e   : > { %8567 = vadd.xlane.f32.xlu0 %v8566_v48  ;;  %v8563_v39 = vsel %vm682_vm0, %v8547_v55, 0.0 }
0x495f   : > { %8564 = vadd.xlane.f32.xlu1 %v8563_v39 }
0x49df   : > { %v8526_v17 = vpop.xlane.xlu0 %8525 }
0x49e0   : > { %v8534_v28 = vmul.f32 0.03125, %v8526_v17  ;;  %v8523_v56 = vpop.xlane.xlu1 %8522 }
0x49e1   : > { %v8533_v38 = vmul.f32 0.03125, %v8523_v56 }
0x49e2   : > { %v12522_v58 = vsub.f32 %v8500_v54, %v8534_v28 }
0x49e3   : > { %v12524_v61 = vsub.f32 %v8499_v52, %v8533_v38  ;;  %v8556_v50 = vpop.xlane.xlu0 %8555 }
0x49e4   : > { %v8576_v63 = vmul.f32 0.03125, %v8556_v50  ;;  %v8553_v11 = vpop.xlane.xlu1 %8552  ;;  %v8550_v30 = vmul.f32 %v12522_v58, %v12522_v58 }
0x49e5   : > { %v8575_v57 = vmul.f32 0.03125, %v8553_v11  ;;  %v8549_v2 = vmul.f32 %v12524_v61, %v12524_v61 }
0x49e6   : > { %v8584_v9 = vadd.f32 1e-05, %v8576_v63  ;;  %v8572_v4 = vsel %vm682_vm0, %v8550_v30, 0.0 }
0x49e7   : > { %v8583_v22 = vadd.f32 1e-05, %v8575_v57  ;;  %8573 = vadd.xlane.f32.xlu0 %v8572_v4  ;;  %v8562_v3 = vpop.xlane.xlu0 %8561  ;;  %v8569_v37 = vsel %vm682_vm0, %v8549_v2, 0.0 }
0x49e8   : > { %10874 = vrsqrt.f32 %v8584_v9  ;;  %v8578_v29 = vmul.f32 0.03125, %v8562_v3  ;;  %8570 = vadd.xlane.f32.xlu1 %v8569_v37  ;;  %v8559_v0 = vpop.xlane.xlu1 %8558 }
0x49e9   : > { %10876 = vrsqrt.f32 %v8583_v22  ;;  %v8577_v45 = vmul.f32 0.03125, %v8559_v0 }
0x49ea   : > { %v8586_v33 = vadd.f32 1e-05, %v8578_v29 }
0x49eb   : > { %v8585_v6 = vadd.f32 1e-05, %v8577_v45  ;;  %v8568_v20 = vpop.xlane.xlu0 %8567 }
0x49ec   : > { %10878 = vrsqrt.f32 %v8586_v33  ;;  %v8580_v23 = vmul.f32 0.03125, %v8568_v20  ;;  %v8565_v10 = vpop.xlane.xlu1 %8564 }
0x49ed   : > { %10880 = vrsqrt.f32 %v8585_v6  ;;  %v8579_v35 = vmul.f32 0.03125, %v8565_v10 }
0x49ee   : > { %v8588_v40 = vadd.f32 1e-05, %v8580_v23 }
0x49ef   : > { %v8587_v1 = vadd.f32 1e-05, %v8579_v35 }
0x49f0   : > { %10882 = vrsqrt.f32 %v8588_v40 }
0x49f1   : > { %10884 = vrsqrt.f32 %v8587_v1 }
0x49f2   : > { %v10875_v14 = vpop.eup %10874 }
0x49f3   : > { %v10877_v27 = vpop.eup %10876  ;;  %v8600_v54 = vmul.f32 %v10875_v14, %v12490_v36 }
0x49f4   : > { %v8599_v19 = vmul.f32 %v10877_v27, %v12493_v25 }
0x49f5   : > { %v8614_v52 = vmul.f32 %v8972_v8, %v8600_v54 }
0x49f6   : > { %v10879_v21 = vpop.eup %10878  ;;  %v8613_v31 = vmul.f32 %v8972_v8, %v8599_v19 }
0x49f7   : > { %v10881_v15 = vpop.eup %10880  ;;  %v8628_v7 = vadd.f32 %v8973_v24, %v8614_v52  ;;  %v8602_v36 = vmul.f32 %v10879_v21, %v12500_v5 }
0x49f8   : > { %v8627_v12 = vadd.f32 %v8973_v24, %v8613_v31  ;;  %v8601_v42 = vmul.f32 %v10881_v15, %v12503_v44 }
0x49f9   : > { %8636 = vst.msk [vmem:[%s12544_s27 + $0x8] sm:$0xff] %vm682_vm0, %v8628_v7  ;;  %v8616_v25 = vmul.f32 %v8972_v8, %v8602_v36 }
0x49fa   : > { %v10883_v18 = vpop.eup %10882  ;;  %8635 = vst.msk [vmem:[%s12544_s27] sm:$0xff] %vm682_vm0, %v8627_v12  ;;  %v8615_v32 = vmul.f32 %v8972_v8, %v8601_v42 }
0x49fb   : > { %v10885_v46 = vpop.eup %10884  ;;  %v8630_v13 = vadd.f32 %v8973_v24, %v8616_v25  ;;  %v8604_v41 = vmul.f32 %v10883_v18, %v12510_v16 }
0x49fc   : > { %v8629_v43 = vadd.f32 %v8973_v24, %v8615_v32  ;;  %v8603_v34 = vmul.f32 %v10885_v46, %v12513_v51 }
0x49fd   : > { %8638 = vst.msk [vmem:[%s12544_s27 + $0x18] sm:$0xff] %vm682_vm0, %v8630_v13  ;;  %v8618_v5 = vmul.f32 %v8972_v8, %v8604_v41 }
0x49fe   : > { %8637 = vst.msk [vmem:[%s12544_s27 + $0x10] sm:$0xff] %vm682_vm0, %v8629_v43  ;;  %v8617_v44 = vmul.f32 %v8972_v8, %v8603_v34 }
0x49ff   : > { %v8632_v26 = vadd.f32 %v8973_v24, %v8618_v5 }
0x4a00   : > { %v8631_v60 = vadd.f32 %v8973_v24, %v8617_v44 }
0x4a01   : > { %8640 = vst.msk [vmem:[%s12544_s27 + $0x28] sm:$0xff] %vm682_vm0, %v8632_v26 }
0x4a02   : > { %8639 = vst.msk [vmem:[%s12544_s27 + $0x20] sm:$0xff] %vm682_vm0, %v8631_v60 }
0x4a74   : > { %v8574_v49 = vpop.xlane.xlu0 %8573 }
0x4a75   : > { %v8582_v59 = vmul.f32 0.03125, %v8574_v49  ;;  %v8571_v16 = vpop.xlane.xlu1 %8570 }
0x4a76   : > { %v8581_v47 = vmul.f32 0.03125, %v8571_v16 }
0x4a77   : > { %v8590_v62 = vadd.f32 1e-05, %v8582_v59 }
0x4a78   : > { %v8589_v51 = vadd.f32 1e-05, %v8581_v47 }
0x4a79   : > { %10886 = vrsqrt.f32 %v8590_v62 }
0x4a7a   : > { %10888 = vrsqrt.f32 %v8589_v51 }
0x4a83   : > { %v10887_v53 = vpop.eup %10886 }
0x4a84   : > { %v10889_v55 = vpop.eup %10888  ;;  %v8606_v48 = vmul.f32 %v10887_v53, %v12522_v58 }
0x4a85   : > { %v8605_v39 = vmul.f32 %v10889_v55, %v12524_v61 }
0x4a86   : > { %v8620_v17 = vmul.f32 %v8972_v8, %v8606_v48 }
0x4a87   : > { %v8619_v28 = vmul.f32 %v8972_v8, %v8605_v39 }
0x4a88   : > { %v8634_v56 = vadd.f32 %v8973_v24, %v8620_v17 }
0x4a89   : > { %v8633_v38 = vadd.f32 %v8973_v24, %v8619_v28 }
0x4a8a   : > { %8642 = vst.msk [vmem:[%s12544_s27 + $0x38] sm:$0xff] %vm682_vm0, %v8634_v56 }
0x4a8b   : > { %8641 = vst.msk [vmem:[%s12544_s27 + $0x30] sm:$0xff] %vm682_vm0, %v8633_v38 }
0x4a8c PF: > { %s30_s1 = sadd.s32 1, %s10905_s1  }
0x4a8d   : > { %p27_p4 = scmp.ge.s32.totalorder %s30_s1, 4  }
0x4a8f   :  { %29 = sbr.rel (!%p27_p4) target bundleno = 6 (0x6), region = 133 }

</bundles_post_ra>
